<compile_context>
chip_gen: v6e
topology: v6e:2x2x1
jax: 0.10.0
libtpu: 0.0.40
codegen_flags: <defaults>
</compile_context>

<pallas_src>
import jax
import jax.numpy as jnp
from jax.experimental import pallas as pl
from jax.experimental.pallas import tpu as pltpu

_EPS = 1e-5  # nn.BatchNorm2d default eps


# --------------------------------------------------------------------------
# Kernels
# --------------------------------------------------------------------------
def _conv1_stats_kernel(x_ref, w_ref, y_ref, st_ref, p_ref):
    """conv3x3 (no bias) + per-image centered BN1 moments.

    x_ref : (1, H+2, W+2, Cin) bf16 (zero-padded input image)
    w_ref : (9*Cin, Cout)      bf16 (rows ordered (ky, kx, cin))
    y_ref : (1, H, W, Cout)    bf16 raw conv output
    st_ref: (1, 2, Cout)       f32  [mean, centered sum-of-squares] per image
    p_ref : (H*W, 9*Cin)       bf16 im2col scratch
    """
    _, Hp, Wp, Cin = x_ref.shape
    H, W = Hp - 2, Wp - 2
    Cout = w_ref.shape[1]
    inv_hw = 1.0 / (H * W)

    # Build im2col with per-tap ref slices (bounded live ranges; no full-image
    # value kept resident in vregs).
    for ky in range(3):
        for kx in range(3):
            t = ky * 3 + kx
            p_ref[:, t * Cin:(t + 1) * Cin] = (
                x_ref[:, ky:ky + H, kx:kx + W, :].reshape(H * W, Cin))

    # One MXU push per image (K = 9*Cin), f32 accumulation.
    acc = jnp.dot(p_ref[...], w_ref[...], preferred_element_type=jnp.float32)

    m = jnp.sum(acc, axis=0, keepdims=True) * inv_hw          # (1, Cout)
    d = acc - m
    q = jnp.sum(d * d, axis=0, keepdims=True)                 # (1, Cout)
    st_ref[:, 0:1, :] = m.reshape(1, 1, Cout)
    st_ref[:, 1:2, :] = q.reshape(1, 1, Cout)

    y_ref[...] = acc.reshape(1, H, W, Cout).astype(y_ref.dtype)


def _bn1_conv2_stats_kernel(y1_ref, sc_ref, sh_ref, w_ref,
                            y2_ref, st_ref, pad_ref, p_ref):
    """BN1 (folded scale/shift) + ReLU + conv3x3 (no bias) + BN2 moments.

    y1_ref : (1, H, W, C)   bf16 raw conv1 output
    sc_ref, sh_ref: (1, C)  f32  folded BN1 scale / shift
    w_ref  : (9*C, Cout)    bf16
    y2_ref : (1, H, W, Cout) bf16 raw conv2 output
    st_ref : (1, 2, Cout)   f32  [mean, centered sum-of-squares] per image
    pad_ref: (1, H+2, W+2, C) bf16 padded-activation scratch
    p_ref  : (H*W, 9*C)     bf16 im2col scratch
    """
    _, H, W, C = y1_ref.shape
    Hp, Wp = H + 2, W + 2
    Cout = w_ref.shape[1]
    inv_hw = 1.0 / (H * W)

    # BN1 + ReLU with scale/shift folded from global batch stats (f32 VPU math),
    # single cast to bf16 on the interior write.
    a = jnp.maximum(
        y1_ref[...].astype(jnp.float32) * sc_ref[...] + sh_ref[...], 0.0)

    # Zero only the 1-px border every step (safe on multi-TC grid splits),
    # write the interior once, then slice pad_ref directly per tap.
    pad_ref[:, 0:1, :, :] = jnp.zeros((1, 1, Wp, C), jnp.bfloat16)
    pad_ref[:, Hp - 1:Hp, :, :] = jnp.zeros((1, 1, Wp, C), jnp.bfloat16)
    pad_ref[:, 1:1 + H, 0:1, :] = jnp.zeros((1, H, 1, C), jnp.bfloat16)
    pad_ref[:, 1:1 + H, Wp - 1:Wp, :] = jnp.zeros((1, H, 1, C), jnp.bfloat16)
    pad_ref[:, 1:1 + H, 1:1 + W, :] = a.astype(jnp.bfloat16)

    for ky in range(3):
        for kx in range(3):
            t = ky * 3 + kx
            p_ref[:, t * C:(t + 1) * C] = (
                pad_ref[:, ky:ky + H, kx:kx + W, :].reshape(H * W, C))

    acc = jnp.dot(p_ref[...], w_ref[...], preferred_element_type=jnp.float32)

    m = jnp.sum(acc, axis=0, keepdims=True) * inv_hw
    d = acc - m
    q = jnp.sum(d * d, axis=0, keepdims=True)
    st_ref[:, 0:1, :] = m.reshape(1, 1, Cout)
    st_ref[:, 1:2, :] = q.reshape(1, 1, Cout)

    y2_ref[...] = acc.reshape(1, H, W, Cout).astype(y2_ref.dtype)


# --------------------------------------------------------------------------
# Wrapper
# --------------------------------------------------------------------------
def _fold_bn(stats, gamma, beta, hw, eps):
    """Merge per-image (mean, centered sum-sq) -> folded BN scale/shift.

    Welford-style parallel variance merge (all tiny (N, Cout) XLA ops).
    """
    m_i = stats[:, 0, :]                       # (N, Cout) per-image means
    q_i = stats[:, 1, :]                       # (N, Cout) per-image centered SS
    n = stats.shape[0]
    mean = jnp.mean(m_i, axis=0)               # (Cout,)
    var = (jnp.sum(q_i, axis=0)
           + hw * jnp.sum((m_i - mean) ** 2, axis=0)) / (n * hw)
    var = jnp.maximum(var, 0.0)
    scale = gamma * jax.lax.rsqrt(var + eps)
    shift = beta - mean * scale
    return scale.astype(jnp.float32), shift.astype(jnp.float32)


def double_conv2d_bn_forward(x_nchw, params, eps=_EPS):
    """x_nchw: (N, Cin, H, W) f32. Returns (N, Cout, H, W) f32 (PyTorch layout)."""
    N, Cin, H, W = x_nchw.shape
    Cout = params["w1"].shape[0]
    Hp, Wp = H + 2, W + 2

    # NCHW -> NHWC + zero pad (conv padding=1); bf16 MXU operand.
    x = jnp.transpose(x_nchw, (0, 2, 3, 1))
    xpad = jnp.pad(x, ((0, 0), (1, 1), (1, 1), (0, 0))).astype(jnp.bfloat16)

    # PyTorch (Cout, Cin, 3, 3) -> im2col weight (9*Cin, Cout), rows = (ky,kx,cin)
    w1 = jnp.transpose(params["w1"], (2, 3, 1, 0)).reshape(9 * Cin, Cout)
    w2 = jnp.transpose(params["w2"], (2, 3, 1, 0)).reshape(9 * Cout, Cout)
    w1 = w1.astype(jnp.bfloat16)
    w2 = w2.astype(jnp.bfloat16)
    # NOTE: conv biases b1/b2 cancel exactly under train-mode BatchNorm
    # ((y+b) - mean(y+b) == y - mean(y)), so the kernels ignore them.
    # This is NOT valid for eval-mode (running-stats) BatchNorm.

    cparams = pltpu.CompilerParams(
        dimension_semantics=("parallel",),
        # 32 MiB is safe on every generation (v7x has 64 MiB physical); raise
        # toward 64-100 MiB on v6e (128 MiB physical) when using larger tiles.
        vmem_limit_bytes=32 * 1024 * 1024,
    )

    # ---- pass 1: conv1 + per-image BN1 centered moments ---------------------
    y1, st1 = pl.pallas_call(
        _conv1_stats_kernel,
        out_shape=(jax.ShapeDtypeStruct((N, H, W, Cout), jnp.bfloat16),
                   jax.ShapeDtypeStruct((N, 2, Cout), jnp.float32)),
        grid_spec=pltpu.PrefetchScalarGridSpec(
            num_scalar_prefetch=0, grid=(N,),
            in_specs=[
                pl.BlockSpec((1, Hp, Wp, Cin), lambda n: (n, 0, 0, 0)),
                pl.BlockSpec((9 * Cin, Cout), lambda n: (0, 0)),
            ],
            out_specs=(
                pl.BlockSpec((1, H, W, Cout), lambda n: (n, 0, 0, 0)),
                pl.BlockSpec((1, 2, Cout), lambda n: (n, 0, 0)),
            ),
            scratch_shapes=[pltpu.VMEM((H * W, 9 * Cin), jnp.bfloat16)]),
        compiler_params=cparams,
    )(xpad, w1)

    scale1, shift1 = _fold_bn(st1, params["g1"], params["be1"], H * W, eps)

    # ---- pass 2: BN1+ReLU -> conv2 + per-image BN2 centered moments ---------
    y2, st2 = pl.pallas_call(
        _bn1_conv2_stats_kernel,
        out_shape=(jax.ShapeDtypeStruct((N, H, W, Cout), jnp.bfloat16),
                   jax.ShapeDtypeStruct((N, 2, Cout), jnp.float32)),
        grid_spec=pltpu.PrefetchScalarGridSpec(
            num_scalar_prefetch=0, grid=(N,),
            in_specs=[
                pl.BlockSpec((1, H, W, Cout), lambda n: (n, 0, 0, 0)),
                pl.BlockSpec((1, Cout), lambda n: (0, 0)),
                pl.BlockSpec((1, Cout), lambda n: (0, 0)),
                pl.BlockSpec((9 * Cout, Cout), lambda n: (0, 0)),
            ],
            out_specs=(
                pl.BlockSpec((1, H, W, Cout), lambda n: (n, 0, 0, 0)),
                pl.BlockSpec((1, 2, Cout), lambda n: (n, 0, 0)),
            ),
            scratch_shapes=[pltpu.VMEM((1, Hp, Wp, Cout), jnp.bfloat16),
                            pltpu.VMEM((H * W, 9 * Cout), jnp.bfloat16)]),
        compiler_params=cparams,
    )(y1, scale1.reshape(1, Cout), shift1.reshape(1, Cout), w2)

    scale2, shift2 = _fold_bn(st2, params["g2"], params["be2"], H * W, eps)

    # ---- epilogue: BN2 + ReLU folded into the NCHW transpose ----------------
    # XLA fuses cast + affine + relu + transpose into a single pass over y2,
    # so the output tensor makes exactly one HBM round trip here.
    out_nhwc = jnp.maximum(
        y2.astype(jnp.float32) * scale2[None, None, None, :]
        + shift2[None, None, None, :], 0.0)
    return jnp.transpose(out_nhwc, (0, 3, 1, 2))


# --------------------------------------------------------------------------
# Pure-JAX f32 reference (matches the PyTorch module, biases included)
# --------------------------------------------------------------------------
def _reference(x_nchw, params, eps=_EPS):
    def conv(x, w, b):
        y = jax.lax.conv_general_dilated(
            x, w, window_strides=(1, 1), padding=((1, 1), (1, 1)),
            dimension_numbers=("NCHW", "OIHW", "NCHW"))
        return y + b[None, :, None, None]

    def bn_relu(x, g, be):
        mean = jnp.mean(x, axis=(0, 2, 3), keepdims=True)
        var = jnp.mean((x - mean) ** 2, axis=(0, 2, 3), keepdims=True)
        y = (x - mean) * jax.lax.rsqrt(var + eps)
        y = y * g[None, :, None, None] + be[None, :, None, None]
        return jnp.maximum(y, 0.0)

    y = bn_relu(conv(x_nchw, params["w1"], params["b1"]),
                params["g1"], params["be1"])
    return bn_relu(conv(y, params["w2"], params["b2"]),
                   params["g2"], params["be2"])


if __name__ == "__main__":
    N, Cin, Cout, H, W = 2, 4, 8, 16, 16
    key = jax.random.PRNGKey(0)
    ks = jax.random.split(key, 9)

    params = {
        "w1": 0.1 * jax.random.normal(ks[0], (Cout, Cin, 3, 3), jnp.float32),
        "b1": 0.1 * jax.random.normal(ks[1], (Cout,), jnp.float32),
        "w2": 0.1 * jax.random.normal(ks[2], (Cout, Cout, 3, 3), jnp.float32),
        "b2": 0.1 * jax.random.normal(ks[3], (Cout,), jnp.float32),
        "g1": 1.0 + 0.1 * jax.random.normal(ks[4], (Cout,), jnp.float32),
        "be1": 0.1 * jax.random.normal(ks[5], (Cout,), jnp.float32),
        "g2": 1.0 + 0.1 * jax.random.normal(ks[6], (Cout,), jnp.float32),
        "be2": 0.1 * jax.random.normal(ks[7], (Cout,), jnp.float32),
    }
    x = jax.random.normal(ks[8], (N, Cin, H, W), jnp.float32)

    out = jax.jit(double_conv2d_bn_forward)(x, params)
    out = jax.block_until_ready(out)

    ref = jax.block_until_ready(_reference(x, params))
    assert out.shape == (N, Cout, H, W), out.shape
    # bf16 MXU operands + bf16 inter-pass activations (f32 accumulation and
    # f32 BN math) => bf16-aware tolerance.
    assert jnp.allclose(out, ref, atol=3e-2, rtol=3e-2), \
        float(jnp.max(jnp.abs(out - ref)))

    print("KERNEL_OK")
</pallas_src>

<mosaic_0001>
module attributes {stable_mosaic.version = 11 : i64} {
  func.func @_conv1_stats_kernel(%arg0: i32, %arg1: memref<1x18x18x4xbf16, #tpu.memory_space<vmem>>, %arg2: memref<36x8xbf16, #tpu.memory_space<vmem>>, %arg3: memref<1x16x16x8xbf16, #tpu.memory_space<vmem>>, %arg4: memref<1x2x8xf32, #tpu.memory_space<vmem>>, %arg5: memref<256x36xbf16, #tpu.memory_space<vmem>>) attributes {dimension_semantics = [#tpu.dimension_semantics<parallel>], iteration_bounds = array<i64: 2>, scalar_prefetch = 0 : i64, scratch_operands = 1 : i64, tpu.core_type = #tpu.core_type<tc>, window_params = [{transform_indices = @transform_0, window_bounds = array<i64: 1, 18, 18, 4>}, {pipeline_mode = #tpu.pipeline_mode<synchronous>, transform_indices = @transform_1, window_bounds = array<i64: 36, 8>}, {transform_indices = @transform_2, window_bounds = array<i64: 1, 16, 16, 8>}, {transform_indices = @transform_3, window_bounds = array<i64: 1, 2, 8>}]} {
    %c0 = arith.constant 0 : index
    %c0_0 = arith.constant 0 : index
    %c0_1 = arith.constant 0 : index
    %c0_2 = arith.constant 0 : index
    %0 = vector.load %arg1[%c0, %c0_0, %c0_1, %c0_2] : memref<1x18x18x4xbf16, #tpu.memory_space<vmem>>, vector<1x16x16x4xbf16>
    %1 = vector.shape_cast %0 : vector<1x16x16x4xbf16> to vector<256x4xbf16>
    %c0_3 = arith.constant 0 : index
    %c0_4 = arith.constant 0 : index
    %2 = vector.load %arg5[%c0_3, %c0_4] : memref<256x36xbf16, #tpu.memory_space<vmem>>, vector<256x4xbf16>
    tpu.vector_store %arg5[%c0_3, %c0_4], %1 {strides = array<i32>} : memref<256x36xbf16, #tpu.memory_space<vmem>>, vector<256x4xbf16>,
    %c0_5 = arith.constant 0 : index
    %c0_6 = arith.constant 0 : index
    %c1 = arith.constant 1 : index
    %c0_7 = arith.constant 0 : index
    %3 = vector.load %arg1[%c0_5, %c0_6, %c1, %c0_7] : memref<1x18x18x4xbf16, #tpu.memory_space<vmem>>, vector<1x16x16x4xbf16>
    %4 = vector.shape_cast %3 : vector<1x16x16x4xbf16> to vector<256x4xbf16>
    %c0_8 = arith.constant 0 : index
    %c4 = arith.constant 4 : index
    %5 = vector.load %arg5[%c0_8, %c4] : memref<256x36xbf16, #tpu.memory_space<vmem>>, vector<256x4xbf16>
    tpu.vector_store %arg5[%c0_8, %c4], %4 {strides = array<i32>} : memref<256x36xbf16, #tpu.memory_space<vmem>>, vector<256x4xbf16>,
    %c0_9 = arith.constant 0 : index
    %c0_10 = arith.constant 0 : index
    %c2 = arith.constant 2 : index
    %c0_11 = arith.constant 0 : index
    %6 = vector.load %arg1[%c0_9, %c0_10, %c2, %c0_11] : memref<1x18x18x4xbf16, #tpu.memory_space<vmem>>, vector<1x16x16x4xbf16>
    %7 = vector.shape_cast %6 : vector<1x16x16x4xbf16> to vector<256x4xbf16>
    %c0_12 = arith.constant 0 : index
    %c8 = arith.constant 8 : index
    %8 = vector.load %arg5[%c0_12, %c8] : memref<256x36xbf16, #tpu.memory_space<vmem>>, vector<256x4xbf16>
    tpu.vector_store %arg5[%c0_12, %c8], %7 {strides = array<i32>} : memref<256x36xbf16, #tpu.memory_space<vmem>>, vector<256x4xbf16>,
    %c0_13 = arith.constant 0 : index
    %c1_14 = arith.constant 1 : index
    %c0_15 = arith.constant 0 : index
    %c0_16 = arith.constant 0 : index
    %9 = vector.load %arg1[%c0_13, %c1_14, %c0_15, %c0_16] : memref<1x18x18x4xbf16, #tpu.memory_space<vmem>>, vector<1x16x16x4xbf16>
    %10 = vector.shape_cast %9 : vector<1x16x16x4xbf16> to vector<256x4xbf16>
    %c0_17 = arith.constant 0 : index
    %c12 = arith.constant 12 : index
    %11 = vector.load %arg5[%c0_17, %c12] : memref<256x36xbf16, #tpu.memory_space<vmem>>, vector<256x4xbf16>
    tpu.vector_store %arg5[%c0_17, %c12], %10 {strides = array<i32>} : memref<256x36xbf16, #tpu.memory_space<vmem>>, vector<256x4xbf16>,
    %c0_18 = arith.constant 0 : index
    %c1_19 = arith.constant 1 : index
    %c1_20 = arith.constant 1 : index
    %c0_21 = arith.constant 0 : index
    %12 = vector.load %arg1[%c0_18, %c1_19, %c1_20, %c0_21] : memref<1x18x18x4xbf16, #tpu.memory_space<vmem>>, vector<1x16x16x4xbf16>
    %13 = vector.shape_cast %12 : vector<1x16x16x4xbf16> to vector<256x4xbf16>
    %c0_22 = arith.constant 0 : index
    %c16 = arith.constant 16 : index
    %14 = vector.load %arg5[%c0_22, %c16] : memref<256x36xbf16, #tpu.memory_space<vmem>>, vector<256x4xbf16>
    tpu.vector_store %arg5[%c0_22, %c16], %13 {strides = array<i32>} : memref<256x36xbf16, #tpu.memory_space<vmem>>, vector<256x4xbf16>,
    %c0_23 = arith.constant 0 : index
    %c1_24 = arith.constant 1 : index
    %c2_25 = arith.constant 2 : index
    %c0_26 = arith.constant 0 : index
    %15 = vector.load %arg1[%c0_23, %c1_24, %c2_25, %c0_26] : memref<1x18x18x4xbf16, #tpu.memory_space<vmem>>, vector<1x16x16x4xbf16>
    %16 = vector.shape_cast %15 : vector<1x16x16x4xbf16> to vector<256x4xbf16>
    %c0_27 = arith.constant 0 : index
    %c20 = arith.constant 20 : index
    %17 = vector.load %arg5[%c0_27, %c20] : memref<256x36xbf16, #tpu.memory_space<vmem>>, vector<256x4xbf16>
    tpu.vector_store %arg5[%c0_27, %c20], %16 {strides = array<i32>} : memref<256x36xbf16, #tpu.memory_space<vmem>>, vector<256x4xbf16>,
    %c0_28 = arith.constant 0 : index
    %c2_29 = arith.constant 2 : index
    %c0_30 = arith.constant 0 : index
    %c0_31 = arith.constant 0 : index
    %18 = vector.load %arg1[%c0_28, %c2_29, %c0_30, %c0_31] : memref<1x18x18x4xbf16, #tpu.memory_space<vmem>>, vector<1x16x16x4xbf16>
    %19 = vector.shape_cast %18 : vector<1x16x16x4xbf16> to vector<256x4xbf16>
    %c0_32 = arith.constant 0 : index
    %c24 = arith.constant 24 : index
    %20 = vector.load %arg5[%c0_32, %c24] : memref<256x36xbf16, #tpu.memory_space<vmem>>, vector<256x4xbf16>
    tpu.vector_store %arg5[%c0_32, %c24], %19 {strides = array<i32>} : memref<256x36xbf16, #tpu.memory_space<vmem>>, vector<256x4xbf16>,
    %c0_33 = arith.constant 0 : index
    %c2_34 = arith.constant 2 : index
    %c1_35 = arith.constant 1 : index
    %c0_36 = arith.constant 0 : index
    %21 = vector.load %arg1[%c0_33, %c2_34, %c1_35, %c0_36] : memref<1x18x18x4xbf16, #tpu.memory_space<vmem>>, vector<1x16x16x4xbf16>
    %22 = vector.shape_cast %21 : vector<1x16x16x4xbf16> to vector<256x4xbf16>
    %c0_37 = arith.constant 0 : index
    %c28 = arith.constant 28 : index
    %23 = vector.load %arg5[%c0_37, %c28] : memref<256x36xbf16, #tpu.memory_space<vmem>>, vector<256x4xbf16>
    tpu.vector_store %arg5[%c0_37, %c28], %22 {strides = array<i32>} : memref<256x36xbf16, #tpu.memory_space<vmem>>, vector<256x4xbf16>,
    %c0_38 = arith.constant 0 : index
    %c2_39 = arith.constant 2 : index
    %c2_40 = arith.constant 2 : index
    %c0_41 = arith.constant 0 : index
    %24 = vector.load %arg1[%c0_38, %c2_39, %c2_40, %c0_41] : memref<1x18x18x4xbf16, #tpu.memory_space<vmem>>, vector<1x16x16x4xbf16>
    %25 = vector.shape_cast %24 : vector<1x16x16x4xbf16> to vector<256x4xbf16>
    %c0_42 = arith.constant 0 : index
    %c32 = arith.constant 32 : index
    %26 = vector.load %arg5[%c0_42, %c32] : memref<256x36xbf16, #tpu.memory_space<vmem>>, vector<256x4xbf16>
    tpu.vector_store %arg5[%c0_42, %c32], %25 {strides = array<i32>} : memref<256x36xbf16, #tpu.memory_space<vmem>>, vector<256x4xbf16>,
    %c0_43 = arith.constant 0 : index
    %c0_44 = arith.constant 0 : index
    %27 = vector.load %arg5[%c0_43, %c0_44] : memref<256x36xbf16, #tpu.memory_space<vmem>>, vector<256x36xbf16>
    %c0_45 = arith.constant 0 : index
    %c0_46 = arith.constant 0 : index
    %28 = vector.load %arg2[%c0_45, %c0_46] : memref<36x8xbf16, #tpu.memory_space<vmem>>, vector<36x8xbf16>
    %cst = arith.constant dense<0.000000e+00> : vector<256x8xf32>
    %29 = tpu.matmul %27, %28, %cst {dimension_numbers = #tpu.dot_dimension_numbers<[1], [0], [0], [1], [0, 0, 1, 1], [], []>} : vector<256x36xbf16>, vector<36x8xbf16>, vector<256x8xf32> -> vector<256x8xf32>
    %cst_47 = arith.constant dense<0.000000e+00> : vector<8xf32>
    %30 = vector.multi_reduction <add>, %29, %cst_47 [0] : vector<256x8xf32> to vector<8xf32>
    %31 = vector.shape_cast %30 : vector<8xf32> to vector<1x8xf32>
    %cst_48 = arith.constant 3.906250e-03 : f32
    %32 = vector.broadcast %cst_48 : f32 to vector<1x8xf32>
    %33 = arith.mulf %31, %32 : vector<1x8xf32>
    %34 = vector.broadcast %33 : vector<1x8xf32> to vector<256x8xf32>
    %35 = arith.subf %29, %34 : vector<256x8xf32>
    %36 = arith.mulf %35, %35 : vector<256x8xf32>
    %cst_49 = arith.constant dense<0.000000e+00> : vector<8xf32>
    %37 = vector.multi_reduction <add>, %36, %cst_49 [0] : vector<256x8xf32> to vector<8xf32>
    %38 = vector.shape_cast %37 : vector<8xf32> to vector<1x8xf32>
    %39 = vector.shape_cast %33 : vector<1x8xf32> to vector<1x1x8xf32>
    %c0_50 = arith.constant 0 : index
    %c0_51 = arith.constant 0 : index
    %c0_52 = arith.constant 0 : index
    %40 = vector.load %arg4[%c0_50, %c0_51, %c0_52] : memref<1x2x8xf32, #tpu.memory_space<vmem>>, vector<1x1x8xf32>
    tpu.vector_store %arg4[%c0_50, %c0_51, %c0_52], %39 {strides = array<i32>} : memref<1x2x8xf32, #tpu.memory_space<vmem>>, vector<1x1x8xf32>,
    %41 = vector.shape_cast %38 : vector<1x8xf32> to vector<1x1x8xf32>
    %c0_53 = arith.constant 0 : index
    %c1_54 = arith.constant 1 : index
    %c0_55 = arith.constant 0 : index
    %42 = vector.load %arg4[%c0_53, %c1_54, %c0_55] : memref<1x2x8xf32, #tpu.memory_space<vmem>>, vector<1x1x8xf32>
    tpu.vector_store %arg4[%c0_53, %c1_54, %c0_55], %41 {strides = array<i32>} : memref<1x2x8xf32, #tpu.memory_space<vmem>>, vector<1x1x8xf32>,
    %43 = vector.shape_cast %29 : vector<256x8xf32> to vector<1x16x16x8xf32>
    %44 = arith.truncf %43 : vector<1x16x16x8xf32> to vector<1x16x16x8xbf16>
    %c0_56 = arith.constant 0 : index
    %c0_57 = arith.constant 0 : index
    %c0_58 = arith.constant 0 : index
    %c0_59 = arith.constant 0 : index
    %45 = vector.load %arg3[%c0_56, %c0_57, %c0_58, %c0_59] : memref<1x16x16x8xbf16, #tpu.memory_space<vmem>>, vector<1x16x16x8xbf16>
    tpu.vector_store %arg3[%c0_56, %c0_57, %c0_58, %c0_59], %44 {strides = array<i32>} : memref<1x16x16x8xbf16, #tpu.memory_space<vmem>>, vector<1x16x16x8xbf16>,
    return
  }
  func.func @transform_0(%arg0: i32) -> (i32, i32, i32, i32) {
    %c0_i32 = arith.constant 0 : i32
    %c0_i32_0 = arith.constant 0 : i32
    %c0_i32_1 = arith.constant 0 : i32
    %c0_i32_2 = arith.constant 0 : i32
    return %arg0, %c0_i32, %c0_i32_0, %c0_i32_1 : i32, i32, i32, i32
  }
  func.func @transform_1(%arg0: i32) -> (i32, i32) {
    %c0_i32 = arith.constant 0 : i32
    %c0_i32_0 = arith.constant 0 : i32
    %c0_i32_1 = arith.constant 0 : i32
    return %c0_i32, %c0_i32_0 : i32, i32
  }
  func.func @transform_2(%arg0: i32) -> (i32, i32, i32, i32) {
    %c0_i32 = arith.constant 0 : i32
    %c0_i32_0 = arith.constant 0 : i32
    %c0_i32_1 = arith.constant 0 : i32
    %c0_i32_2 = arith.constant 0 : i32
    return %arg0, %c0_i32, %c0_i32_0, %c0_i32_1 : i32, i32, i32, i32
  }
  func.func @transform_3(%arg0: i32) -> (i32, i32, i32) {
    %c0_i32 = arith.constant 0 : i32
    %c0_i32_0 = arith.constant 0 : i32
    %c0_i32_1 = arith.constant 0 : i32
    return %arg0, %c0_i32, %c0_i32_0 : i32, i32, i32
  }
}

module attributes {stable_mosaic.version = 11 : i64} {
  func.func @_bn1_conv2_stats_kernel(%arg0: i32, %arg1: memref<1x16x16x8xbf16, #tpu.memory_space<vmem>>, %arg2: memref<1x8xf32, #tpu.memory_space<vmem>>, %arg3: memref<1x8xf32, #tpu.memory_space<vmem>>, %arg4: memref<72x8xbf16, #tpu.memory_space<vmem>>, %arg5: memref<1x16x16x8xbf16, #tpu.memory_space<vmem>>, %arg6: memref<1x2x8xf32, #tpu.memory_space<vmem>>, %arg7: memref<1x18x18x8xbf16, #tpu.memory_space<vmem>>, %arg8: memref<256x72xbf16, #tpu.memory_space<vmem>>) attributes {dimension_semantics = [#tpu.dimension_semantics<parallel>], iteration_bounds = array<i64: 2>, scalar_prefetch = 0 : i64, scratch_operands = 2 : i64, tpu.core_type = #tpu.core_type<tc>, window_params = [{transform_indices = @transform_0, window_bounds = array<i64: 1, 16, 16, 8>}, {pipeline_mode = #tpu.pipeline_mode<synchronous>, transform_indices = @transform_1, window_bounds = array<i64: 1, 8>}, {pipeline_mode = #tpu.pipeline_mode<synchronous>, transform_indices = @transform_2, window_bounds = array<i64: 1, 8>}, {pipeline_mode = #tpu.pipeline_mode<synchronous>, transform_indices = @transform_3, window_bounds = array<i64: 72, 8>}, {transform_indices = @transform_4, window_bounds = array<i64: 1, 16, 16, 8>}, {transform_indices = @transform_5, window_bounds = array<i64: 1, 2, 8>}]} {
    %c0 = arith.constant 0 : index
    %c0_0 = arith.constant 0 : index
    %c0_1 = arith.constant 0 : index
    %c0_2 = arith.constant 0 : index
    %0 = vector.load %arg1[%c0, %c0_0, %c0_1, %c0_2] : memref<1x16x16x8xbf16, #tpu.memory_space<vmem>>, vector<1x16x16x8xbf16>
    %1 = arith.extf %0 : vector<1x16x16x8xbf16> to vector<1x16x16x8xf32>
    %c0_3 = arith.constant 0 : index
    %c0_4 = arith.constant 0 : index
    %2 = vector.load %arg2[%c0_3, %c0_4] : memref<1x8xf32, #tpu.memory_space<vmem>>, vector<1x8xf32>
    %3 = vector.shape_cast %2 : vector<1x8xf32> to vector<1x1x1x8xf32>
    %4 = vector.broadcast %3 : vector<1x1x1x8xf32> to vector<1x16x16x8xf32>
    %5 = arith.mulf %1, %4 : vector<1x16x16x8xf32>
    %c0_5 = arith.constant 0 : index
    %c0_6 = arith.constant 0 : index
    %6 = vector.load %arg3[%c0_5, %c0_6] : memref<1x8xf32, #tpu.memory_space<vmem>>, vector<1x8xf32>
    %7 = vector.shape_cast %6 : vector<1x8xf32> to vector<1x1x1x8xf32>
    %8 = vector.broadcast %7 : vector<1x1x1x8xf32> to vector<1x16x16x8xf32>
    %9 = arith.addf %5, %8 : vector<1x16x16x8xf32>
    %cst = arith.constant 0.000000e+00 : f32
    %10 = vector.broadcast %cst : f32 to vector<1x16x16x8xf32>
    %11 = arith.maximumf %9, %10 : vector<1x16x16x8xf32>
    %cst_7 = arith.constant 0.000000e+00 : bf16
    %12 = vector.broadcast %cst_7 : bf16 to vector<1x1x18x8xbf16>
    %c0_8 = arith.constant 0 : index
    %c0_9 = arith.constant 0 : index
    %c0_10 = arith.constant 0 : index
    %c0_11 = arith.constant 0 : index
    %13 = vector.load %arg7[%c0_8, %c0_9, %c0_10, %c0_11] : memref<1x18x18x8xbf16, #tpu.memory_space<vmem>>, vector<1x1x18x8xbf16>
    tpu.vector_store %arg7[%c0_8, %c0_9, %c0_10, %c0_11], %12 {strides = array<i32>} : memref<1x18x18x8xbf16, #tpu.memory_space<vmem>>, vector<1x1x18x8xbf16>,
    %cst_12 = arith.constant 0.000000e+00 : bf16
    %14 = vector.broadcast %cst_12 : bf16 to vector<1x1x18x8xbf16>
    %c0_13 = arith.constant 0 : index
    %c17 = arith.constant 17 : index
    %c0_14 = arith.constant 0 : index
    %c0_15 = arith.constant 0 : index
    %15 = vector.load %arg7[%c0_13, %c17, %c0_14, %c0_15] : memref<1x18x18x8xbf16, #tpu.memory_space<vmem>>, vector<1x1x18x8xbf16>
    tpu.vector_store %arg7[%c0_13, %c17, %c0_14, %c0_15], %14 {strides = array<i32>} : memref<1x18x18x8xbf16, #tpu.memory_space<vmem>>, vector<1x1x18x8xbf16>,
    %cst_16 = arith.constant 0.000000e+00 : bf16
    %16 = vector.broadcast %cst_16 : bf16 to vector<1x16x1x8xbf16>
    %c0_17 = arith.constant 0 : index
    %c1 = arith.constant 1 : index
    %c0_18 = arith.constant 0 : index
    %c0_19 = arith.constant 0 : index
    %17 = vector.load %arg7[%c0_17, %c1, %c0_18, %c0_19] : memref<1x18x18x8xbf16, #tpu.memory_space<vmem>>, vector<1x16x1x8xbf16>
    tpu.vector_store %arg7[%c0_17, %c1, %c0_18, %c0_19], %16 {strides = array<i32>} : memref<1x18x18x8xbf16, #tpu.memory_space<vmem>>, vector<1x16x1x8xbf16>,
    %cst_20 = arith.constant 0.000000e+00 : bf16
    %18 = vector.broadcast %cst_20 : bf16 to vector<1x16x1x8xbf16>
    %c0_21 = arith.constant 0 : index
    %c1_22 = arith.constant 1 : index
    %c17_23 = arith.constant 17 : index
    %c0_24 = arith.constant 0 : index
    %19 = vector.load %arg7[%c0_21, %c1_22, %c17_23, %c0_24] : memref<1x18x18x8xbf16, #tpu.memory_space<vmem>>, vector<1x16x1x8xbf16>
    tpu.vector_store %arg7[%c0_21, %c1_22, %c17_23, %c0_24], %18 {strides = array<i32>} : memref<1x18x18x8xbf16, #tpu.memory_space<vmem>>, vector<1x16x1x8xbf16>,
    %20 = arith.truncf %11 : vector<1x16x16x8xf32> to vector<1x16x16x8xbf16>
    %c0_25 = arith.constant 0 : index
    %c1_26 = arith.constant 1 : index
    %c1_27 = arith.constant 1 : index
    %c0_28 = arith.constant 0 : index
    %21 = vector.load %arg7[%c0_25, %c1_26, %c1_27, %c0_28] : memref<1x18x18x8xbf16, #tpu.memory_space<vmem>>, vector<1x16x16x8xbf16>
    tpu.vector_store %arg7[%c0_25, %c1_26, %c1_27, %c0_28], %20 {strides = array<i32>} : memref<1x18x18x8xbf16, #tpu.memory_space<vmem>>, vector<1x16x16x8xbf16>,
    %c0_29 = arith.constant 0 : index
    %c0_30 = arith.constant 0 : index
    %c0_31 = arith.constant 0 : index
    %c0_32 = arith.constant 0 : index
    %22 = vector.load %arg7[%c0_29, %c0_30, %c0_31, %c0_32] : memref<1x18x18x8xbf16, #tpu.memory_space<vmem>>, vector<1x16x16x8xbf16>
    %23 = vector.shape_cast %22 : vector<1x16x16x8xbf16> to vector<256x8xbf16>
    %c0_33 = arith.constant 0 : index
    %c0_34 = arith.constant 0 : index
    %24 = vector.load %arg8[%c0_33, %c0_34] : memref<256x72xbf16, #tpu.memory_space<vmem>>, vector<256x8xbf16>
    tpu.vector_store %arg8[%c0_33, %c0_34], %23 {strides = array<i32>} : memref<256x72xbf16, #tpu.memory_space<vmem>>, vector<256x8xbf16>,
    %c0_35 = arith.constant 0 : index
    %c0_36 = arith.constant 0 : index
    %c1_37 = arith.constant 1 : index
    %c0_38 = arith.constant 0 : index
    %25 = vector.load %arg7[%c0_35, %c0_36, %c1_37, %c0_38] : memref<1x18x18x8xbf16, #tpu.memory_space<vmem>>, vector<1x16x16x8xbf16>
    %26 = vector.shape_cast %25 : vector<1x16x16x8xbf16> to vector<256x8xbf16>
    %c0_39 = arith.constant 0 : index
    %c8 = arith.constant 8 : index
    %27 = vector.load %arg8[%c0_39, %c8] : memref<256x72xbf16, #tpu.memory_space<vmem>>, vector<256x8xbf16>
    tpu.vector_store %arg8[%c0_39, %c8], %26 {strides = array<i32>} : memref<256x72xbf16, #tpu.memory_space<vmem>>, vector<256x8xbf16>,
    %c0_40 = arith.constant 0 : index
    %c0_41 = arith.constant 0 : index
    %c2 = arith.constant 2 : index
    %c0_42 = arith.constant 0 : index
    %28 = vector.load %arg7[%c0_40, %c0_41, %c2, %c0_42] : memref<1x18x18x8xbf16, #tpu.memory_space<vmem>>, vector<1x16x16x8xbf16>
    %29 = vector.shape_cast %28 : vector<1x16x16x8xbf16> to vector<256x8xbf16>
    %c0_43 = arith.constant 0 : index
    %c16 = arith.constant 16 : index
    %30 = vector.load %arg8[%c0_43, %c16] : memref<256x72xbf16, #tpu.memory_space<vmem>>, vector<256x8xbf16>
    tpu.vector_store %arg8[%c0_43, %c16], %29 {strides = array<i32>} : memref<256x72xbf16, #tpu.memory_space<vmem>>, vector<256x8xbf16>,
    %c0_44 = arith.constant 0 : index
    %c1_45 = arith.constant 1 : index
    %c0_46 = arith.constant 0 : index
    %c0_47 = arith.constant 0 : index
    %31 = vector.load %arg7[%c0_44, %c1_45, %c0_46, %c0_47] : memref<1x18x18x8xbf16, #tpu.memory_space<vmem>>, vector<1x16x16x8xbf16>
    %32 = vector.shape_cast %31 : vector<1x16x16x8xbf16> to vector<256x8xbf16>
    %c0_48 = arith.constant 0 : index
    %c24 = arith.constant 24 : index
    %33 = vector.load %arg8[%c0_48, %c24] : memref<256x72xbf16, #tpu.memory_space<vmem>>, vector<256x8xbf16>
    tpu.vector_store %arg8[%c0_48, %c24], %32 {strides = array<i32>} : memref<256x72xbf16, #tpu.memory_space<vmem>>, vector<256x8xbf16>,
    %c0_49 = arith.constant 0 : index
    %c1_50 = arith.constant 1 : index
    %c1_51 = arith.constant 1 : index
    %c0_52 = arith.constant 0 : index
    %34 = vector.load %arg7[%c0_49, %c1_50, %c1_51, %c0_52] : memref<1x18x18x8xbf16, #tpu.memory_space<vmem>>, vector<1x16x16x8xbf16>
    %35 = vector.shape_cast %34 : vector<1x16x16x8xbf16> to vector<256x8xbf16>
    %c0_53 = arith.constant 0 : index
    %c32 = arith.constant 32 : index
    %36 = vector.load %arg8[%c0_53, %c32] : memref<256x72xbf16, #tpu.memory_space<vmem>>, vector<256x8xbf16>
    tpu.vector_store %arg8[%c0_53, %c32], %35 {strides = array<i32>} : memref<256x72xbf16, #tpu.memory_space<vmem>>, vector<256x8xbf16>,
    %c0_54 = arith.constant 0 : index
    %c1_55 = arith.constant 1 : index
    %c2_56 = arith.constant 2 : index
    %c0_57 = arith.constant 0 : index
    %37 = vector.load %arg7[%c0_54, %c1_55, %c2_56, %c0_57] : memref<1x18x18x8xbf16, #tpu.memory_space<vmem>>, vector<1x16x16x8xbf16>
    %38 = vector.shape_cast %37 : vector<1x16x16x8xbf16> to vector<256x8xbf16>
    %c0_58 = arith.constant 0 : index
    %c40 = arith.constant 40 : index
    %39 = vector.load %arg8[%c0_58, %c40] : memref<256x72xbf16, #tpu.memory_space<vmem>>, vector<256x8xbf16>
    tpu.vector_store %arg8[%c0_58, %c40], %38 {strides = array<i32>} : memref<256x72xbf16, #tpu.memory_space<vmem>>, vector<256x8xbf16>,
    %c0_59 = arith.constant 0 : index
    %c2_60 = arith.constant 2 : index
    %c0_61 = arith.constant 0 : index
    %c0_62 = arith.constant 0 : index
    %40 = vector.load %arg7[%c0_59, %c2_60, %c0_61, %c0_62] : memref<1x18x18x8xbf16, #tpu.memory_space<vmem>>, vector<1x16x16x8xbf16>
    %41 = vector.shape_cast %40 : vector<1x16x16x8xbf16> to vector<256x8xbf16>
    %c0_63 = arith.constant 0 : index
    %c48 = arith.constant 48 : index
    %42 = vector.load %arg8[%c0_63, %c48] : memref<256x72xbf16, #tpu.memory_space<vmem>>, vector<256x8xbf16>
    tpu.vector_store %arg8[%c0_63, %c48], %41 {strides = array<i32>} : memref<256x72xbf16, #tpu.memory_space<vmem>>, vector<256x8xbf16>,
    %c0_64 = arith.constant 0 : index
    %c2_65 = arith.constant 2 : index
    %c1_66 = arith.constant 1 : index
    %c0_67 = arith.constant 0 : index
    %43 = vector.load %arg7[%c0_64, %c2_65, %c1_66, %c0_67] : memref<1x18x18x8xbf16, #tpu.memory_space<vmem>>, vector<1x16x16x8xbf16>
    %44 = vector.shape_cast %43 : vector<1x16x16x8xbf16> to vector<256x8xbf16>
    %c0_68 = arith.constant 0 : index
    %c56 = arith.constant 56 : index
    %45 = vector.load %arg8[%c0_68, %c56] : memref<256x72xbf16, #tpu.memory_space<vmem>>, vector<256x8xbf16>
    tpu.vector_store %arg8[%c0_68, %c56], %44 {strides = array<i32>} : memref<256x72xbf16, #tpu.memory_space<vmem>>, vector<256x8xbf16>,
    %c0_69 = arith.constant 0 : index
    %c2_70 = arith.constant 2 : index
    %c2_71 = arith.constant 2 : index
    %c0_72 = arith.constant 0 : index
    %46 = vector.load %arg7[%c0_69, %c2_70, %c2_71, %c0_72] : memref<1x18x18x8xbf16, #tpu.memory_space<vmem>>, vector<1x16x16x8xbf16>
    %47 = vector.shape_cast %46 : vector<1x16x16x8xbf16> to vector<256x8xbf16>
    %c0_73 = arith.constant 0 : index
    %c64 = arith.constant 64 : index
    %48 = vector.load %arg8[%c0_73, %c64] : memref<256x72xbf16, #tpu.memory_space<vmem>>, vector<256x8xbf16>
    tpu.vector_store %arg8[%c0_73, %c64], %47 {strides = array<i32>} : memref<256x72xbf16, #tpu.memory_space<vmem>>, vector<256x8xbf16>,
    %c0_74 = arith.constant 0 : index
    %c0_75 = arith.constant 0 : index
    %49 = vector.load %arg8[%c0_74, %c0_75] : memref<256x72xbf16, #tpu.memory_space<vmem>>, vector<256x72xbf16>
    %c0_76 = arith.constant 0 : index
    %c0_77 = arith.constant 0 : index
    %50 = vector.load %arg4[%c0_76, %c0_77] : memref<72x8xbf16, #tpu.memory_space<vmem>>, vector<72x8xbf16>
    %cst_78 = arith.constant dense<0.000000e+00> : vector<256x8xf32>
    %51 = tpu.matmul %49, %50, %cst_78 {dimension_numbers = #tpu.dot_dimension_numbers<[1], [0], [0], [1], [0, 0, 1, 1], [], []>} : vector<256x72xbf16>, vector<72x8xbf16>, vector<256x8xf32> -> vector<256x8xf32>
    %cst_79 = arith.constant dense<0.000000e+00> : vector<8xf32>
    %52 = vector.multi_reduction <add>, %51, %cst_79 [0] : vector<256x8xf32> to vector<8xf32>
    %53 = vector.shape_cast %52 : vector<8xf32> to vector<1x8xf32>
    %cst_80 = arith.constant 3.906250e-03 : f32
    %54 = vector.broadcast %cst_80 : f32 to vector<1x8xf32>
    %55 = arith.mulf %53, %54 : vector<1x8xf32>
    %56 = vector.broadcast %55 : vector<1x8xf32> to vector<256x8xf32>
    %57 = arith.subf %51, %56 : vector<256x8xf32>
    %58 = arith.mulf %57, %57 : vector<256x8xf32>
    %cst_81 = arith.constant dense<0.000000e+00> : vector<8xf32>
    %59 = vector.multi_reduction <add>, %58, %cst_81 [0] : vector<256x8xf32> to vector<8xf32>
    %60 = vector.shape_cast %59 : vector<8xf32> to vector<1x8xf32>
    %61 = vector.shape_cast %55 : vector<1x8xf32> to vector<1x1x8xf32>
    %c0_82 = arith.constant 0 : index
    %c0_83 = arith.constant 0 : index
    %c0_84 = arith.constant 0 : index
    %62 = vector.load %arg6[%c0_82, %c0_83, %c0_84] : memref<1x2x8xf32, #tpu.memory_space<vmem>>, vector<1x1x8xf32>
    tpu.vector_store %arg6[%c0_82, %c0_83, %c0_84], %61 {strides = array<i32>} : memref<1x2x8xf32, #tpu.memory_space<vmem>>, vector<1x1x8xf32>,
    %63 = vector.shape_cast %60 : vector<1x8xf32> to vector<1x1x8xf32>
    %c0_85 = arith.constant 0 : index
    %c1_86 = arith.constant 1 : index
    %c0_87 = arith.constant 0 : index
    %64 = vector.load %arg6[%c0_85, %c1_86, %c0_87] : memref<1x2x8xf32, #tpu.memory_space<vmem>>, vector<1x1x8xf32>
    tpu.vector_store %arg6[%c0_85, %c1_86, %c0_87], %63 {strides = array<i32>} : memref<1x2x8xf32, #tpu.memory_space<vmem>>, vector<1x1x8xf32>,
    %65 = vector.shape_cast %51 : vector<256x8xf32> to vector<1x16x16x8xf32>
    %66 = arith.truncf %65 : vector<1x16x16x8xf32> to vector<1x16x16x8xbf16>
    %c0_88 = arith.constant 0 : index
    %c0_89 = arith.constant 0 : index
    %c0_90 = arith.constant 0 : index
    %c0_91 = arith.constant 0 : index
    %67 = vector.load %arg5[%c0_88, %c0_89, %c0_90, %c0_91] : memref<1x16x16x8xbf16, #tpu.memory_space<vmem>>, vector<1x16x16x8xbf16>
    tpu.vector_store %arg5[%c0_88, %c0_89, %c0_90, %c0_91], %66 {strides = array<i32>} : memref<1x16x16x8xbf16, #tpu.memory_space<vmem>>, vector<1x16x16x8xbf16>,
    return
  }
  func.func @transform_0(%arg0: i32) -> (i32, i32, i32, i32) {
    %c0_i32 = arith.constant 0 : i32
    %c0_i32_0 = arith.constant 0 : i32
    %c0_i32_1 = arith.constant 0 : i32
    %c0_i32_2 = arith.constant 0 : i32
    return %arg0, %c0_i32, %c0_i32_0, %c0_i32_1 : i32, i32, i32, i32
  }
  func.func @transform_1(%arg0: i32) -> (i32, i32) {
    %c0_i32 = arith.constant 0 : i32
    %c0_i32_0 = arith.constant 0 : i32
    %c0_i32_1 = arith.constant 0 : i32
    return %c0_i32, %c0_i32_0 : i32, i32
  }
  func.func @transform_2(%arg0: i32) -> (i32, i32) {
    %c0_i32 = arith.constant 0 : i32
    %c0_i32_0 = arith.constant 0 : i32
    %c0_i32_1 = arith.constant 0 : i32
    return %c0_i32, %c0_i32_0 : i32, i32
  }
  func.func @transform_3(%arg0: i32) -> (i32, i32) {
    %c0_i32 = arith.constant 0 : i32
    %c0_i32_0 = arith.constant 0 : i32
    %c0_i32_1 = arith.constant 0 : i32
    return %c0_i32, %c0_i32_0 : i32, i32
  }
  func.func @transform_4(%arg0: i32) -> (i32, i32, i32, i32) {
    %c0_i32 = arith.constant 0 : i32
    %c0_i32_0 = arith.constant 0 : i32
    %c0_i32_1 = arith.constant 0 : i32
    %c0_i32_2 = arith.constant 0 : i32
    return %arg0, %c0_i32, %c0_i32_0, %c0_i32_1 : i32, i32, i32, i32
  }
  func.func @transform_5(%arg0: i32) -> (i32, i32, i32) {
    %c0_i32 = arith.constant 0 : i32
    %c0_i32_0 = arith.constant 0 : i32
    %c0_i32_1 = arith.constant 0 : i32
    return %arg0, %c0_i32, %c0_i32_0 : i32, i32, i32
  }
}

</mosaic_0001>

<bundles_post_ra>
// kernel: double_conv2d_bn_forward.2
= control target key start
LH: loop header
LB: loop body
LE: loop exit
PB: predicated region body
PF: predicated region fallthrough
CT: control target
= control target key end

     0   :  { %s4688_s12 = smov 0   ;;  %s6475_s0 = inlined_call_operand.vmem [shape: bf16[2,18,18,4], index: 0, kind: input, shape index: {}]   ;;  %s6476_s1 = inlined_call_operand.vmem [shape: bf16[36,8], index: 1, kind: input, shape index: {}]   ;;  %s6477_s2 = inlined_call_operand.vmem [shape: bf16[2,16,16,8], index: 2, kind: output, shape index: {0}]   ;;  %s6478_s3 = inlined_call_operand.vmem [shape: f32[2,2,8], index: 3, kind: output, shape index: {1}]  }
   0x1 LB: > { %s4136_s13 = sadd.s32 4294967295, %s4658_s12   ;;  %p4140_p0 = scmp.ge.s32.totalorder %s4658_s12, 1  ;;  %s4658_s12 = sphi %s4688_s12, %s14_s12  }
   0x2   : > { %p140_p1 = scmp.lt.s32.totalorder %s4658_s12, 3 }
   0x4   : > { %p141_p2 = pnand %p4140_p0, %p140_p1 }
   0x5   : > { %p168_p3 = scmp.lt.s32.totalorder (!%p141_p2), %s4136_s13, 1  ;;  %s4660_s18 = smov (!%p141_p2), 4  }
   0x6   : > { %144 = sbr.rel (%p141_p2) target bundleno = 958 (0x3be), region = 28  ;;  %s4661_s19 = smov (!%p141_p2), 8  }
   0x7   : > { %s4662_s20 = smov (!%p141_p2), 12   ;;  %s4663_s21 = smov (!%p141_p2), 16  }
   0x8   : > { %s4664_s22 = smov (!%p141_p2), 20   ;;  %s4665_s23 = smov (!%p141_p2), 24  }
   0x9   : > { %s4666_s24 = smov (!%p141_p2), 28   ;;  %s4667_s25 = smov (!%p141_p2), 32  }
   0xb   : > { %s6484_s13 = smov (!%p168_p3, %s4136_s13), 1  ;;  %vm296_vm0 = vsmask.f32 3328  ;;  %vm297_vm1 = vsmask.f32 7440  ;;  %vm215_vm3 = vcmask 27648  }
   0xc   : > { %s4616_s14 = smul.u32 216, %s6484_s13  ;;  %vm4713_vm2 = vmor %vm296_vm0, %vm297_vm1  ;;  %vm908_vm4 = vcmask 1042432   ;;  %vm909_vm5 = vcmask 1046532   ;;  %vm779_vm7 = vcmask 60448   ;;  %vm3517_vm8 = vcmask 1041408   ;;  %s4518_s5 = sshll.u32 %s6484_s13, 7 }
   0xd   : > { %vm4860_vm6 = vmor %vm908_vm4, %vm909_vm5  ;;  %vm1119_vm9 = vcmask 93248   ;;  %vm1313_vm10 = vcmask 126048   ;;  %vm1874_vm11 = vcmask 158848   ;;  %vm2211_vm12 = vcmask 191648   ;;  %s5886_s8 = scalar_lea.vmem %s6477_s2, %s4518_s5  ;;  %s4144_s9 = sshll.u32 %s6484_s13, 1 }
   0xe   : > { %s4702_s17 = scalar_lea.vmem %s6475_s0, %s4616_s14  ;;  %vm2405_vm13 = vcmask 224448   ;;  %vm2966_vm14 = vcmask 257248   ;;  %vm3303_vm15 = vcmask 290048   ;;  %vm3468_vm0 = vcmask 293888   ;;  %s6355_s14 = scalar_lea.vmem %s6478_s3, %s4144_s9 }
   0xf   : > { %v251_v0 = vld [vmem:[%s4702_s17 + $0xc] sm:$0xf]  ;;  %v252_v1 = vld [vmem:[%s4702_s17 + $0x10] sm:$0xf]  ;;  %v248_v2 = vld [vmem:[%s4702_s17] sm:$0xf] }
  0x10   : > { %v324_v3 = vshrl.u32 %v251_v0, 16  ;;  %v327_v4 = vshll.u32 %v251_v0, 16  ;;  %v333_v5 = vshll.u32 %v252_v1, 16  ;;  %v337_v6 = vshrl.u32 %v252_v1, 16  ;;  %v249_v7 = vld [vmem:[%s4702_s17 + $0x4] sm:$0xf] }
  0x11   : > { %v300_v8 = vshrl.u32 %v248_v2, 16  ;;  %v303_v9 = vshll.u32 %v248_v2, 16  ;;  %v309_v10 = vshll.u32 %v249_v7, 16  ;;  %v313_v11 = vshrl.u32 %v249_v7, 16  ;;  %v253_v12 = vld [vmem:[%s4702_s17 + $0x14] sm:$0x1] }
  0x12   : > { %v326_v13 = vrot.slane %v324_v3, 4  ;;  %v329_v14 = vrot.slane %v327_v4, 5  ;;  %v335_v15 = vrot.slane %v333_v5, 5  ;;  %v339_v16 = vrot.slane %v337_v6, 4  ;;  %v250_v17 = vld [vmem:[%s4702_s17 + $0x8] sm:$0x1] }
  0x13   : > { %v302_v18 = vrot.slane %v300_v8, 4  ;;  %v305_v19 = vrot.slane %v303_v9, 5  ;;  %v311_v20 = vrot.slane %v309_v10, 5  ;;  %v315_v21 = vrot.slane %v313_v11, 4  ;;  %v255_v22 = vld [vmem:[%s4702_s17 + $0x1c] sm:$0xf] }
  0x14   : > { %v330_v23 = vor.u32 %v329_v14, %v326_v13  ;;  %v340_v24 = vor.u32 %v339_v16, %v335_v15  ;;  %v343_v25 = vshll.u32 %v253_v12, 16  ;;  %v319_v26 = vshll.u32 %v250_v17, 16  ;;  %v256_v30 = vld [vmem:[%s4702_s17 + $0x20] sm:$0x1]  ;;  %v254_v33 = vld [vmem:[%s4702_s17 + $0x18] sm:$0xf] }
  0x15   : > { %v306_v28 = vor.u32 %v305_v19, %v302_v18  ;;  %v316_v29 = vor.u32 %v315_v21, %v311_v20  ;;  %v357_v31 = vshll.u32 %v255_v22, 16  ;;  %v361_v32 = vshrl.u32 %v255_v22, 16  ;;  %v258_v42 = vld [vmem:[%s4702_s17 + $0x28] sm:$0xf]  ;;  %v259_v47 = vld [vmem:[%s4702_s17 + $0x2c] sm:$0x1] }
  0x16   : > { %v331_v34 = vrot.slane %v330_v23, 4  ;;  %v341_v35 = vrot.slane %v340_v24, 4  ;;  %v345_v36 = vrot.slane %v343_v25, 5  ;;  %v321_v37 = vrot.slane %v319_v26, 5  ;;  %v257_v48 = vld [vmem:[%s4702_s17 + $0x24] sm:$0xf] }
  0x17   : > { %v307_v38 = vrot.slane %v306_v28, 4  ;;  %v317_v39 = vrot.slane %v316_v29, 4  ;;  %v359_v40 = vrot.slane %v357_v31, 5  ;;  %v363_v41 = vrot.slane %v361_v32, 4  ;;  %v261_v53 = vld [vmem:[%s4702_s17 + $0x34] sm:$0xf] }
  0x18   : > { %v336_v43 = vsel %vm4713_vm2, %v331_v34, %v335_v15  ;;  %v346_v44 = vsel %vm4713_vm2, %v341_v35, %v345_v36  ;;  %v367_v45 = vshll.u32 %v256_v30, 16  ;;  %v348_v46 = vshrl.u32 %v254_v33, 16  ;;  %v262_v62 = vld [vmem:[%s4702_s17 + $0x38] sm:$0x1]  ;;  %v260_v3 = vld [vmem:[%s4702_s17 + $0x30] sm:$0xf] }
  0x19   : > { %687 = vrot.lane.b32.xlu1 %v336_v43, %s4660_s18  ;;  %v312_v49 = vsel %vm4713_vm2, %v307_v38, %v311_v20  ;;  %v322_v50 = vsel %vm4713_vm2, %v317_v39, %v321_v37  ;;  %v364_v51 = vor.u32 %v363_v41, %v359_v40  ;;  %v351_v52 = vshll.u32 %v254_v33, 16  ;;  %v264_v8 = vld [vmem:[%s4702_s17 + $0x40] sm:$0xf]  ;;  %v265_v17 = vld [vmem:[%s4702_s17 + $0x44] sm:$0x1] }
  0x1a   : > { %683 = vrot.lane.b32.xlu0 %v312_v49, %s4660_s18  ;;  %v369_v54 = vrot.slane %v367_v45, 5  ;;  %v350_v55 = vrot.slane %v348_v46, 4  ;;  %v381_v56 = vshll.u32 %v258_v42, 16  ;;  %v385_v57 = vshrl.u32 %v258_v42, 16  ;;  %v263_v22 = vld [vmem:[%s4702_s17 + $0x3c] sm:$0xf] }
  0x1b   : > { %v365_v58 = vrot.slane %v364_v51, 4  ;;  %v353_v59 = vrot.slane %v351_v52, 5  ;;  %v391_v60 = vshll.u32 %v259_v47, 16  ;;  %v372_v61 = vshrl.u32 %v257_v48, 16  ;;  %v267_v28 = vld [vmem:[%s4702_s17 + $0x4c] sm:$0xf] }
  0x1c   : > { %v383_v63 = vrot.slane %v381_v56, 5  ;;  %v387_v0 = vrot.slane %v385_v57, 4  ;;  %v375_v1 = vshll.u32 %v257_v48, 16  ;;  %v405_v2 = vshll.u32 %v261_v53, 16  ;;  %v268_v37 = vld [vmem:[%s4702_s17 + $0x50] sm:$0x1] }
  0x1d   : > { %689 = vrot.lane.b32.xlu1 %v346_v44, %s4660_s18  ;;  %v370_v4 = vsel %vm4713_vm2, %v365_v58, %v369_v54  ;;  %v354_v5 = vor.u32 %v353_v59, %v350_v55  ;;  %v393_v6 = vrot.slane %v391_v60, 5  ;;  %v374_v7 = vrot.slane %v372_v61, 4  ;;  %v266_v42 = vld [vmem:[%s4702_s17 + $0x48] sm:$0xf]  ;;  %v270_v47 = vld [vmem:[%s4702_s17 + $0x58] sm:$0xf] }
  0x1e   : > { %685 = vrot.lane.b32.xlu0 %v322_v50, %s4660_s18  ;;  %v388_v9 = vor.u32 %v387_v0, %v383_v63  ;;  %v377_v10 = vrot.slane %v375_v1, 5  ;;  %v407_v11 = vrot.slane %v405_v2, 5  ;;  %v409_v12 = vshrl.u32 %v261_v53, 16  ;;  %v271_v56 = vld [vmem:[%s4702_s17 + $0x5c] sm:$0x1] }
  0x1f   : > { %v355_v13 = vrot.slane %v354_v5, 4  ;;  %v415_v14 = vshll.u32 %v262_v62, 16  ;;  %v396_v15 = vshrl.u32 %v260_v3, 16  ;;  %v399_v16 = vshll.u32 %v260_v3, 16  ;;  %v269_v61 = vld [vmem:[%s4702_s17 + $0x54] sm:$0xf] }
  0x20   : > { %v389_v18 = vrot.slane %v388_v9, 4  ;;  %v378_v19 = vor.u32 %v377_v10, %v374_v7  ;;  %v411_v20 = vrot.slane %v409_v12, 4  ;;  %v429_v21 = vshll.u32 %v264_v8, 16 }
  0x21   : > { %693 = vrot.lane.b32.xlu1 %v370_v4, %s4660_s18  ;;  %v360_v23 = vsel %vm4713_vm2, %v355_v13, %v359_v40  ;;  %v417_v24 = vrot.slane %v415_v14, 5  ;;  %v398_v25 = vrot.slane %v396_v15, 4  ;;  %v401_v26 = vrot.slane %v399_v16, 5  ;;  %v274_v15 = vld [vmem:[%s4702_s17 + $0x68] sm:$0x1] }
  0x22   : > { %691 = vrot.lane.b32.xlu0 %v360_v23, %s4660_s18  ;;  %v394_v29 = vsel %vm4713_vm2, %v389_v18, %v393_v6  ;;  %v379_v30 = vrot.slane %v378_v19, 4  ;;  %v412_v31 = vor.u32 %v411_v20, %v407_v11  ;;  %v431_v32 = vrot.slane %v429_v21, 5  ;;  %v273_v6 = vld [vmem:[%s4702_s17 + $0x64] sm:$0xf]  ;;  %v272_v16 = vld [vmem:[%s4702_s17 + $0x60] sm:$0xf] }
  0x23   : > { %v402_v33 = vor.u32 %v401_v26, %v398_v25  ;;  %v433_v34 = vshrl.u32 %v264_v8, 16  ;;  %v439_v35 = vshll.u32 %v265_v17, 16  ;;  %v420_v36 = vshrl.u32 %v263_v22, 16  ;;  %v276_v25 = vld [vmem:[%s4702_s17 + $0x70] sm:$0xf] }
  0x24   : > { %v384_v38 = vsel %vm4713_vm2, %v379_v30, %v383_v63  ;;  %v413_v39 = vrot.slane %v412_v31, 4  ;;  %v423_v40 = vshll.u32 %v263_v22, 16  ;;  %v453_v41 = vshll.u32 %v267_v28, 16 }
  0x25   : > { %697 = vrot.lane.b32.xlu1 %v394_v29, %s4660_s18  ;;  %v403_v43 = vrot.slane %v402_v33, 4  ;;  %v435_v44 = vrot.slane %v433_v34, 4  ;;  %v441_v45 = vrot.slane %v439_v35, 5  ;;  %v422_v46 = vrot.slane %v420_v36, 4  ;;  %v277_v35 = vld [vmem:[%s4702_s17 + $0x74] sm:$0x1] }
  0x26   : > { %695 = vrot.lane.b32.xlu0 %v384_v38, %s4660_s18  ;;  %v418_v48 = vsel %vm4713_vm2, %v413_v39, %v417_v24  ;;  %v425_v49 = vrot.slane %v423_v40, 5  ;;  %v455_v50 = vrot.slane %v453_v41, 5  ;;  %v457_v51 = vshrl.u32 %v267_v28, 16  ;;  %v275_v36 = vld [vmem:[%s4702_s17 + $0x6c] sm:$0xf] }
  0x27   : > { %v408_v52 = vsel %vm4713_vm2, %v403_v43, %v407_v11  ;;  %v436_v53 = vor.u32 %v435_v44, %v431_v32  ;;  %v463_v54 = vshll.u32 %v268_v37, 16  ;;  %v444_v55 = vshrl.u32 %v266_v42, 16 }
  0x28   : > { %v426_v57 = vor.u32 %v425_v49, %v422_v46  ;;  %v459_v58 = vrot.slane %v457_v51, 4  ;;  %v447_v59 = vshll.u32 %v266_v42, 16  ;;  %v477_v60 = vshll.u32 %v270_v47, 16 }
  0x29   : > { %701 = vrot.lane.b32.xlu1 %v418_v48, %s4660_s18  ;;  %v437_v62 = vrot.slane %v436_v53, 4  ;;  %v465_v63 = vrot.slane %v463_v54, 5  ;;  %v446_v0 = vrot.slane %v444_v55, 4  ;;  %v481_v1 = vshrl.u32 %v270_v47, 16  ;;  %v280_v54 = vld [vmem:[%s4702_s17 + $0x80] sm:$0x1] }
  0x2a   : > { %699 = vrot.lane.b32.xlu0 %v408_v52, %s4660_s18  ;;  %v427_v2 = vrot.slane %v426_v57, 4  ;;  %v460_v3 = vor.u32 %v459_v58, %v455_v50  ;;  %v449_v4 = vrot.slane %v447_v59, 5  ;;  %v479_v5 = vrot.slane %v477_v60, 5  ;;  %v278_v55 = vld [vmem:[%s4702_s17 + $0x78] sm:$0xf] }
  0x2b   : > { %v442_v7 = vsel %vm4713_vm2, %v437_v62, %v441_v45  ;;  %v483_v8 = vrot.slane %v481_v1, 4  ;;  %v487_v9 = vshll.u32 %v271_v56, 16  ;;  %v468_v10 = vshrl.u32 %v269_v61, 16  ;;  %v279_v45 = vld [vmem:[%s4702_s17 + $0x7c] sm:$0xf] }
  0x2c   : > { %v432_v11 = vsel %vm4713_vm2, %v427_v2, %v431_v32  ;;  %v461_v12 = vrot.slane %v460_v3, 4  ;;  %v450_v13 = vor.u32 %v449_v4, %v446_v0  ;;  %v471_v14 = vshll.u32 %v269_v61, 16  ;;  %v282_v0 = vld [vmem:[%s4702_s17 + $0x88] sm:$0xf] }
  0x2d   : > { %705 = vrot.lane.b32.xlu1 %v442_v7, %s4660_s18  ;;  %v484_v17 = vor.u32 %v483_v8, %v479_v5  ;;  %v489_v18 = vrot.slane %v487_v9, 5  ;;  %v470_v19 = vrot.slane %v468_v10, 4  ;;  %v501_v20 = vshll.u32 %v273_v6, 16  ;;  %v281_v10 = vld [vmem:[%s4702_s17 + $0x84] sm:$0xf] }
  0x2e   : > { %703 = vrot.lane.b32.xlu0 %v432_v11, %s4660_s18  ;;  %v466_v21 = vsel %vm4713_vm2, %v461_v12, %v465_v63  ;;  %v451_v22 = vrot.slane %v450_v13, 4  ;;  %v473_v23 = vrot.slane %v471_v14, 5  ;;  %v505_v24 = vshrl.u32 %v273_v6, 16 }
  0x2f   : > { %v485_v26 = vrot.slane %v484_v17, 4  ;;  %v503_v28 = vrot.slane %v501_v20, 5  ;;  %v511_v29 = vshll.u32 %v274_v15, 16  ;;  %v492_v30 = vshrl.u32 %v272_v16, 16 }
  0x30   : > { %v456_v31 = vsel %vm4713_vm2, %v451_v22, %v455_v50  ;;  %v474_v32 = vor.u32 %v473_v23, %v470_v19  ;;  %v507_v33 = vrot.slane %v505_v24, 4  ;;  %v495_v34 = vshll.u32 %v272_v16, 16  ;;  %v285_v19 = vld [vmem:[%s4702_s17 + $0x94] sm:$0xf]  ;;  %v286_v24 = vld [vmem:[%s4702_s17 + $0x98] sm:$0x1] }
  0x31   : > { %709 = vrot.lane.b32.xlu1 %v466_v21, %s4660_s18  ;;  %v490_v37 = vsel %vm4713_vm2, %v485_v26, %v489_v18  ;;  %v513_v38 = vrot.slane %v511_v29, 5  ;;  %v494_v39 = vrot.slane %v492_v30, 4  ;;  %v525_v40 = vshll.u32 %v276_v25, 16  ;;  %v284_v30 = vld [vmem:[%s4702_s17 + $0x90] sm:$0xf] }
  0x32   : > { %707 = vrot.lane.b32.xlu0 %v456_v31, %s4660_s18  ;;  %v475_v41 = vrot.slane %v474_v32, 4  ;;  %v508_v42 = vor.u32 %v507_v33, %v503_v28  ;;  %v497_v43 = vrot.slane %v495_v34, 5  ;;  %v529_v44 = vshrl.u32 %v276_v25, 16 }
  0x33   : > { %v527_v46 = vrot.slane %v525_v40, 5  ;;  %v535_v47 = vshll.u32 %v277_v35, 16  ;;  %v516_v48 = vshrl.u32 %v275_v36, 16  ;;  %v519_v49 = vshll.u32 %v275_v36, 16 }
  0x34   : > { %v480_v50 = vsel %vm4713_vm2, %v475_v41, %v479_v5  ;;  %v509_v51 = vrot.slane %v508_v42, 4  ;;  %v498_v52 = vor.u32 %v497_v43, %v494_v39  ;;  %v531_v53 = vrot.slane %v529_v44, 4  ;;  %v283_v5 = vld [vmem:[%s4702_s17 + $0x8c] sm:$0x1]  ;;  %v288_v39 = vld [vmem:[%s4702_s17 + $0xa0] sm:$0xf] }
  0x35   : > { %713 = vrot.lane.b32.xlu1 %v490_v37, %s4660_s18  ;;  %v537_v56 = vrot.slane %v535_v47, 5  ;;  %v518_v57 = vrot.slane %v516_v48, 4  ;;  %v521_v58 = vrot.slane %v519_v49, 5  ;;  %v549_v59 = vshll.u32 %v279_v45, 16  ;;  %v289_v48 = vld [vmem:[%s4702_s17 + $0xa4] sm:$0x1] }
  0x36   : > { %711 = vrot.lane.b32.xlu0 %v480_v50, %s4660_s18  ;;  %v514_v60 = vsel %vm4713_vm2, %v509_v51, %v513_v38  ;;  %v499_v61 = vrot.slane %v498_v52, 4  ;;  %v532_v62 = vor.u32 %v531_v53, %v527_v46  ;;  %v553_v63 = vshrl.u32 %v279_v45, 16  ;;  %v287_v49 = vld [vmem:[%s4702_s17 + $0x9c] sm:$0xf] }
  0x37   : > { %v522_v1 = vor.u32 %v521_v58, %v518_v57  ;;  %v551_v2 = vrot.slane %v549_v59, 5  ;;  %v559_v3 = vshll.u32 %v280_v54, 16  ;;  %v540_v4 = vshrl.u32 %v278_v55, 16  ;;  %v291_v58 = vld [vmem:[%s4702_s17 + $0xac] sm:$0xf] }
  0x38   : > { %v504_v6 = vsel %vm4713_vm2, %v499_v61, %v503_v28  ;;  %v533_v7 = vrot.slane %v532_v62, 4  ;;  %v555_v8 = vrot.slane %v553_v63, 4  ;;  %v543_v9 = vshll.u32 %v278_v55, 16 }
  0x39   : > { %717 = vrot.lane.b32.xlu1 %v514_v60, %s4660_s18  ;;  %v523_v11 = vrot.slane %v522_v1, 4  ;;  %v561_v12 = vrot.slane %v559_v3, 5  ;;  %v542_v13 = vrot.slane %v540_v4, 4  ;;  %v573_v14 = vshll.u32 %v282_v0, 16  ;;  %v292_v3 = vld [vmem:[%s4702_s17 + $0xb0] sm:$0x1] }
  0x3a   : > { %715 = vrot.lane.b32.xlu0 %v504_v6, %s4660_s18  ;;  %v538_v15 = vsel %vm4713_vm2, %v533_v7, %v537_v56  ;;  %v556_v16 = vor.u32 %v555_v8, %v551_v2  ;;  %v545_v17 = vrot.slane %v543_v9, 5  ;;  %v577_v18 = vshrl.u32 %v282_v0, 16  ;;  %v290_v4 = vld [vmem:[%s4702_s17 + $0xa8] sm:$0xf] }
  0x3b   : > { %v528_v20 = vsel %vm4713_vm2, %v523_v11, %v527_v46  ;;  %v575_v21 = vrot.slane %v573_v14, 5  ;;  %v583_v22 = vshll.u32 %v283_v5, 16  ;;  %v564_v23 = vshrl.u32 %v281_v10, 16 }
  0x3c   : > { %v557_v25 = vrot.slane %v556_v16, 4  ;;  %v546_v26 = vor.u32 %v545_v17, %v542_v13  ;;  %v579_v28 = vrot.slane %v577_v18, 4  ;;  %v567_v29 = vshll.u32 %v281_v10, 16  ;;  %v294_v13 = vld [vmem:[%s4702_s17 + $0xb8] sm:$0xf] }
  0x3d   : > { %721 = vrot.lane.b32.xlu1 %v538_v15, %s4660_s18  ;;  %v585_v31 = vrot.slane %v583_v22, 5  ;;  %v566_v32 = vrot.slane %v564_v23, 4  ;;  %v597_v33 = vshll.u32 %v285_v19, 16  ;;  %v601_v34 = vshrl.u32 %v285_v19, 16  ;;  %v295_v22 = vld [vmem:[%s4702_s17 + $0xbc] sm:$0x1] }
  0x3e   : > { %719 = vrot.lane.b32.xlu0 %v528_v20, %s4660_s18  ;;  %v562_v35 = vsel %vm4713_vm2, %v557_v25, %v561_v12  ;;  %v547_v36 = vrot.slane %v546_v26, 4  ;;  %v580_v37 = vor.u32 %v579_v28, %v575_v21  ;;  %v569_v38 = vrot.slane %v567_v29, 5  ;;  %v293_v23 = vld [vmem:[%s4702_s17 + $0xb4] sm:$0xf] }
  0x3f   : > { %v599_v40 = vrot.slane %v597_v33, 5  ;;  %v603_v41 = vrot.slane %v601_v34, 4  ;;  %v607_v42 = vshll.u32 %v286_v24, 16  ;;  %v588_v43 = vshrl.u32 %v284_v30, 16  ;;  %v813_v33 = vld [vmem:[%s4702_s17 + $0x4] sm:$0xf] }
  0x40   : > { %v552_v44 = vsel %vm4713_vm2, %v547_v36, %v551_v2  ;;  %v581_v45 = vrot.slane %v580_v37, 4  ;;  %v570_v46 = vor.u32 %v569_v38, %v566_v32  ;;  %v591_v47 = vshll.u32 %v284_v30, 16 }
  0x41   : > { %725 = vrot.lane.b32.xlu1 %v562_v35, %s4660_s18  ;;  %v604_v50 = vor.u32 %v603_v41, %v599_v40  ;;  %v609_v51 = vrot.slane %v607_v42, 5  ;;  %v590_v52 = vrot.slane %v588_v43, 4  ;;  %v621_v53 = vshll.u32 %v288_v39, 16 }
  0x42   : > { %723 = vrot.lane.b32.xlu0 %v552_v44, %s4660_s18  ;;  %v586_v54 = vsel %vm4713_vm2, %v581_v45, %v585_v31  ;;  %v571_v55 = vrot.slane %v570_v46, 4  ;;  %v593_v56 = vrot.slane %v591_v47, 5  ;;  %v625_v57 = vshrl.u32 %v288_v39, 16 }
  0x43   : > { %v605_v59 = vrot.slane %v604_v50, 4  ;;  %v623_v60 = vrot.slane %v621_v53, 5  ;;  %v631_v61 = vshll.u32 %v289_v48, 16  ;;  %v612_v62 = vshrl.u32 %v287_v49, 16  ;;  %v185_v50 = vld [vmem:[%s4702_s17 + $0xc] sm:$0xf] }
  0x44   : > { %v576_v63 = vsel %vm4713_vm2, %v571_v55, %v575_v21  ;;  %v594_v0 = vor.u32 %v593_v56, %v590_v52  ;;  %v627_v1 = vrot.slane %v625_v57, 4  ;;  %v615_v2 = vshll.u32 %v287_v49, 16  ;;  %v814_v49 = vld [vmem:[%s4702_s17 + $0x8] sm:$0x1]  ;;  %v816_v52 = vld [vmem:[%s4702_s17 + $0x10] sm:$0xf] }
  0x45   : > { %729 = vrot.lane.b32.xlu1 %v586_v54, %s4660_s18  ;;  %v610_v5 = vsel %vm4713_vm2, %v605_v59, %v609_v51  ;;  %v633_v6 = vrot.slane %v631_v61, 5  ;;  %v614_v7 = vrot.slane %v612_v62, 4  ;;  %v645_v8 = vshll.u32 %v291_v58, 16  ;;  %218 = vst.msk [vmem:[#allocation2 + $0x8] sm:$0xf] %vm215_vm3, %v185_v50 }
  0x46   : > { %727 = vrot.lane.b32.xlu0 %v576_v63, %s4660_s18  ;;  %v595_v9 = vrot.slane %v594_v0, 4  ;;  %v628_v10 = vor.u32 %v627_v1, %v623_v60  ;;  %v617_v11 = vrot.slane %v615_v2, 5  ;;  %v649_v12 = vshrl.u32 %v291_v58, 16  ;;  %v183_v53 = vld [vmem:[%s4702_s17] sm:$0xf] }
  0x47   : > { %v647_v14 = vrot.slane %v645_v8, 5  ;;  %v655_v15 = vshll.u32 %v292_v3, 16  ;;  %v636_v16 = vshrl.u32 %v290_v4, 16  ;;  %v639_v17 = vshll.u32 %v290_v4, 16  ;;  %v812_v56 = vld [vmem:[%s4702_s17] sm:$0xe] }
  0x48   : > { %v600_v18 = vsel %vm4713_vm2, %v595_v9, %v599_v40  ;;  %v629_v19 = vrot.slane %v628_v10, 4  ;;  %v618_v20 = vor.u32 %v617_v11, %v614_v7  ;;  %v651_v21 = vrot.slane %v649_v12, 4  ;;  %216 = vst.msk [vmem:[#allocation2] sm:$0xf] %vm215_vm3, %v183_v53  ;;  %v186_v62 = vld [vmem:[%s4702_s17 + $0x10] sm:$0xf] }
  0x49   : > { %733 = vrot.lane.b32.xlu1 %v610_v5, %s4660_s18  ;;  %v657_v24 = vrot.slane %v655_v15, 5  ;;  %v638_v25 = vrot.slane %v636_v16, 4  ;;  %v641_v26 = vrot.slane %v639_v17, 5  ;;  %v669_v28 = vshll.u32 %v294_v13, 16  ;;  %v184_v63 = vld [vmem:[%s4702_s17 + $0x4] sm:$0xf] }
  0x4a   : > { %731 = vrot.lane.b32.xlu0 %v600_v18, %s4660_s18  ;;  %v634_v29 = vsel %vm4713_vm2, %v629_v19, %v633_v6  ;;  %v619_v30 = vrot.slane %v618_v20, 4  ;;  %v652_v31 = vor.u32 %v651_v21, %v647_v14  ;;  %v673_v32 = vshrl.u32 %v294_v13, 16  ;;  %v817_v2 = vld [vmem:[%s4702_s17 + $0x14] sm:$0x1]  ;;  %v819_v3 = vld [vmem:[%s4702_s17 + $0x1c] sm:$0xf] }
  0x4b   : > { %v642_v34 = vor.u32 %v641_v26, %v638_v25  ;;  %v671_v35 = vrot.slane %v669_v28, 5  ;;  %v679_v36 = vshll.u32 %v295_v22, 16  ;;  %v660_v37 = vshrl.u32 %v293_v23, 16  ;;  %219 = vst.msk [vmem:[#allocation2 + $0xc] sm:$0xf] %vm215_vm3, %v186_v62 }
  0x4c   : > { %v624_v38 = vsel %vm4713_vm2, %v619_v30, %v623_v60  ;;  %v653_v39 = vrot.slane %v652_v31, 4  ;;  %v675_v40 = vrot.slane %v673_v32, 4  ;;  %v663_v41 = vshll.u32 %v293_v23, 16  ;;  %217 = vst.msk [vmem:[#allocation2 + $0x4] sm:$0xf] %vm215_vm3, %v184_v63 }
  0x4d   : > { %737 = vrot.lane.b32.xlu1 %v634_v29, %s4660_s18  ;;  %v643_v42 = vrot.slane %v642_v34, 4  ;;  %v662_v43 = vrot.slane %v660_v37, 4  ;;  %v913_v44 = vrot.slane %v813_v33, 5  ;;  %v681_v47 = vrot.slane %v679_v36, 5  ;;  %v815_v5 = vld [vmem:[%s4702_s17 + $0xc] sm:$0xe] }
  0x4e   : > { %735 = vrot.lane.b32.xlu0 %v624_v38, %s4660_s18  ;;  %v658_v45 = vsel %vm4713_vm2, %v653_v39, %v657_v24  ;;  %v676_v46 = vor.u32 %v675_v40, %v671_v35  ;;  %v665_v48 = vrot.slane %v663_v41, 5  ;;  %v916_v58 = vrot.slane %v814_v49, 5  ;;  %v188_v6 = vld [vmem:[%s4702_s17 + $0x1c] sm:$0xf]  ;;  %v187_v11 = vld [vmem:[%s4702_s17 + $0x18] sm:$0xf] }
  0x4f   : > { %v648_v51 = vsel %vm4713_vm2, %v643_v42, %v647_v14  ;;  %v915_v57 = vrot.slane %v913_v44, 4  ;;  %v920_v61 = vrot.slane %v816_v52, 5  ;;  %v4145_v1 = vrot.slane %v812_v56, 9  ;;  %221 = vst.msk [vmem:[#allocation2 + $0x14] sm:$0xf] %vm215_vm3, %v188_v6 }
  0x50   : > { %v677_v54 = vrot.slane %v676_v46, 4  ;;  %v666_v55 = vor.u32 %v665_v48, %v662_v43  ;;  %v923_v9 = vrot.slane %v817_v2, 5  ;;  %v927_v10 = vrot.slane %v819_v3, 5  ;;  %v820_v14 = vld [vmem:[%s4702_s17 + $0x20] sm:$0x1] }
  0x51   : > { %741 = vrot.lane.b32.xlu1 %v658_v45, %s4660_s18  ;;  %v917_v7 = vsel %vm4860_vm6, %v915_v57, %v916_v58  ;;  %v922_v8 = vrot.slane %v920_v61, 4  ;;  %v914_v12 = vsel %vm4860_vm6, %v4145_v1, %v913_v44  ;;  %v4146_v13 = vrot.slane %v815_v5, 9  ;;  %v822_v15 = vld [vmem:[%s4702_s17 + $0x28] sm:$0xf]  ;;  %220 = vst.msk [vmem:[#allocation2 + $0x10] sm:$0xf] %vm215_vm3, %v187_v11 }
  0x52   : > { %739 = vrot.lane.b32.xlu0 %v648_v51, %s4660_s18  ;;  %v682_v59 = vsel %vm4713_vm2, %v677_v54, %v681_v47  ;;  %v667_v60 = vrot.slane %v666_v55, 4  ;;  %v818_v16 = vld [vmem:[%s4702_s17 + $0x18] sm:$0xe]  ;;  %v825_v17 = vld [vmem:[%s4702_s17 + $0x34] sm:$0xf]  ;;  %v929_v20 = vrot.slane %v927_v10, 4 }
  0x53   : > { %v190_v18 = vld [vmem:[%s4702_s17 + $0x28] sm:$0xf]  ;;  %v924_v19 = vsel %vm4860_vm6, %v922_v8, %v923_v9  ;;  %v930_v21 = vrot.slane %v820_v14, 5  ;;  %v934_v22 = vrot.slane %v822_v15, 5  ;;  %v189_v23 = vld [vmem:[%s4702_s17 + $0x24] sm:$0xf]  ;;  %v921_v24 = vsel %vm4860_vm6, %v4146_v13, %v920_v61 }
  0x54   : > { %v672_v4 = vsel %vm4713_vm2, %v667_v60, %v671_v35  ;;  %223 = vst.msk [vmem:[#allocation2 + $0x1c] sm:$0xf] %vm215_vm3, %v190_v18  ;;  %v4147_v25 = vrot.slane %v818_v16, 9  ;;  %v823_v26 = vld [vmem:[%s4702_s17 + $0x2c] sm:$0x1]  ;;  %v941_v30 = vrot.slane %v825_v17, 5 }
  0x55   : > { %745 = vrot.lane.b32.xlu1 %v682_v59, %s4660_s18  ;;  %222 = vst.msk [vmem:[#allocation2 + $0x18] sm:$0xf] %vm215_vm3, %v189_v23  ;;  %v821_v28 = vld [vmem:[%s4702_s17 + $0x24] sm:$0xe]  ;;  %v826_v29 = vld [vmem:[%s4702_s17 + $0x38] sm:$0x1]  ;;  %v931_v31 = vsel %vm4860_vm6, %v929_v20, %v930_v21 }
  0x56   : > { %743 = vrot.lane.b32.xlu0 %v672_v4, %s4660_s18  ;;  %v936_v32 = vrot.slane %v934_v22, 4  ;;  %v937_v33 = vrot.slane %v823_v26, 5  ;;  %v824_v34 = vld [vmem:[%s4702_s17 + $0x30] sm:$0xe]  ;;  %v192_v35 = vld [vmem:[%s4702_s17 + $0x34] sm:$0xf]  ;;  %v928_v36 = vsel %vm4860_vm6, %v4147_v25, %v927_v10 }
  0x57   : > { %v4148_v37 = vrot.slane %v821_v28, 9  ;;  %v4194_v38 = vld [vmem:[%s4702_s17 + $0x10] sm:$0xf]  ;;  %225 = vst.msk [vmem:[#allocation2 + $0x24] sm:$0xf] %vm215_vm3, %v192_v35  ;;  %v943_v42 = vrot.slane %v941_v30, 4 }
  0x58   : > { %v191_v39 = vld [vmem:[%s4702_s17 + $0x30] sm:$0xf]  ;;  %v4193_v40 = vld [vmem:[%s4702_s17 + $0xc] sm:$0xf]  ;;  %v194_v41 = vld [vmem:[%s4702_s17 + $0x40] sm:$0xf]  ;;  %v938_v46 = vsel %vm4860_vm6, %v936_v32, %v937_v33 }
  0x59   : > { %1025 = vrot.lane.b32.xlu1 %v917_v7, %s4661_s19  ;;  %224 = vst.msk [vmem:[#allocation2 + $0x20] sm:$0xf] %vm215_vm3, %v191_v39  ;;  %v944_v43 = vrot.slane %v826_v29, 5  ;;  %v4149_v44 = vrot.slane %v824_v34, 9  ;;  %227 = vst.msk [vmem:[#allocation2 + $0x2c] sm:$0xf] %vm215_vm3, %v194_v41  ;;  %v935_v50 = vsel %vm4860_vm6, %v4148_v37, %v934_v22 }
  0x5a   : > { %1023 = vrot.lane.b32.xlu0 %v914_v12, %s4661_s19  ;;  %v193_v45 = vld [vmem:[%s4702_s17 + $0x3c] sm:$0xf]  ;;  %v1404_v47 = vshll.u32 %v4194_v38, 16  ;;  %v1408_v48 = vshrl.u32 %v4194_v38, 16  ;;  %v1395_v51 = vshrl.u32 %v4193_v40, 16  ;;  %v1398_v52 = vshll.u32 %v4193_v40, 16 }
  0x5b   : > { %v4197_v49 = vld [vmem:[%s4702_s17 + $0x1c] sm:$0xf]  ;;  %226 = vst.msk [vmem:[#allocation2 + $0x28] sm:$0xf] %vm215_vm3, %v193_v45  ;;  %v196_v53 = vld [vmem:[%s4702_s17 + $0x4c] sm:$0xf]  ;;  %v945_v56 = vsel %vm4860_vm6, %v943_v42, %v944_v43  ;;  %v942_v57 = vsel %vm4860_vm6, %v4149_v44, %v941_v30 }
  0x5c   : > { %v195_v54 = vld [vmem:[%s4702_s17 + $0x48] sm:$0xf]  ;;  %v4196_v55 = vld [vmem:[%s4702_s17 + $0x18] sm:$0xf]  ;;  %229 = vst.msk [vmem:[#allocation2 + $0x34] sm:$0xf] %vm215_vm3, %v196_v53 }
  0x5d   : > { %1029 = vrot.lane.b32.xlu1 %v924_v19, %s4661_s19  ;;  %228 = vst.msk [vmem:[#allocation2 + $0x30] sm:$0xf] %vm215_vm3, %v195_v54  ;;  %v4195_v58 = vld [vmem:[%s4702_s17 + $0x14] sm:$0x1]  ;;  %v4934_v59 = vrot.slane %v1404_v47, 5  ;;  %v1410_v60 = vrot.slane %v1408_v48, 4 }
  0x5e   : > { %1027 = vrot.lane.b32.xlu0 %v921_v24, %s4661_s19  ;;  %v1428_v61 = vshll.u32 %v4197_v49, 16  ;;  %v1432_v62 = vshrl.u32 %v4197_v49, 16  ;;  %v1397_v63 = vrot.slane %v1395_v51, 4  ;;  %v1400_v1 = vrot.slane %v1398_v52, 5  ;;  %v198_v4 = vld [vmem:[%s4702_s17 + $0x58] sm:$0xf] }
  0x5f   : > { %v1419_v2 = vshrl.u32 %v4196_v55, 16  ;;  %v1422_v3 = vshll.u32 %v4196_v55, 16  ;;  %231 = vst.msk [vmem:[#allocation2 + $0x3c] sm:$0xf] %vm215_vm3, %v198_v4  ;;  %v197_v5 = vld [vmem:[%s4702_s17 + $0x54] sm:$0xf]  ;;  %v1411_v8 = vor.u32 %v1410_v60, %v4934_v59 }
  0x60   : > { %v4162_v6 = vld [vmem:[%s4702_s17 + $0x10] sm:$0xf]  ;;  %v4161_v7 = vld [vmem:[%s4702_s17 + $0xc] sm:$0xf]  ;;  %230 = vst.msk [vmem:[#allocation2 + $0x38] sm:$0xf] %vm215_vm3, %v197_v5  ;;  %v1401_v13 = vor.u32 %v1400_v1, %v1397_v63 }
  0x61   : > { %1033 = vrot.lane.b32.xlu1 %v931_v31, %s4661_s19  ;;  %v1414_v9 = vshll.u32 %v4195_v58, 16  ;;  %v4945_v10 = vrot.slane %v1428_v61, 5  ;;  %v1434_v11 = vrot.slane %v1432_v62, 4  ;;  %v200_v12 = vld [vmem:[%s4702_s17 + $0x64] sm:$0xf]  ;;  %v1421_v15 = vrot.slane %v1419_v2, 4 }
  0x62   : > { %1031 = vrot.lane.b32.xlu0 %v928_v36, %s4661_s19  ;;  %v4198_v14 = vld [vmem:[%s4702_s17 + $0x20] sm:$0x1]  ;;  %v1424_v16 = vrot.slane %v1422_v3, 5  ;;  %233 = vst.msk [vmem:[#allocation2 + $0x44] sm:$0xf] %vm215_vm3, %v200_v12  ;;  %v1412_v20 = vrot.slane %v1411_v8, 4 }
  0x63   : > { %v199_v17 = vld [vmem:[%s4702_s17 + $0x60] sm:$0xf]  ;;  %v4164_v18 = vld [vmem:[%s4702_s17 + $0x1c] sm:$0xf]  ;;  %v4163_v19 = vld [vmem:[%s4702_s17 + $0x18] sm:$0xf]  ;;  %v1435_v22 = vor.u32 %v1434_v11, %v4945_v10 }
  0x64   : > { %232 = vst.msk [vmem:[#allocation2 + $0x40] sm:$0xf] %vm215_vm3, %v199_v17  ;;  %v1416_v21 = vrot.slane %v1414_v9, 5  ;;  %v1438_v23 = vshll.u32 %v4198_v14, 16  ;;  %v202_v24 = vld [vmem:[%s4702_s17 + $0x70] sm:$0xf]  ;;  %v1425_v26 = vor.u32 %v1424_v16, %v1421_v15 }
  0x65   : > { %1037 = vrot.lane.b32.xlu1 %v938_v46, %s4661_s19  ;;  %v1402_v25 = vrot.slane %v1401_v13, 4  ;;  %v4242_v28 = vld [vmem:[%s4702_s17 + $0x10] sm:$0xf]  ;;  %235 = vst.msk [vmem:[#allocation2 + $0x4c] sm:$0xf] %vm215_vm3, %v202_v24  ;;  %v1436_v32 = vrot.slane %v1435_v22, 4 }
  0x66   : > { %1035 = vrot.lane.b32.xlu0 %v935_v50, %s4661_s19  ;;  %v201_v29 = vld [vmem:[%s4702_s17 + $0x6c] sm:$0xf]  ;;  %v4243_v30 = vld [vmem:[%s4702_s17 + $0x14] sm:$0x1]  ;;  %v1417_v31 = vsel %vm4713_vm2, %v1412_v20, %v1416_v21  ;;  %v1440_v33 = vrot.slane %v1438_v23, 5  ;;  %v2005_v34 = vrot.slane %v4242_v28, 5 }
  0x67   : > { %234 = vst.msk [vmem:[#allocation2 + $0x48] sm:$0xf] %vm215_vm3, %v201_v29  ;;  %v4245_v35 = vld [vmem:[%s4702_s17 + $0x1c] sm:$0xf]  ;;  %v1407_v36 = vsel %vm4713_vm2, %v1402_v25, %v4934_v59  ;;  %v1426_v37 = vrot.slane %v1425_v26, 4  ;;  %v2008_v46 = vrot.slane %v4243_v30, 5 }
  0x68   : > { %v204_v38 = vld [vmem:[%s4702_s17 + $0x7c] sm:$0xf]  ;;  %v203_v39 = vld [vmem:[%s4702_s17 + $0x78] sm:$0xf]  ;;  %v4241_v40 = vld [vmem:[%s4702_s17 + $0xc] sm:$0xe]  ;;  %v1441_v44 = vsel %vm4713_vm2, %v1436_v32, %v1440_v33 }
  0x69   : > { %1041 = vrot.lane.b32.xlu1 %v945_v56, %s4661_s19  ;;  %237 = vst.msk [vmem:[#allocation2 + $0x54] sm:$0xf] %vm215_vm3, %v204_v38  ;;  %236 = vst.msk [vmem:[#allocation2 + $0x50] sm:$0xf] %vm215_vm3, %v203_v39  ;;  %v4246_v41 = vld [vmem:[%s4702_s17 + $0x20] sm:$0x1]  ;;  %v1431_v49 = vsel %vm4713_vm2, %v1426_v37, %v4945_v10 }
  0x6a   : > { %1039 = vrot.lane.b32.xlu0 %v942_v57, %s4661_s19  ;;  %v2012_v42 = vrot.slane %v4245_v35, 5  ;;  %v4244_v43 = vld [vmem:[%s4702_s17 + $0x18] sm:$0xe]  ;;  %v2007_v45 = vrot.slane %v2005_v34, 4  ;;  %v206_v47 = vld [vmem:[%s4702_s17 + $0x88] sm:$0xf] }
  0x6b   : > { %v205_v48 = vld [vmem:[%s4702_s17 + $0x84] sm:$0xf]  ;;  %v4289_v50 = vrot.slane %v4241_v40, 9  ;;  %v4338_v51 = vld [vmem:[%s4702_s17 + $0x1c] sm:$0xf]  ;;  %v2015_v56 = vrot.slane %v4246_v41, 5 }
  0x6c   : > { %239 = vst.msk [vmem:[#allocation2 + $0x5c] sm:$0xf] %vm215_vm3, %v206_v47  ;;  %238 = vst.msk [vmem:[#allocation2 + $0x58] sm:$0xf] %vm215_vm3, %v205_v48  ;;  %v4337_v52 = vld [vmem:[%s4702_s17 + $0x18] sm:$0xf]  ;;  %v2009_v58 = vsel %vm4860_vm6, %v2007_v45, %v2008_v46 }
  0x6d   : > { %1219 = vrot.lane.b32.xlu1 %v4162_v6, %s4662_s20  ;;  %v208_v53 = vld [vmem:[%s4702_s17 + $0x94] sm:$0xf]  ;;  %v207_v54 = vld [vmem:[%s4702_s17 + $0x90] sm:$0xf]  ;;  %v2014_v55 = vrot.slane %v2012_v42, 4  ;;  %v4290_v57 = vrot.slane %v4244_v43, 9  ;;  %v2006_v62 = vsel %vm4860_vm6, %v4289_v50, %v2005_v34 }
  0x6e   : > { %1217 = vrot.lane.b32.xlu0 %v4161_v7, %s4662_s20  ;;  %241 = vst.msk [vmem:[#allocation2 + $0x64] sm:$0xf] %vm215_vm3, %v208_v53  ;;  %240 = vst.msk [vmem:[#allocation2 + $0x60] sm:$0xf] %vm215_vm3, %v207_v54  ;;  %v2496_v59 = vshll.u32 %v4338_v51, 16  ;;  %v2500_v60 = vshrl.u32 %v4338_v51, 16 }
  0x6f   : > { %v210_v61 = vld [vmem:[%s4702_s17 + $0xa0] sm:$0xf]  ;;  %v2487_v63 = vshrl.u32 %v4337_v52, 16  ;;  %v2490_v1 = vshll.u32 %v4337_v52, 16  ;;  %v4341_v2 = vld [vmem:[%s4702_s17 + $0x28] sm:$0xf]  ;;  %v2016_v5 = vsel %vm4860_vm6, %v2014_v55, %v2015_v56  ;;  %v2013_v6 = vsel %vm4860_vm6, %v4290_v57, %v2012_v42 }
  0x70   : > { %243 = vst.msk [vmem:[#allocation2 + $0x6c] sm:$0xf] %vm215_vm3, %v210_v61  ;;  %v209_v3 = vld [vmem:[%s4702_s17 + $0x9c] sm:$0xf]  ;;  %v4340_v4 = vld [vmem:[%s4702_s17 + $0x24] sm:$0xf] }
  0x71   : > { %1223 = vrot.lane.b32.xlu1 %v4164_v18, %s4662_s20  ;;  %242 = vst.msk [vmem:[#allocation2 + $0x68] sm:$0xf] %vm215_vm3, %v209_v3  ;;  %v212_v7 = vld [vmem:[%s4702_s17 + $0xac] sm:$0xf]  ;;  %v2498_v8 = vrot.slane %v2496_v59, 5  ;;  %v2502_v9 = vrot.slane %v2500_v60, 4 }
  0x72   : > { %1221 = vrot.lane.b32.xlu0 %v4163_v19, %s4662_s20  ;;  %v2520_v10 = vshll.u32 %v4341_v2, 16  ;;  %v2524_v11 = vshrl.u32 %v4341_v2, 16  ;;  %245 = vst.msk [vmem:[#allocation2 + $0x74] sm:$0xf] %vm215_vm3, %v212_v7  ;;  %v211_v12 = vld [vmem:[%s4702_s17 + $0xa8] sm:$0xf] }
  0x73   : > { %v4339_v13 = vld [vmem:[%s4702_s17 + $0x20] sm:$0x1]  ;;  %v2489_v14 = vrot.slane %v2487_v63, 4  ;;  %v2492_v15 = vrot.slane %v2490_v1, 5  ;;  %v2511_v16 = vshrl.u32 %v4340_v4, 16  ;;  %v2514_v17 = vshll.u32 %v4340_v4, 16 }
  0x74   : > { %244 = vst.msk [vmem:[#allocation2 + $0x70] sm:$0xf] %vm215_vm3, %v211_v12  ;;  %v4306_v18 = vld [vmem:[%s4702_s17 + $0x1c] sm:$0xf]  ;;  %v214_v19 = vld [vmem:[%s4702_s17 + $0xb8] sm:$0xf]  ;;  %v2503_v20 = vor.u32 %v2502_v9, %v2498_v8 }
  0x75   : > { %1780 = vrot.lane.b32.xlu1 %v1417_v31, %s4663_s21  ;;  %v2506_v21 = vshll.u32 %v4339_v13, 16  ;;  %v2522_v22 = vrot.slane %v2520_v10, 5  ;;  %v2526_v23 = vrot.slane %v2524_v11, 4  ;;  %247 = vst.msk [vmem:[#allocation2 + $0x7c] sm:$0xf] %vm215_vm3, %v214_v19  ;;  %v2493_v26 = vor.u32 %v2492_v15, %v2489_v14 }
  0x76   : > { %1778 = vrot.lane.b32.xlu0 %v1407_v36, %s4663_s21  ;;  %v213_v24 = vld [vmem:[%s4702_s17 + $0xb4] sm:$0xf]  ;;  %v4305_v25 = vld [vmem:[%s4702_s17 + $0x18] sm:$0xf]  ;;  %v4342_v28 = vld [vmem:[%s4702_s17 + $0x2c] sm:$0x1] }
  0x77   : > { %v2513_v29 = vrot.slane %v2511_v16, 4  ;;  %v2516_v30 = vrot.slane %v2514_v17, 5  ;;  %246 = vst.msk [vmem:[#allocation2 + $0x78] sm:$0xf] %vm215_vm3, %v213_v24  ;;  %v4308_v31 = vld [vmem:[%s4702_s17 + $0x28] sm:$0xf]  ;;  %v2527_v34 = vor.u32 %v2526_v23, %v2522_v22 }
  0x78   : > { %v2504_v32 = vrot.slane %v2503_v20, 4  ;;  %v2508_v33 = vrot.slane %v2506_v21, 5  ;;  %v2530_v35 = vshll.u32 %v4342_v28, 16  ;;  %v4307_v36 = vld [vmem:[%s4702_s17 + $0x24] sm:$0xf]  ;;  %v2494_v37 = vrot.slane %v2493_v26, 4 }
  0x79   : > { %1784 = vrot.lane.b32.xlu1 %v1441_v44, %s4663_s21  ;;  %v2517_v38 = vor.u32 %v2516_v30, %v2513_v29  ;;  %v4386_v39 = vld [vmem:[%s4702_s17 + $0x1c] sm:$0xf]  ;;  %v2528_v41 = vrot.slane %v2527_v34, 4  ;;  %v4389_v44 = vld [vmem:[%s4702_s17 + $0x28] sm:$0xf]  ;;  %vm4017_vm1 = vcmask 60416  }
  0x7a   : > { %1782 = vrot.lane.b32.xlu0 %v1431_v49, %s4663_s21  ;;  %v2509_v40 = vsel %vm4713_vm2, %v2504_v32, %v2508_v33  ;;  %v2532_v42 = vrot.slane %v2530_v35, 5  ;;  %v3097_v43 = vrot.slane %v4386_v39, 5  ;;  %v2499_v46 = vsel %vm4713_vm2, %v2494_v37, %v2498_v8  ;;  %v4387_v48 = vld [vmem:[%s4702_s17 + $0x20] sm:$0x1]  ;;  %v4385_v50 = vld [vmem:[%s4702_s17 + $0x18] sm:$0xe] }
  0x7b   : > { %v2518_v47 = vrot.slane %v2517_v38, 4  ;;  %v3104_v51 = vrot.slane %v4389_v44, 5  ;;  %v3100_v54 = vrot.slane %v4387_v48, 5  ;;  %v4390_v55 = vld [vmem:[%s4702_s17 + $0x2c] sm:$0x1]  ;;  %v4433_v59 = vrot.slane %v4385_v50, 9 }
  0x7c   : > { %v2533_v52 = vsel %vm4713_vm2, %v2528_v41, %v2532_v42  ;;  %v3099_v53 = vrot.slane %v3097_v43, 4  ;;  %v4388_v56 = vld [vmem:[%s4702_s17 + $0x24] sm:$0xe]  ;;  %v4200_v60 = vld [vmem:[%s4702_s17 + $0x28] sm:$0xf]  ;;  %v3107_v1 = vrot.slane %v4390_v55, 5 }
  0x7d   : > { %2117 = vrot.lane.b32.xlu1 %v2009_v58, %s4664_s22  ;;  %v2523_v58 = vsel %vm4713_vm2, %v2518_v47, %v2522_v22  ;;  %v3106_v63 = vrot.slane %v3104_v51, 4  ;;  %v4434_v2 = vrot.slane %v4388_v56, 9  ;;  %v1452_v4 = vshll.u32 %v4200_v60, 16  ;;  %v4203_v10 = vld [vmem:[%s4702_s17 + $0x34] sm:$0xf]  ;;  %v4634_v56 = vld [vmem:[%s6476_s1 + $0x8] sm:$0xff]  }
  0x7e   : > { %2115 = vrot.lane.b32.xlu0 %v2006_v62, %s4664_s22  ;;  %v4199_v62 = vld [vmem:[%s4702_s17 + $0x24] sm:$0xf]  ;;  %v3101_v3 = vsel %vm4860_vm6, %v3099_v53, %v3100_v54  ;;  %v3098_v7 = vsel %vm4860_vm6, %v4433_v59, %v3097_v43  ;;  %v4202_v12 = vld [vmem:[%s4702_s17 + $0x30] sm:$0xf]  ;;  %v1476_v17 = vshll.u32 %v4203_v10, 16  ;;  %vm3886_vm3 = vcmask 57344  }
  0x7f   : > { %v1443_v8 = vshrl.u32 %v4199_v62, 16  ;;  %v1446_v9 = vshll.u32 %v4199_v62, 16  ;;  %v3108_v13 = vsel %vm4860_vm6, %v3106_v63, %v3107_v1  ;;  %v3105_v14 = vsel %vm4860_vm6, %v4434_v2, %v3104_v51  ;;  %v4201_v20 = vld [vmem:[%s4702_s17 + $0x2c] sm:$0x1]  ;;  %v4166_v26 = vld [vmem:[%s4702_s17 + $0x28] sm:$0xf] }
  0x80   : > { %v5071_v15 = vrot.slane %v1452_v4, 5  ;;  %v1467_v23 = vshrl.u32 %v4202_v12, 16  ;;  %v1470_v24 = vshll.u32 %v4202_v12, 16  ;;  %v1462_v29 = vshll.u32 %v4201_v20, 16  ;;  %v4204_v30 = vld [vmem:[%s4702_s17 + $0x38] sm:$0x1] }
  0x81   : > { %2121 = vrot.lane.b32.xlu1 %v2016_v5, %s4664_s22  ;;  %v1456_v5 = vshrl.u32 %v4200_v60, 16  ;;  %v1445_v21 = vrot.slane %v1443_v8, 4  ;;  %v1448_v22 = vrot.slane %v1446_v9, 5  ;;  %v4165_v34 = vld [vmem:[%s4702_s17 + $0x24] sm:$0xf]  ;;  %v1486_v39 = vshll.u32 %v4204_v30, 16 }
  0x82   : > { %2119 = vrot.lane.b32.xlu0 %v2013_v6, %s4664_s22  ;;  %v1472_v37 = vrot.slane %v1470_v24, 5  ;;  %v1464_v42 = vrot.slane %v1462_v29, 5  ;;  %v5091_v44 = vld [vmem:[%s4702_s17 + $0x28] sm:$0xf]  ;;  %v4249_v60 = vld [vmem:[%s4702_s17 + $0x2c] sm:$0x1] }
  0x83   : > { %v1458_v16 = vrot.slane %v1456_v5, 4  ;;  %v1449_v35 = vor.u32 %v1448_v22, %v1445_v21  ;;  %v1488_v50 = vrot.slane %v1486_v39, 5  ;;  %v2019_v51 = vrot.slane %v5091_v44, 5  ;;  %v4633_v55 = vld [vmem:[%s6476_s1 + $0x10] ss:$0 sps:$4 sm:$0x33]  }
  0x84   : > { %v4247_v62 = vld [vmem:[%s4702_s17 + $0x24] sm:$0xe]  ;;  %4614 = vmatprep.subr.msk.bf16.mxu0 %vm3517_vm8, %v4633_v55  ;;  %v3519_v63 = vsel %vm3517_vm8, %v4633_v55, 0  ;;  %4615 = vmatprep.subr.msk.bf16.mxu1 %vm3517_vm8, %v4633_v55  ;;  %v4252_v1 = vld [vmem:[%s4702_s17 + $0x38] sm:$0x1]  ;;  %v2022_v5 = vrot.slane %v4249_v60, 5 }
  0x85   : > { %2311 = vrot.lane.b32.xlu1 %v4306_v18, %s4665_s23  ;;  %v1480_v18 = vshrl.u32 %v4203_v10, 16  ;;  %v1459_v28 = vor.u32 %v1458_v16, %v5071_v15  ;;  %v1450_v47 = vrot.slane %v1449_v35, 4  ;;  %4571 = vmatpush3.bf16.msra.mxu0 %v3519_v63  ;;  %v2021_v4 = vrot.slane %v2019_v51, 4  ;;  %v4347_v24 = vld [vmem:[%s4702_s17 + $0x40] sm:$0xf] }
  0x86   : > { %2309 = vrot.lane.b32.xlu0 %v4305_v25, %s4665_s23  ;;  %4572 = vmatprep.subr.bf16.mxu0 %v4634_v56  ;;  %v4291_v10 = vrot.slane %v4247_v62, 9  ;;  %v4345_v35 = vld [vmem:[%s4702_s17 + $0x38] sm:$0x1]  ;;  %v4392_v62 = vld [vmem:[%s4702_s17 + $0x34] sm:$0xf] }
  0x87   : > { %v1482_v32 = vrot.slane %v1480_v18, 4  ;;  %v1460_v41 = vrot.slane %v1459_v28, 4  ;;  %4611 = vmatpush3.bf16.msra.mxu1 %v3519_v63 }
  0x88   : > { %4609 = vmatprep.subr.bf16.mxu1 %v4634_v56  ;;  %v2020_v21 = vsel %vm4860_vm6, %v4291_v10, %v2019_v51 }
  0x89   : > { %2315 = vrot.lane.b32.xlu1 %v4308_v31, %s4665_s23  ;;  %v5081_v31 = vrot.slane %v1476_v17, 5  ;;  %v1465_v53 = vsel %vm4713_vm2, %v1460_v41, %v1464_v42  ;;  %4573 = vmatpush3.bf16.msra.mxu0 %v4634_v56  ;;  %v2023_v17 = vsel %vm4860_vm6, %v2021_v4, %v2022_v5  ;;  %v4310_v41 = vld [vmem:[%s4702_s17 + $0x34] sm:$0xf]  ;;  %v3111_v4 = vrot.slane %v4392_v62, 5  ;;  %v4170_v62 = vld [vmem:[%s4702_s17 + $0x40] sm:$0xf] }
  0x8a   : > { %2313 = vrot.lane.b32.xlu0 %v4307_v36, %s4665_s23  ;;  %v1469_v36 = vrot.slane %v1467_v23, 4 }
  0x8b   : > { %v688_v45 = vpop.permute.xlu1 %687  ;;  %v1483_v43 = vor.u32 %v1482_v32, %v5081_v31  ;;  %4612 = vmatpush3.bf16.msra.mxu1 %v4634_v56  ;;  %v2568_v32 = vshll.u32 %v4347_v24, 16 }
  0x8c   : > { %782 = vst.msk [vmem:[#allocation2 + $0x8] sm:$0xf] %vm779_vm7, %v688_v45  ;;  %v684_v49 = vpop.permute.xlu0 %683  ;;  %v1473_v48 = vor.u32 %v1472_v37, %v1469_v36 }
  0x8d   : > { %780 = vst.msk [vmem:[#allocation2] sm:$0xf] %vm779_vm7, %v684_v49  ;;  %2872 = vrot.lane.b32.xlu1 %v2509_v40, %s4666_s24  ;;  %v4168_v40 = vld [vmem:[%s4702_s17 + $0x34] sm:$0xf]  ;;  %v1484_v54 = vrot.slane %v1483_v43, 4  ;;  %v2554_v43 = vshll.u32 %v4345_v35, 16 }
  0x8e   : > { %2870 = vrot.lane.b32.xlu0 %v2499_v46, %s4666_s24  ;;  %v4167_v46 = vld [vmem:[%s4702_s17 + $0x30] sm:$0xf]  ;;  %v1474_v59 = vrot.slane %v1473_v48, 4  ;;  %v2570_v44 = vrot.slane %v2568_v32, 5  ;;  %v4205_v35 = vld [vmem:[%s4702_s17 + $0x3c] sm:$0xf] }
  0x8f   : > { %v690_v57 = vpop.permute.xlu1 %689  ;;  %v2556_v55 = vrot.slane %v2554_v43, 5 }
  0x90   : > { %783 = vst.msk [vmem:[#allocation2 + $0xc] sm:$0xf] %vm779_vm7, %v690_v57  ;;  %v686_v61 = vpop.permute.xlu0 %685  ;;  %v1479_v9 = vsel %vm4713_vm2, %v1474_v59, %v5081_v31  ;;  %v4311_v59 = vld [vmem:[%s4702_s17 + $0x3c] sm:$0xf] }
  0x91   : > { %781 = vst.msk [vmem:[#allocation2 + $0x4] sm:$0xf] %vm779_vm7, %v686_v61  ;;  %2876 = vrot.lane.b32.xlu1 %v2533_v52, %s4666_s24  ;;  %v5099_v52 = vld [vmem:[%s4702_s17 + $0x34] sm:$0xf] }
  0x92   : > { %2874 = vrot.lane.b32.xlu0 %v2523_v58, %s4666_s24  ;;  %v1455_v58 = vsel %vm4713_vm2, %v1450_v47, %v5071_v15  ;;  %v2026_v2 = vrot.slane %v5099_v52, 5  ;;  %v2029_v15 = vrot.slane %v4252_v1, 5  ;;  %v4309_v47 = vld [vmem:[%s4702_s17 + $0x30] sm:$0xf] }
  0x93   : > { %v694_v6 = vpop.permute.xlu1 %693 }
  0x94   : > { %785 = vst.msk [vmem:[#allocation2 + $0x14] sm:$0xf] %vm779_vm7, %v694_v6  ;;  %v692_v11 = vpop.permute.xlu0 %691  ;;  %v4250_v6 = vld [vmem:[%s4702_s17 + $0x30] sm:$0xe] }
  0x95   : > { %784 = vst.msk [vmem:[#allocation2 + $0x10] sm:$0xf] %vm779_vm7, %v692_v11  ;;  %3209 = vrot.lane.b32.xlu1 %v3101_v3, %s4667_s25  ;;  %v1489_v3 = vsel %vm4713_vm2, %v1484_v54, %v1488_v50  ;;  %v4344_v11 = vld [vmem:[%s4702_s17 + $0x34] sm:$0xf]  ;;  %v4292_v16 = vrot.slane %v4250_v6, 9 }
  0x96   : > { %3207 = vrot.lane.b32.xlu0 %v3098_v7, %s4667_s25  ;;  %v4635_v7 = vld [vmem:[%s6476_s1] sm:$0xff]   ;;  %v2544_v18 = vshll.u32 %v4344_v11, 16 }
  0x97   : > { %v698_v19 = vpop.permute.xlu1 %697  ;;  %4574 = vmatprep.subr.bf16.mxu0 %v4635_v7  ;;  %4610 = vmatprep.subr.bf16.mxu1 %v4635_v7  ;;  %v2027_v29 = vsel %vm4860_vm6, %v4292_v16, %v2026_v2  ;;  %v828_v16 = vld [vmem:[%s4702_s17 + $0x40] sm:$0xf] }
  0x98   : > { %787 = vst.msk [vmem:[#allocation2 + $0x1c] sm:$0xf] %vm779_vm7, %v698_v19  ;;  %v696_v25 = vpop.permute.xlu0 %695  ;;  %v2548_v19 = vshrl.u32 %v4344_v11, 16  ;;  %4575 = vmatpush3.bf16.msra.mxu0 %v4635_v7  ;;  %v2546_v30 = vrot.slane %v2544_v18, 5  ;;  %4613 = vmatpush3.bf16.msra.mxu1 %v4635_v7  ;;  %v4391_v11 = vld [vmem:[%s4702_s17 + $0x30] sm:$0xe] }
  0x99   : > { %786 = vst.msk [vmem:[#allocation2 + $0x18] sm:$0xf] %vm779_vm7, %v696_v25  ;;  %3213 = vrot.lane.b32.xlu1 %v3108_v13, %s4667_s25  ;;  %v4343_v13 = vld [vmem:[%s4702_s17 + $0x30] sm:$0xf] }
  0x9a   : > { %3211 = vrot.lane.b32.xlu0 %v3105_v14, %s4667_s25  ;;  %v2028_v14 = vrot.slane %v2026_v2, 4  ;;  %v2535_v22 = vshrl.u32 %v4343_v13, 16  ;;  %v2538_v23 = vshll.u32 %v4343_v13, 16  ;;  %v2550_v31 = vrot.slane %v2548_v19, 4 }
  0x9b   : > { %v702_v33 = vpop.permute.xlu1 %701  ;;  %v3113_v13 = vrot.slane %v3111_v4, 4  ;;  %v4435_v19 = vrot.slane %v4391_v11, 9  ;;  %v4172_v11 = vld [vmem:[%s4702_s17 + $0x4c] sm:$0xf] }
  0x9c   : > { %789 = vst.msk [vmem:[#allocation2 + $0x24] sm:$0xf] %vm779_vm7, %v702_v33  ;;  %v700_v38 = vpop.permute.xlu0 %699  ;;  %v2030_v28 = vsel %vm4860_vm6, %v2028_v14, %v2029_v15  ;;  %v2572_v33 = vshrl.u32 %v4347_v24, 16  ;;  %v2537_v36 = vrot.slane %v2535_v22, 4  ;;  %v2540_v37 = vrot.slane %v2538_v23, 5 }
  0x9d   : > { %788 = vst.msk [vmem:[#allocation2 + $0x20] sm:$0xf] %vm779_vm7, %v700_v38  ;;  %1227 = vrot.lane.b32.xlu1 %v4166_v26, %s4662_s20  ;;  %v4346_v26 = vld [vmem:[%s4702_s17 + $0x3c] sm:$0xf]  ;;  %v2551_v42 = vor.u32 %v2550_v31, %v2546_v30  ;;  %v948_v23 = vrot.slane %v828_v16, 5  ;;  %v3112_v31 = vsel %vm4860_vm6, %v4435_v19, %v3111_v4 }
  0x9e   : > { %1225 = vrot.lane.b32.xlu0 %v4165_v34, %s4662_s20  ;;  %v2559_v38 = vshrl.u32 %v4346_v26, 16  ;;  %v2562_v39 = vshll.u32 %v4346_v26, 16  ;;  %v2541_v48 = vor.u32 %v2540_v37, %v2537_v36  ;;  %v4394_v22 = vld [vmem:[%s4702_s17 + $0x3c] sm:$0xe] }
  0x9f   : > { %v706_v45 = vpop.permute.xlu1 %705  ;;  %v2552_v54 = vrot.slane %v2551_v42, 4  ;;  %v4436_v32 = vrot.slane %v4394_v22, 9  ;;  %v950_v36 = vrot.slane %v948_v23, 4 }
  0xa0   : > { %791 = vst.msk [vmem:[#allocation2 + $0x2c] sm:$0xf] %vm779_vm7, %v706_v45  ;;  %v704_v49 = vpop.permute.xlu0 %703  ;;  %v2574_v45 = vrot.slane %v2572_v33, 4  ;;  %v2561_v50 = vrot.slane %v2559_v38, 4  ;;  %v2564_v51 = vrot.slane %v2562_v39, 5  ;;  %v2542_v60 = vrot.slane %v2541_v48, 4 }
  0xa1   : > { %790 = vst.msk [vmem:[#allocation2 + $0x28] sm:$0xf] %vm779_vm7, %v704_v49  ;;  %1231 = vrot.lane.b32.xlu1 %v4168_v40, %s4662_s20  ;;  %v4348_v49 = vld [vmem:[%s4702_s17 + $0x44] sm:$0x1]  ;;  %v2557_v1 = vsel %vm4713_vm2, %v2552_v54, %v2556_v55  ;;  %v4206_v33 = vld [vmem:[%s4702_s17 + $0x40] sm:$0xf] }
  0xa2   : > { %1229 = vrot.lane.b32.xlu0 %v4167_v46, %s4662_s20  ;;  %v2575_v56 = vor.u32 %v2574_v45, %v2570_v44  ;;  %v2547_v6 = vsel %vm4713_vm2, %v2542_v60, %v2546_v30  ;;  %v1494_v45 = vshll.u32 %v4205_v35, 16  ;;  %v4208_v48 = vld [vmem:[%s4702_s17 + $0x48] sm:$0xf] }
  0xa3   : > { %v710_v57 = vpop.permute.xlu1 %709  ;;  %v1518_v60 = vshll.u32 %v4208_v48, 16 }
  0xa4   : > { %793 = vst.msk [vmem:[#allocation2 + $0x34] sm:$0xf] %vm779_vm7, %v710_v57  ;;  %v708_v61 = vpop.permute.xlu0 %707  ;;  %v2578_v57 = vshll.u32 %v4348_v49, 16  ;;  %v2576_v2 = vrot.slane %v2575_v56, 4  ;;  %v4207_v56 = vld [vmem:[%s4702_s17 + $0x44] sm:$0x1] }
  0xa5   : > { %792 = vst.msk [vmem:[#allocation2 + $0x30] sm:$0xf] %vm779_vm7, %v708_v61  ;;  %1788 = vrot.lane.b32.xlu1 %v1465_v53, %s4663_s21  ;;  %v4312_v53 = vld [vmem:[%s4702_s17 + $0x40] sm:$0xf]  ;;  %v2565_v61 = vor.u32 %v2564_v51, %v2561_v50 }
  0xa6   : > { %1786 = vrot.lane.b32.xlu0 %v1455_v58, %s4663_s21 }
  0xa7   : > { %v714_v8 = vpop.permute.xlu1 %713  ;;  %v2566_v7 = vrot.slane %v2565_v61, 4 }
  0xa8   : > { %795 = vst.msk [vmem:[#allocation2 + $0x3c] sm:$0xf] %vm779_vm7, %v714_v8  ;;  %v712_v12 = vpop.permute.xlu0 %711  ;;  %v4393_v8 = vld [vmem:[%s4702_s17 + $0x38] sm:$0x1] }
  0xa9   : > { %794 = vst.msk [vmem:[#allocation2 + $0x38] sm:$0xf] %vm779_vm7, %v712_v12  ;;  %1792 = vrot.lane.b32.xlu1 %v1489_v3, %s4663_s21  ;;  %v2580_v3 = vrot.slane %v2578_v57, 5  ;;  %v3114_v14 = vrot.slane %v4393_v8, 5  ;;  %v2571_v18 = vsel %vm4713_vm2, %v2566_v7, %v2570_v44  ;;  %v1491_v44 = vshrl.u32 %v4205_v35, 16 }
  0xaa   : > { %1790 = vrot.lane.b32.xlu0 %v1479_v9, %s4663_s21  ;;  %v4395_v9 = vld [vmem:[%s4702_s17 + $0x40] sm:$0xf]  ;;  %v4210_v7 = vld [vmem:[%s4702_s17 + $0x50] sm:$0x1] }
  0xab   : > { %v718_v20 = vpop.permute.xlu1 %717  ;;  %v2581_v12 = vsel %vm4713_vm2, %v2576_v2, %v2580_v3  ;;  %v3118_v15 = vrot.slane %v4395_v9, 5  ;;  %v3115_v24 = vsel %vm4860_vm6, %v3113_v13, %v3114_v14  ;;  %v1493_v57 = vrot.slane %v1491_v44, 4 }
  0xac   : > { %797 = vst.msk [vmem:[#allocation2 + $0x44] sm:$0xf] %vm779_vm7, %v718_v20  ;;  %v716_v25 = vpop.permute.xlu0 %715  ;;  %v4396_v20 = vld [vmem:[%s4702_s17 + $0x44] sm:$0x1]  ;;  %v1520_v9 = vrot.slane %v1518_v60, 5 }
  0xad   : > { %796 = vst.msk [vmem:[#allocation2 + $0x40] sm:$0xf] %vm779_vm7, %v716_v25  ;;  %2125 = vrot.lane.b32.xlu1 %v2023_v17, %s4664_s22  ;;  %v3120_v25 = vrot.slane %v3118_v15, 4  ;;  %v3121_v26 = vrot.slane %v4396_v20, 5  ;;  %v3119_v43 = vsel %vm4860_vm6, %v4436_v32, %v3118_v15  ;;  %v1534_v15 = vshll.u32 %v4210_v7, 16 }
  0xae   : > { %2123 = vrot.lane.b32.xlu0 %v2020_v21, %s4664_s22  ;;  %v4254_v20 = vld [vmem:[%s4702_s17 + $0x40] sm:$0xf] }
  0xaf   : > { %v722_v34 = vpop.permute.xlu1 %721  ;;  %v3122_v39 = vsel %vm4860_vm6, %v3120_v25, %v3121_v26  ;;  %v2033_v25 = vrot.slane %v4254_v20, 5  ;;  %v4257_v26 = vld [vmem:[%s4702_s17 + $0x4c] sm:$0xf] }
  0xb0   : > { %799 = vst.msk [vmem:[#allocation2 + $0x4c] sm:$0xf] %vm779_vm7, %v722_v34  ;;  %v720_v40 = vpop.permute.xlu0 %719 }
  0xb1   : > { %798 = vst.msk [vmem:[#allocation2 + $0x48] sm:$0xf] %vm779_vm7, %v720_v40  ;;  %2129 = vrot.lane.b32.xlu1 %v2030_v28, %s4664_s22  ;;  %v829_v28 = vld [vmem:[%s4702_s17 + $0x44] sm:$0x1]  ;;  %v1500_v40 = vshll.u32 %v4206_v33, 16 }
  0xb2   : > { %2127 = vrot.lane.b32.xlu0 %v2027_v29, %s4664_s22  ;;  %v827_v29 = vld [vmem:[%s4702_s17 + $0x3c] sm:$0xe]  ;;  %v951_v37 = vrot.slane %v829_v28, 5 }
  0xb3   : > { %v726_v46 = vpop.permute.xlu1 %725  ;;  %v4150_v38 = vrot.slane %v827_v29, 9  ;;  %v1502_v51 = vrot.slane %v1500_v40, 5 }
  0xb4   : > { %801 = vst.msk [vmem:[#allocation2 + $0x54] sm:$0xf] %vm779_vm7, %v726_v46  ;;  %v724_v52 = vpop.permute.xlu0 %723  ;;  %v4209_v46 = vld [vmem:[%s4702_s17 + $0x4c] sm:$0xf]  ;;  %v952_v49 = vsel %vm4860_vm6, %v950_v36, %v951_v37  ;;  %v2035_v36 = vrot.slane %v2033_v25, 4 }
  0xb5   : > { %800 = vst.msk [vmem:[#allocation2 + $0x50] sm:$0xf] %vm779_vm7, %v724_v52  ;;  %2319 = vrot.lane.b32.xlu1 %v4310_v41, %s4665_s23  ;;  %v1504_v41 = vshrl.u32 %v4206_v33, 16  ;;  %v949_v50 = vsel %vm4860_vm6, %v4150_v38, %v948_v23  ;;  %v1528_v54 = vshrl.u32 %v4209_v46, 16  ;;  %v4253_v33 = vld [vmem:[%s4702_s17 + $0x3c] sm:$0xe] }
  0xb6   : > { %2317 = vrot.lane.b32.xlu0 %v4309_v47, %s4665_s23  ;;  %v4258_v38 = vld [vmem:[%s4702_s17 + $0x50] sm:$0x1] }
  0xb7   : > { %v730_v58 = vpop.permute.xlu1 %729  ;;  %v1506_v52 = vrot.slane %v1504_v41, 4  ;;  %v1530_v3 = vrot.slane %v1528_v54, 4 }
  0xb8   : > { %803 = vst.msk [vmem:[#allocation2 + $0x5c] sm:$0xf] %vm779_vm7, %v730_v58  ;;  %v728_v63 = vpop.permute.xlu0 %727  ;;  %v1496_v58 = vrot.slane %v1494_v45, 5  ;;  %v4349_v45 = vld [vmem:[%s4702_s17 + $0x48] sm:$0xf] }
  0xb9   : > { %802 = vst.msk [vmem:[#allocation2 + $0x58] sm:$0xf] %vm779_vm7, %v728_v63  ;;  %2323 = vrot.lane.b32.xlu1 %v4312_v53, %s4665_s23  ;;  %v1524_v53 = vshll.u32 %v4209_v46, 16  ;;  %v1507_v63 = vor.u32 %v1506_v52, %v1502_v51  ;;  %v2583_v54 = vshrl.u32 %v4349_v45, 16 }
  0xba   : > { %2321 = vrot.lane.b32.xlu0 %v4311_v59, %s4665_s23  ;;  %v1515_v59 = vshrl.u32 %v4208_v48, 16 }
  0xbb   : > { %v734_v5 = vpop.permute.xlu1 %733  ;;  %v1526_v2 = vrot.slane %v1524_v53, 5 }
  0xbc   : > { %805 = vst.msk [vmem:[#allocation2 + $0x64] sm:$0xf] %vm779_vm7, %v734_v5  ;;  %v732_v10 = vpop.permute.xlu0 %731  ;;  %v4169_v5 = vld [vmem:[%s4702_s17 + $0x3c] sm:$0xf]  ;;  %v1517_v8 = vrot.slane %v1515_v59, 4 }
  0xbd   : > { %804 = vst.msk [vmem:[#allocation2 + $0x60] sm:$0xf] %vm779_vm7, %v732_v10  ;;  %2880 = vrot.lane.b32.xlu1 %v2557_v1, %s4666_s24  ;;  %v1510_v1 = vshll.u32 %v4207_v56, 16  ;;  %v1531_v14 = vor.u32 %v1530_v3, %v1526_v2  ;;  %v4353_v56 = vld [vmem:[%s4702_s17 + $0x58] sm:$0xf] }
  0xbe   : > { %2878 = vrot.lane.b32.xlu0 %v2547_v6, %s4666_s24  ;;  %v1497_v6 = vor.u32 %v1496_v58, %v1493_v57  ;;  %v1521_v19 = vor.u32 %v1520_v9, %v1517_v8  ;;  %v4352_v58 = vld [vmem:[%s4702_s17 + $0x54] sm:$0xf]  ;;  %v4351_v3 = vld [vmem:[%s4702_s17 + $0x50] sm:$0x1]  ;;  %v4314_v9 = vld [vmem:[%s4702_s17 + $0x4c] sm:$0xf] }
  0xbf   : > { %v738_v17 = vpop.permute.xlu1 %737  ;;  %v1512_v13 = vrot.slane %v1510_v1, 5  ;;  %v1532_v23 = vrot.slane %v1531_v14, 4  ;;  %v2620_v1 = vshrl.u32 %v4353_v56, 16  ;;  %v2610_v7 = vshll.u32 %v4352_v58, 16 }
  0xc0   : > { %807 = vst.msk [vmem:[#allocation2 + $0x6c] sm:$0xf] %vm779_vm7, %v738_v17  ;;  %v736_v21 = vpop.permute.xlu0 %735  ;;  %v4171_v17 = vld [vmem:[%s4702_s17 + $0x48] sm:$0xf] }
  0xc1   : > { %806 = vst.msk [vmem:[#allocation2 + $0x68] sm:$0xf] %vm779_vm7, %v736_v21  ;;  %2884 = vrot.lane.b32.xlu1 %v2581_v12, %s4666_s24  ;;  %v1508_v12 = vrot.slane %v1507_v63, 4  ;;  %v2616_v63 = vshll.u32 %v4353_v56, 16 }
  0xc2   : > { %2882 = vrot.lane.b32.xlu0 %v2571_v18, %s4666_s24  ;;  %v1498_v18 = vrot.slane %v1497_v6, 4  ;;  %v2607_v6 = vshrl.u32 %v4352_v58, 16 }
  0xc3   : > { %v742_v30 = vpop.permute.xlu1 %741  ;;  %v1513_v22 = vsel %vm4713_vm2, %v1508_v12, %v1512_v13  ;;  %v2618_v12 = vrot.slane %v2616_v63, 5  ;;  %v2622_v13 = vrot.slane %v2620_v1, 4  ;;  %v832_v63 = vld [vmem:[%s4702_s17 + $0x50] sm:$0x1] }
  0xc4   : > { %809 = vst.msk [vmem:[#allocation2 + $0x74] sm:$0xf] %vm779_vm7, %v742_v30  ;;  %v740_v34 = vpop.permute.xlu0 %739  ;;  %v1503_v29 = vsel %vm4713_vm2, %v1498_v18, %v1502_v51  ;;  %v1522_v30 = vrot.slane %v1521_v19, 4  ;;  %v2609_v18 = vrot.slane %v2607_v6, 4  ;;  %v2612_v19 = vrot.slane %v2610_v7, 5 }
  0xc5   : > { %808 = vst.msk [vmem:[#allocation2 + $0x70] sm:$0xf] %vm779_vm7, %v740_v34  ;;  %3217 = vrot.lane.b32.xlu1 %v3115_v24, %s4667_s25  ;;  %v1536_v24 = vrot.slane %v1534_v15, 5  ;;  %v2040_v34 = vrot.slane %v4257_v26, 5  ;;  %v4313_v15 = vld [vmem:[%s4702_s17 + $0x48] sm:$0xf] }
  0xc6   : > { %3215 = vrot.lane.b32.xlu0 %v3112_v31, %s4667_s25  ;;  %v4255_v31 = vld [vmem:[%s4702_s17 + $0x44] sm:$0x1]  ;;  %v1527_v41 = vsel %vm4713_vm2, %v1522_v30, %v1526_v2  ;;  %v2613_v30 = vor.u32 %v2612_v19, %v2609_v18  ;;  %v958_v6 = vrot.slane %v832_v63, 5  ;;  %v835_v7 = vld [vmem:[%s4702_s17 + $0x5c] sm:$0x1] }
  0xc7   : > { %v746_v42 = vpop.permute.xlu1 %745  ;;  %v1537_v35 = vsel %vm4713_vm2, %v1532_v23, %v1536_v24  ;;  %v2036_v37 = vrot.slane %v4255_v31, 5  ;;  %v2042_v46 = vrot.slane %v2040_v34, 4  ;;  %v2623_v24 = vor.u32 %v2622_v13, %v2618_v12  ;;  %v4398_v31 = vld [vmem:[%s4702_s17 + $0x4c] sm:$0xf]  ;;  %v4260_v63 = vld [vmem:[%s4702_s17 + $0x58] sm:$0xf] }
  0xc8   : > { %811 = vst.msk [vmem:[#allocation2 + $0x7c] sm:$0xf] %vm779_vm7, %v746_v42  ;;  %v744_v47 = vpop.permute.xlu0 %743  ;;  %v4293_v42 = vrot.slane %v4253_v33, 9 }
  0xc9   : > { %810 = vst.msk [vmem:[#allocation2 + $0x78] sm:$0xf] %vm779_vm7, %v744_v47  ;;  %3221 = vrot.lane.b32.xlu1 %v3122_v39, %s4667_s25  ;;  %v4256_v39 = vld [vmem:[%s4702_s17 + $0x48] sm:$0xe]  ;;  %v2043_v47 = vrot.slane %v4258_v38, 5 }
  0xca   : > { %3219 = vrot.lane.b32.xlu0 %v3119_v43, %s4667_s25  ;;  %v4350_v43 = vld [vmem:[%s4702_s17 + $0x4c] sm:$0xf]  ;;  %v4294_v48 = vrot.slane %v4256_v39, 9  ;;  %v2034_v53 = vsel %vm4860_vm6, %v4293_v42, %v2033_v25  ;;  %v2614_v39 = vrot.slane %v2613_v30, 4 }
  0xcb   : > { %v1026_v55 = vpop.permute.xlu1 %1025  ;;  %v2596_v51 = vshrl.u32 %v4350_v43, 16  ;;  %v2044_v59 = vsel %vm4860_vm6, %v2042_v46, %v2043_v47 }
  0xcc   : > { %1121 = vst.msk [vmem:[#allocation2 + $0x4] sm:$0xf] %vm1119_vm9, %v1026_v55  ;;  %v1024_v61 = vpop.permute.xlu0 %1023  ;;  %v2586_v55 = vshll.u32 %v4349_v45, 16  ;;  %v2041_v60 = vsel %vm4860_vm6, %v4294_v48, %v2040_v34  ;;  %v2624_v34 = vrot.slane %v2623_v24, 4 }
  0xcd   : > { %1120 = vst.msk [vmem:[#allocation2] sm:$0xf] %vm1119_vm9, %v1024_v61  ;;  %1045 = vrot.lane.b32.xlu1 %v952_v49, %s4661_s19  ;;  %v2037_v49 = vsel %vm4860_vm6, %v2035_v36, %v2036_v37  ;;  %v3125_v36 = vrot.slane %v4398_v31, 5 }
  0xce   : > { %1043 = vrot.lane.b32.xlu0 %v949_v50, %s4661_s19  ;;  %v2592_v50 = vshll.u32 %v4350_v43, 16  ;;  %v4397_v43 = vld [vmem:[%s4702_s17 + $0x48] sm:$0xe] }
  0xcf   : > { %v1030_v4 = vpop.permute.xlu1 %1029  ;;  %v3127_v45 = vrot.slane %v3125_v36, 4 }
  0xd0   : > { %1123 = vst.msk [vmem:[#allocation2 + $0xc] sm:$0xf] %vm1119_vm9, %v1030_v4  ;;  %v1028_v10 = vpop.permute.xlu0 %1027  ;;  %v2594_v61 = vrot.slane %v2592_v50, 5  ;;  %v2585_v4 = vrot.slane %v2583_v54, 4  ;;  %v4437_v50 = vrot.slane %v4397_v43, 9 }
  0xd1   : > { %1122 = vst.msk [vmem:[#allocation2 + $0x8] sm:$0xf] %vm1119_vm9, %v1028_v10  ;;  %1235 = vrot.lane.b32.xlu1 %v4170_v62, %s4662_s20  ;;  %v2598_v62 = vrot.slane %v2596_v51, 4  ;;  %v4402_v51 = vld [vmem:[%s4702_s17 + $0x5c] sm:$0x1] }
  0xd2   : > { %1233 = vrot.lane.b32.xlu0 %v4169_v5, %s4662_s20  ;;  %v2588_v5 = vrot.slane %v2586_v55, 5  ;;  %v4400_v54 = vld [vmem:[%s4702_s17 + $0x54] sm:$0xe] }
  0xd3   : > { %v1034_v16 = vpop.permute.xlu1 %1033  ;;  %v2599_v10 = vor.u32 %v2598_v62, %v2594_v61  ;;  %v4438_v62 = vrot.slane %v4400_v54, 9  ;;  %v4176_v54 = vld [vmem:[%s4702_s17 + $0x64] sm:$0xf] }
  0xd4   : > { %1125 = vst.msk [vmem:[#allocation2 + $0x14] sm:$0xf] %vm1119_vm9, %v1034_v16  ;;  %v1032_v21 = vpop.permute.xlu0 %1031  ;;  %v2589_v16 = vor.u32 %v2588_v5, %v2585_v4 }
  0xd5   : > { %1124 = vst.msk [vmem:[#allocation2 + $0x10] sm:$0xf] %vm1119_vm9, %v1032_v21  ;;  %1239 = vrot.lane.b32.xlu1 %v4172_v11, %s4662_s20  ;;  %v2602_v11 = vshll.u32 %v4351_v3, 16  ;;  %v4316_v21 = vld [vmem:[%s4702_s17 + $0x58] sm:$0xf] }
  0xd6   : > { %1237 = vrot.lane.b32.xlu0 %v4171_v17, %s4662_s20  ;;  %v4354_v17 = vld [vmem:[%s4702_s17 + $0x5c] sm:$0x1] }
  0xd7   : > { %v1038_v28 = vpop.permute.xlu1 %1037  ;;  %v2604_v23 = vrot.slane %v2602_v11, 5  ;;  %v2626_v25 = vshll.u32 %v4354_v17, 16 }
  0xd8   : > { %1127 = vst.msk [vmem:[#allocation2 + $0x1c] sm:$0xf] %vm1119_vm9, %v1038_v28  ;;  %v1036_v32 = vpop.permute.xlu0 %1035  ;;  %v4315_v28 = vld [vmem:[%s4702_s17 + $0x54] sm:$0xf] }
  0xd9   : > { %1126 = vst.msk [vmem:[#allocation2 + $0x18] sm:$0xf] %vm1119_vm9, %v1036_v32  ;;  %1796 = vrot.lane.b32.xlu1 %v1513_v22, %s4663_s21  ;;  %v2600_v22 = vrot.slane %v2599_v10, 4 }
  0xda   : > { %1794 = vrot.lane.b32.xlu0 %v1503_v29, %s4663_s21  ;;  %v2590_v29 = vrot.slane %v2589_v16, 4  ;;  %v965_v16 = vrot.slane %v835_v7, 5 }
  0xdb   : > { %v1042_v40 = vpop.permute.xlu1 %1041  ;;  %v2605_v33 = vsel %vm4713_vm2, %v2600_v22, %v2604_v23 }
  0xdc   : > { %1129 = vst.msk [vmem:[#allocation2 + $0x24] sm:$0xf] %vm1119_vm9, %v1042_v40  ;;  %v1040_v44 = vpop.permute.xlu0 %1039  ;;  %v2595_v38 = vsel %vm4713_vm2, %v2590_v29, %v2594_v61  ;;  %v4399_v40 = vld [vmem:[%s4702_s17 + $0x50] sm:$0x1]  ;;  %v3126_v61 = vsel %vm4860_vm6, %v4437_v50, %v3125_v36  ;;  %v4213_v36 = vld [vmem:[%s4702_s17 + $0x5c] sm:$0x1] }
  0xdd   : > { %1128 = vst.msk [vmem:[#allocation2 + $0x20] sm:$0xf] %vm1119_vm9, %v1040_v44  ;;  %1800 = vrot.lane.b32.xlu1 %v1537_v35, %s4663_s21  ;;  %v2628_v35 = vrot.slane %v2626_v25, 5  ;;  %v3128_v46 = vrot.slane %v4399_v40, 5  ;;  %v4215_v25 = vld [vmem:[%s4702_s17 + $0x64] sm:$0xf] }
  0xde   : > { %1798 = vrot.lane.b32.xlu0 %v1527_v41, %s4663_s21  ;;  %v4401_v41 = vld [vmem:[%s4702_s17 + $0x58] sm:$0xf]  ;;  %v4216_v50 = vld [vmem:[%s4702_s17 + $0x68] sm:$0x1] }
  0xdf   : > { %v1220_v52 = vpop.permute.xlu1 %1219  ;;  %v2629_v44 = vsel %vm4713_vm2, %v2624_v34, %v2628_v35  ;;  %v3132_v47 = vrot.slane %v4401_v41, 5  ;;  %v3129_v55 = vsel %vm4860_vm6, %v3127_v45, %v3128_v46  ;;  %v1576_v34 = vshrl.u32 %v4215_v25, 16 }
  0xe0   : > { %1315 = vst.msk [vmem:[#allocation2 + $0x4] sm:$0xf] %vm1313_vm10, %v1220_v52  ;;  %v1218_v57 = vpop.permute.xlu0 %1217  ;;  %v831_v52 = vld [vmem:[%s4702_s17 + $0x4c] sm:$0xf] }
  0xe1   : > { %1314 = vst.msk [vmem:[#allocation2] sm:$0xf] %vm1313_vm10, %v1218_v57  ;;  %2133 = vrot.lane.b32.xlu1 %v2037_v49, %s4664_s22  ;;  %v2619_v49 = vsel %vm4713_vm2, %v2614_v39, %v2618_v12  ;;  %v3134_v56 = vrot.slane %v3132_v47, 4  ;;  %v3135_v57 = vrot.slane %v4402_v51, 5  ;;  %v955_v58 = vrot.slane %v831_v52, 5 }
  0xe2   : > { %2131 = vrot.lane.b32.xlu0 %v2034_v53, %s4664_s22  ;;  %v3133_v10 = vsel %vm4860_vm6, %v4438_v62, %v3132_v47  ;;  %v4212_v12 = vld [vmem:[%s4702_s17 + $0x58] sm:$0xf]  ;;  %v1578_v46 = vrot.slane %v1576_v34, 4 }
  0xe3   : > { %v1224_v2 = vpop.permute.xlu1 %1223  ;;  %v3136_v4 = vsel %vm4860_vm6, %v3134_v56, %v3135_v57  ;;  %v957_v5 = vrot.slane %v955_v58, 4  ;;  %v1548_v19 = vshll.u32 %v4212_v12, 16 }
  0xe4   : > { %1317 = vst.msk [vmem:[#allocation2 + $0xc] sm:$0xf] %vm1313_vm10, %v1224_v2  ;;  %v1222_v8 = vpop.permute.xlu0 %1221  ;;  %v830_v2 = vld [vmem:[%s4702_s17 + $0x48] sm:$0xe] }
  0xe5   : > { %1316 = vst.msk [vmem:[#allocation2 + $0x8] sm:$0xf] %vm1313_vm10, %v1222_v8  ;;  %2137 = vrot.lane.b32.xlu1 %v2044_v59, %s4664_s22  ;;  %v834_v59 = vld [vmem:[%s4702_s17 + $0x58] sm:$0xf]  ;;  %v833_v8 = vld [vmem:[%s4702_s17 + $0x54] sm:$0xe]  ;;  %v959_v18 = vsel %vm4860_vm6, %v957_v5, %v958_v6 }
  0xe6   : > { %2135 = vrot.lane.b32.xlu0 %v2041_v60, %s4664_s22  ;;  %v962_v3 = vrot.slane %v834_v59, 5  ;;  %v4151_v11 = vrot.slane %v830_v2, 9  ;;  %v4152_v17 = vrot.slane %v833_v8, 9  ;;  %v5351_v31 = vrot.slane %v1548_v19, 5  ;;  %v4263_v6 = vld [vmem:[%s4702_s17 + $0x64] sm:$0xf] }
  0xe7   : > { %v1781_v14 = vpop.permute.xlu1 %1780  ;;  %v2047_v5 = vrot.slane %v4260_v63, 5  ;;  %v4262_v19 = vld [vmem:[%s4702_s17 + $0x60] sm:$0xe] }
  0xe8   : > { %1876 = vst.msk [vmem:[#allocation2 + $0x4] sm:$0xf] %vm1874_vm11, %v1781_v14  ;;  %v1779_v20 = vpop.permute.xlu0 %1778  ;;  %v4211_v14 = vld [vmem:[%s4702_s17 + $0x54] sm:$0xf]  ;;  %v956_v22 = vsel %vm4860_vm6, %v4151_v11, %v955_v58  ;;  %v963_v30 = vsel %vm4860_vm6, %v4152_v17, %v962_v3  ;;  %v1582_v58 = vshll.u32 %v4216_v50, 16 }
  0xe9   : > { %1875 = vst.msk [vmem:[#allocation2] sm:$0xf] %vm1874_vm11, %v1779_v20  ;;  %2327 = vrot.lane.b32.xlu1 %v4314_v9, %s4665_s23  ;;  %v1552_v20 = vshrl.u32 %v4212_v12, 16  ;;  %v1539_v23 = vshrl.u32 %v4211_v14, 16  ;;  %v1542_v24 = vshll.u32 %v4211_v14, 16  ;;  %v2054_v14 = vrot.slane %v4263_v6, 5 }
  0xea   : > { %2325 = vrot.lane.b32.xlu0 %v4313_v15, %s4665_s23  ;;  %v964_v15 = vrot.slane %v962_v3, 4 }
  0xeb   : > { %v1785_v26 = vpop.permute.xlu1 %1784 }
  0xec   : > { %1878 = vst.msk [vmem:[#allocation2 + $0xc] sm:$0xf] %vm1874_vm11, %v1785_v26  ;;  %v1783_v32 = vpop.permute.xlu0 %1782  ;;  %v966_v29 = vsel %vm4860_vm6, %v964_v15, %v965_v16  ;;  %v2049_v16 = vrot.slane %v2047_v5, 4 }
  0xed   : > { %1877 = vst.msk [vmem:[#allocation2 + $0x8] sm:$0xf] %vm1874_vm11, %v1783_v32  ;;  %2331 = vrot.lane.b32.xlu1 %v4316_v21, %s4665_s23  ;;  %v1554_v32 = vrot.slane %v1552_v20, 4 }
  0xee   : > { %2329 = vrot.lane.b32.xlu0 %v4315_v28, %s4665_s23  ;;  %v4214_v28 = vld [vmem:[%s4702_s17 + $0x60] sm:$0xf] }
  0xef   : > { %v2118_v37 = vpop.permute.xlu1 %2117  ;;  %v1563_v39 = vshrl.u32 %v4214_v28, 16  ;;  %v1566_v40 = vshll.u32 %v4214_v28, 16  ;;  %v1555_v43 = vor.u32 %v1554_v32, %v5351_v31  ;;  %v2056_v28 = vrot.slane %v2054_v14, 4 }
  0xf0   : > { %2213 = vst.msk [vmem:[#allocation2 + $0x4] sm:$0xf] %vm2211_vm12, %v2118_v37  ;;  %v2116_v42 = vpop.permute.xlu0 %2115  ;;  %v1541_v37 = vrot.slane %v1539_v23, 4  ;;  %v4356_v23 = vld [vmem:[%s4702_s17 + $0x64] sm:$0xf] }
  0xf1   : > { %2212 = vst.msk [vmem:[#allocation2] sm:$0xf] %vm2211_vm12, %v2116_v42  ;;  %2888 = vrot.lane.b32.xlu1 %v2605_v33, %s4666_s24  ;;  %v1572_v33 = vshll.u32 %v4215_v25, 16  ;;  %v4174_v42 = vld [vmem:[%s4702_s17 + $0x58] sm:$0xf]  ;;  %v1565_v51 = vrot.slane %v1563_v39, 4 }
  0xf2   : > { %2886 = vrot.lane.b32.xlu0 %v2595_v38, %s4666_s24  ;;  %v1544_v38 = vrot.slane %v1542_v24, 5  ;;  %v1568_v52 = vrot.slane %v1566_v40, 5  ;;  %v2640_v32 = vshll.u32 %v4356_v23, 16  ;;  %v4358_v40 = vld [vmem:[%s4702_s17 + $0x6c] sm:$0xf] }
  0xf3   : > { %v2122_v48 = vpop.permute.xlu1 %2121  ;;  %v5360_v45 = vrot.slane %v1572_v33, 5  ;;  %v2644_v33 = vshrl.u32 %v4356_v23, 16 }
  0xf4   : > { %2215 = vst.msk [vmem:[#allocation2 + $0xc] sm:$0xf] %vm2211_vm12, %v2122_v48  ;;  %v2120_v53 = vpop.permute.xlu0 %2119  ;;  %v4173_v48 = vld [vmem:[%s4702_s17 + $0x54] sm:$0xf]  ;;  %v1569_v62 = vor.u32 %v1568_v52, %v1565_v51  ;;  %v2655_v51 = vshrl.u32 %v4358_v40, 16  ;;  %v2658_v52 = vshll.u32 %v4358_v40, 16 }
  0xf5   : > { %2214 = vst.msk [vmem:[#allocation2 + $0x8] sm:$0xf] %vm2211_vm12, %v2120_v53  ;;  %2892 = vrot.lane.b32.xlu1 %v2629_v44, %s4666_s24  ;;  %v1558_v44 = vshll.u32 %v4213_v36, 16  ;;  %v1579_v57 = vor.u32 %v1578_v46, %v5360_v45 }
  0xf6   : > { %2890 = vrot.lane.b32.xlu0 %v2619_v49, %s4666_s24  ;;  %v1545_v49 = vor.u32 %v1544_v38, %v1541_v37  ;;  %v4359_v38 = vld [vmem:[%s4702_s17 + $0x70] sm:$0xf]  ;;  %v2657_v63 = vrot.slane %v2655_v51, 4 }
  0xf7   : > { %v2312_v60 = vpop.permute.xlu1 %2311  ;;  %v1560_v56 = vrot.slane %v1558_v44, 5  ;;  %v1580_v3 = vrot.slane %v1579_v57, 4  ;;  %v2646_v44 = vrot.slane %v2644_v33, 4  ;;  %v2668_v46 = vshrl.u32 %v4359_v38, 16  ;;  %v4408_v33 = vld [vmem:[%s4702_s17 + $0x74] sm:$0x1] }
  0xf8   : > { %2407 = vst.msk [vmem:[#allocation2 + $0x4] sm:$0xf] %vm2405_vm13, %v2312_v60  ;;  %v2310_v1 = vpop.permute.xlu0 %2309  ;;  %v4175_v60 = vld [vmem:[%s4702_s17 + $0x60] sm:$0xf] }
  0xf9   : > { %2406 = vst.msk [vmem:[#allocation2] sm:$0xf] %vm2405_vm13, %v2310_v1  ;;  %3225 = vrot.lane.b32.xlu1 %v3129_v55, %s4667_s25  ;;  %v1556_v55 = vrot.slane %v1555_v43, 4  ;;  %v2642_v43 = vrot.slane %v2640_v32, 5 }
  0xfa   : > { %3223 = vrot.lane.b32.xlu0 %v3126_v61, %s4667_s25  ;;  %v1546_v61 = vrot.slane %v1545_v49, 4 }
  0xfb   : > { %v2316_v9 = vpop.permute.xlu1 %2315  ;;  %v1561_v2 = vsel %vm4713_vm2, %v1556_v55, %v1560_v56  ;;  %v2647_v55 = vor.u32 %v2646_v44, %v2642_v43 }
  0xfc   : > { %2409 = vst.msk [vmem:[#allocation2 + $0xc] sm:$0xf] %vm2405_vm13, %v2316_v9  ;;  %v2314_v13 = vpop.permute.xlu0 %2313  ;;  %v1551_v8 = vsel %vm4713_vm2, %v1546_v61, %v5351_v31  ;;  %v1570_v9 = vrot.slane %v1569_v62, 4  ;;  %v4360_v62 = vld [vmem:[%s4702_s17 + $0x74] sm:$0x1] }
  0xfd   : > { %2408 = vst.msk [vmem:[#allocation2 + $0x8] sm:$0xf] %vm2405_vm13, %v2314_v13  ;;  %3229 = vrot.lane.b32.xlu1 %v3136_v4, %s4667_s25  ;;  %v1584_v4 = vrot.slane %v1582_v58, 5  ;;  %v4259_v13 = vld [vmem:[%s4702_s17 + $0x54] sm:$0xe]  ;;  %v2670_v58 = vrot.slane %v2668_v46, 4 }
  0xfe   : > { %3227 = vrot.lane.b32.xlu0 %v3133_v10, %s4667_s25  ;;  %v4261_v10 = vld [vmem:[%s4702_s17 + $0x5c] sm:$0x1] }
  0xff   : > { %v2873_v21 = vpop.permute.xlu1 %2872  ;;  %v1585_v15 = vsel %vm4713_vm2, %v1580_v3, %v1584_v4  ;;  %v2050_v17 = vrot.slane %v4261_v10, 5  ;;  %v4320_v3 = vld [vmem:[%s4702_s17 + $0x70] sm:$0xf]  ;;  %v2648_v4 = vrot.slane %v2647_v55, 4 }
 0x100   : > { %2968 = vst.msk [vmem:[#allocation2 + $0x4] sm:$0xf] %vm2966_vm14, %v2873_v21  ;;  %v2871_v26 = vpop.permute.xlu0 %2870  ;;  %v1575_v21 = vsel %vm4713_vm2, %v1570_v9, %v5360_v45  ;;  %v2664_v45 = vshll.u32 %v4359_v38, 16  ;;  %v4319_v9 = vld [vmem:[%s4702_s17 + $0x6c] sm:$0xf] }
 0x101   : > { %2967 = vst.msk [vmem:[#allocation2] sm:$0xf] %vm2966_vm14, %v2871_v26  ;;  %1049 = vrot.lane.b32.xlu1 %v959_v18, %s4661_s19  ;;  %v4264_v18 = vld [vmem:[%s4702_s17 + $0x68] sm:$0x1]  ;;  %v4355_v26 = vld [vmem:[%s4702_s17 + $0x60] sm:$0xf]  ;;  %v2051_v31 = vsel %vm4860_vm6, %v2049_v16, %v2050_v17 }
 0x102   : > { %1047 = vrot.lane.b32.xlu0 %v956_v22, %s4661_s19  ;;  %v4295_v22 = vrot.slane %v4259_v13, 9  ;;  %v2631_v36 = vshrl.u32 %v4355_v26, 16  ;;  %v2634_v37 = vshll.u32 %v4355_v26, 16  ;;  %v2666_v57 = vrot.slane %v2664_v45, 5  ;;  %v838_v45 = vld [vmem:[%s4702_s17 + $0x68] sm:$0x1] }
 0x103   : > { %v2877_v35 = vpop.permute.xlu1 %2876  ;;  %v972_v51 = vrot.slane %v838_v45, 5 }
 0x104   : > { %2970 = vst.msk [vmem:[#allocation2 + $0xc] sm:$0xf] %vm2966_vm14, %v2877_v35  ;;  %v2875_v41 = vpop.permute.xlu0 %2874  ;;  %v2048_v35 = vsel %vm4860_vm6, %v4295_v22, %v2047_v5  ;;  %v2633_v49 = vrot.slane %v2631_v36, 4  ;;  %v2636_v50 = vrot.slane %v2634_v37, 5  ;;  %v2671_v6 = vor.u32 %v2670_v58, %v2666_v57  ;;  %v4407_v22 = vld [vmem:[%s4702_s17 + $0x70] sm:$0xf] }
 0x105   : > { %2969 = vst.msk [vmem:[#allocation2 + $0x8] sm:$0xf] %vm2966_vm14, %v2875_v41  ;;  %1053 = vrot.lane.b32.xlu1 %v966_v29, %s4661_s19  ;;  %v2057_v29 = vrot.slane %v4264_v18, 5  ;;  %v4406_v36 = vld [vmem:[%s4702_s17 + $0x6c] sm:$0xe] }
 0x106   : > { %1051 = vrot.lane.b32.xlu0 %v963_v30, %s4661_s19  ;;  %v4296_v30 = vrot.slane %v4262_v19, 9  ;;  %v2637_v61 = vor.u32 %v2636_v50, %v2633_v49  ;;  %v4440_v44 = vrot.slane %v4406_v36, 9 }
 0x107   : > { %v3210_v47 = vpop.permute.xlu1 %3209  ;;  %v2058_v41 = vsel %vm4860_vm6, %v2056_v28, %v2057_v29  ;;  %v3146_v29 = vrot.slane %v4407_v22, 5 }
 0x108   : > { %3305 = vst.msk [vmem:[#allocation2 + $0x4] sm:$0xf] %vm3303_vm15, %v3210_v47  ;;  %v3208_v53 = vpop.permute.xlu0 %3207  ;;  %v2638_v10 = vrot.slane %v2637_v61, 4 }
 0x109   : > { %3304 = vst.msk [vmem:[#allocation2] sm:$0xf] %vm3303_vm15, %v3208_v53  ;;  %1243 = vrot.lane.b32.xlu1 %v4174_v42, %s4662_s20  ;;  %v2055_v42 = vsel %vm4860_vm6, %v4296_v30, %v2054_v14  ;;  %v3148_v38 = vrot.slane %v3146_v29, 4  ;;  %v3147_v55 = vsel %vm4860_vm6, %v4440_v44, %v3146_v29 }
 0x10a   : > { %1241 = vrot.lane.b32.xlu0 %v4173_v48, %s4662_s20  ;;  %v4357_v48 = vld [vmem:[%s4702_s17 + $0x68] sm:$0x1]  ;;  %v2643_v19 = vsel %vm4713_vm2, %v2638_v10, %v2642_v43 }
 0x10b   : > { %v3214_v59 = vpop.permute.xlu1 %3213  ;;  %v2650_v56 = vshll.u32 %v4357_v48, 16 }
 0x10c   : > { %3307 = vst.msk [vmem:[#allocation2 + $0xc] sm:$0xf] %vm3303_vm15, %v3214_v59  ;;  %v3212_v1 = vpop.permute.xlu0 %3211 }
 0x10d   : > { %3306 = vst.msk [vmem:[#allocation2 + $0x8] sm:$0xf] %vm3303_vm15, %v3212_v1  ;;  %1247 = vrot.lane.b32.xlu1 %v4176_v54, %s4662_s20  ;;  %v4318_v54 = vld [vmem:[%s4702_s17 + $0x64] sm:$0xf]  ;;  %v2660_v1 = vrot.slane %v2658_v52, 5  ;;  %v2652_v5 = vrot.slane %v2650_v56, 5 }
 0x10e   : > { %1245 = vrot.lane.b32.xlu0 %v4175_v60, %s4662_s20  ;;  %v4317_v60 = vld [vmem:[%s4702_s17 + $0x60] sm:$0xf]  ;;  %v841_v52 = vld [vmem:[%s4702_s17 + $0x74] sm:$0x1] }
 0x10f   : > { %v1228_v7 = vpop.permute.xlu1 %1227  ;;  %v2653_v14 = vsel %vm4713_vm2, %v2648_v4, %v2652_v5  ;;  %v979_v61 = vrot.slane %v841_v52, 5 }
 0x110   : > { %1319 = vst.msk [vmem:[#allocation2 + $0x14] sm:$0xf] %vm1313_vm10, %v1228_v7  ;;  %v1226_v11 = vpop.permute.xlu0 %1225  ;;  %v4636_v12 = vld [vmem:[#allocation2] sm:$0xff]   ;;  %v2674_v7 = vshll.u32 %v4360_v62, 16 }
 0x111   : > { %1318 = vst.msk [vmem:[#allocation2 + $0x10] sm:$0xf] %vm1313_vm10, %v1226_v11  ;;  %1804 = vrot.lane.b32.xlu1 %v1561_v2, %s4663_s21  ;;  %4576 = vmatprep.mubr.msk.bf16.mxu0 %vm3468_vm0, %v4636_v12  ;;  %v2661_v11 = vor.u32 %v2660_v1, %v2657_v63  ;;  %v4404_v12 = vld [vmem:[%s4702_s17 + $0x64] sm:$0xf] }
 0x112   : > { %1802 = vrot.lane.b32.xlu0 %v1551_v8, %s4663_s21  ;;  %v2676_v16 = vrot.slane %v2674_v7, 5  ;;  %v3139_v17 = vrot.slane %v4404_v12, 5  ;;  %v4221_v7 = vld [vmem:[%s4702_s17 + $0x7c] sm:$0xf] }
 0x113   : > { %v1232_v20 = vpop.permute.xlu1 %1231 }
 0x114   : > { %1321 = vst.msk [vmem:[#allocation2 + $0x1c] sm:$0xf] %vm1313_vm10, %v1232_v20  ;;  %v1230_v24 = vpop.permute.xlu0 %1229  ;;  %v4637_v25 = vld [vmem:[#allocation2 + $0x8] sm:$0xff]   ;;  %v2662_v20 = vrot.slane %v2661_v11, 4  ;;  %v3141_v26 = vrot.slane %v3139_v17, 4 }
 0x115   : > { %1320 = vst.msk [vmem:[#allocation2 + $0x18] sm:$0xf] %vm1313_vm10, %v1230_v24  ;;  %1808 = vrot.lane.b32.xlu1 %v1585_v15, %s4663_s21  ;;  %4577 = vmatmul.mubr.msk.bf16.vlgmr.msra.gmra.mxu0 %vm3468_vm0, %v4637_v25  ;;  %v2672_v15 = vrot.slane %v2671_v6, 4  ;;  %v4403_v24 = vld [vmem:[%s4702_s17 + $0x60] sm:$0xe] }
 0x116   : > { %1806 = vrot.lane.b32.xlu0 %v1575_v21, %s4663_s21  ;;  %v4405_v21 = vld [vmem:[%s4702_s17 + $0x68] sm:$0x1]  ;;  %v4439_v32 = vrot.slane %v4403_v24, 9  ;;  %v4177_v24 = vld [vmem:[%s4702_s17 + $0x6c] sm:$0xf] }
 0x117   : > { %v1789_v34 = vpop.permute.xlu1 %1788  ;;  %v2677_v25 = vsel %vm4713_vm2, %v2672_v15, %v2676_v16  ;;  %v3142_v28 = vrot.slane %v4405_v21, 5  ;;  %v1624_v15 = vshrl.u32 %v4221_v7, 16 }
 0x118   : > { %1880 = vst.msk [vmem:[#allocation2 + $0x14] sm:$0xf] %vm1874_vm11, %v1789_v34  ;;  %v1787_v39 = vpop.permute.xlu0 %1786  ;;  %v837_v34 = vld [vmem:[%s4702_s17 + $0x64] sm:$0xf]  ;;  %v3140_v43 = vsel %vm4860_vm6, %v4439_v32, %v3139_v17  ;;  %v4219_v17 = vld [vmem:[%s4702_s17 + $0x74] sm:$0x1] }
 0x119   : > { %1879 = vst.msk [vmem:[#allocation2 + $0x10] sm:$0xf] %vm1874_vm11, %v1787_v39  ;;  %2141 = vrot.lane.b32.xlu1 %v2051_v31, %s4664_s22  ;;  %v2667_v31 = vsel %vm4713_vm2, %v2662_v20, %v2666_v57  ;;  %v3143_v37 = vsel %vm4860_vm6, %v3141_v26, %v3142_v28  ;;  %v3149_v39 = vrot.slane %v4408_v33, 5  ;;  %v969_v40 = vrot.slane %v837_v34, 5  ;;  %v4218_v57 = vld [vmem:[%s4702_s17 + $0x70] sm:$0xf] }
 0x11a   : > { %2139 = vrot.lane.b32.xlu0 %v2048_v35, %s4664_s22  ;;  %v1596_v1 = vshll.u32 %v4218_v57, 16  ;;  %v1606_v26 = vshll.u32 %v4219_v17, 16  ;;  %v1626_v29 = vrot.slane %v1624_v15, 4  ;;  %v4222_v32 = vld [vmem:[%s4702_s17 + $0x80] sm:$0x1] }
 0x11b   : > { %v1793_v47 = vpop.permute.xlu1 %1792  ;;  %v3150_v49 = vsel %vm4860_vm6, %v3148_v38, %v3149_v39  ;;  %v971_v50 = vrot.slane %v969_v40, 4  ;;  %v4179_v38 = vld [vmem:[%s4702_s17 + $0x78] sm:$0xf] }
 0x11c   : > { %1882 = vst.msk [vmem:[#allocation2 + $0x1c] sm:$0xf] %vm1874_vm11, %v1793_v47  ;;  %v1791_v53 = vpop.permute.xlu0 %1790  ;;  %v836_v47 = vld [vmem:[%s4702_s17 + $0x60] sm:$0xe]  ;;  %v5495_v12 = vrot.slane %v1596_v1, 5 }
 0x11d   : > { %1881 = vst.msk [vmem:[#allocation2 + $0x18] sm:$0xf] %vm1874_vm11, %v1791_v53  ;;  %2145 = vrot.lane.b32.xlu1 %v2058_v41, %s4664_s22  ;;  %v840_v41 = vld [vmem:[%s4702_s17 + $0x70] sm:$0xf]  ;;  %v839_v53 = vld [vmem:[%s4702_s17 + $0x6c] sm:$0xe]  ;;  %v973_v63 = vsel %vm4860_vm6, %v971_v50, %v972_v51 }
 0x11e   : > { %2143 = vrot.lane.b32.xlu0 %v2055_v42, %s4664_s22  ;;  %v976_v48 = vrot.slane %v840_v41, 5  ;;  %v4153_v56 = vrot.slane %v836_v47, 9  ;;  %v4154_v62 = vrot.slane %v839_v53, 9  ;;  %v4269_v53 = vld [vmem:[%s4702_s17 + $0x7c] sm:$0xf] }
 0x11f   : > { %v2126_v59 = vpop.permute.xlu1 %2125  ;;  %v4270_v1 = vld [vmem:[%s4702_s17 + $0x80] sm:$0x1] }
 0x120   : > { %2217 = vst.msk [vmem:[#allocation2 + $0x14] sm:$0xf] %vm2211_vm12, %v2126_v59  ;;  %v2124_v2 = vpop.permute.xlu0 %2123  ;;  %v4217_v59 = vld [vmem:[%s4702_s17 + $0x6c] sm:$0xf]  ;;  %v970_v4 = vsel %vm4860_vm6, %v4153_v56, %v969_v40  ;;  %v977_v11 = vsel %vm4860_vm6, %v4154_v62, %v976_v48  ;;  %v1608_v40 = vrot.slane %v1606_v26, 5 }
 0x121   : > { %2216 = vst.msk [vmem:[#allocation2 + $0x10] sm:$0xf] %vm2211_vm12, %v2124_v2  ;;  %2335 = vrot.lane.b32.xlu1 %v4318_v54, %s4665_s23  ;;  %v1600_v2 = vshrl.u32 %v4218_v57, 16  ;;  %v1587_v5 = vshrl.u32 %v4217_v59, 16  ;;  %v1590_v6 = vshll.u32 %v4217_v59, 16 }
 0x122   : > { %2333 = vrot.lane.b32.xlu0 %v4317_v60, %s4665_s23  ;;  %v978_v60 = vrot.slane %v976_v48, 4  ;;  %v4267_v57 = vld [vmem:[%s4702_s17 + $0x74] sm:$0x1]  ;;  %v4265_v59 = vld [vmem:[%s4702_s17 + $0x6c] sm:$0xe] }
 0x123   : > { %v2130_v8 = vpop.permute.xlu1 %2129 }
 0x124   : > { %2219 = vst.msk [vmem:[#allocation2 + $0x1c] sm:$0xf] %vm2211_vm12, %v2130_v8  ;;  %v2128_v13 = vpop.permute.xlu0 %2127  ;;  %v980_v10 = vsel %vm4860_vm6, %v978_v60, %v979_v61  ;;  %v2068_v60 = vrot.slane %v4269_v53, 5 }
 0x125   : > { %2218 = vst.msk [vmem:[#allocation2 + $0x18] sm:$0xf] %vm2211_vm12, %v2128_v13  ;;  %2339 = vrot.lane.b32.xlu1 %v4320_v3, %s4665_s23  ;;  %v1602_v13 = vrot.slane %v1600_v2, 4  ;;  %v4268_v2 = vld [vmem:[%s4702_s17 + $0x78] sm:$0xe] }
 0x126   : > { %2337 = vrot.lane.b32.xlu0 %v4319_v9, %s4665_s23  ;;  %v4220_v9 = vld [vmem:[%s4702_s17 + $0x78] sm:$0xf] }
 0x127   : > { %v2320_v18 = vpop.permute.xlu1 %2319  ;;  %v1611_v20 = vshrl.u32 %v4220_v9, 16  ;;  %v1614_v21 = vshll.u32 %v4220_v9, 16  ;;  %v2070_v9 = vrot.slane %v2068_v60, 4 }
 0x128   : > { %2411 = vst.msk [vmem:[#allocation2 + $0x14] sm:$0xf] %vm2405_vm13, %v2320_v18  ;;  %v2318_v23 = vpop.permute.xlu0 %2317  ;;  %v1589_v18 = vrot.slane %v1587_v5, 4  ;;  %v4297_v5 = vrot.slane %v4265_v59, 9 }
 0x129   : > { %2410 = vst.msk [vmem:[#allocation2 + $0x10] sm:$0xf] %vm2405_vm13, %v2318_v23  ;;  %2896 = vrot.lane.b32.xlu1 %v2653_v14, %s4666_s24  ;;  %v1620_v14 = vshll.u32 %v4221_v7, 16  ;;  %v4178_v23 = vld [vmem:[%s4702_s17 + $0x70] sm:$0xf]  ;;  %v1613_v33 = vrot.slane %v1611_v20, 4 }
 0x12a   : > { %2894 = vrot.lane.b32.xlu0 %v2643_v19, %s4666_s24  ;;  %v1592_v19 = vrot.slane %v1590_v6, 5  ;;  %v1616_v34 = vrot.slane %v1614_v21, 5  ;;  %v4362_v6 = vld [vmem:[%s4702_s17 + $0x7c] sm:$0xf]  ;;  %v4364_v21 = vld [vmem:[%s4702_s17 + $0x84] sm:$0xf] }
 0x12b   : > { %v2324_v30 = vpop.permute.xlu1 %2323  ;;  %v5505_v28 = vrot.slane %v1620_v14, 5  ;;  %v2692_v14 = vshrl.u32 %v4362_v6, 16 }
 0x12c   : > { %2413 = vst.msk [vmem:[#allocation2 + $0x1c] sm:$0xf] %vm2405_vm13, %v2324_v30  ;;  %v2322_v35 = vpop.permute.xlu0 %2321  ;;  %v1617_v45 = vor.u32 %v1616_v34, %v1613_v33  ;;  %v2703_v33 = vshrl.u32 %v4364_v21, 16  ;;  %v2706_v34 = vshll.u32 %v4364_v21, 16 }
 0x12d   : > { %2412 = vst.msk [vmem:[#allocation2 + $0x18] sm:$0xf] %vm2405_vm13, %v2322_v35  ;;  %2900 = vrot.lane.b32.xlu1 %v2677_v25, %s4666_s24  ;;  %v1603_v25 = vor.u32 %v1602_v13, %v5495_v12  ;;  %v1627_v41 = vor.u32 %v1626_v29, %v5505_v28  ;;  %v2688_v13 = vshll.u32 %v4362_v6, 16  ;;  %v4409_v6 = vld [vmem:[%s4702_s17 + $0x78] sm:$0xe] }
 0x12e   : > { %2898 = vrot.lane.b32.xlu0 %v2667_v31, %s4666_s24  ;;  %v1593_v31 = vor.u32 %v1592_v19, %v1589_v18  ;;  %v1618_v56 = vrot.slane %v1617_v45, 4  ;;  %v4365_v19 = vld [vmem:[%s4702_s17 + $0x88] sm:$0xf]  ;;  %v2705_v45 = vrot.slane %v2703_v33, 4 }
 0x12f   : > { %v2881_v42 = vpop.permute.xlu1 %2880  ;;  %v1604_v39 = vrot.slane %v1603_v25, 4  ;;  %v1628_v50 = vrot.slane %v1627_v41, 4  ;;  %v2694_v25 = vrot.slane %v2692_v14, 4  ;;  %v2712_v26 = vshll.u32 %v4365_v19, 16  ;;  %v4414_v14 = vld [vmem:[%s4702_s17 + $0x8c] sm:$0x1] }
 0x130   : > { %2972 = vst.msk [vmem:[#allocation2 + $0x14] sm:$0xf] %vm2966_vm14, %v2881_v42  ;;  %v2879_v46 = vpop.permute.xlu0 %2878  ;;  %v1630_v42 = vshll.u32 %v4222_v32, 16  ;;  %v1594_v44 = vrot.slane %v1593_v31, 4 }
 0x131   : > { %2971 = vst.msk [vmem:[#allocation2 + $0x10] sm:$0xf] %vm2966_vm14, %v2879_v46  ;;  %3233 = vrot.lane.b32.xlu1 %v3143_v37, %s4667_s25  ;;  %v4180_v37 = vld [vmem:[%s4702_s17 + $0x7c] sm:$0xf]  ;;  %v4266_v46 = vld [vmem:[%s4702_s17 + $0x70] sm:$0xf] }
 0x132   : > { %3231 = vrot.lane.b32.xlu0 %v3140_v43, %s4667_s25  ;;  %v1632_v51 = vrot.slane %v1630_v42, 5  ;;  %v2061_v52 = vrot.slane %v4266_v46, 5  ;;  %v4321_v42 = vld [vmem:[%s4702_s17 + $0x78] sm:$0xf]  ;;  %v2708_v46 = vrot.slane %v2706_v34, 5 }
 0x133   : > { %v2885_v54 = vpop.permute.xlu1 %2884  ;;  %v847_v34 = vld [vmem:[%s4702_s17 + $0x8c] sm:$0x1] }
 0x134   : > { %2974 = vst.msk [vmem:[#allocation2 + $0x1c] sm:$0xf] %vm2966_vm14, %v2885_v54  ;;  %v2883_v58 = vpop.permute.xlu0 %2882  ;;  %v1633_v61 = vsel %vm4713_vm2, %v1628_v50, %v1632_v51  ;;  %v2063_v62 = vrot.slane %v2061_v52, 4 }
 0x135   : > { %2973 = vst.msk [vmem:[#allocation2 + $0x18] sm:$0xf] %vm2966_vm14, %v2883_v58  ;;  %3237 = vrot.lane.b32.xlu1 %v3150_v49, %s4667_s25  ;;  %v1609_v49 = vsel %vm4713_vm2, %v1604_v39, %v1608_v40  ;;  %v2714_v39 = vrot.slane %v2712_v26, 5  ;;  %v844_v26 = vld [vmem:[%s4702_s17 + $0x80] sm:$0x1] }
 0x136   : > { %3235 = vrot.lane.b32.xlu0 %v3147_v55, %s4667_s25  ;;  %v1599_v55 = vsel %vm4713_vm2, %v1594_v44, %v5495_v12  ;;  %v4366_v44 = vld [vmem:[%s4702_s17 + $0x8c] sm:$0x1]  ;;  %v986_v33 = vrot.slane %v844_v26, 5 }
 0x137   : > { %v3218_v3 = vpop.permute.xlu1 %3217 }
 0x138   : > { %3309 = vst.msk [vmem:[#allocation2 + $0x14] sm:$0xf] %vm3303_vm15, %v3218_v3  ;;  %v3216_v8 = vpop.permute.xlu0 %3215 }
 0x139   : > { %3308 = vst.msk [vmem:[#allocation2 + $0x10] sm:$0xf] %vm3303_vm15, %v3216_v8  ;;  %1057 = vrot.lane.b32.xlu1 %v973_v63, %s4661_s19  ;;  %v2064_v63 = vrot.slane %v4267_v57, 5  ;;  %v4361_v8 = vld [vmem:[%s4702_s17 + $0x78] sm:$0xf] }
 0x13a   : > { %1055 = vrot.lane.b32.xlu0 %v970_v4, %s4661_s19  ;;  %v1623_v4 = vsel %vm4713_vm2, %v1618_v56, %v5505_v28  ;;  %v2679_v17 = vshrl.u32 %v4361_v8, 16  ;;  %v2682_v18 = vshll.u32 %v4361_v8, 16  ;;  %v2716_v28 = vshrl.u32 %v4365_v19, 16  ;;  %v4410_v57 = vld [vmem:[%s4702_s17 + $0x7c] sm:$0xf] }
 0x13b   : > { %v3222_v16 = vpop.permute.xlu1 %3221  ;;  %v2065_v12 = vsel %vm4860_vm6, %v2063_v62, %v2064_v63  ;;  %v2709_v56 = vor.u32 %v2708_v46, %v2705_v45  ;;  %v3153_v62 = vrot.slane %v4410_v57, 5  ;;  %v4225_v57 = vld [vmem:[%s4702_s17 + $0x8c] sm:$0x1] }
 0x13c   : > { %3311 = vst.msk [vmem:[#allocation2 + $0x1c] sm:$0xf] %vm3303_vm15, %v3222_v16  ;;  %v3220_v22 = vpop.permute.xlu0 %3219  ;;  %v2062_v16 = vsel %vm4860_vm6, %v4297_v5, %v2061_v52  ;;  %v2681_v31 = vrot.slane %v2679_v17, 4  ;;  %v2684_v32 = vrot.slane %v2682_v18, 5  ;;  %v2718_v40 = vrot.slane %v2716_v28, 4 }
 0x13d   : > { %3310 = vst.msk [vmem:[#allocation2 + $0x18] sm:$0xf] %vm3303_vm15, %v3220_v22  ;;  %1061 = vrot.lane.b32.xlu1 %v980_v10, %s4661_s19  ;;  %v2071_v10 = vrot.slane %v4270_v1, 5  ;;  %v2722_v52 = vshll.u32 %v4366_v44, 16  ;;  %v3155_v8 = vrot.slane %v3153_v62, 4 }
 0x13e   : > { %1059 = vrot.lane.b32.xlu0 %v977_v11, %s4661_s19  ;;  %v4298_v11 = vrot.slane %v4268_v2, 9  ;;  %v2719_v51 = vor.u32 %v2718_v40, %v2714_v39  ;;  %v2710_v2 = vrot.slane %v2709_v56, 4  ;;  %v4412_v17 = vld [vmem:[%s4702_s17 + $0x84] sm:$0xe] }
 0x13f   : > { %v1046_v30 = vpop.permute.xlu1 %1045  ;;  %v2072_v22 = vsel %vm4860_vm6, %v2070_v9, %v2071_v10 }
 0x140   : > { %1131 = vst.msk [vmem:[#allocation2 + $0x2c] sm:$0xf] %vm1119_vm9, %v1046_v30  ;;  %v1044_v35 = vpop.permute.xlu0 %1043  ;;  %v4638_v36 = vld [vmem:[#allocation2 + $0x10] sm:$0xff]   ;;  %v4363_v30 = vld [vmem:[%s4702_s17 + $0x80] sm:$0x1] }
 0x141   : > { %1130 = vst.msk [vmem:[#allocation2 + $0x28] sm:$0xf] %vm1119_vm9, %v1044_v35  ;;  %1251 = vrot.lane.b32.xlu1 %v4178_v23, %s4662_s20  ;;  %4580 = vmatprep.mubr.msk.bf16.mxu0 %vm3468_vm0, %v4638_v36  ;;  %v2069_v23 = vsel %vm4860_vm6, %v4298_v11, %v2068_v60  ;;  %v4322_v36 = vld [vmem:[%s4702_s17 + $0x7c] sm:$0xf]  ;;  %v2720_v60 = vrot.slane %v2719_v51, 4 }
 0x142   : > { %1249 = vrot.lane.b32.xlu0 %v4177_v24, %s4662_s20  ;;  %v2690_v24 = vrot.slane %v2688_v13, 5  ;;  %v4441_v13 = vrot.slane %v4409_v6, 9  ;;  %v4182_v6 = vld [vmem:[%s4702_s17 + $0x88] sm:$0xf] }
 0x143   : > { %v1236_v43 = vpop.permute.xlu1 %1235 }
 0x144   : > { %1323 = vst.msk [vmem:[#allocation2 + $0x24] sm:$0xf] %vm1313_vm10, %v1236_v43  ;;  %v1234_v47 = vpop.permute.xlu0 %1233  ;;  %v4639_v48 = vld [vmem:[#allocation2 + $0x18] sm:$0xff]   ;;  %v2685_v43 = vor.u32 %v2684_v32, %v2681_v31 }
 0x145   : > { %1322 = vst.msk [vmem:[#allocation2 + $0x20] sm:$0xf] %vm1313_vm10, %v1234_v47  ;;  %1255 = vrot.lane.b32.xlu1 %v4180_v37, %s4662_s20  ;;  %4581 = vmatmul.mubr.msk.bf16.gmra.mxu0 %vm3468_vm0, %v4639_v48  ;;  %v2695_v37 = vor.u32 %v2694_v25, %v2690_v24  ;;  %v4324_v48 = vld [vmem:[%s4702_s17 + $0x88] sm:$0xf]  ;;  %v4442_v25 = vrot.slane %v4412_v17, 9 }
 0x146   : > { %1253 = vrot.lane.b32.xlu0 %v4179_v38, %s4662_s20  ;;  %v2698_v38 = vshll.u32 %v4363_v30, 16 }
 0x147   : > { %v1240_v54 = vpop.permute.xlu1 %1239 }
 0x148   : > { %1325 = vst.msk [vmem:[#allocation2 + $0x2c] sm:$0xf] %vm1313_vm10, %v1240_v54  ;;  %v1238_v58 = vpop.permute.xlu0 %1237  ;;  %v2700_v50 = vrot.slane %v2698_v38, 5  ;;  %v4323_v54 = vld [vmem:[%s4702_s17 + $0x84] sm:$0xf] }
 0x149   : > { %1324 = vst.msk [vmem:[#allocation2 + $0x28] sm:$0xf] %vm1313_vm10, %v1238_v58  ;;  %1812 = vrot.lane.b32.xlu1 %v1609_v49, %s4663_s21  ;;  %v2696_v49 = vrot.slane %v2695_v37, 4 }
 0x14a   : > { %1810 = vrot.lane.b32.xlu0 %v1599_v55, %s4663_s21  ;;  %v2686_v55 = vrot.slane %v2685_v43, 4  ;;  %v993_v43 = vrot.slane %v847_v34, 5 }
 0x14b   : > { %v1797_v3 = vpop.permute.xlu1 %1796  ;;  %v2701_v59 = vsel %vm4713_vm2, %v2696_v49, %v2700_v50 }
 0x14c   : > { %1884 = vst.msk [vmem:[#allocation2 + $0x24] sm:$0xf] %vm1874_vm11, %v1797_v3  ;;  %v1795_v7 = vpop.permute.xlu0 %1794  ;;  %v2691_v1 = vsel %vm4713_vm2, %v2686_v55, %v2690_v24  ;;  %v4411_v3 = vld [vmem:[%s4702_s17 + $0x80] sm:$0x1]  ;;  %v3154_v24 = vsel %vm4860_vm6, %v4441_v13, %v3153_v62 }
 0x14d   : > { %1883 = vst.msk [vmem:[#allocation2 + $0x20] sm:$0xf] %vm1874_vm11, %v1795_v7  ;;  %1816 = vrot.lane.b32.xlu1 %v1633_v61, %s4663_s21  ;;  %v2724_v61 = vrot.slane %v2722_v52, 5  ;;  %v3156_v9 = vrot.slane %v4411_v3, 5  ;;  %v4227_v52 = vld [vmem:[%s4702_s17 + $0x94] sm:$0xf] }
 0x14e   : > { %1814 = vrot.lane.b32.xlu0 %v1623_v4, %s4663_s21  ;;  %v4413_v4 = vld [vmem:[%s4702_s17 + $0x88] sm:$0xf] }
 0x14f   : > { %v1801_v15 = vpop.permute.xlu1 %1800  ;;  %v2725_v7 = vsel %vm4713_vm2, %v2720_v60, %v2724_v61  ;;  %v3160_v10 = vrot.slane %v4413_v4, 5  ;;  %v3157_v18 = vsel %vm4860_vm6, %v3155_v8, %v3156_v9  ;;  %v1668_v60 = vshll.u32 %v4227_v52, 16 }
 0x150   : > { %1886 = vst.msk [vmem:[#allocation2 + $0x2c] sm:$0xf] %vm1874_vm11, %v1801_v15  ;;  %v1799_v20 = vpop.permute.xlu0 %1798  ;;  %v843_v15 = vld [vmem:[%s4702_s17 + $0x7c] sm:$0xf]  ;;  %v1672_v61 = vshrl.u32 %v4227_v52, 16  ;;  %v1654_v9 = vshll.u32 %v4225_v57, 16 }
 0x151   : > { %1885 = vst.msk [vmem:[#allocation2 + $0x28] sm:$0xf] %vm1874_vm11, %v1799_v20  ;;  %2149 = vrot.lane.b32.xlu1 %v2065_v12, %s4664_s22  ;;  %v2715_v12 = vsel %vm4713_vm2, %v2710_v2, %v2714_v39  ;;  %v3162_v19 = vrot.slane %v3160_v10, 4  ;;  %v3163_v20 = vrot.slane %v4414_v14, 5  ;;  %v983_v21 = vrot.slane %v843_v15, 5 }
 0x152   : > { %2147 = vrot.lane.b32.xlu0 %v2062_v16, %s4664_s22  ;;  %v3161_v37 = vsel %vm4860_vm6, %v4442_v25, %v3160_v10  ;;  %v4224_v39 = vld [vmem:[%s4702_s17 + $0x88] sm:$0xf]  ;;  %v1670_v10 = vrot.slane %v1668_v60, 5  ;;  %v4228_v14 = vld [vmem:[%s4702_s17 + $0x98] sm:$0x1] }
 0x153   : > { %v2134_v29 = vpop.permute.xlu1 %2133  ;;  %v3164_v31 = vsel %vm4860_vm6, %v3162_v19, %v3163_v20  ;;  %v985_v32 = vrot.slane %v983_v21, 4  ;;  %v1644_v46 = vshll.u32 %v4224_v39, 16  ;;  %v4184_v19 = vld [vmem:[%s4702_s17 + $0x94] sm:$0xf]  ;;  %v4183_v25 = vld [vmem:[%s4702_s17 + $0x90] sm:$0xf] }
 0x154   : > { %2221 = vst.msk [vmem:[#allocation2 + $0x24] sm:$0xf] %vm2211_vm12, %v2134_v29  ;;  %v2132_v35 = vpop.permute.xlu0 %2131  ;;  %v842_v29 = vld [vmem:[%s4702_s17 + $0x78] sm:$0xe] }
 0x155   : > { %2220 = vst.msk [vmem:[#allocation2 + $0x20] sm:$0xf] %vm2211_vm12, %v2132_v35  ;;  %2153 = vrot.lane.b32.xlu1 %v2072_v22, %s4664_s22  ;;  %v846_v22 = vld [vmem:[%s4702_s17 + $0x88] sm:$0xf]  ;;  %v845_v35 = vld [vmem:[%s4702_s17 + $0x84] sm:$0xe]  ;;  %v987_v45 = vsel %vm4860_vm6, %v985_v32, %v986_v33 }
 0x156   : > { %2151 = vrot.lane.b32.xlu0 %v2069_v23, %s4664_s22  ;;  %v990_v30 = vrot.slane %v846_v22, 5  ;;  %v4155_v38 = vrot.slane %v842_v29, 9  ;;  %v4156_v44 = vrot.slane %v845_v35, 9  ;;  %v4272_v29 = vld [vmem:[%s4702_s17 + $0x88] sm:$0xf] }
 0x157   : > { %v2138_v41 = vpop.permute.xlu1 %2137  ;;  %v2075_v34 = vrot.slane %v4272_v29, 5  ;;  %v4275_v35 = vld [vmem:[%s4702_s17 + $0x94] sm:$0xf] }
 0x158   : > { %2223 = vst.msk [vmem:[#allocation2 + $0x2c] sm:$0xf] %vm2211_vm12, %v2138_v41  ;;  %v2136_v47 = vpop.permute.xlu0 %2135  ;;  %v4223_v41 = vld [vmem:[%s4702_s17 + $0x84] sm:$0xf]  ;;  %v984_v49 = vsel %vm4860_vm6, %v4155_v38, %v983_v21  ;;  %v991_v56 = vsel %vm4860_vm6, %v4156_v44, %v990_v30  ;;  %v1656_v21 = vrot.slane %v1654_v9, 5 }
 0x159   : > { %2222 = vst.msk [vmem:[#allocation2 + $0x28] sm:$0xf] %vm2211_vm12, %v2136_v47  ;;  %2343 = vrot.lane.b32.xlu1 %v4322_v36, %s4665_s23  ;;  %v1648_v47 = vshrl.u32 %v4224_v39, 16  ;;  %v1635_v50 = vshrl.u32 %v4223_v41, 16  ;;  %v1638_v51 = vshll.u32 %v4223_v41, 16  ;;  %v2077_v44 = vrot.slane %v2075_v34, 4 }
 0x15a   : > { %2341 = vrot.lane.b32.xlu0 %v4321_v42, %s4665_s23  ;;  %v992_v42 = vrot.slane %v990_v30, 4  ;;  %v4273_v39 = vld [vmem:[%s4702_s17 + $0x8c] sm:$0x1]  ;;  %v4271_v41 = vld [vmem:[%s4702_s17 + $0x84] sm:$0xe] }
 0x15b   : > { %v2328_v53 = vpop.permute.xlu1 %2327 }
 0x15c   : > { %2415 = vst.msk [vmem:[#allocation2 + $0x24] sm:$0xf] %vm2405_vm13, %v2328_v53  ;;  %v2326_v58 = vpop.permute.xlu0 %2325  ;;  %v994_v55 = vsel %vm4860_vm6, %v992_v42, %v993_v43  ;;  %v2082_v42 = vrot.slane %v4275_v35, 5 }
 0x15d   : > { %2414 = vst.msk [vmem:[#allocation2 + $0x20] sm:$0xf] %vm2405_vm13, %v2326_v58  ;;  %2347 = vrot.lane.b32.xlu1 %v4324_v48, %s4665_s23  ;;  %v5640_v58 = vrot.slane %v1644_v46, 5  ;;  %v4276_v46 = vld [vmem:[%s4702_s17 + $0x98] sm:$0x1] }
 0x15e   : > { %2345 = vrot.lane.b32.xlu0 %v4323_v54, %s4665_s23  ;;  %v4226_v54 = vld [vmem:[%s4702_s17 + $0x90] sm:$0xf] }
 0x15f   : > { %v2332_v63 = vpop.permute.xlu1 %2331  ;;  %v1659_v2 = vshrl.u32 %v4226_v54, 16  ;;  %v1662_v3 = vshll.u32 %v4226_v54, 16  ;;  %v2084_v54 = vrot.slane %v2082_v42, 4 }
 0x160   : > { %2417 = vst.msk [vmem:[#allocation2 + $0x2c] sm:$0xf] %vm2405_vm13, %v2332_v63  ;;  %v2330_v5 = vpop.permute.xlu0 %2329  ;;  %v1637_v63 = vrot.slane %v1635_v50, 4  ;;  %v4299_v50 = vrot.slane %v4271_v41, 9 }
 0x161   : > { %2416 = vst.msk [vmem:[#allocation2 + $0x28] sm:$0xf] %vm2405_vm13, %v2330_v5  ;;  %2904 = vrot.lane.b32.xlu1 %v2701_v59, %s4666_s24  ;;  %v1650_v59 = vrot.slane %v1648_v47, 4  ;;  %v1661_v15 = vrot.slane %v1659_v2, 4  ;;  %v4274_v47 = vld [vmem:[%s4702_s17 + $0x90] sm:$0xe] }
 0x162   : > { %2902 = vrot.lane.b32.xlu0 %v2691_v1, %s4666_s24  ;;  %v1640_v1 = vrot.slane %v1638_v51, 5  ;;  %v4368_v51 = vld [vmem:[%s4702_s17 + $0x94] sm:$0xf] }
 0x163   : > { %v2889_v11 = vpop.permute.xlu1 %2888  ;;  %v1651_v8 = vor.u32 %v1650_v59, %v5640_v58  ;;  %v2740_v59 = vshrl.u32 %v4368_v51, 16 }
 0x164   : > { %2976 = vst.msk [vmem:[#allocation2 + $0x24] sm:$0xf] %vm2966_vm14, %v2889_v11  ;;  %v2887_v16 = vpop.permute.xlu0 %2886  ;;  %v1674_v11 = vrot.slane %v1672_v61, 4  ;;  %v1641_v13 = vor.u32 %v1640_v1, %v1637_v63  ;;  %v2076_v61 = vsel %vm4860_vm6, %v4299_v50, %v2075_v34  ;;  %v4371_v1 = vld [vmem:[%s4702_s17 + $0xa0] sm:$0xf] }
 0x165   : > { %2975 = vst.msk [vmem:[#allocation2 + $0x20] sm:$0xf] %vm2966_vm14, %v2887_v16  ;;  %2908 = vrot.lane.b32.xlu1 %v2725_v7, %s4666_s24  ;;  %v4181_v7 = vld [vmem:[%s4702_s17 + $0x84] sm:$0xf]  ;;  %v1664_v16 = vrot.slane %v1662_v3, 5  ;;  %v1652_v20 = vrot.slane %v1651_v8, 4 }
 0x166   : > { %2906 = vrot.lane.b32.xlu0 %v2715_v12, %s4666_s24  ;;  %v1675_v22 = vor.u32 %v1674_v11, %v1670_v10  ;;  %v1642_v26 = vrot.slane %v1641_v13, 4  ;;  %v4370_v3 = vld [vmem:[%s4702_s17 + $0x9c] sm:$0xf]  ;;  %v2760_v8 = vshll.u32 %v4371_v1, 16  ;;  %v2764_v9 = vshrl.u32 %v4371_v1, 16 }
 0x167   : > { %v2893_v23 = vpop.permute.xlu1 %2892  ;;  %v4369_v11 = vld [vmem:[%s4702_s17 + $0x98] sm:$0x1] }
 0x168   : > { %2978 = vst.msk [vmem:[#allocation2 + $0x2c] sm:$0xf] %vm2966_vm14, %v2893_v23  ;;  %v2891_v28 = vpop.permute.xlu0 %2890  ;;  %v1678_v23 = vshll.u32 %v4228_v14, 16  ;;  %v1676_v32 = vrot.slane %v1675_v22, 4  ;;  %v2751_v14 = vshrl.u32 %v4370_v3, 16 }
 0x169   : > { %2977 = vst.msk [vmem:[#allocation2 + $0x28] sm:$0xf] %vm2966_vm14, %v2891_v28  ;;  %3241 = vrot.lane.b32.xlu1 %v3157_v18, %s4667_s25  ;;  %v1665_v28 = vor.u32 %v1664_v16, %v1661_v15  ;;  %v2754_v15 = vshll.u32 %v4370_v3, 16 }
 0x16a   : > { %3239 = vrot.lane.b32.xlu0 %v3154_v24, %s4667_s25  ;;  %v1680_v33 = vrot.slane %v1678_v23, 5  ;;  %v4325_v23 = vld [vmem:[%s4702_s17 + $0x90] sm:$0xf] }
 0x16b   : > { %v3226_v36 = vpop.permute.xlu1 %3225  ;;  %v1666_v38 = vrot.slane %v1665_v28, 4  ;;  %v2756_v28 = vrot.slane %v2754_v15, 5  ;;  %v853_v15 = vld [vmem:[%s4702_s17 + $0xa4] sm:$0x1] }
 0x16c   : > { %3313 = vst.msk [vmem:[#allocation2 + $0x24] sm:$0xf] %vm3303_vm15, %v3226_v36  ;;  %v3224_v40 = vpop.permute.xlu0 %3223  ;;  %v1681_v43 = vsel %vm4713_vm2, %v1676_v32, %v1680_v33 }
 0x16d   : > { %3312 = vst.msk [vmem:[#allocation2 + $0x20] sm:$0xf] %vm3303_vm15, %v3224_v40  ;;  %3245 = vrot.lane.b32.xlu1 %v3164_v31, %s4667_s25  ;;  %v1657_v31 = vsel %vm4713_vm2, %v1652_v20, %v1656_v21  ;;  %v2762_v20 = vrot.slane %v2760_v8, 5  ;;  %v2766_v21 = vrot.slane %v2764_v9, 4  ;;  %v850_v8 = vld [vmem:[%s4702_s17 + $0x98] sm:$0x1] }
 0x16e   : > { %3243 = vrot.lane.b32.xlu0 %v3161_v37, %s4667_s25  ;;  %v1647_v37 = vsel %vm4713_vm2, %v1642_v26, %v5640_v58  ;;  %v2736_v58 = vshll.u32 %v4368_v51, 16  ;;  %v2753_v26 = vrot.slane %v2751_v14, 4  ;;  %v4415_v51 = vld [vmem:[%s4702_s17 + $0x90] sm:$0xe]  ;;  %v1000_v14 = vrot.slane %v850_v8, 5 }
 0x16f   : > { %v3230_v48 = vpop.permute.xlu1 %3229  ;;  %v2767_v33 = vor.u32 %v2766_v21, %v2762_v20 }
 0x170   : > { %3315 = vst.msk [vmem:[#allocation2 + $0x2c] sm:$0xf] %vm3303_vm15, %v3230_v48  ;;  %v3228_v53 = vpop.permute.xlu0 %3227 }
 0x171   : > { %3314 = vst.msk [vmem:[#allocation2 + $0x28] sm:$0xf] %vm3303_vm15, %v3228_v53  ;;  %1065 = vrot.lane.b32.xlu1 %v987_v45, %s4661_s19  ;;  %v2078_v45 = vrot.slane %v4273_v39, 5  ;;  %v4367_v53 = vld [vmem:[%s4702_s17 + $0x90] sm:$0xf] }
 0x172   : > { %1063 = vrot.lane.b32.xlu0 %v984_v49, %s4661_s19  ;;  %v1671_v49 = vsel %vm4713_vm2, %v1666_v38, %v1670_v10  ;;  %v2730_v63 = vshll.u32 %v4367_v53, 16  ;;  %v2757_v38 = vor.u32 %v2756_v28, %v2753_v26  ;;  %v4416_v39 = vld [vmem:[%s4702_s17 + $0x94] sm:$0xf] }
 0x173   : > { %v1050_v62 = vpop.permute.xlu1 %1049  ;;  %v2079_v57 = vsel %vm4860_vm6, %v2077_v44, %v2078_v45  ;;  %v3167_v44 = vrot.slane %v4416_v39, 5  ;;  %v4231_v39 = vld [vmem:[%s4702_s17 + $0xa4] sm:$0x1] }
 0x174   : > { %1133 = vst.msk [vmem:[#allocation2 + $0x34] sm:$0xf] %vm1119_vm9, %v1050_v62  ;;  %v1048_v4 = vpop.permute.xlu0 %1047  ;;  %v4640_v5 = vld [vmem:[#allocation2 + $0x20] sm:$0xff]   ;;  %v2727_v62 = vshrl.u32 %v4367_v53, 16  ;;  %v2732_v13 = vrot.slane %v2730_v63, 5 }
 0x175   : > { %1132 = vst.msk [vmem:[#allocation2 + $0x30] sm:$0xf] %vm1119_vm9, %v1048_v4  ;;  %1069 = vrot.lane.b32.xlu1 %v994_v55, %s4661_s19  ;;  %4584 = vmatprep.mubr.msk.bf16.mxu0 %vm3468_vm0, %v4640_v5  ;;  %v2085_v55 = vrot.slane %v4276_v46, 5  ;;  %v3169_v53 = vrot.slane %v3167_v44, 4 }
 0x176   : > { %1067 = vrot.lane.b32.xlu0 %v991_v56, %s4661_s19  ;;  %v4300_v56 = vrot.slane %v4274_v47, 9  ;;  %v2758_v47 = vrot.slane %v2757_v38, 4 }
 0x177   : > { %v1054_v12 = vpop.permute.xlu1 %1053  ;;  %v2086_v4 = vsel %vm4860_vm6, %v2084_v54, %v2085_v55 }
 0x178   : > { %1135 = vst.msk [vmem:[#allocation2 + $0x3c] sm:$0xf] %vm1119_vm9, %v1054_v12  ;;  %v1052_v17 = vpop.permute.xlu0 %1051  ;;  %v4641_v18 = vld [vmem:[#allocation2 + $0x28] sm:$0xff]   ;;  %v2083_v5 = vsel %vm4860_vm6, %v4300_v56, %v2082_v42  ;;  %v2729_v12 = vrot.slane %v2727_v62, 4  ;;  %v2768_v42 = vrot.slane %v2767_v33, 4 }
 0x179   : > { %1134 = vst.msk [vmem:[#allocation2 + $0x38] sm:$0xf] %vm1119_vm9, %v1052_v17  ;;  %1259 = vrot.lane.b32.xlu1 %v4182_v6, %s4662_s20  ;;  %4585 = vmatmul.mubr.msk.bf16.gmra.mxu0 %vm3468_vm0, %v4641_v18  ;;  %v2738_v6 = vrot.slane %v2736_v58, 5  ;;  %v4326_v17 = vld [vmem:[%s4702_s17 + $0x94] sm:$0xf]  ;;  %v4443_v58 = vrot.slane %v4415_v51, 9 }
 0x17a   : > { %1257 = vrot.lane.b32.xlu0 %v4181_v7, %s4662_s20  ;;  %v2742_v7 = vrot.slane %v2740_v59, 4  ;;  %v4420_v59 = vld [vmem:[%s4702_s17 + $0xa4] sm:$0x1]  ;;  %v4418_v62 = vld [vmem:[%s4702_s17 + $0x9c] sm:$0xe] }
 0x17b   : > { %v1244_v24 = vpop.permute.xlu1 %1243  ;;  %v4186_v51 = vld [vmem:[%s4702_s17 + $0xa0] sm:$0xf] }
 0x17c   : > { %1327 = vst.msk [vmem:[#allocation2 + $0x34] sm:$0xf] %vm1313_vm10, %v1244_v24  ;;  %v1242_v30 = vpop.permute.xlu0 %1241  ;;  %v2743_v18 = vor.u32 %v2742_v7, %v2738_v6  ;;  %v2733_v24 = vor.u32 %v2732_v13, %v2729_v12  ;;  %v4444_v7 = vrot.slane %v4418_v62, 9 }
 0x17d   : > { %1326 = vst.msk [vmem:[#allocation2 + $0x30] sm:$0xf] %vm1313_vm10, %v1242_v30  ;;  %1263 = vrot.lane.b32.xlu1 %v4184_v19, %s4662_s20  ;;  %v2746_v19 = vshll.u32 %v4369_v11, 16  ;;  %v4328_v30 = vld [vmem:[%s4702_s17 + $0xa0] sm:$0xf] }
 0x17e   : > { %1261 = vrot.lane.b32.xlu0 %v4183_v25, %s4662_s20  ;;  %v4372_v25 = vld [vmem:[%s4702_s17 + $0xa4] sm:$0x1] }
 0x17f   : > { %v1248_v36 = vpop.permute.xlu1 %1247  ;;  %v2748_v32 = vrot.slane %v2746_v19, 5  ;;  %v2770_v34 = vshll.u32 %v4372_v25, 16 }
 0x180   : > { %1329 = vst.msk [vmem:[#allocation2 + $0x3c] sm:$0xf] %vm1313_vm10, %v1248_v36  ;;  %v1246_v40 = vpop.permute.xlu0 %1245  ;;  %v4327_v36 = vld [vmem:[%s4702_s17 + $0x9c] sm:$0xf] }
 0x181   : > { %1328 = vst.msk [vmem:[#allocation2 + $0x38] sm:$0xf] %vm1313_vm10, %v1246_v40  ;;  %1820 = vrot.lane.b32.xlu1 %v1657_v31, %s4663_s21  ;;  %v2744_v31 = vrot.slane %v2743_v18, 4 }
 0x182   : > { %1818 = vrot.lane.b32.xlu0 %v1647_v37, %s4663_s21  ;;  %v2734_v37 = vrot.slane %v2733_v24, 4  ;;  %v1007_v24 = vrot.slane %v853_v15, 5 }
 0x183   : > { %v1805_v48 = vpop.permute.xlu1 %1804  ;;  %v2749_v41 = vsel %vm4713_vm2, %v2744_v31, %v2748_v32 }
 0x184   : > { %1888 = vst.msk [vmem:[#allocation2 + $0x34] sm:$0xf] %vm1874_vm11, %v1805_v48  ;;  %v1803_v52 = vpop.permute.xlu0 %1802  ;;  %v2739_v46 = vsel %vm4713_vm2, %v2734_v37, %v2738_v6  ;;  %v4417_v48 = vld [vmem:[%s4702_s17 + $0x98] sm:$0x1]  ;;  %v3168_v6 = vsel %vm4860_vm6, %v4443_v58, %v3167_v44 }
 0x185   : > { %1887 = vst.msk [vmem:[#allocation2 + $0x30] sm:$0xf] %vm1874_vm11, %v1803_v52  ;;  %1824 = vrot.lane.b32.xlu1 %v1681_v43, %s4663_s21  ;;  %v2772_v43 = vrot.slane %v2770_v34, 5  ;;  %v3170_v54 = vrot.slane %v4417_v48, 5  ;;  %v4233_v34 = vld [vmem:[%s4702_s17 + $0xac] sm:$0xf] }
 0x186   : > { %1822 = vrot.lane.b32.xlu0 %v1671_v49, %s4663_s21  ;;  %v4419_v49 = vld [vmem:[%s4702_s17 + $0xa0] sm:$0xf] }
 0x187   : > { %v1809_v60 = vpop.permute.xlu1 %1808  ;;  %v2773_v52 = vsel %vm4713_vm2, %v2768_v42, %v2772_v43  ;;  %v3174_v55 = vrot.slane %v4419_v49, 5  ;;  %v3171_v63 = vsel %vm4860_vm6, %v3169_v53, %v3170_v54  ;;  %v1716_v42 = vshll.u32 %v4233_v34, 16 }
 0x188   : > { %1890 = vst.msk [vmem:[#allocation2 + $0x3c] sm:$0xf] %vm1874_vm11, %v1809_v60  ;;  %v1807_v2 = vpop.permute.xlu0 %1806  ;;  %v849_v60 = vld [vmem:[%s4702_s17 + $0x94] sm:$0xf]  ;;  %v1720_v43 = vshrl.u32 %v4233_v34, 16  ;;  %v1702_v54 = vshll.u32 %v4231_v39, 16 }
 0x189   : > { %1889 = vst.msk [vmem:[#allocation2 + $0x38] sm:$0xf] %vm1874_vm11, %v1807_v2  ;;  %2157 = vrot.lane.b32.xlu1 %v2079_v57, %s4664_s22  ;;  %v2763_v57 = vsel %vm4713_vm2, %v2758_v47, %v2762_v20  ;;  %v3176_v1 = vrot.slane %v3174_v55, 4  ;;  %v3177_v2 = vrot.slane %v4420_v59, 5  ;;  %v997_v3 = vrot.slane %v849_v60, 5 }
 0x18a   : > { %2155 = vrot.lane.b32.xlu0 %v2076_v61, %s4664_s22  ;;  %v3175_v18 = vsel %vm4860_vm6, %v4444_v7, %v3174_v55  ;;  %v4230_v20 = vld [vmem:[%s4702_s17 + $0xa0] sm:$0xf]  ;;  %v1718_v55 = vrot.slane %v1716_v42, 5  ;;  %v4234_v59 = vld [vmem:[%s4702_s17 + $0xb0] sm:$0x1] }
 0x18b   : > { %v2142_v10 = vpop.permute.xlu1 %2141  ;;  %v3178_v12 = vsel %vm4860_vm6, %v3176_v1, %v3177_v2  ;;  %v999_v13 = vrot.slane %v997_v3, 4  ;;  %v1692_v28 = vshll.u32 %v4230_v20, 16  ;;  %v4188_v1 = vld [vmem:[%s4702_s17 + $0xac] sm:$0xf]  ;;  %v4187_v7 = vld [vmem:[%s4702_s17 + $0xa8] sm:$0xf] }
 0x18c   : > { %2225 = vst.msk [vmem:[#allocation2 + $0x34] sm:$0xf] %vm2211_vm12, %v2142_v10  ;;  %v2140_v16 = vpop.permute.xlu0 %2139  ;;  %v848_v10 = vld [vmem:[%s4702_s17 + $0x90] sm:$0xe] }
 0x18d   : > { %2224 = vst.msk [vmem:[#allocation2 + $0x30] sm:$0xf] %vm2211_vm12, %v2140_v16  ;;  %2161 = vrot.lane.b32.xlu1 %v2086_v4, %s4664_s22  ;;  %v852_v4 = vld [vmem:[%s4702_s17 + $0xa0] sm:$0xf]  ;;  %v851_v16 = vld [vmem:[%s4702_s17 + $0x9c] sm:$0xe]  ;;  %v1001_v26 = vsel %vm4860_vm6, %v999_v13, %v1000_v14 }
 0x18e   : > { %2159 = vrot.lane.b32.xlu0 %v2083_v5, %s4664_s22  ;;  %v1004_v11 = vrot.slane %v852_v4, 5  ;;  %v4157_v19 = vrot.slane %v848_v10, 9  ;;  %v4158_v25 = vrot.slane %v851_v16, 9  ;;  %v4278_v10 = vld [vmem:[%s4702_s17 + $0xa0] sm:$0xf] }
 0x18f   : > { %v2146_v22 = vpop.permute.xlu1 %2145  ;;  %v2089_v15 = vrot.slane %v4278_v10, 5  ;;  %v4281_v16 = vld [vmem:[%s4702_s17 + $0xac] sm:$0xf] }
 0x190   : > { %2227 = vst.msk [vmem:[#allocation2 + $0x3c] sm:$0xf] %vm2211_vm12, %v2146_v22  ;;  %v2144_v29 = vpop.permute.xlu0 %2143  ;;  %v4229_v22 = vld [vmem:[%s4702_s17 + $0x9c] sm:$0xf]  ;;  %v998_v31 = vsel %vm4860_vm6, %v4157_v19, %v997_v3  ;;  %v1005_v38 = vsel %vm4860_vm6, %v4158_v25, %v1004_v11  ;;  %v1704_v3 = vrot.slane %v1702_v54, 5 }
 0x191   : > { %2226 = vst.msk [vmem:[#allocation2 + $0x38] sm:$0xf] %vm2211_vm12, %v2144_v29  ;;  %2351 = vrot.lane.b32.xlu1 %v4326_v17, %s4665_s23  ;;  %v1696_v29 = vshrl.u32 %v4230_v20, 16  ;;  %v1683_v32 = vshrl.u32 %v4229_v22, 16  ;;  %v1686_v33 = vshll.u32 %v4229_v22, 16  ;;  %v2091_v25 = vrot.slane %v2089_v15, 4 }
 0x192   : > { %2349 = vrot.lane.b32.xlu0 %v4325_v23, %s4665_s23  ;;  %v1006_v23 = vrot.slane %v1004_v11, 4  ;;  %v4279_v20 = vld [vmem:[%s4702_s17 + $0xa4] sm:$0x1]  ;;  %v4277_v22 = vld [vmem:[%s4702_s17 + $0x9c] sm:$0xe] }
 0x193   : > { %v2336_v35 = vpop.permute.xlu1 %2335 }
 0x194   : > { %2419 = vst.msk [vmem:[#allocation2 + $0x34] sm:$0xf] %vm2405_vm13, %v2336_v35  ;;  %v2334_v40 = vpop.permute.xlu0 %2333  ;;  %v1008_v37 = vsel %vm4860_vm6, %v1006_v23, %v1007_v24  ;;  %v2096_v23 = vrot.slane %v4281_v16, 5 }
 0x195   : > { %2418 = vst.msk [vmem:[#allocation2 + $0x30] sm:$0xf] %vm2405_vm13, %v2334_v40  ;;  %2355 = vrot.lane.b32.xlu1 %v4328_v30, %s4665_s23  ;;  %v5780_v40 = vrot.slane %v1692_v28, 5  ;;  %v4282_v28 = vld [vmem:[%s4702_s17 + $0xb0] sm:$0x1] }
 0x196   : > { %2353 = vrot.lane.b32.xlu0 %v4327_v36, %s4665_s23  ;;  %v4232_v36 = vld [vmem:[%s4702_s17 + $0xa8] sm:$0xf] }
 0x197   : > { %v2340_v45 = vpop.permute.xlu1 %2339  ;;  %v1707_v47 = vshrl.u32 %v4232_v36, 16  ;;  %v1710_v48 = vshll.u32 %v4232_v36, 16  ;;  %v2098_v36 = vrot.slane %v2096_v23, 4 }
 0x198   : > { %2421 = vst.msk [vmem:[#allocation2 + $0x3c] sm:$0xf] %vm2405_vm13, %v2340_v45  ;;  %v2338_v50 = vpop.permute.xlu0 %2337  ;;  %v1685_v45 = vrot.slane %v1683_v32, 4  ;;  %v4301_v32 = vrot.slane %v4277_v22, 9 }
 0x199   : > { %2420 = vst.msk [vmem:[#allocation2 + $0x38] sm:$0xf] %vm2405_vm13, %v2338_v50  ;;  %2912 = vrot.lane.b32.xlu1 %v2749_v41, %s4666_s24  ;;  %v1698_v41 = vrot.slane %v1696_v29, 4  ;;  %v1709_v60 = vrot.slane %v1707_v47, 4  ;;  %v4280_v29 = vld [vmem:[%s4702_s17 + $0xa8] sm:$0xe] }
 0x19a   : > { %2910 = vrot.lane.b32.xlu0 %v2739_v46, %s4666_s24  ;;  %v1688_v46 = vrot.slane %v1686_v33, 5  ;;  %v4374_v33 = vld [vmem:[%s4702_s17 + $0xac] sm:$0xf] }
 0x19b   : > { %v2897_v56 = vpop.permute.xlu1 %2896  ;;  %v1699_v53 = vor.u32 %v1698_v41, %v5780_v40  ;;  %v2788_v41 = vshrl.u32 %v4374_v33, 16 }
 0x19c   : > { %2980 = vst.msk [vmem:[#allocation2 + $0x34] sm:$0xf] %vm2966_vm14, %v2897_v56  ;;  %v2895_v61 = vpop.permute.xlu0 %2894  ;;  %v1722_v56 = vrot.slane %v1720_v43, 4  ;;  %v1689_v58 = vor.u32 %v1688_v46, %v1685_v45  ;;  %v2090_v43 = vsel %vm4860_vm6, %v4301_v32, %v2089_v15  ;;  %v4377_v46 = vld [vmem:[%s4702_s17 + $0xb8] sm:$0xf] }
 0x19d   : > { %2979 = vst.msk [vmem:[#allocation2 + $0x30] sm:$0xf] %vm2966_vm14, %v2895_v61  ;;  %2916 = vrot.lane.b32.xlu1 %v2773_v52, %s4666_s24  ;;  %v4185_v52 = vld [vmem:[%s4702_s17 + $0x9c] sm:$0xf]  ;;  %v1712_v61 = vrot.slane %v1710_v48, 5  ;;  %v1700_v2 = vrot.slane %v1699_v53, 4 }
 0x19e   : > { %2914 = vrot.lane.b32.xlu0 %v2763_v57, %s4666_s24  ;;  %v1723_v4 = vor.u32 %v1722_v56, %v1718_v55  ;;  %v1690_v8 = vrot.slane %v1689_v58, 4  ;;  %v4376_v48 = vld [vmem:[%s4702_s17 + $0xb4] sm:$0xf]  ;;  %v2808_v53 = vshll.u32 %v4377_v46, 16  ;;  %v2812_v54 = vshrl.u32 %v4377_v46, 16 }
 0x19f   : > { %v2901_v5 = vpop.permute.xlu1 %2900  ;;  %v4375_v56 = vld [vmem:[%s4702_s17 + $0xb0] sm:$0x1] }
 0x1a0   : > { %2982 = vst.msk [vmem:[#allocation2 + $0x3c] sm:$0xf] %vm2966_vm14, %v2901_v5  ;;  %v2899_v9 = vpop.permute.xlu0 %2898  ;;  %v1726_v5 = vshll.u32 %v4234_v59, 16  ;;  %v1724_v13 = vrot.slane %v1723_v4, 4  ;;  %v2799_v59 = vshrl.u32 %v4376_v48, 16 }
 0x1a1   : > { %2981 = vst.msk [vmem:[#allocation2 + $0x38] sm:$0xf] %vm2966_vm14, %v2899_v9  ;;  %3249 = vrot.lane.b32.xlu1 %v3171_v63, %s4667_s25  ;;  %v1713_v9 = vor.u32 %v1712_v61, %v1709_v60  ;;  %v2802_v60 = vshll.u32 %v4376_v48, 16 }
 0x1a2   : > { %3247 = vrot.lane.b32.xlu0 %v3168_v6, %s4667_s25  ;;  %v1728_v14 = vrot.slane %v1726_v5, 5  ;;  %v4329_v5 = vld [vmem:[%s4702_s17 + $0xa8] sm:$0xf] }
 0x1a3   : > { %v3234_v17 = vpop.permute.xlu1 %3233  ;;  %v1714_v19 = vrot.slane %v1713_v9, 4  ;;  %v2804_v9 = vrot.slane %v2802_v60, 5 }
 0x1a4   : > { %3317 = vst.msk [vmem:[#allocation2 + $0x34] sm:$0xf] %vm3303_vm15, %v3234_v17  ;;  %v3232_v21 = vpop.permute.xlu0 %3231  ;;  %v1729_v24 = vsel %vm4713_vm2, %v1724_v13, %v1728_v14 }
 0x1a5   : > { %3316 = vst.msk [vmem:[#allocation2 + $0x30] sm:$0xf] %vm3303_vm15, %v3232_v21  ;;  %3253 = vrot.lane.b32.xlu1 %v3178_v12, %s4667_s25  ;;  %v1705_v12 = vsel %vm4713_vm2, %v1700_v2, %v1704_v3  ;;  %v2810_v2 = vrot.slane %v2808_v53, 5  ;;  %v2814_v3 = vrot.slane %v2812_v54, 4 }
 0x1a6   : > { %3251 = vrot.lane.b32.xlu0 %v3175_v18, %s4667_s25  ;;  %v1695_v18 = vsel %vm4713_vm2, %v1690_v8, %v5780_v40  ;;  %v2784_v40 = vshll.u32 %v4374_v33, 16  ;;  %v2801_v8 = vrot.slane %v2799_v59, 4  ;;  %v4421_v33 = vld [vmem:[%s4702_s17 + $0xa8] sm:$0xe] }
 0x1a7   : > { %v3238_v30 = vpop.permute.xlu1 %3237  ;;  %v2815_v14 = vor.u32 %v2814_v3, %v2810_v2  ;;  %v857_v3 = vld [vmem:[%s4702_s17 + $0xb4] sm:$0xe] }
 0x1a8   : > { %3319 = vst.msk [vmem:[#allocation2 + $0x3c] sm:$0xf] %vm3303_vm15, %v3238_v30  ;;  %v3236_v35 = vpop.permute.xlu0 %3235 }
 0x1a9   : > { %3318 = vst.msk [vmem:[#allocation2 + $0x38] sm:$0xf] %vm3303_vm15, %v3236_v35  ;;  %1073 = vrot.lane.b32.xlu1 %v1001_v26, %s4661_s19  ;;  %v2092_v26 = vrot.slane %v4279_v20, 5  ;;  %v4373_v35 = vld [vmem:[%s4702_s17 + $0xa8] sm:$0xf] }
 0x1aa   : > { %1071 = vrot.lane.b32.xlu0 %v998_v31, %s4661_s19  ;;  %v1719_v31 = vsel %vm4713_vm2, %v1714_v19, %v1718_v55  ;;  %v2778_v45 = vshll.u32 %v4373_v35, 16  ;;  %v2805_v19 = vor.u32 %v2804_v9, %v2801_v8  ;;  %v4422_v20 = vld [vmem:[%s4702_s17 + $0xac] sm:$0xf]  ;;  %v4236_v8 = vld [vmem:[%s4702_s17 + $0xb8] sm:$0xf] }
 0x1ab   : > { %v1058_v44 = vpop.permute.xlu1 %1057  ;;  %v2093_v39 = vsel %vm4860_vm6, %v2091_v25, %v2092_v26  ;;  %v3181_v25 = vrot.slane %v4422_v20, 5 }
 0x1ac   : > { %1137 = vst.msk [vmem:[#allocation2 + $0x44] sm:$0xf] %vm1119_vm9, %v1058_v44  ;;  %v1056_v49 = vpop.permute.xlu0 %1055  ;;  %v4642_v50 = vld [vmem:[#allocation2 + $0x30] sm:$0xff]   ;;  %v2775_v44 = vshrl.u32 %v4373_v35, 16  ;;  %v2780_v58 = vrot.slane %v2778_v45, 5 }
 0x1ad   : > { %1136 = vst.msk [vmem:[#allocation2 + $0x40] sm:$0xf] %vm1119_vm9, %v1056_v49  ;;  %1077 = vrot.lane.b32.xlu1 %v1008_v37, %s4661_s19  ;;  %4588 = vmatprep.mubr.msk.bf16.mxu0 %vm3468_vm0, %v4642_v50  ;;  %v2099_v37 = vrot.slane %v4282_v28, 5  ;;  %v3183_v35 = vrot.slane %v3181_v25, 4 }
 0x1ae   : > { %1075 = vrot.lane.b32.xlu0 %v1005_v38, %s4661_s19  ;;  %v4302_v38 = vrot.slane %v4280_v29, 9  ;;  %v2806_v29 = vrot.slane %v2805_v19, 4 }
 0x1af   : > { %v1062_v57 = vpop.permute.xlu1 %1061  ;;  %v2100_v49 = vsel %vm4860_vm6, %v2098_v36, %v2099_v37 }
 0x1b0   : > { %1139 = vst.msk [vmem:[#allocation2 + $0x4c] sm:$0xf] %vm1119_vm9, %v1062_v57  ;;  %v1060_v62 = vpop.permute.xlu0 %1059  ;;  %v4643_v63 = vld [vmem:[#allocation2 + $0x38] sm:$0xff]   ;;  %v2097_v50 = vsel %vm4860_vm6, %v4302_v38, %v2096_v23  ;;  %v2777_v57 = vrot.slane %v2775_v44, 4  ;;  %v2816_v23 = vrot.slane %v2815_v14, 4 }
 0x1b1   : > { %1138 = vst.msk [vmem:[#allocation2 + $0x48] sm:$0xf] %vm1119_vm9, %v1060_v62  ;;  %1267 = vrot.lane.b32.xlu1 %v4186_v51, %s4662_s20  ;;  %4589 = vmatmul.mubr.msk.bf16.gmra.mxu0 %vm3468_vm0, %v4643_v63  ;;  %v2786_v51 = vrot.slane %v2784_v40, 5  ;;  %v4330_v62 = vld [vmem:[%s4702_s17 + $0xac] sm:$0xf]  ;;  %v4445_v40 = vrot.slane %v4421_v33, 9 }
 0x1b2   : > { %1265 = vrot.lane.b32.xlu0 %v4185_v52, %s4662_s20  ;;  %v2790_v52 = vrot.slane %v2788_v41, 4  ;;  %v4426_v41 = vld [vmem:[%s4702_s17 + $0xbc] sm:$0x1]  ;;  %v4424_v44 = vld [vmem:[%s4702_s17 + $0xb4] sm:$0xe] }
 0x1b3   : > { %v1252_v6 = vpop.permute.xlu1 %1251  ;;  %v3191_v48 = vrot.slane %v4426_v41, 5  ;;  %v3182_v53 = vsel %vm4860_vm6, %v4445_v40, %v3181_v25  ;;  %v4446_v54 = vrot.slane %v4424_v44, 9  ;;  %v4238_v25 = vld [vmem:[%s4702_s17 + $0xc0] sm:$0xf]  ;;  %v4190_v41 = vld [vmem:[%s4702_s17 + $0xb8] sm:$0xf] }
 0x1b4   : > { %1331 = vst.msk [vmem:[#allocation2 + $0x44] sm:$0xf] %vm1313_vm10, %v1252_v6  ;;  %v1250_v11 = vpop.permute.xlu0 %1249  ;;  %v2791_v63 = vor.u32 %v2790_v52, %v2786_v51  ;;  %v2781_v6 = vor.u32 %v2780_v58, %v2777_v57  ;;  %v854_v58 = vld [vmem:[%s4702_s17 + $0xa8] sm:$0xe] }
 0x1b5   : > { %1330 = vst.msk [vmem:[#allocation2 + $0x40] sm:$0xf] %vm1313_vm10, %v1250_v11  ;;  %1271 = vrot.lane.b32.xlu1 %v4188_v1, %s4662_s20  ;;  %v2794_v1 = vshll.u32 %v4375_v56, 16  ;;  %v4332_v11 = vld [vmem:[%s4702_s17 + $0xb8] sm:$0xf] }
 0x1b6   : > { %1269 = vrot.lane.b32.xlu0 %v4187_v7, %s4662_s20  ;;  %v4378_v7 = vld [vmem:[%s4702_s17 + $0xbc] sm:$0x1] }
 0x1b7   : > { %v1256_v17 = vpop.permute.xlu1 %1255  ;;  %v2796_v13 = vrot.slane %v2794_v1, 5  ;;  %v2818_v15 = vshll.u32 %v4378_v7, 16  ;;  %v4159_v7 = vrot.slane %v854_v58, 9 }
 0x1b8   : > { %1333 = vst.msk [vmem:[#allocation2 + $0x4c] sm:$0xf] %vm1313_vm10, %v1256_v17  ;;  %v1254_v21 = vpop.permute.xlu0 %1253  ;;  %v4331_v17 = vld [vmem:[%s4702_s17 + $0xb4] sm:$0xf] }
 0x1b9   : > { %1332 = vst.msk [vmem:[#allocation2 + $0x48] sm:$0xf] %vm1313_vm10, %v1254_v21  ;;  %1828 = vrot.lane.b32.xlu1 %v1705_v12, %s4663_s21  ;;  %v2792_v12 = vrot.slane %v2791_v63, 4 }
 0x1ba   : > { %1826 = vrot.lane.b32.xlu0 %v1695_v18, %s4663_s21  ;;  %v2782_v18 = vrot.slane %v2781_v6, 4 }
 0x1bb   : > { %v1813_v30 = vpop.permute.xlu1 %1812  ;;  %v2797_v22 = vsel %vm4713_vm2, %v2792_v12, %v2796_v13 }
 0x1bc   : > { %1892 = vst.msk [vmem:[#allocation2 + $0x44] sm:$0xf] %vm1874_vm11, %v1813_v30  ;;  %v1811_v34 = vpop.permute.xlu0 %1810  ;;  %v2787_v28 = vsel %vm4713_vm2, %v2782_v18, %v2786_v51  ;;  %v4423_v30 = vld [vmem:[%s4702_s17 + $0xb0] sm:$0x1]  ;;  %v1744_v18 = vshrl.u32 %v4236_v8, 16 }
 0x1bd   : > { %1891 = vst.msk [vmem:[#allocation2 + $0x40] sm:$0xf] %vm1874_vm11, %v1811_v34  ;;  %1832 = vrot.lane.b32.xlu1 %v1729_v24, %s4663_s21  ;;  %v2820_v24 = vrot.slane %v2818_v15, 5  ;;  %v3184_v36 = vrot.slane %v4423_v30, 5  ;;  %v4160_v15 = vrot.slane %v857_v3, 9 }
 0x1be   : > { %1830 = vrot.lane.b32.xlu0 %v1719_v31, %s4663_s21  ;;  %v4425_v31 = vld [vmem:[%s4702_s17 + $0xb8] sm:$0xf] }
 0x1bf   : > { %v1817_v42 = vpop.permute.xlu1 %1816  ;;  %v2821_v34 = vsel %vm4713_vm2, %v2816_v23, %v2820_v24  ;;  %v3188_v37 = vrot.slane %v4425_v31, 5  ;;  %v3185_v46 = vsel %vm4860_vm6, %v3183_v35, %v3184_v36  ;;  %v4239_v23 = vld [vmem:[%s4702_s17 + $0xc4] sm:$0xf]  ;;  %v1746_v31 = vrot.slane %v1744_v18, 4  ;;  %v4284_v3 = vld [vmem:[%s4702_s17 + $0xb8] sm:$0xf] }
 0x1c0   : > { %1894 = vst.msk [vmem:[#allocation2 + $0x4c] sm:$0xf] %vm1874_vm11, %v1817_v42  ;;  %v1815_v47 = vpop.permute.xlu0 %1814  ;;  %v855_v42 = vld [vmem:[%s4702_s17 + $0xac] sm:$0xf]  ;;  %v1768_v33 = vshrl.u32 %v4239_v23, 16 }
 0x1c1   : > { %1893 = vst.msk [vmem:[#allocation2 + $0x48] sm:$0xf] %vm1874_vm11, %v1815_v47  ;;  %2165 = vrot.lane.b32.xlu1 %v2093_v39, %s4664_s22  ;;  %v2811_v39 = vsel %vm4713_vm2, %v2806_v29, %v2810_v2  ;;  %v3190_v47 = vrot.slane %v3188_v37, 4  ;;  %v859_v2 = vld [vmem:[%s4702_s17 + $0xbc] sm:$0x1]  ;;  %v3189_v6 = vsel %vm4860_vm6, %v4446_v54, %v3188_v37  ;;  %v1755_v37 = vshrl.u32 %v4238_v25, 16 }
 0x1c2   : > { %2163 = vrot.lane.b32.xlu0 %v2090_v43, %s4664_s22  ;;  %v1021_v14 = vrot.slane %v859_v2, 5  ;;  %v4237_v29 = vld [vmem:[%s4702_s17 + $0xbc] sm:$0x1] }
 0x1c3   : > { %v2150_v55 = vpop.permute.xlu1 %2149  ;;  %v1750_v44 = vshll.u32 %v4237_v29, 16  ;;  %v4379_v29 = vld [vmem:[%s4702_s17 + $0xc0] sm:$0xf] }
 0x1c4   : > { %2229 = vst.msk [vmem:[#allocation2 + $0x44] sm:$0xf] %vm2211_vm12, %v2150_v55  ;;  %v2148_v61 = vpop.permute.xlu0 %2147  ;;  %v856_v55 = vld [vmem:[%s4702_s17 + $0xb0] sm:$0x1] }
 0x1c5   : > { %2228 = vst.msk [vmem:[#allocation2 + $0x40] sm:$0xf] %vm2211_vm12, %v2148_v61  ;;  %2169 = vrot.lane.b32.xlu1 %v2100_v49, %s4664_s22  ;;  %v1011_v49 = vrot.slane %v855_v42, 5  ;;  %v1014_v1 = vrot.slane %v856_v55, 5  ;;  %v4189_v42 = vld [vmem:[%s4702_s17 + $0xb4] sm:$0xf] }
 0x1c6   : > { %2167 = vrot.lane.b32.xlu0 %v2097_v50, %s4664_s22  ;;  %v858_v50 = vld [vmem:[%s4702_s17 + $0xb8] sm:$0xf]  ;;  %v4192_v55 = vld [vmem:[%s4702_s17 + $0xc4] sm:$0xf]  ;;  %v1752_v58 = vrot.slane %v1750_v44, 5 }
 0x1c7   : > { %v2154_v4 = vpop.permute.xlu1 %2153  ;;  %v1018_v60 = vrot.slane %v858_v50, 5  ;;  %v1013_v63 = vrot.slane %v1011_v49, 4  ;;  %v1012_v20 = vsel %vm4860_vm6, %v4159_v7, %v1011_v49  ;;  %v4240_v50 = vld [vmem:[%s4702_s17 + $0xc8] sm:$0x1] }
 0x1c8   : > { %2231 = vst.msk [vmem:[#allocation2 + $0x4c] sm:$0xf] %vm2211_vm12, %v2154_v4  ;;  %v2152_v10 = vpop.permute.xlu0 %2151 }
 0x1c9   : > { %2230 = vst.msk [vmem:[#allocation2 + $0x48] sm:$0xf] %vm2211_vm12, %v2152_v10  ;;  %2359 = vrot.lane.b32.xlu1 %v4330_v62, %s4665_s23  ;;  %v3192_v62 = vsel %vm4860_vm6, %v3190_v47, %v3191_v48  ;;  %v1020_v13 = vrot.slane %v1018_v60, 4  ;;  %v1770_v47 = vrot.slane %v1768_v33, 4 }
 0x1ca   : > { %2357 = vrot.lane.b32.xlu0 %v4329_v5, %s4665_s23 }
 0x1cb   : > { %v2344_v16 = vpop.permute.xlu1 %2343 }
 0x1cc   : > { %2423 = vst.msk [vmem:[#allocation2 + $0x44] sm:$0xf] %vm2405_vm13, %v2344_v16  ;;  %v2342_v21 = vpop.permute.xlu0 %2341  ;;  %v1015_v16 = vsel %vm4860_vm6, %v1013_v63, %v1014_v1  ;;  %v4191_v63 = vld [vmem:[%s4702_s17 + $0xc0] sm:$0xf] }
 0x1cd   : > { %2422 = vst.msk [vmem:[#allocation2 + $0x40] sm:$0xf] %vm2405_vm13, %v2342_v21  ;;  %2363 = vrot.lane.b32.xlu1 %v4332_v11, %s4665_s23  ;;  %v4235_v11 = vld [vmem:[%s4702_s17 + $0xb4] sm:$0xf] }
 0x1ce   : > { %2361 = vrot.lane.b32.xlu0 %v4331_v17, %s4665_s23  ;;  %v1740_v17 = vshll.u32 %v4236_v8, 16  ;;  %v1731_v21 = vshrl.u32 %v4235_v11, 16  ;;  %v2103_v8 = vrot.slane %v4284_v3, 5 }
 0x1cf   : > { %v2348_v26 = vpop.permute.xlu1 %2347 }
 0x1d0   : > { %2425 = vst.msk [vmem:[#allocation2 + $0x4c] sm:$0xf] %vm2405_vm13, %v2348_v26  ;;  %v2346_v32 = vpop.permute.xlu0 %2345  ;;  %v1022_v26 = vsel %vm4860_vm6, %v1020_v13, %v1021_v14  ;;  %v5950_v30 = vrot.slane %v1740_v17, 5  ;;  %v1733_v35 = vrot.slane %v1731_v21, 4  ;;  %v4285_v14 = vld [vmem:[%s4702_s17 + $0xbc] sm:$0x1] }
 0x1d1   : > { %2424 = vst.msk [vmem:[#allocation2 + $0x48] sm:$0xf] %vm2405_vm13, %v2346_v32  ;;  %2920 = vrot.lane.b32.xlu1 %v2797_v22, %s4666_s24  ;;  %v1734_v22 = vshll.u32 %v4235_v11, 16  ;;  %v1764_v32 = vshll.u32 %v4239_v23, 16  ;;  %v4288_v21 = vld [vmem:[%s4702_s17 + $0xc8] sm:$0x1] }
 0x1d2   : > { %2918 = vrot.lane.b32.xlu0 %v2787_v28, %s4666_s24  ;;  %v1019_v28 = vsel %vm4860_vm6, %v4160_v15, %v1018_v60  ;;  %v1774_v60 = vshll.u32 %v4240_v50, 16 }
 0x1d3   : > { %v2905_v38 = vpop.permute.xlu1 %2904  ;;  %v1736_v36 = vrot.slane %v1734_v22, 5  ;;  %v4286_v22 = vld [vmem:[%s4702_s17 + $0xc0] sm:$0xe] }
 0x1d4   : > { %2984 = vst.msk [vmem:[#allocation2 + $0x44] sm:$0xf] %vm2966_vm14, %v2905_v38  ;;  %v2903_v43 = vpop.permute.xlu0 %2902  ;;  %v1758_v38 = vshll.u32 %v4238_v25, 16  ;;  %v1776_v7 = vrot.slane %v1774_v60, 5 }
 0x1d5   : > { %2983 = vst.msk [vmem:[#allocation2 + $0x40] sm:$0xf] %vm2966_vm14, %v2903_v43  ;;  %2924 = vrot.lane.b32.xlu1 %v2821_v34, %s4666_s24  ;;  %v5888_v45 = vpop.f32.mrf.mxu0  ;;  %v1747_v43 = vor.u32 %v1746_v31, %v5950_v30  ;;  %v1737_v49 = vor.u32 %v1736_v36, %v1733_v35  ;;  %v2113_v31 = vrot.slane %v4288_v21, 5 }
 0x1d6   : > { %2922 = vrot.lane.b32.xlu0 %v2811_v39, %s4666_s24  ;;  %v4521_v51 = vpack.c.bf16 %v5888_v45, %v5888_v45 }
 0x1d7   : > { %v2909_v52 = vpop.permute.xlu1 %2908  ;;  %v5899_v57 = vpop.f32.mrf.mxu0  ;;  %v1738_v1 = vrot.slane %v1737_v49, 4 }
 0x1d8   : > { %2986 = vst.msk [vmem:[#allocation2 + $0x4c] sm:$0xf] %vm2966_vm14, %v2909_v52  ;;  %v2907_v56 = vpop.permute.xlu0 %2906  ;;  %v4519_v59 = vpack.c.bf16 %v5899_v57, %v5899_v57  ;;  %v1760_v52 = vrot.slane %v1758_v38, 5  ;;  %v2823_v38 = vshrl.u32 %v4379_v29, 16 }
 0x1d9   : > { %4020 = vst.msk [vmem:[%s5886_s8 + $0x8] sm:$0xf] %vm4017_vm1, %v4521_v51  ;;  %3257 = vrot.lane.b32.xlu1 %v3185_v46, %s4667_s25  ;;  %v5909_v61 = vpop.f32.mrf.mxu0  ;;  %v1766_v46 = vrot.slane %v1764_v32, 5  ;;  %v1757_v51 = vrot.slane %v1755_v37, 4  ;;  %v4304_v32 = vrot.slane %v4286_v22, 9 }
 0x1da   : > { %2985 = vst.msk [vmem:[#allocation2 + $0x48] sm:$0xf] %vm2966_vm14, %v2907_v56  ;;  %3255 = vrot.lane.b32.xlu0 %v3182_v53, %s4667_s25  ;;  %v4522_v4 = vpack.c.bf16 %v5909_v61, %v5909_v61  ;;  %v1748_v56 = vrot.slane %v1747_v43, 4 }
 0x1db   : > { %4018 = vst.msk [vmem:[%s5886_s8] sm:$0xf] %vm4017_vm1, %v4519_v59  ;;  %v3242_v5 = vpop.permute.xlu1 %3241  ;;  %v5923_v10 = vpop.f32.mrf.mxu0  ;;  %v1771_v59 = vor.u32 %v1770_v47, %v1766_v46  ;;  %v1761_v2 = vor.u32 %v1760_v52, %v1757_v51  ;;  %v4381_v51 = vld [vmem:[%s4702_s17 + $0xc8] sm:$0x1]  ;;  %v2825_v52 = vrot.slane %v2823_v38, 4 }
 0x1dc   : > { %3321 = vst.msk [vmem:[#allocation2 + $0x44] sm:$0xf] %vm3303_vm15, %v3242_v5  ;;  %v3240_v9 = vpop.permute.xlu0 %3239  ;;  %v4520_v12 = vpack.c.bf16 %v5923_v10, %v5923_v10  ;;  %v1753_v5 = vsel %vm4713_vm2, %v1748_v56, %v1752_v58  ;;  %v4334_v58 = vld [vmem:[%s4702_s17 + $0xc4] sm:$0xf]  ;;  %v2842_v60 = vshll.u32 %v4381_v51, 16 }
 0x1dd   : > { %4021 = vst.msk [vmem:[%s5886_s8 + $0xc] sm:$0xf] %vm4017_vm1, %v4522_v4  ;;  %3261 = vrot.lane.b32.xlu1 %v3192_v62, %s4667_s25  ;;  %v1762_v13 = vrot.slane %v1761_v2, 4  ;;  %v4333_v2 = vld [vmem:[%s4702_s17 + $0xc0] sm:$0xf] }
 0x1de   : > { %3320 = vst.msk [vmem:[#allocation2 + $0x40] sm:$0xf] %vm3303_vm15, %v3240_v9  ;;  %3259 = vrot.lane.b32.xlu0 %v3189_v6, %s4667_s25  ;;  %v1772_v6 = vrot.slane %v1771_v59, 4  ;;  %v4287_v9 = vld [vmem:[%s4702_s17 + $0xc4] sm:$0xf] }
 0x1df   : > { %4019 = vst.msk [vmem:[%s5886_s8 + $0x4] sm:$0xf] %vm4017_vm1, %v4520_v12  ;;  %v3246_v19 = vpop.permute.xlu1 %3245  ;;  %v1743_v12 = vsel %vm4713_vm2, %v1738_v1, %v5950_v30  ;;  %v2110_v17 = vrot.slane %v4287_v9, 5 }
 0x1e0   : > { %3323 = vst.msk [vmem:[#allocation2 + $0x4c] sm:$0xf] %vm3303_vm15, %v3246_v19  ;;  %v3244_v24 = vpop.permute.xlu0 %3243  ;;  %v1777_v18 = vsel %vm4713_vm2, %v1772_v6, %v1776_v7  ;;  %v2105_v19 = vrot.slane %v2103_v8, 4 }
 0x1e1   : > { %3322 = vst.msk [vmem:[#allocation2 + $0x48] sm:$0xf] %vm3303_vm15, %v3244_v24  ;;  %1081 = vrot.lane.b32.xlu1 %v1015_v16, %s4661_s19  ;;  %v4283_v16 = vld [vmem:[%s4702_s17 + $0xb4] sm:$0xe]  ;;  %v1767_v24 = vsel %vm4713_vm2, %v1762_v13, %v1766_v46  ;;  %v2112_v30 = vrot.slane %v2110_v17, 4  ;;  %v2111_v44 = vsel %vm4860_vm6, %v4304_v32, %v2110_v17 }
 0x1e2   : > { %1079 = vrot.lane.b32.xlu0 %v1012_v20, %s4661_s19  ;;  %v2106_v20 = vrot.slane %v4285_v14, 5  ;;  %v4303_v25 = vrot.slane %v4283_v16, 9 }
 0x1e3   : > { %v1066_v34 = vpop.permute.xlu1 %1065  ;;  %v2114_v43 = vsel %vm4860_vm6, %v2112_v30, %v2113_v31  ;;  %v4429_v30 = vld [vmem:[%s4702_s17 + $0xc8] sm:$0x1]  ;;  %v4431_v31 = vld [vmem:[%s4702_s17 + $0xd0] sm:$0xf] }
 0x1e4   : > { %1141 = vst.msk [vmem:[#allocation2 + $0x54] sm:$0xf] %vm1119_vm9, %v1066_v34  ;;  %v1064_v39 = vpop.permute.xlu0 %1063  ;;  %v2107_v33 = vsel %vm4860_vm6, %v2105_v19, %v2106_v20  ;;  %v2104_v37 = vsel %vm4860_vm6, %v4303_v25, %v2103_v8  ;;  %v4336_v8 = vld [vmem:[%s4702_s17 + $0xd0] sm:$0xf] }
 0x1e5   : > { %v4644_v40 = vld [vmem:[#allocation2 + $0x40] sm:$0xff]   ;;  %1140 = vst.msk [vmem:[#allocation2 + $0x50] sm:$0xf] %vm1119_vm9, %v1064_v39  ;;  %1085 = vrot.lane.b32.xlu1 %v1022_v26, %s4661_s19  ;;  %v2826_v39 = vshll.u32 %v4379_v29, 16 }
 0x1e6   : > { %1083 = vrot.lane.b32.xlu0 %v1019_v28, %s4661_s19  ;;  %4592 = vmatprep.mubr.msk.bf16.mxu1 %vm3468_vm0, %v4644_v40  ;;  %v4380_v26 = vld [vmem:[%s4702_s17 + $0xc4] sm:$0xf]  ;;  %v4383_v40 = vld [vmem:[%s4702_s17 + $0xd0] sm:$0xf] }
 0x1e7   : > { %v1070_v48 = vpop.permute.xlu1 %1069  ;;  %v2832_v34 = vshll.u32 %v4380_v26, 16  ;;  %v2836_v35 = vshrl.u32 %v4380_v26, 16  ;;  %v2860_v49 = vshrl.u32 %v4383_v40, 16 }
 0x1e8   : > { %1143 = vst.msk [vmem:[#allocation2 + $0x5c] sm:$0xf] %vm1119_vm9, %v1070_v48  ;;  %v1068_v53 = vpop.permute.xlu0 %1067  ;;  %v4645_v54 = vld [vmem:[#allocation2 + $0x48] sm:$0xff]   ;;  %v2856_v48 = vshll.u32 %v4383_v40, 16  ;;  %v3202_v40 = vrot.slane %v4431_v31, 5 }
 0x1e9   : > { %1142 = vst.msk [vmem:[#allocation2 + $0x58] sm:$0xf] %vm1119_vm9, %v1068_v53  ;;  %1275 = vrot.lane.b32.xlu1 %v4190_v41, %s4662_s20  ;;  %4593 = vmatmul.mubr.msk.bf16.vlgmr.msra.gmra.mxu1 %vm3468_vm0, %v4645_v54  ;;  %v6011_v46 = vrot.slane %v2832_v34, 5  ;;  %v2838_v47 = vrot.slane %v2836_v35, 4  ;;  %v2828_v53 = vrot.slane %v2826_v39, 5  ;;  %v3198_v39 = vrot.slane %v4429_v30, 5 }
 0x1ea   : > { %1273 = vrot.lane.b32.xlu0 %v4189_v42, %s4662_s20  ;;  %v4382_v42 = vld [vmem:[%s4702_s17 + $0xcc] sm:$0xf]  ;;  %v4427_v34 = vld [vmem:[%s4702_s17 + $0xc0] sm:$0xe]  ;;  %v3204_v51 = vrot.slane %v3202_v40, 4 }
 0x1eb   : > { %v1260_v62 = vpop.permute.xlu1 %1259  ;;  %v2847_v54 = vshrl.u32 %v4382_v42, 16  ;;  %v2839_v59 = vor.u32 %v2838_v47, %v6011_v46  ;;  %v2829_v3 = vor.u32 %v2828_v53, %v2825_v52 }
 0x1ec   : > { %1335 = vst.msk [vmem:[#allocation2 + $0x54] sm:$0xf] %vm1313_vm10, %v1260_v62  ;;  %v1258_v4 = vpop.permute.xlu0 %1257  ;;  %v6020_v62 = vrot.slane %v2856_v48, 5 }
 0x1ed   : > { %1334 = vst.msk [vmem:[#allocation2 + $0x50] sm:$0xf] %vm1313_vm10, %v1258_v4  ;;  %1279 = vrot.lane.b32.xlu1 %v4192_v55, %s4662_s20  ;;  %v2850_v55 = vshll.u32 %v4382_v42, 16  ;;  %v4384_v4 = vld [vmem:[%s4702_s17 + $0xd4] sm:$0x1]  ;;  %v2840_v9 = vrot.slane %v2839_v59, 4 }
 0x1ee   : > { %1277 = vrot.lane.b32.xlu0 %v4191_v63, %s4662_s20  ;;  %v2862_v63 = vrot.slane %v2860_v49, 4  ;;  %v2866_v13 = vshll.u32 %v4384_v4, 16  ;;  %v2830_v16 = vrot.slane %v2829_v3, 4  ;;  %v4430_v49 = vld [vmem:[%s4702_s17 + $0xcc] sm:$0xe] }
 0x1ef   : > { %v1264_v11 = vpop.permute.xlu1 %1263  ;;  %v2852_v6 = vrot.slane %v2850_v55, 5  ;;  %v4448_v55 = vrot.slane %v4430_v49, 9 }
 0x1f0   : > { %1337 = vst.msk [vmem:[#allocation2 + $0x5c] sm:$0xf] %vm1313_vm10, %v1264_v11  ;;  %v1262_v15 = vpop.permute.xlu0 %1261  ;;  %v2844_v11 = vrot.slane %v2842_v60, 5 }
 0x1f1   : > { %1336 = vst.msk [vmem:[#allocation2 + $0x58] sm:$0xf] %vm1313_vm10, %v1262_v15  ;;  %1836 = vrot.lane.b32.xlu1 %v1753_v5, %s4663_s21  ;;  %v2849_v5 = vrot.slane %v2847_v54, 4  ;;  %v4335_v15 = vld [vmem:[%s4702_s17 + $0xcc] sm:$0xf]  ;;  %v3203_v60 = vsel %vm4860_vm6, %v4448_v55, %v3202_v40 }
 0x1f2   : > { %1834 = vrot.lane.b32.xlu0 %v1743_v12, %s4663_s21  ;;  %v2863_v12 = vor.u32 %v2862_v63, %v6020_v62  ;;  %v2845_v21 = vsel %vm4713_vm2, %v2840_v9, %v2844_v11 }
 0x1f3   : > { %v1821_v23 = vpop.permute.xlu1 %1820  ;;  %v2853_v17 = vor.u32 %v2852_v6, %v2849_v5 }
 0x1f4   : > { %1896 = vst.msk [vmem:[#allocation2 + $0x54] sm:$0xf] %vm1874_vm11, %v1821_v23  ;;  %v1819_v28 = vpop.permute.xlu0 %1818  ;;  %v2864_v22 = vrot.slane %v2863_v12, 4  ;;  %v2868_v23 = vrot.slane %v2866_v13, 5 }
 0x1f5   : > { %1895 = vst.msk [vmem:[#allocation2 + $0x50] sm:$0xf] %vm1874_vm11, %v1819_v28  ;;  %1840 = vrot.lane.b32.xlu1 %v1777_v18, %s4663_s21  ;;  %v4428_v18 = vld [vmem:[%s4702_s17 + $0xc4] sm:$0xf]  ;;  %v2835_v28 = vsel %vm4713_vm2, %v2830_v16, %v6011_v46  ;;  %v2854_v29 = vrot.slane %v2853_v17, 4 }
 0x1f6   : > { %1838 = vrot.lane.b32.xlu0 %v1767_v24, %s4663_s21  ;;  %v3195_v24 = vrot.slane %v4428_v18, 5  ;;  %v4432_v46 = vld [vmem:[%s4702_s17 + $0xd4] sm:$0x1] }
 0x1f7   : > { %v1825_v36 = vpop.permute.xlu1 %1824  ;;  %v3205_v52 = vrot.slane %v4432_v46, 5 }
 0x1f8   : > { %1898 = vst.msk [vmem:[#allocation2 + $0x5c] sm:$0xf] %vm1874_vm11, %v1825_v36  ;;  %v1823_v41 = vpop.permute.xlu0 %1822  ;;  %v3197_v38 = vrot.slane %v3195_v24, 4 }
 0x1f9   : > { %1897 = vst.msk [vmem:[#allocation2 + $0x58] sm:$0xf] %vm1874_vm11, %v1823_v41  ;;  %2173 = vrot.lane.b32.xlu1 %v2107_v33, %s4664_s22 }
 0x1fa   : > { %2171 = vrot.lane.b32.xlu0 %v2104_v37, %s4664_s22  ;;  %v2869_v37 = vsel %vm4713_vm2, %v2864_v22, %v2868_v23  ;;  %v3199_v27 = vsel %vm4860_vm6, %v3197_v38, %v3198_v39 }
 0x1fb   : > { %v2158_v50 = vpop.permute.xlu1 %2157 }
 0x1fc   : > { %2233 = vst.msk [vmem:[#allocation2 + $0x54] sm:$0xf] %vm2211_vm12, %v2158_v50  ;;  %v2156_v56 = vpop.permute.xlu0 %2155 }
 0x1fd   : > { %2232 = vst.msk [vmem:[#allocation2 + $0x50] sm:$0xf] %vm2211_vm12, %v2156_v56  ;;  %2177 = vrot.lane.b32.xlu1 %v2114_v43, %s4664_s22  ;;  %v2859_v43 = vsel %vm4713_vm2, %v2854_v29, %v6020_v62  ;;  %vm3682_vm2 = vcmask 64512  }
 0x1fe   : > { %2175 = vrot.lane.b32.xlu0 %v2111_v44, %s4664_s22  ;;  %v4447_v44 = vrot.slane %v4427_v34, 9 }
 0x1ff   : > { %v2162_v1 = vpop.permute.xlu1 %2161 }
 0x200   : > { %2235 = vst.msk [vmem:[#allocation2 + $0x5c] sm:$0xf] %vm2211_vm12, %v2162_v1  ;;  %v2160_v7 = vpop.permute.xlu0 %2159  ;;  %v3196_v54 = vsel %vm4860_vm6, %v4447_v44, %v3195_v24 }
 0x201   : > { %2234 = vst.msk [vmem:[#allocation2 + $0x58] sm:$0xf] %vm2211_vm12, %v2160_v7  ;;  %2367 = vrot.lane.b32.xlu1 %v4334_v58, %s4665_s23  ;;  %v3206_v58 = vsel %vm4860_vm6, %v3204_v51, %v3205_v52 }
 0x202   : > { %2365 = vrot.lane.b32.xlu0 %v4333_v2, %s4665_s23 }
 0x203   : > { %v2352_v14 = vpop.permute.xlu1 %2351 }
 0x204   : > { %2427 = vst.msk [vmem:[#allocation2 + $0x54] sm:$0xf] %vm2405_vm13, %v2352_v14  ;;  %v2350_v19 = vpop.permute.xlu0 %2349 }
 0x205   : > { %2426 = vst.msk [vmem:[#allocation2 + $0x50] sm:$0xf] %vm2405_vm13, %v2350_v19  ;;  %2371 = vrot.lane.b32.xlu1 %v4336_v8, %s4665_s23  ;;  %v6036_v20 = vpop.f32.mrf.mxu0 }
 0x206   : > { %2369 = vrot.lane.b32.xlu0 %v4335_v15, %s4665_s23  ;;  %v4525_v25 = vpack.c.bf16 %v6036_v20, %v6036_v20 }
 0x207   : > { %v2356_v26 = vpop.permute.xlu1 %2355  ;;  %v6048_v33 = vpop.f32.mrf.mxu0 }
 0x208   : > { %2429 = vst.msk [vmem:[#allocation2 + $0x5c] sm:$0xf] %vm2405_vm13, %v2356_v26  ;;  %v2354_v32 = vpop.permute.xlu0 %2353  ;;  %v4523_v35 = vpack.c.bf16 %v6048_v33, %v6048_v33 }
 0x209   : > { %4024 = vst.msk [vmem:[%s5886_s8 + $0x18] sm:$0xf] %vm4017_vm1, %v4525_v25  ;;  %2928 = vrot.lane.b32.xlu1 %v2845_v21, %s4666_s24  ;;  %v6058_v36 = vpop.f32.mrf.mxu0 }
 0x20a   : > { %2428 = vst.msk [vmem:[#allocation2 + $0x58] sm:$0xf] %vm2405_vm13, %v2354_v32  ;;  %2926 = vrot.lane.b32.xlu0 %v2835_v28, %s4666_s24  ;;  %v4526_v41 = vpack.c.bf16 %v6058_v36, %v6058_v36 }
 0x20b   : > { %4022 = vst.msk [vmem:[%s5886_s8 + $0x10] sm:$0xf] %vm4017_vm1, %v4523_v35  ;;  %v2913_v42 = vpop.permute.xlu1 %2912  ;;  %v6071_v48 = vpop.f32.mrf.mxu0 }
 0x20c   : > { %2988 = vst.msk [vmem:[#allocation2 + $0x54] sm:$0xf] %vm2966_vm14, %v2913_v42  ;;  %v2911_v47 = vpop.permute.xlu0 %2910  ;;  %v4524_v50 = vpack.c.bf16 %v6071_v48, %v6071_v48 }
 0x20d   : > { %4025 = vst.msk [vmem:[%s5886_s8 + $0x1c] sm:$0xf] %vm4017_vm1, %v4526_v41  ;;  %2932 = vrot.lane.b32.xlu1 %v2869_v37, %s4666_s24 }
 0x20e   : > { %2987 = vst.msk [vmem:[#allocation2 + $0x50] sm:$0xf] %vm2966_vm14, %v2911_v47  ;;  %2930 = vrot.lane.b32.xlu0 %v2859_v43, %s4666_s24 }
 0x20f   : > { %4023 = vst.msk [vmem:[%s5886_s8 + $0x14] sm:$0xf] %vm4017_vm1, %v4524_v50  ;;  %v2917_v53 = vpop.permute.xlu1 %2916 }
 0x210   : > { %2990 = vst.msk [vmem:[#allocation2 + $0x5c] sm:$0xf] %vm2966_vm14, %v2917_v53  ;;  %v2915_v56 = vpop.permute.xlu0 %2914 }
 0x211   : > { %2989 = vst.msk [vmem:[#allocation2 + $0x58] sm:$0xf] %vm2966_vm14, %v2915_v56  ;;  %3265 = vrot.lane.b32.xlu1 %v3199_v27, %s4667_s25 }
 0x212   : > { %3263 = vrot.lane.b32.xlu0 %v3196_v54, %s4667_s25 }
 0x213   : > { %v3250_v59 = vpop.permute.xlu1 %3249 }
 0x214   : > { %3325 = vst.msk [vmem:[#allocation2 + $0x54] sm:$0xf] %vm3303_vm15, %v3250_v59  ;;  %v3248_v62 = vpop.permute.xlu0 %3247 }
 0x215   : > { %3324 = vst.msk [vmem:[#allocation2 + $0x50] sm:$0xf] %vm3303_vm15, %v3248_v62  ;;  %3269 = vrot.lane.b32.xlu1 %v3206_v58, %s4667_s25 }
 0x216   : > { %3267 = vrot.lane.b32.xlu0 %v3203_v60, %s4667_s25 }
 0x217   : > { %v3254_v63 = vpop.permute.xlu1 %3253 }
 0x218   : > { %3327 = vst.msk [vmem:[#allocation2 + $0x5c] sm:$0xf] %vm3303_vm15, %v3254_v63  ;;  %v3252_v1 = vpop.permute.xlu0 %3251 }
 0x219   : > { %3326 = vst.msk [vmem:[#allocation2 + $0x58] sm:$0xf] %vm3303_vm15, %v3252_v1 }
 0x21b   : > { %v1074_v2 = vpop.permute.xlu1 %1073 }
 0x21c   : > { %1145 = vst.msk [vmem:[#allocation2 + $0x64] sm:$0xf] %vm1119_vm9, %v1074_v2  ;;  %v1072_v0 = vpop.permute.xlu0 %1071  ;;  %v4646_v3 = vld [vmem:[#allocation2 + $0x50] sm:$0xff]  }
 0x21d   : > { %1144 = vst.msk [vmem:[#allocation2 + $0x60] sm:$0xf] %vm1119_vm9, %v1072_v0  ;;  %4596 = vmatprep.mubr.msk.bf16.mxu1 %vm3468_vm0, %v4646_v3 }
 0x21f   : > { %v1078_v4 = vpop.permute.xlu1 %1077 }
 0x220   : > { %1147 = vst.msk [vmem:[#allocation2 + $0x6c] sm:$0xf] %vm1119_vm9, %v1078_v4  ;;  %v1076_v5 = vpop.permute.xlu0 %1075  ;;  %v4647_v6 = vld [vmem:[#allocation2 + $0x58] sm:$0xff]  }
 0x221   : > { %1146 = vst.msk [vmem:[#allocation2 + $0x68] sm:$0xf] %vm1119_vm9, %v1076_v5  ;;  %4597 = vmatmul.mubr.msk.bf16.gmra.mxu1 %vm3468_vm0, %v4647_v6 }
 0x223   : > { %v1268_v7 = vpop.permute.xlu1 %1267 }
 0x224   : > { %1339 = vst.msk [vmem:[#allocation2 + $0x64] sm:$0xf] %vm1313_vm10, %v1268_v7  ;;  %v1266_v8 = vpop.permute.xlu0 %1265 }
 0x225   : > { %1338 = vst.msk [vmem:[#allocation2 + $0x60] sm:$0xf] %vm1313_vm10, %v1266_v8 }
 0x227   : > { %v1272_v9 = vpop.permute.xlu1 %1271 }
 0x228   : > { %1341 = vst.msk [vmem:[#allocation2 + $0x6c] sm:$0xf] %vm1313_vm10, %v1272_v9  ;;  %v1270_v11 = vpop.permute.xlu0 %1269 }
 0x229   : > { %1340 = vst.msk [vmem:[#allocation2 + $0x68] sm:$0xf] %vm1313_vm10, %v1270_v11 }
 0x22b   : > { %v1829_v12 = vpop.permute.xlu1 %1828 }
 0x22c   : > { %1900 = vst.msk [vmem:[#allocation2 + $0x64] sm:$0xf] %vm1874_vm11, %v1829_v12  ;;  %v1827_v13 = vpop.permute.xlu0 %1826 }
 0x22d   : > { %1899 = vst.msk [vmem:[#allocation2 + $0x60] sm:$0xf] %vm1874_vm11, %v1827_v13 }
 0x22f   : > { %v1833_v14 = vpop.permute.xlu1 %1832 }
 0x230   : > { %1902 = vst.msk [vmem:[#allocation2 + $0x6c] sm:$0xf] %vm1874_vm11, %v1833_v14  ;;  %v1831_v15 = vpop.permute.xlu0 %1830 }
 0x231   : > { %1901 = vst.msk [vmem:[#allocation2 + $0x68] sm:$0xf] %vm1874_vm11, %v1831_v15 }
 0x233   : > { %v2166_v16 = vpop.permute.xlu1 %2165 }
 0x234   : > { %2237 = vst.msk [vmem:[#allocation2 + $0x64] sm:$0xf] %vm2211_vm12, %v2166_v16  ;;  %v2164_v17 = vpop.permute.xlu0 %2163 }
 0x235   : > { %2236 = vst.msk [vmem:[#allocation2 + $0x60] sm:$0xf] %vm2211_vm12, %v2164_v17 }
 0x237   : > { %v2170_v18 = vpop.permute.xlu1 %2169 }
 0x238   : > { %2239 = vst.msk [vmem:[#allocation2 + $0x6c] sm:$0xf] %vm2211_vm12, %v2170_v18  ;;  %v2168_v19 = vpop.permute.xlu0 %2167 }
 0x239   : > { %2238 = vst.msk [vmem:[#allocation2 + $0x68] sm:$0xf] %vm2211_vm12, %v2168_v19  ;;  %v6119_v21 = vpop.f32.mrf.mxu0 }
 0x23a   : > { %v4529_v22 = vpack.c.bf16 %v6119_v21, %v6119_v21 }
 0x23b   : > { %v2360_v23 = vpop.permute.xlu1 %2359  ;;  %v6124_v25 = vpop.f32.mrf.mxu0 }
 0x23c   : > { %2431 = vst.msk [vmem:[#allocation2 + $0x64] sm:$0xf] %vm2405_vm13, %v2360_v23  ;;  %v2358_v24 = vpop.permute.xlu0 %2357  ;;  %v4527_v26 = vpack.c.bf16 %v6124_v25, %v6124_v25 }
 0x23d   : > { %4028 = vst.msk [vmem:[%s5886_s8 + $0x28] sm:$0xf] %vm4017_vm1, %v4529_v22  ;;  %v6131_v28 = vpop.f32.mrf.mxu0 }
 0x23e   : > { %2430 = vst.msk [vmem:[#allocation2 + $0x60] sm:$0xf] %vm2405_vm13, %v2358_v24  ;;  %v4530_v29 = vpack.c.bf16 %v6131_v28, %v6131_v28 }
 0x23f   : > { %4026 = vst.msk [vmem:[%s5886_s8 + $0x20] sm:$0xf] %vm4017_vm1, %v4527_v26  ;;  %v2364_v30 = vpop.permute.xlu1 %2363  ;;  %v6138_v32 = vpop.f32.mrf.mxu0 }
 0x240   : > { %2433 = vst.msk [vmem:[#allocation2 + $0x6c] sm:$0xf] %vm2405_vm13, %v2364_v30  ;;  %v2362_v31 = vpop.permute.xlu0 %2361  ;;  %v4528_v34 = vpack.c.bf16 %v6138_v32, %v6138_v32 }
 0x241   : > { %4029 = vst.msk [vmem:[%s5886_s8 + $0x2c] sm:$0xf] %vm4017_vm1, %v4530_v29 }
 0x242   : > { %2432 = vst.msk [vmem:[#allocation2 + $0x68] sm:$0xf] %vm2405_vm13, %v2362_v31 }
 0x243   : > { %4027 = vst.msk [vmem:[%s5886_s8 + $0x24] sm:$0xf] %vm4017_vm1, %v4528_v34  ;;  %v2921_v35 = vpop.permute.xlu1 %2920 }
 0x244   : > { %2992 = vst.msk [vmem:[#allocation2 + $0x64] sm:$0xf] %vm2966_vm14, %v2921_v35  ;;  %v2919_v37 = vpop.permute.xlu0 %2918 }
 0x245   : > { %2991 = vst.msk [vmem:[#allocation2 + $0x60] sm:$0xf] %vm2966_vm14, %v2919_v37 }
 0x247   : > { %v2925_v38 = vpop.permute.xlu1 %2924 }
 0x248   : > { %2994 = vst.msk [vmem:[#allocation2 + $0x6c] sm:$0xf] %vm2966_vm14, %v2925_v38  ;;  %v2923_v39 = vpop.permute.xlu0 %2922 }
 0x249   : > { %2993 = vst.msk [vmem:[#allocation2 + $0x68] sm:$0xf] %vm2966_vm14, %v2923_v39 }
 0x24b   : > { %v3258_v40 = vpop.permute.xlu1 %3257 }
 0x24c   : > { %3329 = vst.msk [vmem:[#allocation2 + $0x64] sm:$0xf] %vm3303_vm15, %v3258_v40  ;;  %v3256_v41 = vpop.permute.xlu0 %3255 }
 0x24d   : > { %3328 = vst.msk [vmem:[#allocation2 + $0x60] sm:$0xf] %vm3303_vm15, %v3256_v41 }
 0x24f   : > { %v3262_v42 = vpop.permute.xlu1 %3261 }
 0x250   : > { %3331 = vst.msk [vmem:[#allocation2 + $0x6c] sm:$0xf] %vm3303_vm15, %v3262_v42  ;;  %v3260_v43 = vpop.permute.xlu0 %3259 }
 0x251   : > { %3330 = vst.msk [vmem:[#allocation2 + $0x68] sm:$0xf] %vm3303_vm15, %v3260_v43 }
 0x253   : > { %v1082_v44 = vpop.permute.xlu1 %1081 }
 0x254   : > { %1149 = vst.msk [vmem:[#allocation2 + $0x74] sm:$0xf] %vm1119_vm9, %v1082_v44  ;;  %v1080_v46 = vpop.permute.xlu0 %1079  ;;  %v4648_v47 = vld [vmem:[#allocation2 + $0x60] sm:$0xff]  }
 0x255   : > { %1148 = vst.msk [vmem:[#allocation2 + $0x70] sm:$0xf] %vm1119_vm9, %v1080_v46  ;;  %4600 = vmatprep.mubr.msk.bf16.mxu1 %vm3468_vm0, %v4648_v47 }
 0x257   : > { %v1086_v49 = vpop.permute.xlu1 %1085 }
 0x258   : > { %1151 = vst.msk [vmem:[#allocation2 + $0x7c] sm:$0xf] %vm1119_vm9, %v1086_v49  ;;  %v1084_v50 = vpop.permute.xlu0 %1083  ;;  %v4649_v27 = vld [vmem:[#allocation2 + $0x68] sm:$0xff]  }
 0x259   : > { %1150 = vst.msk [vmem:[#allocation2 + $0x78] sm:$0xf] %vm1119_vm9, %v1084_v50  ;;  %4601 = vmatmul.mubr.msk.bf16.gmra.mxu1 %vm3468_vm0, %v4649_v27  ;;  %v3684_v50 = vsel %vm3682_vm2, %v5923_v10, 0.0  ;;  %v3683_v27 = vsel %vm3682_vm2, %v5899_v57, 0.0 }
 0x25b   : > { %v1276_v51 = vpop.permute.xlu1 %1275 }
 0x25c   : > { %1343 = vst.msk [vmem:[#allocation2 + $0x74] sm:$0xf] %vm1313_vm10, %v1276_v51  ;;  %v1274_v52 = vpop.permute.xlu0 %1273  ;;  %v3685_v51 = vadd.f32 %v3684_v50, %v3683_v27 }
 0x25d   : > { %1342 = vst.msk [vmem:[#allocation2 + $0x70] sm:$0xf] %vm1313_vm10, %v1274_v52  ;;  %v3686_v52 = vsel %vm3682_vm2, %v5888_v45, 0.0 }
 0x25f   : > { %v1280_v53 = vpop.permute.xlu1 %1279 }
 0x260   : > { %1345 = vst.msk [vmem:[#allocation2 + $0x7c] sm:$0xf] %vm1313_vm10, %v1280_v53  ;;  %v1278_v54 = vpop.permute.xlu0 %1277  ;;  %v3687_v53 = vadd.f32 %v3686_v52, %v3685_v51 }
 0x261   : > { %1344 = vst.msk [vmem:[#allocation2 + $0x78] sm:$0xf] %vm1313_vm10, %v1278_v54  ;;  %v3688_v54 = vsel %vm3682_vm2, %v5909_v61, 0.0 }
 0x263   : > { %v1837_v55 = vpop.permute.xlu1 %1836 }
 0x264   : > { %1904 = vst.msk [vmem:[#allocation2 + $0x74] sm:$0xf] %vm1874_vm11, %v1837_v55  ;;  %v1835_v56 = vpop.permute.xlu0 %1834  ;;  %v3690_v55 = vsel %vm3682_vm2, %v6048_v33, 0.0 }
 0x265   : > { %1903 = vst.msk [vmem:[#allocation2 + $0x70] sm:$0xf] %vm1874_vm11, %v1835_v56  ;;  %v3689_v56 = vadd.f32 %v3688_v54, %v3687_v53 }
 0x267   : > { %v1841_v58 = vpop.permute.xlu1 %1840 }
 0x268   : > { %1906 = vst.msk [vmem:[#allocation2 + $0x7c] sm:$0xf] %vm1874_vm11, %v1841_v58  ;;  %v1839_v59 = vpop.permute.xlu0 %1838  ;;  %v3692_v58 = vsel %vm3682_vm2, %v6071_v48, 0.0 }
 0x269   : > { %1905 = vst.msk [vmem:[#allocation2 + $0x78] sm:$0xf] %vm1874_vm11, %v1839_v59  ;;  %v3691_v59 = vadd.f32 %v3690_v55, %v3689_v56 }
 0x26b   : > { %v2174_v60 = vpop.permute.xlu1 %2173 }
 0x26c   : > { %2241 = vst.msk [vmem:[#allocation2 + $0x74] sm:$0xf] %vm2211_vm12, %v2174_v60  ;;  %v2172_v62 = vpop.permute.xlu0 %2171  ;;  %v3693_v60 = vadd.f32 %v3692_v58, %v3691_v59 }
 0x26d   : > { %2240 = vst.msk [vmem:[#allocation2 + $0x70] sm:$0xf] %vm2211_vm12, %v2172_v62  ;;  %v3694_v62 = vsel %vm3682_vm2, %v6036_v20, 0.0 }
 0x26f   : > { %v2178_v63 = vpop.permute.xlu1 %2177 }
 0x270   : > { %2243 = vst.msk [vmem:[#allocation2 + $0x7c] sm:$0xf] %vm2211_vm12, %v2178_v63  ;;  %v2176_v1 = vpop.permute.xlu0 %2175  ;;  %v3695_v63 = vadd.f32 %v3694_v62, %v3693_v60 }
 0x271   : > { %2242 = vst.msk [vmem:[#allocation2 + $0x78] sm:$0xf] %vm2211_vm12, %v2176_v1  ;;  %v6173_v2 = vpop.f32.mrf.mxu0  ;;  %v3696_v1 = vsel %vm3682_vm2, %v6058_v36, 0.0 }
 0x272   : > { %v4533_v0 = vpack.c.bf16 %v6173_v2, %v6173_v2 }
 0x273   : > { %v2368_v3 = vpop.permute.xlu1 %2367  ;;  %v6178_v5 = vpop.f32.mrf.mxu0 }
 0x274   : > { %2435 = vst.msk [vmem:[#allocation2 + $0x74] sm:$0xf] %vm2405_vm13, %v2368_v3  ;;  %v2366_v4 = vpop.permute.xlu0 %2365  ;;  %v4531_v6 = vpack.c.bf16 %v6178_v5, %v6178_v5  ;;  %v3697_v3 = vadd.f32 %v3696_v1, %v3695_v63 }
 0x275   : > { %4032 = vst.msk [vmem:[%s5886_s8 + $0x38] sm:$0xf] %vm4017_vm1, %v4533_v0  ;;  %v6185_v7 = vpop.f32.mrf.mxu0  ;;  %v3698_v0 = vsel %vm3682_vm2, %v6124_v25, 0.0 }
 0x276   : > { %2434 = vst.msk [vmem:[#allocation2 + $0x70] sm:$0xf] %vm2405_vm13, %v2366_v4  ;;  %v4534_v8 = vpack.c.bf16 %v6185_v7, %v6185_v7 }
 0x277   : > { %4030 = vst.msk [vmem:[%s5886_s8 + $0x30] sm:$0xf] %vm4017_vm1, %v4531_v6  ;;  %v2372_v9 = vpop.permute.xlu1 %2371  ;;  %v6192_v12 = vpop.f32.mrf.mxu0  ;;  %v3700_v6 = vsel %vm3682_vm2, %v6138_v32, 0.0 }
 0x278   : > { %2437 = vst.msk [vmem:[#allocation2 + $0x7c] sm:$0xf] %vm2405_vm13, %v2372_v9  ;;  %v2370_v11 = vpop.permute.xlu0 %2369  ;;  %v4532_v13 = vpack.c.bf16 %v6192_v12, %v6192_v12  ;;  %v3699_v9 = vadd.f32 %v3698_v0, %v3697_v3 }
 0x279   : > { %4033 = vst.msk [vmem:[%s5886_s8 + $0x3c] sm:$0xf] %vm4017_vm1, %v4534_v8 }
 0x27a   : > { %2436 = vst.msk [vmem:[#allocation2 + $0x78] sm:$0xf] %vm2405_vm13, %v2370_v11 }
 0x27b   : > { %4031 = vst.msk [vmem:[%s5886_s8 + $0x34] sm:$0xf] %vm4017_vm1, %v4532_v13  ;;  %v2929_v14 = vpop.permute.xlu1 %2928 }
 0x27c   : > { %2996 = vst.msk [vmem:[#allocation2 + $0x74] sm:$0xf] %vm2966_vm14, %v2929_v14  ;;  %v2927_v15 = vpop.permute.xlu0 %2926  ;;  %v3701_v14 = vadd.f32 %v3700_v6, %v3699_v9 }
 0x27d   : > { %2995 = vst.msk [vmem:[#allocation2 + $0x70] sm:$0xf] %vm2966_vm14, %v2927_v15 }
 0x27f   : > { %v2933_v16 = vpop.permute.xlu1 %2932 }
 0x280   : > { %2998 = vst.msk [vmem:[#allocation2 + $0x7c] sm:$0xf] %vm2966_vm14, %v2933_v16  ;;  %v2931_v17 = vpop.permute.xlu0 %2930 }
 0x281   : > { %2997 = vst.msk [vmem:[#allocation2 + $0x78] sm:$0xf] %vm2966_vm14, %v2931_v17 }
 0x283   : > { %v3266_v18 = vpop.permute.xlu1 %3265 }
 0x284   : > { %3333 = vst.msk [vmem:[#allocation2 + $0x74] sm:$0xf] %vm3303_vm15, %v3266_v18  ;;  %v3264_v19 = vpop.permute.xlu0 %3263  ;;  %v3702_v18 = vsel %vm3682_vm2, %v6119_v21, 0.0 }
 0x285   : > { %3332 = vst.msk [vmem:[#allocation2 + $0x70] sm:$0xf] %vm3303_vm15, %v3264_v19 }
 0x287   : > { %v3270_v22 = vpop.permute.xlu1 %3269 }
 0x288   : > { %3335 = vst.msk [vmem:[#allocation2 + $0x7c] sm:$0xf] %vm3303_vm15, %v3270_v22  ;;  %v3268_v23 = vpop.permute.xlu0 %3267  ;;  %v3703_v22 = vadd.f32 %v3702_v18, %v3701_v14 }
 0x289   : > { %3334 = vst.msk [vmem:[#allocation2 + $0x78] sm:$0xf] %vm3303_vm15, %v3268_v23  ;;  %v3704_v23 = vsel %vm3682_vm2, %v6131_v28, 0.0 }
 0x28c   : > { %v4650_v24 = vld [vmem:[#allocation2 + $0x70] sm:$0xff]  }
 0x28d   : > { %4604 = vmatprep.mubr.msk.bf16.mxu1 %vm3468_vm0, %v4650_v24  ;;  %v3706_v24 = vsel %vm3682_vm2, %v6178_v5, 0.0 }
 0x290   : > { %v4651_v26 = vld [vmem:[#allocation2 + $0x78] sm:$0xff]  }
 0x291   : > { %4605 = vmatmul.mubr.msk.bf16.gmra.mxu1 %vm3468_vm0, %v4651_v26  ;;  %v3705_v26 = vadd.f32 %v3704_v23, %v3703_v22 }
 0x2a9   : > { %v6211_v29 = vpop.f32.mrf.mxu1 }
 0x2aa   : > { %v4537_v30 = vpack.c.bf16 %v6211_v29, %v6211_v29  ;;  %v3718_v52 = vsel %vm3682_vm2, %v6211_v29, 0.0 }
 0x2ab   : > { %v6215_v31 = vpop.f32.mrf.mxu1 }
 0x2ac   : > { %4036 = vst.msk [vmem:[%s5886_s8 + $0x48] sm:$0xf] %vm4017_vm1, %v4537_v30  ;;  %v4535_v34 = vpack.c.bf16 %v6215_v31, %v6215_v31  ;;  %v3708_v30 = vsel %vm3682_vm2, %v6192_v12, 0.0 }
 0x2ad   : > { %v6221_v35 = vpop.f32.mrf.mxu1 }
 0x2ae   : > { %4034 = vst.msk [vmem:[%s5886_s8 + $0x40] sm:$0xf] %vm4017_vm1, %v4535_v34  ;;  %v4538_v37 = vpack.c.bf16 %v6221_v35, %v6221_v35  ;;  %v3707_v34 = vadd.f32 %v3706_v24, %v3705_v26  ;;  %v3720_v54 = vsel %vm3682_vm2, %v6221_v35, 0.0 }
 0x2af   : > { %v6227_v38 = vpop.f32.mrf.mxu1 }
 0x2b0   : > { %4037 = vst.msk [vmem:[%s5886_s8 + $0x4c] sm:$0xf] %vm4017_vm1, %v4538_v37  ;;  %v4536_v39 = vpack.c.bf16 %v6227_v38, %v6227_v38  ;;  %v3709_v37 = vadd.f32 %v3708_v30, %v3707_v34  ;;  %v3716_v50 = vsel %vm3682_vm2, %v6227_v38, 0.0 }
 0x2b2   : > { %4035 = vst.msk [vmem:[%s5886_s8 + $0x44] sm:$0xf] %vm4017_vm1, %v4536_v39  ;;  %v3710_v39 = vsel %vm3682_vm2, %v6173_v2, 0.0 }
 0x2e1   : > { %v6235_v40 = vpop.f32.mrf.mxu1 }
 0x2e2   : > { %v4541_v41 = vpack.c.bf16 %v6235_v40, %v6235_v40  ;;  %v3726_v62 = vsel %vm3682_vm2, %v6235_v40, 0.0 }
 0x2e3   : > { %v6239_v42 = vpop.f32.mrf.mxu1 }
 0x2e4   : > { %4040 = vst.msk [vmem:[%s5886_s8 + $0x58] sm:$0xf] %vm4017_vm1, %v4541_v41  ;;  %v4539_v43 = vpack.c.bf16 %v6239_v42, %v6239_v42  ;;  %v3711_v41 = vadd.f32 %v3710_v39, %v3709_v37  ;;  %v3722_v55 = vsel %vm3682_vm2, %v6239_v42, 0.0 }
 0x2e5   : > { %v6245_v44 = vpop.f32.mrf.mxu1 }
 0x2e6   : > { %4038 = vst.msk [vmem:[%s5886_s8 + $0x50] sm:$0xf] %vm4017_vm1, %v4539_v43  ;;  %v4542_v46 = vpack.c.bf16 %v6245_v44, %v6245_v44  ;;  %v3712_v43 = vsel %vm3682_vm2, %v6185_v7, 0.0  ;;  %v3728_v1 = vsel %vm3682_vm2, %v6245_v44, 0.0 }
 0x2e7   : > { %v6251_v47 = vpop.f32.mrf.mxu1 }
 0x2e8   : > { %4041 = vst.msk [vmem:[%s5886_s8 + $0x5c] sm:$0xf] %vm4017_vm1, %v4542_v46  ;;  %v4540_v49 = vpack.c.bf16 %v6251_v47, %v6251_v47  ;;  %v3714_v46 = vsel %vm3682_vm2, %v6215_v31, 0.0  ;;  %v3724_v58 = vsel %vm3682_vm2, %v6251_v47, 0.0 }
 0x2ea   : > { %4039 = vst.msk [vmem:[%s5886_s8 + $0x54] sm:$0xf] %vm4017_vm1, %v4540_v49  ;;  %v3713_v49 = vadd.f32 %v3712_v43, %v3711_v41 }
 0x2ec   : > { %v3715_v27 = vadd.f32 %v3714_v46, %v3713_v49 }
 0x2ee   : > { %v3717_v51 = vadd.f32 %v3716_v50, %v3715_v27 }
 0x2f0   : > { %v3719_v53 = vadd.f32 %v3718_v52, %v3717_v51 }
 0x2f2   : > { %v3721_v56 = vadd.f32 %v3720_v54, %v3719_v53 }
 0x2f4   : > { %v3723_v59 = vadd.f32 %v3722_v55, %v3721_v56 }
 0x2f6   : > { %v3725_v60 = vadd.f32 %v3724_v58, %v3723_v59 }
 0x2f8   : > { %v3727_v63 = vadd.f32 %v3726_v62, %v3725_v60 }
 0x2fa   : > { %v3729_v3 = vadd.f32 %v3728_v1, %v3727_v63 }
 0x319   : > { %v6277_v4 = vpop.f32.mrf.mxu1 }
 0x31a   : > { %v4545_v8 = vpack.c.bf16 %v6277_v4, %v6277_v4 }
 0x31b   : > { %v6283_v11 = vpop.f32.mrf.mxu1 }
 0x31c   : > { %4044 = vst.msk [vmem:[%s5886_s8 + $0x68] sm:$0xf] %vm4017_vm1, %v4545_v8  ;;  %v4543_v13 = vpack.c.bf16 %v6283_v11, %v6283_v11  ;;  %v3730_v0 = vsel %vm3682_vm2, %v6283_v11, 0.0 }
 0x31d   : > { %v6289_v15 = vpop.f32.mrf.mxu1  ;;  %v3731_v8 = vadd.f32 %v3730_v0, %v3729_v3 }
 0x31e   : > { %4042 = vst.msk [vmem:[%s5886_s8 + $0x60] sm:$0xf] %vm4017_vm1, %v4543_v13  ;;  %v4546_v16 = vpack.c.bf16 %v6289_v15, %v6289_v15  ;;  %v3734_v13 = vsel %vm3682_vm2, %v6277_v4, 0.0  ;;  %v3736_v22 = vsel %vm3682_vm2, %v6289_v15, 0.0 }
 0x31f   : > { %v6295_v17 = vpop.f32.mrf.mxu1 }
 0x320   : > { %4045 = vst.msk [vmem:[%s5886_s8 + $0x6c] sm:$0xf] %vm4017_vm1, %v4546_v16  ;;  %v4544_v19 = vpack.c.bf16 %v6295_v17, %v6295_v17  ;;  %v3732_v6 = vsel %vm3682_vm2, %v6295_v17, 0.0 }
 0x321   : > { %v3733_v9 = vadd.f32 %v3732_v6, %v3731_v8 }
 0x322   : > { %4043 = vst.msk [vmem:[%s5886_s8 + $0x64] sm:$0xf] %vm4017_vm1, %v4544_v19 }
 0x323   : > { %v3735_v14 = vadd.f32 %v3734_v13, %v3733_v9 }
 0x325   : > { %v3737_v26 = vadd.f32 %v3736_v22, %v3735_v14 }
 0x351   : > { %v4606_v16 = vpop.f32.mrf.mxu1 }
 0x352   : > { %v4549_v18 = vpack.c.bf16 %v4606_v16, %v4606_v16  ;;  %v3742_v49 = vsel %vm3682_vm2, %v4606_v16, 0.0 }
 0x353   : > { %v3667_v19 = vpop.f32.mrf.mxu1 }
 0x354   : > { %4048 = vst.msk [vmem:[%s5886_s8 + $0x78] sm:$0xf] %vm4017_vm1, %v4549_v18  ;;  %v3738_v23 = vsel %vm3682_vm2, %v3667_v19, 0.0  ;;  %v4547_v24 = vpack.c.bf16 %v3667_v19, %v3667_v19 }
 0x355   : > { %v4607_v30 = vpop.f32.mrf.mxu1  ;;  %v3739_v37 = vadd.f32 %v3738_v23, %v3737_v26 }
 0x356   : > { %4046 = vst.msk [vmem:[%s5886_s8 + $0x70] sm:$0xf] %vm4017_vm1, %v4547_v24  ;;  %v4550_v34 = vpack.c.bf16 %v4607_v30, %v4607_v30  ;;  %v3744_v27 = vsel %vm3682_vm2, %v4607_v30, 0.0 }
 0x357   : > { %v3670_v39 = vpop.f32.mrf.mxu1 }
 0x358   : > { %4049 = vst.msk [vmem:[%s5886_s8 + $0x7c] sm:$0xf] %vm4017_vm1, %v4550_v34  ;;  %v3740_v41 = vsel %vm3682_vm2, %v3670_v39, 0.0  ;;  %v4548_v43 = vpack.c.bf16 %v3670_v39, %v3670_v39 }
 0x359   : > { %v3741_v46 = vadd.f32 %v3740_v41, %v3739_v37 }
 0x35a   : > { %4047 = vst.msk [vmem:[%s5886_s8 + $0x74] sm:$0xf] %vm4017_vm1, %v4548_v43 }
 0x35b   : > { %v3743_v50 = vadd.f32 %v3742_v49, %v3741_v46 }
 0x35d   : > { %v3745_v51 = vadd.f32 %v3744_v27, %v3743_v50 }
 0x35f   : > { %v3746_v52 = vrot.slane %v3745_v51, 4 }
 0x361   : > { %v3747_v53 = vadd.f32 %v3746_v52, %v3745_v51 }
 0x363   : > { %v3748_v54 = vrot.slane %v3747_v53, 2 }
 0x365   : > { %v3749_v55 = vadd.f32 %v3748_v54, %v3747_v53 }
 0x367   : > { %v3750_v56 = vrot.slane %v3749_v55, 1 }
 0x369   : > { %v3751_v58 = vadd.f32 %v3750_v56, %v3749_v55 }
 0x36b   : > { %v6357_v59 = vmul.f32 0.00390625, %v3751_v58 }
 0x36d   : > { %3887 = vst.msk [vmem:[%s6355_s14] sm:$0x1] %vm3886_vm3, %v6357_v59  ;;  %v6363_v60 = vsub.f32 %v3667_v19, %v6357_v59  ;;  %v6366_v62 = vsub.f32 %v3670_v39, %v6357_v59  ;;  %v6369_v63 = vsub.f32 %v4606_v16, %v6357_v59  ;;  %v6372_v1 = vsub.f32 %v4607_v30, %v6357_v59 }
 0x36e   : > { %v3753_v0 = vsub.f32 %v5899_v57, %v6357_v59  ;;  %v3754_v3 = vsub.f32 %v5923_v10, %v6357_v59  ;;  %v3755_v6 = vsub.f32 %v5888_v45, %v6357_v59  ;;  %v3756_v8 = vsub.f32 %v5909_v61, %v6357_v59 }
 0x36f   : > { %v3757_v14 = vsub.f32 %v6048_v33, %v6357_v59  ;;  %v3758_v18 = vsub.f32 %v6071_v48, %v6357_v59  ;;  %v3759_v45 = vsub.f32 %v6036_v20, %v6357_v59  ;;  %v3760_v33 = vsub.f32 %v6058_v36, %v6357_v59 }
 0x370   : > { %v3785_v9 = vmul.f32 %v3753_v0, %v3753_v0  ;;  %v3786_v13 = vmul.f32 %v3754_v3, %v3754_v3  ;;  %v3787_v16 = vmul.f32 %v3755_v6, %v3755_v6  ;;  %v3788_v19 = vmul.f32 %v3756_v8, %v3756_v8 }
 0x371   : > { %v3789_v23 = vmul.f32 %v3757_v14, %v3757_v14  ;;  %v3790_v26 = vmul.f32 %v3758_v18, %v3758_v18  ;;  %v3761_v34 = vsub.f32 %v6124_v25, %v6357_v59  ;;  %v3791_v37 = vmul.f32 %v3759_v45, %v3759_v45 }
 0x372   : > { %v3817_v57 = vsel %vm3682_vm2, %v3785_v9, 0.0  ;;  %v3818_v10 = vsel %vm3682_vm2, %v3786_v13, 0.0  ;;  %v3820_v61 = vsel %vm3682_vm2, %v3787_v16, 0.0  ;;  %v3822_v30 = vsel %vm3682_vm2, %v3788_v19, 0.0 }
 0x373   : > { %v3819_v22 = vadd.f32 %v3818_v10, %v3817_v57  ;;  %v3824_v39 = vsel %vm3682_vm2, %v3789_v23, 0.0  ;;  %v3762_v20 = vsub.f32 %v6138_v32, %v6357_v59  ;;  %v3792_v43 = vmul.f32 %v3760_v33, %v3760_v33 }
 0x374   : > { %v3826_v46 = vsel %vm3682_vm2, %v3790_v26, 0.0  ;;  %v3763_v36 = vsub.f32 %v6119_v21, %v6357_v59  ;;  %v3793_v50 = vmul.f32 %v3761_v34, %v3761_v34  ;;  %v3828_v27 = vsel %vm3682_vm2, %v3791_v37, 0.0 }
 0x375   : > { %v3821_v24 = vadd.f32 %v3820_v61, %v3819_v22  ;;  %v3764_v25 = vsub.f32 %v6131_v28, %v6357_v59  ;;  %v3794_v52 = vmul.f32 %v3762_v20, %v3762_v20  ;;  %v3830_v53 = vsel %vm3682_vm2, %v3792_v43, 0.0 }
 0x376   : > { %v3765_v32 = vsub.f32 %v6178_v5, %v6357_v59  ;;  %v3795_v55 = vmul.f32 %v3763_v36, %v3763_v36  ;;  %v3832_v56 = vsel %vm3682_vm2, %v3793_v50, 0.0  ;;  %v3766_v21 = vsub.f32 %v6192_v12, %v6357_v59 }
 0x377   : > { %v3823_v48 = vadd.f32 %v3822_v30, %v3821_v24  ;;  %v3796_v0 = vmul.f32 %v3764_v25, %v3764_v25  ;;  %v3834_v3 = vsel %vm3682_vm2, %v3794_v52, 0.0  ;;  %v3767_v28 = vsub.f32 %v6173_v2, %v6357_v59 }
 0x378   : > { %v3797_v8 = vmul.f32 %v3765_v32, %v3765_v32  ;;  %v3836_v9 = vsel %vm3682_vm2, %v3795_v55, 0.0  ;;  %v3768_v5 = vsub.f32 %v6185_v7, %v6357_v59  ;;  %v3798_v14 = vmul.f32 %v3766_v21, %v3766_v21 }
 0x379   : > { %v3825_v41 = vadd.f32 %v3824_v39, %v3823_v48  ;;  %v3838_v16 = vsel %vm3682_vm2, %v3796_v0, 0.0  ;;  %v3769_v12 = vsub.f32 %v6215_v31, %v6357_v59  ;;  %v3799_v19 = vmul.f32 %v3767_v28, %v3767_v28 }
 0x37a   : > { %v3840_v57 = vsel %vm3682_vm2, %v3797_v8, 0.0  ;;  %v3770_v2 = vsub.f32 %v6227_v38, %v6357_v59  ;;  %v3800_v22 = vmul.f32 %v3768_v5, %v3768_v5  ;;  %v3842_v45 = vsel %vm3682_vm2, %v3798_v14, 0.0 }
 0x37b   : > { %v3827_v49 = vadd.f32 %v3826_v46, %v3825_v41  ;;  %v3771_v7 = vsub.f32 %v6211_v29, %v6357_v59  ;;  %v3801_v61 = vmul.f32 %v3769_v12, %v3769_v12  ;;  %v3844_v24 = vsel %vm3682_vm2, %v3799_v19, 0.0 }
 0x37c   : > { %v3772_v31 = vsub.f32 %v6221_v35, %v6357_v59  ;;  %v3802_v26 = vmul.f32 %v3770_v2, %v3770_v2  ;;  %v3846_v30 = vsel %vm3682_vm2, %v3800_v22, 0.0  ;;  %v3773_v38 = vsub.f32 %v6239_v42, %v6357_v59 }
 0x37d   : > { %v3829_v51 = vadd.f32 %v3828_v27, %v3827_v49  ;;  %v3803_v34 = vmul.f32 %v3771_v7, %v3771_v7  ;;  %v3848_v37 = vsel %vm3682_vm2, %v3801_v61, 0.0  ;;  %v3774_v29 = vsub.f32 %v6251_v47, %v6357_v59 }
 0x37e   : > { %v3804_v41 = vmul.f32 %v3772_v31, %v3772_v31  ;;  %v3850_v20 = vsel %vm3682_vm2, %v3802_v26, 0.0  ;;  %v3775_v35 = vsub.f32 %v6235_v40, %v6357_v59  ;;  %v3805_v46 = vmul.f32 %v3773_v38, %v3773_v38 }
 0x37f   : > { %v3831_v54 = vadd.f32 %v3830_v53, %v3829_v51  ;;  %v3852_v49 = vsel %vm3682_vm2, %v3803_v34, 0.0  ;;  %v3776_v42 = vsub.f32 %v6245_v44, %v6357_v59  ;;  %v3806_v50 = vmul.f32 %v3774_v29, %v3774_v29 }
 0x380   : > { %v3854_v27 = vsel %vm3682_vm2, %v3804_v41, 0.0  ;;  %v3777_v47 = vsub.f32 %v6283_v11, %v6357_v59  ;;  %v3807_v25 = vmul.f32 %v3775_v35, %v3775_v35  ;;  %v3856_v52 = vsel %vm3682_vm2, %v3805_v46, 0.0 }
 0x381   : > { %v3833_v58 = vadd.f32 %v3832_v56, %v3831_v54  ;;  %v3778_v40 = vsub.f32 %v6295_v17, %v6357_v59  ;;  %v3808_v54 = vmul.f32 %v3776_v42, %v3776_v42  ;;  %v3858_v32 = vsel %vm3682_vm2, %v3806_v50, 0.0 }
 0x382   : > { %v3779_v44 = vsub.f32 %v6277_v4, %v6357_v59  ;;  %v3809_v56 = vmul.f32 %v3777_v47, %v3777_v47  ;;  %v3780_v11 = vsub.f32 %v6289_v15, %v6357_v59  ;;  %v3813_v4 = vmul.f32 %v6363_v60, %v6363_v60 }
 0x383   : > { %v3835_v6 = vadd.f32 %v3834_v3, %v3833_v58  ;;  %v3860_v58 = vsel %vm3682_vm2, %v3807_v25, 0.0  ;;  %v3810_v0 = vmul.f32 %v3778_v40, %v3778_v40  ;;  %v3862_v3 = vsel %vm3682_vm2, %v3808_v54, 0.0 }
 0x384   : > { %v3811_v28 = vmul.f32 %v3779_v44, %v3779_v44  ;;  %v3864_v17 = vsel %vm3682_vm2, %v3809_v56, 0.0  ;;  %v3814_v15 = vmul.f32 %v6366_v62, %v6366_v62  ;;  %v3815_v12 = vmul.f32 %v6369_v63, %v6369_v63 }
 0x385   : > { %v3837_v13 = vadd.f32 %v3836_v9, %v3835_v6  ;;  %v3812_v9 = vmul.f32 %v3780_v11, %v3780_v11  ;;  %v3872_v19 = vsel %vm3682_vm2, %v3813_v4, 0.0 }
 0x386   : > { %v3868_v14 = vsel %vm3682_vm2, %v3811_v28, 0.0  ;;  %v3874_v60 = vsel %vm3682_vm2, %v3814_v15, 0.0  ;;  %v3876_v22 = vsel %vm3682_vm2, %v3815_v12, 0.0 }
 0x387   : > { %v3839_v18 = vadd.f32 %v3838_v16, %v3837_v13  ;;  %v3866_v13 = vsel %vm3682_vm2, %v3810_v0, 0.0  ;;  %v3870_v59 = vsel %vm3682_vm2, %v3812_v9, 0.0 }
 0x389   : > { %v3841_v10 = vadd.f32 %v3840_v57, %v3839_v18 }
 0x38b   : > { %v3843_v23 = vadd.f32 %v3842_v45, %v3841_v10  ;;  %v3816_v10 = vmul.f32 %v6372_v1, %v6372_v1 }
 0x38d   : > { %v3845_v33 = vadd.f32 %v3844_v24, %v3843_v23  ;;  %v3878_v62 = vsel %vm3682_vm2, %v3816_v10, 0.0 }
 0x38f   : > { %v3847_v48 = vadd.f32 %v3846_v30, %v3845_v33 }
 0x391   : > { %v3849_v39 = vadd.f32 %v3848_v37, %v3847_v48 }
 0x393   : > { %v3851_v43 = vadd.f32 %v3850_v20, %v3849_v39 }
 0x395   : > { %v3853_v36 = vadd.f32 %v3852_v49, %v3851_v43 }
 0x397   : > { %v3855_v51 = vadd.f32 %v3854_v27, %v3853_v36 }
 0x399   : > { %v3857_v53 = vadd.f32 %v3856_v52, %v3855_v51 }
 0x39b   : > { %v3859_v55 = vadd.f32 %v3858_v32, %v3857_v53 }
 0x39d   : > { %v3861_v21 = vadd.f32 %v3860_v58, %v3859_v55 }
 0x39f   : > { %v3863_v6 = vadd.f32 %v3862_v3, %v3861_v21 }
 0x3a1   : > { %v3865_v8 = vadd.f32 %v3864_v17, %v3863_v6 }
 0x3a3   : > { %v3867_v5 = vadd.f32 %v3866_v13, %v3865_v8 }
 0x3a5   : > { %v3869_v16 = vadd.f32 %v3868_v14, %v3867_v5 }
 0x3a7   : > { %v3871_v18 = vadd.f32 %v3870_v59, %v3869_v16 }
 0x3a9   : > { %v3873_v57 = vadd.f32 %v3872_v19, %v3871_v18 }
 0x3ab   : > { %v3875_v2 = vadd.f32 %v3874_v60, %v3873_v57 }
 0x3ad   : > { %v3877_v45 = vadd.f32 %v3876_v22, %v3875_v2 }
 0x3af   : > { %v3879_v23 = vadd.f32 %v3878_v62, %v3877_v45 }
 0x3b1   : > { %v3880_v7 = vrot.slane %v3879_v23, 4 }
 0x3b3   : > { %v3881_v61 = vadd.f32 %v3880_v7, %v3879_v23 }
 0x3b5   : > { %v3882_v24 = vrot.slane %v3881_v61, 2 }
 0x3b7   : > { %v3883_v63 = vadd.f32 %v3882_v24, %v3881_v61 }
 0x3b9   : > { %v3884_v33 = vrot.slane %v3883_v63, 1 }
 0x3bb   : > { %v3885_v31 = vadd.f32 %v3884_v33, %v3883_v63 }
 0x3bd   : > { %3888 = vst.msk [vmem:[%s6355_s14 + $0x1] sm:$0x1] %vm3886_vm3, %v3885_v31 }
 0x3be PF: > { %s14_s12 = sadd.s32 1, %s4658_s12  }
 0x3bf   : > { %p11_p4 = scmp.ge.s32.totalorder %s14_s12, 4  }
 0x3c1   :  { %13 = sbr.rel (!%p11_p4) target bundleno = 1 (0x1), region = 72 }

// kernel: double_conv2d_bn_forward.3
= control target key start
LH: loop header
LB: loop body
LE: loop exit
PB: predicated region body
PF: predicated region fallthrough
CT: control target
= control target key end

     0   :  { %s5491_s18 = smov 0   ;;  %s7222_s0 = inlined_call_operand.vmem [shape: bf16[2,16,16,8], index: 0, kind: input, shape index: {}]   ;;  %s7223_s1 = inlined_call_operand.vmem [shape: f32[1,8], index: 1, kind: input, shape index: {}]   ;;  %s7224_s2 = inlined_call_operand.vmem [shape: f32[1,8], index: 2, kind: input, shape index: {}]   ;;  %s7225_s3 = inlined_call_operand.vmem [shape: bf16[72,8], index: 3, kind: input, shape index: {}]   ;;  %s7226_s4 = inlined_call_operand.vmem [shape: bf16[2,16,16,8], index: 4, kind: output, shape index: {0}]   ;;  %s7227_s5 = inlined_call_operand.vmem [shape: f32[2,2,8], index: 5, kind: output, shape index: {1}]  }
   0x1 LB: > { %s5019_s19 = sadd.s32 4294967295, %s5450_s18   ;;  %p5023_p0 = scmp.ge.s32.totalorder %s5450_s18, 1  ;;  %s5450_s18 = sphi %s5491_s18, %s16_s18  }
   0x2   : > { %p190_p1 = scmp.lt.s32.totalorder %s5450_s18, 3 }
   0x4   : > { %p191_p2 = pnand %p5023_p0, %p190_p1 }
   0x5   : > { %p222_p3 = scmp.lt.s32.totalorder (!%p191_p2), %s5019_s19, 1  ;;  %s5453_s28 = smov (!%p191_p2), 8  }
   0x6   : > { %194 = sbr.rel (%p191_p2) target bundleno = 1066 (0x42a), region = 36  ;;  %s5454_s8 = smov (!%p191_p2), 16  }
   0x7   : > { %s5455_s9 = smov (!%p191_p2), 24   ;;  %s5456_s10 = smov (!%p191_p2), 32  }
   0x8   : > { %s5457_s11 = smov (!%p191_p2), 40   ;;  %s5458_s12 = smov (!%p191_p2), 48  }
   0x9   : > { %s5459_s13 = smov (!%p191_p2), 56   ;;  %s5460_s16 = smov (!%p191_p2), 64  }
   0xb   : > { %vm411_vm0 = vcmask 60416   ;;  %v5452_v0 = vmov 0   ;;  %vm414_vm1 = vcmask 57344   ;;  %vm422_vm2 = vsmask.f32 256  ;;  %s7241_s19 = smov (!%p222_p3, %s5019_s19), 1 }
   0xc   : > { %412 = vst.msk [vmem:[#allocation2] sm:$0xf] %vm411_vm0, %v5452_v0  ;;  %413 = vst.msk [vmem:[#allocation2 + $0x4] sm:$0xf] %vm411_vm0, %v5452_v0  ;;  %v424_v1 = vld [vmem:[#allocation2 + $0xc] sm:$0x1] }
   0xd   : > { %417 = vst.msk [vmem:[#allocation2 + $0xcc] sm:$0xf] %vm411_vm0, %v5452_v0  ;;  %418 = vst.msk [vmem:[#allocation2 + $0xd0] sm:$0xf] %vm411_vm0, %v5452_v0  ;;  %vm1166_vm3 = vsmask.f32 3328 }
   0xe   : > { %vm1167_vm4 = vsmask.f32 7440  ;;  %vm5507_vm5 = vmand %vm414_vm1, %vm422_vm2  ;;  %vm472_vm6 = vsmask.f32 7938  ;;  %415 = vst.msk [vmem:[#allocation2 + $0x8] sm:$0x1] %vm414_vm1, %v5452_v0 }
   0xf   : > { %419 = vst.msk [vmem:[#allocation2 + $0xd4] sm:$0x1] %vm414_vm1, %v5452_v0  ;;  %v425_v3 = vsel %vm5507_vm5, 0, %v424_v1  ;;  %v474_v4 = vld [vmem:[#allocation2 + $0x14] sm:$0x1]  ;;  %s5182_s20 = sshll.u32 %s7241_s19, 7  ;;  %vm5532_vm7 = vmand %vm414_vm1, %vm472_vm6 }
  0x10   : > { %v427_v5 = vld [vmem:[#allocation2 + $0x18] sm:$0x1]  ;;  %426 = vst [vmem:[#allocation2 + $0xc] sm:$0x1] %v425_v3  ;;  %v477_v7 = vld [vmem:[#allocation2 + $0x20] sm:$0x1]  ;;  %s5523_s23 = scalar_lea.vmem %s7222_s0, %s5182_s20  ;;  %vm5562_vm9 = vmor %vm1166_vm3, %vm1167_vm4  ;;  %s6683_s15 = scalar_lea.vmem %s7226_s4, %s5182_s20 }
  0x11   : > { %v428_v6 = vsel %vm5507_vm5, 0, %v427_v5  ;;  %v430_v8 = vld [vmem:[#allocation2 + $0x24] sm:$0x1]  ;;  %v5528_v9 = vld [vmem:[%s7223_s1] ss:$0 sm:$0xff]  ;;  %v475_v14 = vsel %vm5532_vm7, 0, %v474_v4  ;;  %vm5584_vm11 = vmand %vm411_vm0, %vm472_vm6 }
  0x12   : > { %429 = vst [vmem:[#allocation2 + $0x18] sm:$0x1] %v428_v6  ;;  %v431_v11 = vsel %vm5507_vm5, 0, %v430_v8  ;;  %v480_v12 = vld [vmem:[#allocation2 + $0x2c] sm:$0x1]  ;;  %v5249_v13 = vld [vmem:[%s5523_s23] sm:$0xff]  }
  0x13   : > { %v5312_v15 = vld [vmem:[%s5523_s23 + $0x8] sm:$0xff]   ;;  %v478_v16 = vsel %vm5532_vm7, 0, %v477_v7  ;;  %432 = vst [vmem:[#allocation2 + $0x24] sm:$0x1] %v431_v11  ;;  %v481_v17 = vsel %vm5532_vm7, 0, %v480_v12  ;;  %v5250_v20 = vunpack.c.l.bf16 %v5249_v13  ;;  %v5251_v21 = vunpack.c.h.bf16 %v5249_v13  ;;  %v5313_v34 = vld [vmem:[%s5523_s23 + $0x10] sm:$0xff]  }
  0x14   : > { %v1118_v18 = vld [vmem:[#allocation2] sm:$0xf]  ;;  %v1119_v19 = vld [vmem:[#allocation2 + $0x4] sm:$0xf]  ;;  %476 = vst [vmem:[#allocation2 + $0x14] sm:$0x1] %v475_v14  ;;  %v5254_v22 = vunpack.c.l.bf16 %v5312_v15  ;;  %v5255_v23 = vunpack.c.h.bf16 %v5312_v15  ;;  %v5258_v46 = vunpack.c.l.bf16 %v5313_v34  ;;  %v5259_v55 = vunpack.c.h.bf16 %v5313_v34 }
  0x15   : > { %479 = vst [vmem:[#allocation2 + $0x20] sm:$0x1] %v478_v16  ;;  %482 = vst [vmem:[#allocation2 + $0x2c] sm:$0x1] %v481_v17  ;;  %v1170_v24 = vshrl.u32 %v1118_v18, 16  ;;  %v1173_v25 = vshll.u32 %v1118_v18, 16  ;;  %v308_v29 = vmul.f32 %v5250_v20, %v5528_v9  ;;  %v309_v30 = vmul.f32 %v5251_v21, %v5528_v9 }
  0x16   : > { %v1179_v26 = vshll.u32 %v1119_v19, 16  ;;  %v1183_v27 = vshrl.u32 %v1119_v19, 16  ;;  %v5549_v28 = vld [vmem:[%s7224_s2] ss:$0 sm:$0xff]  ;;  %vm618_vm8 = vsmask.f32 4368  ;;  %v310_v32 = vmul.f32 %v5254_v22, %v5528_v9 }
  0x17   : > { %v1120_v31 = vld [vmem:[#allocation2 + $0x8] sm:$0x1]  ;;  %v311_v33 = vmul.f32 %v5255_v23, %v5528_v9  ;;  %v1172_v35 = vrot.slane %v1170_v24, 4  ;;  %v1175_v36 = vrot.slane %v1173_v25, 5  ;;  %v347_v39 = vadd.f32 %v5549_v28, %v308_v29  ;;  %v5314_v5 = vld [vmem:[%s5523_s23 + $0x18] sm:$0xff]   ;;  %vm5576_vm10 = vmor %vm422_vm2, %vm618_vm8  ;;  %s5028_s20 = sshll.u32 %s7241_s19, 1 }
  0x18   : > { %v1181_v37 = vrot.slane %v1179_v26, 5  ;;  %v1185_v38 = vrot.slane %v1183_v27, 4  ;;  %v348_v40 = vadd.f32 %v5549_v28, %v309_v30  ;;  %v1189_v41 = vshll.u32 %v1120_v31, 16  ;;  %v942_v18 = vld [vmem:[#allocation2 + $0xc] sm:$0xf] }
  0x19   : > { %v349_v42 = vadd.f32 %v5549_v28, %v310_v32  ;;  %v1176_v43 = vor.u32 %v1175_v36, %v1172_v35  ;;  %v350_v45 = vadd.f32 %v5549_v28, %v311_v33  ;;  %v379_v48 = vmax.f32 %v347_v39, 0.0  ;;  %v949_v29 = vld [vmem:[#allocation2 + $0x18] sm:$0xf]  ;;  %v433_v35 = vld [vmem:[#allocation2 + $0x30] sm:$0x1] }
  0x1a   : > { %v1186_v44 = vor.u32 %v1185_v38, %v1181_v37  ;;  %v380_v49 = vmax.f32 %v348_v40, 0.0  ;;  %v1191_v50 = vrot.slane %v1189_v41, 5  ;;  %v312_v59 = vmul.f32 %v5258_v46, %v5528_v9  ;;  %v483_v40 = vld [vmem:[#allocation2 + $0x38] sm:$0x1]  ;;  %v5315_v41 = vld [vmem:[%s5523_s23 + $0x20] sm:$0xff]  }
  0x1b   : > { %v381_v51 = vmax.f32 %v349_v42, 0.0  ;;  %v1177_v52 = vrot.slane %v1176_v43, 4  ;;  %v382_v54 = vmax.f32 %v350_v45, 0.0  ;;  %v5184_v56 = vpack.c.bf16 %v379_v48, %v379_v48  ;;  %v946_v19 = vld [vmem:[#allocation2 + $0x14] sm:$0x1] }
  0x1c   : > { %v1187_v53 = vrot.slane %v1186_v44, 4  ;;  %v5185_v57 = vpack.c.bf16 %v380_v49, %v380_v49  ;;  %v313_v63 = vmul.f32 %v5259_v55, %v5528_v9  ;;  %v351_v15 = vadd.f32 %v5549_v28, %v312_v59  ;;  %v953_v30 = vld [vmem:[#allocation2 + $0x20] sm:$0x1] }
  0x1d   : > { %v5186_v58 = vpack.c.bf16 %v381_v51, %v381_v51  ;;  %v1182_v60 = vsel %vm5562_vm9, %v1177_v52, %v1181_v37  ;;  %v5187_v62 = vpack.c.bf16 %v382_v54, %v382_v54  ;;  %v621_v0 = vshrl.u32 %v5184_v56, 16  ;;  %v436_v51 = vld [vmem:[#allocation2 + $0x3c] sm:$0x1]  ;;  %v486_v52 = vld [vmem:[#allocation2 + $0x44] sm:$0x1] }
  0x1e   : > { %v1192_v61 = vsel %vm5562_vm9, %v1187_v53, %v1191_v50  ;;  %1553 = vrot.lane.b32.xlu0 %v1182_v60, %s5453_s28  ;;  %v624_v1 = vshll.u32 %v5184_v56, 16  ;;  %v629_v3 = vshrl.u32 %v5185_v57, 16  ;;  %v632_v4 = vshll.u32 %v5185_v57, 16  ;;  %v5611_v57 = vld [vmem:[%s5523_s23 + $0x28] sm:$0xff]  }
  0x1f   : > { %v638_v6 = vshrl.u32 %v5186_v58, 16  ;;  %v641_v7 = vshll.u32 %v5186_v58, 16  ;;  %v646_v8 = vshrl.u32 %v5187_v62, 16  ;;  %v649_v11 = vshll.u32 %v5187_v62, 16 }
  0x20   : > { %v623_v13 = vrot.slane %v621_v0, 7  ;;  %v631_v14 = vrot.slane %v629_v3, 7  ;;  %v352_v16 = vadd.f32 %v5549_v28, %v313_v63  ;;  %v5262_v22 = vunpack.c.l.bf16 %v5314_v5 }
  0x21   : > { %v640_v20 = vrot.slane %v638_v6, 7  ;;  %v648_v21 = vrot.slane %v646_v8, 7  ;;  %v5263_v23 = vunpack.c.h.bf16 %v5314_v5  ;;  %v383_v39 = vmax.f32 %v351_v15, 0.0 }
  0x22   : > { %v626_v24 = vor.u32 %v624_v1, %v623_v13  ;;  %v627_v25 = vrot.slane %v623_v13, 4  ;;  %v634_v26 = vor.u32 %v632_v4, %v631_v14  ;;  %1555 = vrot.lane.b32.xlu0 %v1192_v61, %s5453_s28  ;;  %v636_v27 = vrot.slane %v631_v14, 4 }
  0x23   : > { %v643_v31 = vor.u32 %v641_v7, %v640_v20  ;;  %v644_v32 = vrot.slane %v640_v20, 4  ;;  %v651_v33 = vor.u32 %v649_v11, %v648_v21  ;;  %v653_v34 = vrot.slane %v648_v21, 4 }
  0x24   : > { %v635_v36 = vsel %vm5576_vm10, %v627_v25, %v634_v26  ;;  %v943_v37 = vsel %vm5584_vm11, %v626_v24, %v942_v18  ;;  %v947_v38 = vsel %vm5507_vm5, %v636_v27, %v946_v19  ;;  %v384_v45 = vmax.f32 %v352_v16, 0.0  ;;  %v956_v27 = vld [vmem:[#allocation2 + $0x24] sm:$0xf] }
  0x25   : > { %944 = vst [vmem:[#allocation2 + $0xc] sm:$0xf] %v943_v37  ;;  %945 = vst.msk [vmem:[#allocation2 + $0x10] sm:$0xf] %vm411_vm0, %v635_v36  ;;  %v652_v42 = vsel %vm5576_vm10, %v644_v32, %v651_v33  ;;  %v950_v43 = vsel %vm5584_vm11, %v643_v31, %v949_v29  ;;  %v954_v44 = vsel %vm5507_vm5, %v653_v34, %v953_v30  ;;  %v434_v50 = vsel %vm5507_vm5, 0, %v433_v35 }
  0x26   : > { %948 = vst [vmem:[#allocation2 + $0x14] sm:$0x1] %v947_v38  ;;  %951 = vst [vmem:[#allocation2 + $0x18] sm:$0xf] %v950_v43  ;;  %v5188_v46 = vpack.c.bf16 %v383_v39, %v383_v39  ;;  %v314_v48 = vmul.f32 %v5262_v22, %v5528_v9  ;;  %v315_v49 = vmul.f32 %v5263_v23, %v5528_v9  ;;  %v484_v54 = vsel %vm5532_vm7, 0, %v483_v40 }
  0x27   : > { %952 = vst.msk [vmem:[#allocation2 + $0x1c] sm:$0xf] %vm411_vm0, %v652_v42  ;;  %955 = vst [vmem:[#allocation2 + $0x20] sm:$0x1] %v954_v44  ;;  %v5189_v53 = vpack.c.bf16 %v384_v45, %v384_v45  ;;  %v5266_v55 = vunpack.c.l.bf16 %v5315_v41  ;;  %v5267_v56 = vunpack.c.h.bf16 %v5315_v41  ;;  %v437_v6 = vsel %vm5507_vm5, 0, %v436_v51 }
  0x28   : > { %435 = vst [vmem:[#allocation2 + $0x30] sm:$0x1] %v434_v50  ;;  %v655_v58 = vshrl.u32 %v5188_v46, 16  ;;  %v658_v59 = vshll.u32 %v5188_v46, 16  ;;  %v353_v60 = vadd.f32 %v5549_v28, %v314_v48  ;;  %v354_v61 = vadd.f32 %v5549_v28, %v315_v49  ;;  %485 = vst [vmem:[#allocation2 + $0x38] sm:$0x1] %v484_v54 }
  0x29   : > { %v663_v62 = vshrl.u32 %v5189_v53, 16  ;;  %v666_v63 = vshll.u32 %v5189_v53, 16  ;;  %v316_v0 = vmul.f32 %v5266_v55, %v5528_v9  ;;  %v317_v1 = vmul.f32 %v5267_v56, %v5528_v9  ;;  %438 = vst [vmem:[#allocation2 + $0x3c] sm:$0x1] %v437_v6  ;;  %v960_v56 = vld [vmem:[#allocation2 + $0x2c] sm:$0x1] }
  0x2a   : > { %v657_v3 = vrot.slane %v655_v58, 7  ;;  %v385_v4 = vmax.f32 %v353_v60, 0.0  ;;  %v386_v5 = vmax.f32 %v354_v61, 0.0  ;;  %v487_v13 = vsel %vm5532_vm7, 0, %v486_v52 }
  0x2b   : > { %v665_v7 = vrot.slane %v663_v62, 7  ;;  %v5620_v8 = vadd.f32 %v5549_v28, %v316_v0  ;;  %v5623_v11 = vadd.f32 %v5549_v28, %v317_v1  ;;  %488 = vst [vmem:[#allocation2 + $0x44] sm:$0x1] %v487_v13  ;;  %v5270_v21 = vunpack.c.l.bf16 %v5611_v57 }
  0x2c   : > { %v1121_v14 = vld [vmem:[#allocation2 + $0xc] sm:$0xf]  ;;  %v1122_v15 = vld [vmem:[#allocation2 + $0x10] sm:$0xf]  ;;  %v660_v18 = vor.u32 %v658_v59, %v657_v3  ;;  %v5190_v19 = vpack.c.bf16 %v385_v4, %v385_v4  ;;  %v5627_v20 = vpack.c.bf16 %v386_v5, %v386_v5  ;;  %v661_v33 = vrot.slane %v657_v3, 4 }
  0x2d   : > { %v1123_v16 = vld [vmem:[#allocation2 + $0x14] sm:$0x1]  ;;  %v1194_v22 = vshrl.u32 %v1121_v14, 16  ;;  %v1197_v23 = vshll.u32 %v1121_v14, 16  ;;  %v1203_v24 = vshll.u32 %v1122_v15, 16  ;;  %v1207_v25 = vshrl.u32 %v1122_v15, 16 }
  0x2e   : > { %v1124_v26 = vld [vmem:[#allocation2 + $0x18] sm:$0xf]  ;;  %v1213_v29 = vshll.u32 %v1123_v16, 16  ;;  %v1125_v30 = vld [vmem:[#allocation2 + $0x1c] sm:$0xf]  ;;  %v668_v50 = vor.u32 %v666_v63, %v665_v7  ;;  %v957_v51 = vsel %vm5584_vm11, %v660_v18, %v956_v27  ;;  %v670_v60 = vrot.slane %v665_v7, 4 }
  0x2f   : > { %v1218_v31 = vshrl.u32 %v1124_v26, 16  ;;  %v1221_v32 = vshll.u32 %v1124_v26, 16  ;;  %v1196_v34 = vrot.slane %v1194_v22, 4  ;;  %v1199_v35 = vrot.slane %v1197_v23, 5  ;;  %v1126_v38 = vld [vmem:[#allocation2 + $0x20] sm:$0x1] }
  0x30   : > { %v1205_v36 = vrot.slane %v1203_v24, 5  ;;  %v1209_v37 = vrot.slane %v1207_v25, 4  ;;  %v1215_v39 = vrot.slane %v1213_v29, 5  ;;  %v1227_v42 = vshll.u32 %v1125_v30, 16  ;;  %958 = vst [vmem:[#allocation2 + $0x24] sm:$0xf] %v957_v51 }
  0x31   : > { %v1220_v40 = vrot.slane %v1218_v31, 4  ;;  %v1223_v41 = vrot.slane %v1221_v32, 5  ;;  %v1200_v43 = vor.u32 %v1199_v35, %v1196_v34  ;;  %v1231_v45 = vshrl.u32 %v1125_v30, 16  ;;  %v963_v14 = vld [vmem:[#allocation2 + $0x30] sm:$0xf] }
  0x32   : > { %v1210_v44 = vor.u32 %v1209_v37, %v1205_v36  ;;  %v1237_v46 = vshll.u32 %v1126_v38, 16  ;;  %v1229_v49 = vrot.slane %v1227_v42, 5  ;;  %v669_v59 = vsel %vm5576_vm10, %v661_v33, %v668_v50  ;;  %v967_v25 = vld [vmem:[#allocation2 + $0x38] sm:$0x1] }
  0x33   : > { %v1224_v48 = vor.u32 %v1223_v41, %v1220_v40  ;;  %v1201_v52 = vrot.slane %v1200_v43, 4  ;;  %v1233_v54 = vrot.slane %v1231_v45, 4  ;;  %v672_v61 = vshrl.u32 %v5190_v19, 16  ;;  %959 = vst.msk [vmem:[#allocation2 + $0x28] sm:$0xf] %vm411_vm0, %v669_v59 }
  0x34   : > { %v1211_v53 = vrot.slane %v1210_v44, 4  ;;  %v1239_v55 = vrot.slane %v1237_v46, 5  ;;  %v675_v1 = vshll.u32 %v5190_v19, 16  ;;  %v961_v4 = vsel %vm5507_vm5, %v670_v60, %v960_v56  ;;  %v970_v46 = vld [vmem:[#allocation2 + $0x3c] sm:$0xf] }
  0x35   : > { %v1225_v58 = vrot.slane %v1224_v48, 4  ;;  %v1206_v62 = vsel %vm5562_vm9, %v1201_v52, %v1205_v36  ;;  %v1234_v0 = vor.u32 %v1233_v54, %v1229_v49  ;;  %v674_v5 = vrot.slane %v672_v61, 7  ;;  %962 = vst [vmem:[#allocation2 + $0x2c] sm:$0x1] %v961_v4  ;;  %v974_v54 = vld [vmem:[#allocation2 + $0x44] sm:$0x1] }
  0x36   : > { %v1216_v63 = vsel %vm5562_vm9, %v1211_v53, %v1215_v39  ;;  %1557 = vrot.lane.b32.xlu1 %v1206_v62, %s5453_s28  ;;  %v680_v6 = vshrl.u32 %v5627_v20, 16  ;;  %v683_v13 = vshll.u32 %v5627_v20, 16  ;;  %v387_v15 = vmax.f32 %v5620_v8, 0.0  ;;  %v439_v60 = vld [vmem:[#allocation2 + $0x48] sm:$0x1] }
  0x37   : > { %v1230_v3 = vsel %vm5562_vm9, %v1225_v58, %v1229_v49  ;;  %v1235_v7 = vrot.slane %v1234_v0, 4  ;;  %v388_v16 = vmax.f32 %v5623_v11, 0.0  ;;  %v677_v18 = vor.u32 %v675_v1, %v674_v5  ;;  %v1127_v8 = vld [vmem:[#allocation2 + $0x24] sm:$0xf]  ;;  %v489_v1 = vld [vmem:[#allocation2 + $0x50] sm:$0x1] }
  0x38   : > { %1561 = vrot.lane.b32.xlu0 %v1230_v3, %s5453_s28  ;;  %v678_v19 = vrot.slane %v674_v5, 4  ;;  %v682_v22 = vrot.slane %v680_v6, 7  ;;  %v5271_v23 = vunpack.c.h.bf16 %v5611_v57  ;;  %v5192_v26 = vpack.c.bf16 %v387_v15, %v387_v15 }
  0x39   : > { %v1240_v24 = vsel %vm5562_vm9, %v1235_v7, %v1239_v55  ;;  %v5193_v27 = vpack.c.bf16 %v388_v16, %v388_v16  ;;  %v318_v20 = vmul.f32 %v5270_v21, %v5528_v9  ;;  %v964_v11 = vsel %vm5584_vm11, %v677_v18, %v963_v14 }
  0x3a   : > { %1559 = vrot.lane.b32.xlu1 %v1216_v63, %s5453_s28  ;;  %v685_v29 = vor.u32 %v683_v13, %v682_v22  ;;  %v687_v30 = vrot.slane %v682_v22, 4  ;;  %v319_v31 = vmul.f32 %v5271_v23, %v5528_v9  ;;  %v1242_v32 = vshrl.u32 %v1127_v8, 16  ;;  %965 = vst [vmem:[#allocation2 + $0x30] sm:$0xf] %v964_v11  ;;  %v1128_v36 = vld [vmem:[#allocation2 + $0x28] sm:$0xf] }
  0x3b   : > { %v1245_v33 = vshll.u32 %v1127_v8, 16  ;;  %v689_v34 = vshrl.u32 %v5192_v26, 16  ;;  %v692_v35 = vshll.u32 %v5192_v26, 16  ;;  %v697_v37 = vshrl.u32 %v5193_v27, 16 }
  0x3c   : > { %v686_v57 = vsel %vm5576_vm10, %v678_v19, %v685_v29  ;;  %v968_v21 = vsel %vm5507_vm5, %v687_v30, %v967_v25  ;;  %v700_v38 = vshll.u32 %v5193_v27, 16  ;;  %v1244_v39 = vrot.slane %v1242_v32, 4  ;;  %v1129_v43 = vld [vmem:[#allocation2 + $0x2c] sm:$0x1]  ;;  %v5317_v29 = vld [vmem:[%s5523_s23 + $0x30] sm:$0xff]  }
  0x3d   : > { %v1247_v40 = vrot.slane %v1245_v33, 5  ;;  %v1251_v41 = vshll.u32 %v1128_v36, 16  ;;  %v1255_v42 = vshrl.u32 %v1128_v36, 16  ;;  %966 = vst.msk [vmem:[#allocation2 + $0x34] sm:$0xf] %vm411_vm0, %v686_v57  ;;  %v691_v44 = vrot.slane %v689_v34, 7 }
  0x3e   : > { %969 = vst [vmem:[#allocation2 + $0x38] sm:$0x1] %v968_v21  ;;  %1563 = vrot.lane.b32.xlu1 %v1240_v24, %s5453_s28  ;;  %v699_v45 = vrot.slane %v697_v37, 7  ;;  %v357_v48 = vadd.f32 %v5549_v28, %v318_v20  ;;  %v358_v49 = vadd.f32 %v5549_v28, %v319_v31  ;;  %v1261_v53 = vshll.u32 %v1129_v43, 16  ;;  %v442_v33 = vld [vmem:[#allocation2 + $0x54] sm:$0x1] }
  0x3f   : > { %v1248_v50 = vor.u32 %v1247_v40, %v1244_v39  ;;  %v1253_v51 = vrot.slane %v1251_v41, 5  ;;  %v1257_v52 = vrot.slane %v1255_v42, 4  ;;  %v694_v55 = vor.u32 %v692_v35, %v691_v44  ;;  %v5318_v21 = vld [vmem:[%s5523_s23 + $0x38] sm:$0xff]  }
  0x40   : > { %v695_v56 = vrot.slane %v691_v44, 4  ;;  %v702_v58 = vor.u32 %v700_v38, %v699_v45  ;;  %v704_v59 = vrot.slane %v699_v45, 4  ;;  %v1263_v63 = vrot.slane %v1261_v53, 5 }
  0x41   : > { %v1249_v61 = vrot.slane %v1248_v50, 4  ;;  %v1258_v62 = vor.u32 %v1257_v52, %v1253_v51  ;;  %v389_v0 = vmax.f32 %v357_v48, 0.0  ;;  %v1130_v3 = vld [vmem:[#allocation2 + $0x30] sm:$0xf]  ;;  %v971_v5 = vsel %vm5584_vm11, %v694_v55, %v970_v46 }
  0x42   : > { %v703_v4 = vsel %vm5576_vm10, %v695_v56, %v702_v58  ;;  %v975_v6 = vsel %vm5507_vm5, %v704_v59, %v974_v54  ;;  %v390_v7 = vmax.f32 %v358_v49, 0.0  ;;  %v1266_v15 = vshrl.u32 %v1130_v3, 16  ;;  %972 = vst [vmem:[#allocation2 + $0x3c] sm:$0xf] %v971_v5 }
  0x43   : > { %v1254_v13 = vsel %vm5562_vm9, %v1249_v61, %v1253_v51  ;;  %v1259_v14 = vrot.slane %v1258_v62, 4  ;;  %v1269_v16 = vshll.u32 %v1130_v3, 16  ;;  %973 = vst.msk [vmem:[#allocation2 + $0x40] sm:$0xf] %vm411_vm0, %v703_v4  ;;  %976 = vst [vmem:[#allocation2 + $0x44] sm:$0x1] %v975_v6  ;;  %v5194_v23 = vpack.c.bf16 %v389_v0, %v389_v0 }
  0x44   : > { %1565 = vrot.lane.b32.xlu0 %v1254_v13, %s5453_s28  ;;  %v1131_v18 = vld [vmem:[#allocation2 + $0x34] sm:$0xf]  ;;  %v440_v22 = vsel %vm5507_vm5, 0, %v439_v60  ;;  %v5195_v24 = vpack.c.bf16 %v390_v7, %v390_v7  ;;  %v490_v25 = vsel %vm5532_vm7, 0, %v489_v1  ;;  %v1268_v27 = vrot.slane %v1266_v15, 4 }
  0x45   : > { %v1132_v19 = vld [vmem:[#allocation2 + $0x38] sm:$0x1]  ;;  %v1264_v26 = vsel %vm5562_vm9, %v1259_v14, %v1263_v63  ;;  %v1271_v20 = vrot.slane %v1269_v16, 5  ;;  %v1275_v8 = vshll.u32 %v1131_v18, 16  ;;  %441 = vst [vmem:[#allocation2 + $0x48] sm:$0x1] %v440_v22  ;;  %v5274_v40 = vunpack.c.l.bf16 %v5317_v29 }
  0x46   : > { %491 = vst [vmem:[#allocation2 + $0x50] sm:$0x1] %v490_v25  ;;  %1567 = vrot.lane.b32.xlu1 %v1264_v26, %s5453_s28  ;;  %v1279_v11 = vshrl.u32 %v1131_v18, 16  ;;  %v1285_v30 = vshll.u32 %v1132_v19, 16  ;;  %v706_v31 = vshrl.u32 %v5194_v23, 16  ;;  %v709_v32 = vshll.u32 %v5194_v23, 16 }
  0x47   : > { %v1272_v34 = vor.u32 %v1271_v20, %v1268_v27  ;;  %v1277_v35 = vrot.slane %v1275_v8, 5  ;;  %v714_v36 = vshrl.u32 %v5195_v24, 16  ;;  %v717_v57 = vshll.u32 %v5195_v24, 16  ;;  %v492_v4 = vld [vmem:[#allocation2 + $0x5c] sm:$0x1] }
  0x48   : > { %v1281_v37 = vrot.slane %v1279_v11, 4  ;;  %v1287_v38 = vrot.slane %v1285_v30, 5  ;;  %v708_v39 = vrot.slane %v706_v31, 7  ;;  %v5275_v43 = vunpack.c.h.bf16 %v5317_v29  ;;  %v445_v22 = vld [vmem:[#allocation2 + $0x60] sm:$0x1] }
  0x49   : > { %v1273_v41 = vrot.slane %v1272_v34, 4  ;;  %v716_v42 = vrot.slane %v714_v36, 7  ;;  %v443_v44 = vsel %vm5507_vm5, 0, %v442_v33  ;;  %v1133_v46 = vld [vmem:[#allocation2 + $0x3c] sm:$0xf]  ;;  %v320_v51 = vmul.f32 %v5274_v40, %v5528_v9  ;;  %v5709_v30 = vld [vmem:[%s5523_s23 + $0x40] sm:$0xff]  }
  0x4a   : > { %v1282_v45 = vor.u32 %v1281_v37, %v1277_v35  ;;  %v1134_v48 = vld [vmem:[#allocation2 + $0x40] sm:$0xf]  ;;  %v1135_v49 = vld [vmem:[#allocation2 + $0x44] sm:$0x1]  ;;  %v711_v50 = vor.u32 %v709_v32, %v708_v39  ;;  %444 = vst [vmem:[#allocation2 + $0x54] sm:$0x1] %v443_v44  ;;  %v5278_v52 = vunpack.c.l.bf16 %v5318_v21  ;;  %v321_v19 = vmul.f32 %v5275_v43, %v5528_v9 }
  0x4b   : > { %v1278_v53 = vsel %vm5562_vm9, %v1273_v41, %v1277_v35  ;;  %v1290_v54 = vshrl.u32 %v1133_v46, 16  ;;  %v1293_v55 = vshll.u32 %v1133_v46, 16  ;;  %v1299_v56 = vshll.u32 %v1134_v48, 16  ;;  %v495_v27 = vld [vmem:[#allocation2 + $0x68] sm:$0x1] }
  0x4c   : > { %1569 = vrot.lane.b32.xlu0 %v1278_v53, %s5453_s28  ;;  %v1283_v58 = vrot.slane %v1282_v45, 4  ;;  %v1303_v59 = vshrl.u32 %v1134_v48, 16  ;;  %v1309_v60 = vshll.u32 %v1135_v49, 16  ;;  %v712_v61 = vrot.slane %v708_v39, 4  ;;  %v977_v62 = vld [vmem:[#allocation2 + $0x48] sm:$0xf] }
  0x4d   : > { %v1292_v63 = vrot.slane %v1290_v54, 4  ;;  %v1295_v0 = vrot.slane %v1293_v55, 5  ;;  %v1301_v1 = vrot.slane %v1299_v56, 5  ;;  %v719_v3 = vor.u32 %v717_v57, %v716_v42  ;;  %v981_v14 = vld [vmem:[#allocation2 + $0x50] sm:$0x1] }
  0x4e   : > { %v1288_v5 = vsel %vm5562_vm9, %v1283_v58, %v1287_v38  ;;  %v1305_v6 = vrot.slane %v1303_v59, 4  ;;  %v1311_v7 = vrot.slane %v1309_v60, 5  ;;  %v978_v13 = vsel %vm5584_vm11, %v711_v50, %v977_v62  ;;  %v448_v35 = vld [vmem:[#allocation2 + $0x6c] sm:$0x1] }
  0x4f   : > { %1571 = vrot.lane.b32.xlu1 %v1288_v5, %s5453_s28  ;;  %v1296_v15 = vor.u32 %v1295_v0, %v1292_v63  ;;  %v720_v16 = vsel %vm5576_vm10, %v712_v61, %v719_v3  ;;  %979 = vst [vmem:[#allocation2 + $0x48] sm:$0xf] %v978_v13  ;;  %v721_v18 = vrot.slane %v716_v42, 4  ;;  %v359_v24 = vadd.f32 %v5549_v28, %v320_v51 }
  0x50   : > { %v1306_v23 = vor.u32 %v1305_v6, %v1301_v1  ;;  %980 = vst.msk [vmem:[#allocation2 + $0x4c] sm:$0xf] %vm411_vm0, %v720_v16  ;;  %v493_v25 = vsel %vm5532_vm7, 0, %v492_v4  ;;  %v5279_v26 = vunpack.c.h.bf16 %v5318_v21  ;;  %v360_v29 = vadd.f32 %v5549_v28, %v321_v19 }
  0x51   : > { %v1297_v20 = vrot.slane %v1296_v15, 4  ;;  %v982_v8 = vsel %vm5507_vm5, %v721_v18, %v981_v14  ;;  %494 = vst [vmem:[#allocation2 + $0x5c] sm:$0x1] %v493_v25  ;;  %v322_v11 = vmul.f32 %v5278_v52, %v5528_v9  ;;  %v391_v32 = vmax.f32 %v359_v24, 0.0  ;;  %v984_v61 = vld [vmem:[#allocation2 + $0x54] sm:$0xf] }
  0x52   : > { %v1307_v31 = vrot.slane %v1306_v23, 4  ;;  %983 = vst [vmem:[#allocation2 + $0x50] sm:$0x1] %v982_v8  ;;  %v323_v33 = vmul.f32 %v5279_v26, %v5528_v9  ;;  %v446_v34 = vsel %vm5507_vm5, 0, %v445_v22  ;;  %v392_v57 = vmax.f32 %v360_v29, 0.0 }
  0x53   : > { %v1302_v36 = vsel %vm5562_vm9, %v1297_v20, %v1301_v1  ;;  %v361_v21 = vadd.f32 %v5549_v28, %v322_v11  ;;  %447 = vst [vmem:[#allocation2 + $0x60] sm:$0x1] %v446_v34  ;;  %v496_v37 = vsel %vm5532_vm7, 0, %v495_v27  ;;  %v5196_v39 = vpack.c.bf16 %v391_v32, %v391_v32  ;;  %v498_v26 = vld [vmem:[#allocation2 + $0x74] sm:$0x1] }
  0x54   : > { %1573 = vrot.lane.b32.xlu0 %v1302_v36, %s5453_s28  ;;  %v1312_v38 = vsel %vm5562_vm9, %v1307_v31, %v1311_v7  ;;  %v362_v40 = vadd.f32 %v5549_v28, %v323_v33  ;;  %497 = vst [vmem:[#allocation2 + $0x68] sm:$0x1] %v496_v37  ;;  %v5282_v41 = vunpack.c.l.bf16 %v5709_v30  ;;  %v5197_v42 = vpack.c.bf16 %v392_v57, %v392_v57  ;;  %v5320_v33 = vld [vmem:[%s5523_s23 + $0x48] sm:$0xff]   ;;  %v451_v37 = vld [vmem:[#allocation2 + $0x78] sm:$0x1] }
  0x55   : > { %1575 = vrot.lane.b32.xlu1 %v1312_v38, %s5453_s28  ;;  %v393_v43 = vmax.f32 %v361_v21, 0.0  ;;  %v5283_v44 = vunpack.c.h.bf16 %v5709_v30  ;;  %v449_v45 = vsel %vm5507_vm5, 0, %v448_v35  ;;  %v723_v48 = vshrl.u32 %v5196_v39, 16 }
  0x56   : > { %v1136_v46 = vld [vmem:[#allocation2 + $0x48] sm:$0xf]  ;;  %v726_v49 = vshll.u32 %v5196_v39, 16  ;;  %v394_v50 = vmax.f32 %v362_v40, 0.0  ;;  %v324_v51 = vmul.f32 %v5282_v41, %v5528_v9  ;;  %450 = vst [vmem:[#allocation2 + $0x6c] sm:$0x1] %v449_v45  ;;  %v5286_v45 = vunpack.c.l.bf16 %v5320_v33 }
  0x57   : > { %v1137_v52 = vld [vmem:[#allocation2 + $0x4c] sm:$0xf]  ;;  %v1314_v53 = vshrl.u32 %v1136_v46, 16  ;;  %v1317_v54 = vshll.u32 %v1136_v46, 16  ;;  %v731_v55 = vshrl.u32 %v5197_v42, 16  ;;  %v734_v56 = vshll.u32 %v5197_v42, 16 }
  0x58   : > { %v1323_v58 = vshll.u32 %v1137_v52, 16  ;;  %v1327_v59 = vshrl.u32 %v1137_v52, 16  ;;  %v725_v60 = vrot.slane %v723_v48, 7  ;;  %v5198_v62 = vpack.c.bf16 %v393_v43, %v393_v43  ;;  %v988_v14 = vld [vmem:[#allocation2 + $0x5c] sm:$0x1] }
  0x59   : > { %v1316_v63 = vrot.slane %v1314_v53, 4  ;;  %v1319_v0 = vrot.slane %v1317_v54, 5  ;;  %v1138_v1 = vld [vmem:[#allocation2 + $0x50] sm:$0x1]  ;;  %v733_v3 = vrot.slane %v731_v55, 7  ;;  %v5199_v4 = vpack.c.bf16 %v394_v50, %v394_v50 }
  0x5a   : > { %v1325_v5 = vrot.slane %v1323_v58, 5  ;;  %v1329_v6 = vrot.slane %v1327_v59, 4  ;;  %v1333_v7 = vshll.u32 %v1138_v1, 16  ;;  %v728_v13 = vor.u32 %v726_v49, %v725_v60  ;;  %v991_v35 = vld [vmem:[#allocation2 + $0x60] sm:$0xf]  ;;  %v5749_v49 = vld [vmem:[%s5523_s23 + $0x50] sm:$0xff]  }
  0x5b   : > { %v1320_v15 = vor.u32 %v1319_v0, %v1316_v63  ;;  %v729_v16 = vrot.slane %v725_v60, 4  ;;  %v736_v18 = vor.u32 %v734_v56, %v733_v3  ;;  %v738_v19 = vrot.slane %v733_v3, 4  ;;  %v995_v42 = vld [vmem:[#allocation2 + $0x68] sm:$0x1]  ;;  %v501_v48 = vld [vmem:[#allocation2 + $0x80] sm:$0x1] }
  0x5c   : > { %v1330_v22 = vor.u32 %v1329_v6, %v1325_v5  ;;  %v1335_v23 = vrot.slane %v1333_v7, 5  ;;  %v985_v24 = vsel %vm5584_vm11, %v728_v13, %v984_v61  ;;  %v740_v25 = vshrl.u32 %v5198_v62, 16 }
  0x5d   : > { %v1321_v27 = vrot.slane %v1320_v15, 4  ;;  %v737_v20 = vsel %vm5576_vm10, %v729_v16, %v736_v18  ;;  %986 = vst [vmem:[#allocation2 + $0x54] sm:$0xf] %v985_v24  ;;  %v989_v8 = vsel %vm5507_vm5, %v738_v19, %v988_v14  ;;  %v743_v29 = vshll.u32 %v5198_v62, 16 }
  0x5e   : > { %v1331_v11 = vrot.slane %v1330_v22, 4  ;;  %987 = vst.msk [vmem:[#allocation2 + $0x58] sm:$0xf] %vm411_vm0, %v737_v20  ;;  %990 = vst [vmem:[#allocation2 + $0x5c] sm:$0x1] %v989_v8  ;;  %v742_v30 = vrot.slane %v740_v25, 7  ;;  %v325_v36 = vmul.f32 %v5283_v44, %v5528_v9  ;;  %v363_v57 = vadd.f32 %v5549_v28, %v324_v51 }
  0x5f   : > { %v748_v31 = vshrl.u32 %v5199_v4, 16  ;;  %v751_v32 = vshll.u32 %v5199_v4, 16  ;;  %v1326_v34 = vsel %vm5562_vm9, %v1321_v27, %v1325_v5  ;;  %v499_v21 = vsel %vm5532_vm7, 0, %v498_v26  ;;  %v998_v8 = vld [vmem:[#allocation2 + $0x6c] sm:$0xf] }
  0x60   : > { %1577 = vrot.lane.b32.xlu0 %v1326_v34, %s5453_s28  ;;  %v1336_v38 = vsel %vm5562_vm9, %v1331_v11, %v1335_v23  ;;  %v745_v39 = vor.u32 %v743_v29, %v742_v30  ;;  %v746_v40 = vrot.slane %v742_v30, 4  ;;  %500 = vst [vmem:[#allocation2 + $0x74] sm:$0x1] %v499_v21  ;;  %v364_v43 = vadd.f32 %v5549_v28, %v325_v36 }
  0x61   : > { %v750_v41 = vrot.slane %v748_v31, 7  ;;  %1579 = vrot.lane.b32.xlu1 %v1336_v38, %s5453_s28  ;;  %v395_v44 = vmax.f32 %v363_v57, 0.0  ;;  %v5287_v46 = vunpack.c.h.bf16 %v5320_v33  ;;  %v452_v53 = vsel %vm5507_vm5, 0, %v451_v37 }
  0x62   : > { %v992_v51 = vsel %vm5584_vm11, %v745_v39, %v991_v35  ;;  %v396_v54 = vmax.f32 %v364_v43, 0.0  ;;  %v326_v56 = vmul.f32 %v5286_v45, %v5528_v9  ;;  %453 = vst [vmem:[#allocation2 + $0x78] sm:$0x1] %v452_v53  ;;  %v502_v62 = vsel %vm5532_vm7, 0, %v501_v48 }
  0x63   : > { %v753_v50 = vor.u32 %v751_v32, %v750_v41  ;;  %v755_v52 = vrot.slane %v750_v41, 4  ;;  %993 = vst [vmem:[#allocation2 + $0x60] sm:$0xf] %v992_v51  ;;  %v5200_v55 = vpack.c.bf16 %v395_v44, %v395_v44  ;;  %v327_v58 = vmul.f32 %v5287_v46, %v5528_v9  ;;  %503 = vst [vmem:[#allocation2 + $0x80] sm:$0x1] %v502_v62 }
  0x64   : > { %v1139_v59 = vld [vmem:[#allocation2 + $0x54] sm:$0xf]  ;;  %v5290_v63 = vunpack.c.l.bf16 %v5749_v49  ;;  %v5201_v9 = vpack.c.bf16 %v396_v54, %v396_v54  ;;  %v365_v5 = vadd.f32 %v5549_v28, %v326_v56  ;;  %v454_v56 = vld [vmem:[#allocation2 + $0x84] sm:$0x1]  ;;  %vm1778_vm12 = vcmask 1042432  }
  0x65   : > { %v754_v60 = vsel %vm5576_vm10, %v746_v40, %v753_v50  ;;  %v996_v61 = vsel %vm5507_vm5, %v755_v52, %v995_v42  ;;  %v1140_v0 = vld [vmem:[#allocation2 + $0x58] sm:$0xf]  ;;  %v1338_v1 = vshrl.u32 %v1139_v59, 16  ;;  %v1341_v3 = vshll.u32 %v1139_v59, 16  ;;  %v1141_v4 = vld [vmem:[#allocation2 + $0x5c] sm:$0x1] }
  0x66   : > { %994 = vst.msk [vmem:[#allocation2 + $0x64] sm:$0xf] %vm411_vm0, %v754_v60  ;;  %997 = vst [vmem:[#allocation2 + $0x68] sm:$0x1] %v996_v61  ;;  %v1347_v6 = vshll.u32 %v1140_v0, 16  ;;  %v1351_v7 = vshrl.u32 %v1140_v0, 16  ;;  %v366_v29 = vadd.f32 %v5549_v28, %v327_v58 }
  0x67   : > { %v1357_v13 = vshll.u32 %v1141_v4, 16  ;;  %v757_v14 = vshrl.u32 %v5200_v55, 16  ;;  %v1340_v15 = vrot.slane %v1338_v1, 4  ;;  %v1343_v16 = vrot.slane %v1341_v3, 5  ;;  %v1002_v21 = vld [vmem:[#allocation2 + $0x74] sm:$0x1] }
  0x68   : > { %v760_v18 = vshll.u32 %v5200_v55, 16  ;;  %v765_v19 = vshrl.u32 %v5201_v9, 16  ;;  %v1349_v22 = vrot.slane %v1347_v6, 5  ;;  %v1353_v23 = vrot.slane %v1351_v7, 4  ;;  %v504_v58 = vld [vmem:[#allocation2 + $0x8c] sm:$0x1] }
  0x69   : > { %v1359_v24 = vrot.slane %v1357_v13, 5  ;;  %v759_v25 = vrot.slane %v757_v14, 7  ;;  %v1344_v26 = vor.u32 %v1343_v16, %v1340_v15  ;;  %v768_v20 = vshll.u32 %v5201_v9, 16  ;;  %v5784_v4 = vld [vmem:[%s7223_s1] ss:$0 sm:$0xff]  ;;  %v5794_v14 = vld [vmem:[%s5523_s23 + $0x58] sm:$0xff]  }
  0x6a   : > { %v767_v27 = vrot.slane %v765_v19, 7  ;;  %v1354_v11 = vor.u32 %v1353_v23, %v1349_v22  ;;  %v1142_v30 = vld [vmem:[#allocation2 + $0x60] sm:$0xf]  ;;  %v397_v33 = vmax.f32 %v365_v5, 0.0  ;;  %v398_v55 = vmax.f32 %v366_v29, 0.0 }
  0x6b   : > { %v762_v31 = vor.u32 %v760_v18, %v759_v25  ;;  %v763_v32 = vrot.slane %v759_v25, 4  ;;  %v1345_v34 = vrot.slane %v1344_v26, 4  ;;  %v1362_v35 = vshrl.u32 %v1142_v30, 16  ;;  %v1054_v15 = vld [vmem:[#allocation2] sm:$0xf] }
  0x6c   : > { %v1365_v36 = vshll.u32 %v1142_v30, 16  ;;  %v770_v57 = vor.u32 %v768_v20, %v767_v27  ;;  %v1355_v37 = vrot.slane %v1354_v11, 4  ;;  %v772_v41 = vrot.slane %v767_v27, 4  ;;  %1086 = vst.msk [vmem:[#allocation3] sm:$0xf] %vm411_vm0, %v1054_v15 }
  0x6d   : > { %v1143_v38 = vld [vmem:[#allocation2 + $0x64] sm:$0xf]  ;;  %v1144_v39 = vld [vmem:[#allocation2 + $0x68] sm:$0x1]  ;;  %v999_v40 = vsel %vm5584_vm11, %v762_v31, %v998_v8  ;;  %v5202_v42 = vpack.c.bf16 %v397_v33, %v397_v33  ;;  %v1350_v28 = vsel %vm5562_vm9, %v1345_v34, %v1349_v22  ;;  %v1364_v43 = vrot.slane %v1362_v35, 4 }
  0x6e   : > { %v1367_v44 = vrot.slane %v1365_v36, 5  ;;  %v1371_v45 = vshll.u32 %v1143_v38, 16  ;;  %1000 = vst [vmem:[#allocation2 + $0x6c] sm:$0xf] %v999_v40  ;;  %1581 = vrot.lane.b32.xlu0 %v1350_v28, %s5453_s28  ;;  %v1360_v46 = vsel %vm5562_vm9, %v1355_v37, %v1359_v24  ;;  %v1375_v48 = vshrl.u32 %v1143_v38, 16 }
  0x6f   : > { %v1381_v50 = vshll.u32 %v1144_v39, 16  ;;  %v771_v51 = vsel %vm5576_vm10, %v763_v32, %v770_v57  ;;  %1583 = vrot.lane.b32.xlu1 %v1360_v46, %s5453_s28  ;;  %v1003_v54 = vsel %vm5507_vm5, %v772_v41, %v1002_v21  ;;  %v774_v61 = vshrl.u32 %v5202_v42, 16  ;;  %v1005_v22 = vld [vmem:[#allocation2 + $0x78] sm:$0xf]  ;;  %v5804_v27 = vld [vmem:[%s7224_s2] ss:$0 sm:$0xff] }
  0x70   : > { %v1368_v52 = vor.u32 %v1367_v44, %v1364_v43  ;;  %v1373_v53 = vrot.slane %v1371_v45, 5  ;;  %1001 = vst.msk [vmem:[#allocation2 + $0x70] sm:$0xf] %vm411_vm0, %v771_v51  ;;  %v1377_v59 = vrot.slane %v1375_v48, 4  ;;  %1004 = vst [vmem:[#allocation2 + $0x74] sm:$0x1] %v1003_v54  ;;  %v5203_v1 = vpack.c.bf16 %v398_v55, %v398_v55 }
  0x71   : > { %v1383_v60 = vrot.slane %v1381_v50, 5  ;;  %v777_v62 = vshll.u32 %v5202_v42, 16  ;;  %v5291_v3 = vunpack.c.h.bf16 %v5749_v49  ;;  %v328_v9 = vmul.f32 %v5784_v4, %v5290_v63  ;;  %v1056_v63 = vld [vmem:[#allocation2 + $0xc] sm:$0xf]  ;;  %v1009_v30 = vld [vmem:[#allocation2 + $0x80] sm:$0x1] }
  0x72   : > { %v1369_v0 = vrot.slane %v1368_v52, 4  ;;  %v1378_v5 = vor.u32 %v1377_v59, %v1373_v53  ;;  %v776_v6 = vrot.slane %v774_v61, 7  ;;  %v455_v7 = vsel %vm5507_vm5, 0, %v454_v56  ;;  %1088 = vst.msk [vmem:[#allocation3 + $0x8] sm:$0xf] %vm411_vm0, %v1056_v63 }
  0x73   : > { %v505_v13 = vsel %vm5532_vm7, 0, %v504_v58  ;;  %v782_v18 = vshrl.u32 %v5203_v1, 16  ;;  %v785_v19 = vshll.u32 %v5203_v1, 16  ;;  %v329_v49 = vmul.f32 %v5784_v4, %v5291_v3  ;;  %456 = vst [vmem:[#allocation2 + $0x84] sm:$0x1] %v455_v7 }
  0x74   : > { %v1374_v16 = vsel %vm5562_vm9, %v1369_v0, %v1373_v53  ;;  %506 = vst [vmem:[#allocation2 + $0x8c] sm:$0x1] %v505_v13  ;;  %v1379_v23 = vrot.slane %v1378_v5, 4  ;;  %v779_v25 = vor.u32 %v777_v62, %v776_v6  ;;  %v780_v26 = vrot.slane %v776_v6, 4  ;;  %v1055_v57 = vld [vmem:[#allocation2 + $0x4] sm:$0xf] }
  0x75   : > { %1585 = vrot.lane.b32.xlu0 %v1374_v16, %s5453_s28  ;;  %v1145_v24 = vld [vmem:[#allocation2 + $0x6c] sm:$0xf]  ;;  %v367_v20 = vadd.f32 %v5804_v27, %v328_v9  ;;  %v784_v11 = vrot.slane %v782_v18, 7  ;;  %v368_v31 = vadd.f32 %v5804_v27, %v329_v49  ;;  %v5294_v36 = vunpack.c.l.bf16 %v5794_v14  ;;  %1087 = vst.msk [vmem:[#allocation3 + $0x4] sm:$0xf] %vm411_vm0, %v1055_v57  ;;  %v5830_v18 = vld [vmem:[%s5523_s23 + $0x60] sm:$0xff]  }
  0x76   : > { %v1386_v8 = vshrl.u32 %v1145_v24, 16  ;;  %v1389_v29 = vshll.u32 %v1145_v24, 16  ;;  %v1384_v32 = vsel %vm5562_vm9, %v1379_v23, %v1383_v60  ;;  %v1006_v34 = vsel %vm5584_vm11, %v779_v25, %v1005_v22  ;;  %v1057_v44 = vld [vmem:[#allocation2 + $0x10] sm:$0xf]  ;;  %v507_v56 = vld [vmem:[#allocation2 + $0x98] sm:$0x1] }
  0x77   : > { %v1146_v33 = vld [vmem:[#allocation2 + $0x70] sm:$0xf]  ;;  %v399_v35 = vmax.f32 %v367_v20, 0.0  ;;  %1587 = vrot.lane.b32.xlu1 %v1384_v32, %s5453_s28  ;;  %v1147_v40 = vld [vmem:[#allocation2 + $0x74] sm:$0x1]  ;;  %v787_v42 = vor.u32 %v785_v19, %v784_v11  ;;  %v789_v28 = vrot.slane %v784_v11, 4  ;;  %v5295_v3 = vunpack.c.h.bf16 %v5794_v14 }
  0x78   : > { %v1388_v21 = vrot.slane %v1386_v8, 4  ;;  %v1391_v37 = vrot.slane %v1389_v29, 5  ;;  %v1395_v38 = vshll.u32 %v1146_v33, 16  ;;  %v1399_v39 = vshrl.u32 %v1146_v33, 16  ;;  %1007 = vst [vmem:[#allocation2 + $0x78] sm:$0xf] %v1006_v34 }
  0x79   : > { %v1405_v41 = vshll.u32 %v1147_v40, 16  ;;  %v400_v43 = vmax.f32 %v368_v31, 0.0  ;;  %v5204_v50 = vpack.c.bf16 %v399_v35, %v399_v35  ;;  %1089 = vst.msk [vmem:[#allocation3 + $0xc] sm:$0xf] %vm411_vm0, %v1057_v44  ;;  %v788_v52 = vsel %vm5576_vm10, %v780_v26, %v787_v42  ;;  %v457_v55 = vld [vmem:[#allocation2 + $0x90] sm:$0x1] }
  0x7a   : > { %v1392_v45 = vor.u32 %v1391_v37, %v1388_v21  ;;  %v1397_v46 = vrot.slane %v1395_v38, 5  ;;  %v1401_v48 = vrot.slane %v1399_v39, 4  ;;  %v1010_v53 = vsel %vm5507_vm5, %v789_v28, %v1009_v30  ;;  %1008 = vst.msk [vmem:[#allocation2 + $0x7c] sm:$0xf] %vm411_vm0, %v788_v52  ;;  %v1058_v62 = vld [vmem:[#allocation2 + $0x18] sm:$0xf] }
  0x7b   : > { %v1407_v51 = vrot.slane %v1405_v41, 5  ;;  %v5205_v54 = vpack.c.bf16 %v400_v43, %v400_v43  ;;  %1011 = vst [vmem:[#allocation2 + $0x80] sm:$0x1] %v1010_v53  ;;  %v791_v60 = vshrl.u32 %v5204_v50, 16  ;;  %v794_v61 = vshll.u32 %v5204_v50, 16 }
  0x7c   : > { %v1393_v58 = vrot.slane %v1392_v45, 4  ;;  %v1402_v59 = vor.u32 %v1401_v48, %v1397_v46  ;;  %v330_v9 = vmul.f32 %v5784_v4, %v5294_v36  ;;  %1090 = vst.msk [vmem:[#allocation3 + $0x10] sm:$0xf] %vm411_vm0, %v1058_v62  ;;  %v1059_v5 = vld [vmem:[#allocation2 + $0x1c] sm:$0xf]  ;;  %v458_v16 = vsel %vm5507_vm5, 0, %v457_v55 }
  0x7d   : > { %v799_v0 = vshrl.u32 %v5205_v54, 16  ;;  %v802_v1 = vshll.u32 %v5205_v54, 16  ;;  %v793_v13 = vrot.slane %v791_v60, 7  ;;  %v1012_v15 = vld [vmem:[#allocation2 + $0x84] sm:$0xf]  ;;  %v331_v22 = vmul.f32 %v5784_v4, %v5295_v3 }
  0x7e   : > { %v1398_v6 = vsel %vm5562_vm9, %v1393_v58, %v1397_v46  ;;  %v1403_v7 = vrot.slane %v1402_v59, 4  ;;  %1091 = vst.msk [vmem:[#allocation3 + $0x14] sm:$0xf] %vm411_vm0, %v1059_v5  ;;  %v369_v49 = vadd.f32 %v5804_v27, %v330_v9  ;;  %459 = vst [vmem:[#allocation2 + $0x90] sm:$0x1] %v458_v16  ;;  %v508_v63 = vsel %vm5532_vm7, 0, %v507_v56 }
  0x7f   : > { %1589 = vrot.lane.b32.xlu0 %v1398_v6, %s5453_s28  ;;  %v1148_v14 = vld [vmem:[#allocation2 + $0x78] sm:$0xf]  ;;  %v801_v19 = vrot.slane %v799_v0, 7  ;;  %v1060_v23 = vld [vmem:[#allocation2 + $0x24] sm:$0xf]  ;;  %v796_v20 = vor.u32 %v794_v61, %v793_v13  ;;  %v797_v11 = vrot.slane %v793_v13, 4  ;;  %v370_v32 = vadd.f32 %v5804_v27, %v331_v22 }
  0x80   : > { %v1408_v24 = vsel %vm5562_vm9, %v1403_v7, %v1407_v51  ;;  %v1410_v25 = vshrl.u32 %v1148_v14, 16  ;;  %v1413_v26 = vshll.u32 %v1148_v14, 16  ;;  %v1016_v8 = vld [vmem:[#allocation2 + $0x8c] sm:$0x1]  ;;  %509 = vst [vmem:[#allocation2 + $0x98] sm:$0x1] %v508_v63  ;;  %v5298_v40 = vunpack.c.l.bf16 %v5830_v18 }
  0x81   : > { %1092 = vst.msk [vmem:[#allocation3 + $0x18] sm:$0xf] %vm411_vm0, %v1060_v23  ;;  %v1061_v29 = vld [vmem:[#allocation2 + $0x28] sm:$0xf]  ;;  %1591 = vrot.lane.b32.xlu1 %v1408_v24, %s5453_s28  ;;  %v804_v30 = vor.u32 %v802_v1, %v801_v19  ;;  %v806_v31 = vrot.slane %v801_v19, 4  ;;  %v1013_v35 = vsel %vm5584_vm11, %v796_v20, %v1012_v15  ;;  %v401_v36 = vmax.f32 %v369_v49, 0.0 }
  0x82   : > { %1093 = vst.msk [vmem:[#allocation3 + $0x1c] sm:$0xf] %vm411_vm0, %v1061_v29  ;;  %v1412_v33 = vrot.slane %v1410_v25, 4  ;;  %v1415_v34 = vrot.slane %v1413_v26, 5  ;;  %v1149_v57 = vld [vmem:[#allocation2 + $0x7c] sm:$0xf]  ;;  %v5299_v48 = vunpack.c.h.bf16 %v5830_v18  ;;  %v332_v50 = vmul.f32 %v5784_v4, %v5298_v40 }
  0x83   : > { %v1150_v21 = vld [vmem:[#allocation2 + $0x80] sm:$0x1]  ;;  %v805_v37 = vsel %vm5576_vm10, %v797_v11, %v804_v30  ;;  %1014 = vst [vmem:[#allocation2 + $0x84] sm:$0xf] %v1013_v35  ;;  %v1017_v38 = vsel %vm5507_vm5, %v806_v31, %v1016_v8  ;;  %v402_v39 = vmax.f32 %v370_v32, 0.0  ;;  %v1419_v42 = vshll.u32 %v1149_v57, 16 }
  0x84   : > { %v1416_v41 = vor.u32 %v1415_v34, %v1412_v33  ;;  %v1423_v28 = vshrl.u32 %v1149_v57, 16  ;;  %v1429_v43 = vshll.u32 %v1150_v21, 16  ;;  %1015 = vst.msk [vmem:[#allocation2 + $0x88] sm:$0xf] %vm411_vm0, %v805_v37  ;;  %1018 = vst [vmem:[#allocation2 + $0x8c] sm:$0x1] %v1017_v38  ;;  %v5206_v45 = vpack.c.bf16 %v401_v36, %v401_v36 }
  0x85   : > { %v1062_v44 = vld [vmem:[#allocation2 + $0x30] sm:$0xf]  ;;  %v5207_v46 = vpack.c.bf16 %v402_v39, %v402_v39  ;;  %v460_v51 = vld [vmem:[#allocation2 + $0x9c] sm:$0x1]  ;;  %v1063_v52 = vld [vmem:[#allocation2 + $0x34] sm:$0xf]  ;;  %v333_v9 = vmul.f32 %v5784_v4, %v5299_v48  ;;  %v371_v5 = vadd.f32 %v5804_v27, %v332_v50 }
  0x86   : > { %1094 = vst.msk [vmem:[#allocation3 + $0x20] sm:$0xf] %vm411_vm0, %v1062_v44  ;;  %v1417_v53 = vrot.slane %v1416_v41, 4  ;;  %v1421_v54 = vrot.slane %v1419_v42, 5  ;;  %v1425_v55 = vrot.slane %v1423_v28, 4  ;;  %v1431_v56 = vrot.slane %v1429_v43, 5 }
  0x87   : > { %v510_v58 = vld [vmem:[#allocation2 + $0xa4] sm:$0x1]  ;;  %1095 = vst.msk [vmem:[#allocation3 + $0x24] sm:$0xf] %vm411_vm0, %v1063_v52  ;;  %v808_v59 = vshrl.u32 %v5206_v45, 16  ;;  %v811_v60 = vshll.u32 %v5206_v45, 16  ;;  %v372_v49 = vadd.f32 %v5804_v27, %v333_v9 }
  0x88   : > { %v816_v61 = vshrl.u32 %v5207_v46, 16  ;;  %v819_v62 = vshll.u32 %v5207_v46, 16  ;;  %v5857_v0 = vld [vmem:[%s5523_s23 + $0x68] sm:$0xff]   ;;  %v1422_v1 = vsel %vm5562_vm9, %v1417_v53, %v1421_v54  ;;  %v1426_v3 = vor.u32 %v1425_v55, %v1421_v54  ;;  %v1064_v6 = vld [vmem:[#allocation2 + $0x3c] sm:$0xf] }
  0x89   : > { %v1065_v7 = vld [vmem:[#allocation2 + $0x40] sm:$0xf]  ;;  %1593 = vrot.lane.b32.xlu0 %v1422_v1, %s5453_s28  ;;  %v810_v13 = vrot.slane %v808_v59, 7  ;;  %v461_v16 = vsel %vm5507_vm5, 0, %v460_v51  ;;  %v511_v18 = vsel %vm5532_vm7, 0, %v510_v58  ;;  %v403_v63 = vmax.f32 %v371_v5, 0.0 }
  0x8a   : > { %v818_v15 = vrot.slane %v816_v61, 7  ;;  %1096 = vst.msk [vmem:[#allocation3 + $0x28] sm:$0xf] %vm411_vm0, %v1064_v6  ;;  %1097 = vst.msk [vmem:[#allocation3 + $0x2c] sm:$0xf] %vm411_vm0, %v1065_v7  ;;  %v1427_v14 = vrot.slane %v1426_v3, 4  ;;  %v5302_v23 = vunpack.c.l.bf16 %v5857_v0  ;;  %v5303_v51 = vunpack.c.h.bf16 %v5857_v0 }
  0x8b   : > { %v1151_v19 = vld [vmem:[#allocation2 + $0x84] sm:$0xf]  ;;  %v1019_v22 = vld [vmem:[#allocation2 + $0x90] sm:$0xf]  ;;  %462 = vst [vmem:[#allocation2 + $0x9c] sm:$0x1] %v461_v16  ;;  %v813_v8 = vor.u32 %v811_v60, %v810_v13  ;;  %v5208_v44 = vpack.c.bf16 %v403_v63, %v403_v63 }
  0x8c   : > { %512 = vst [vmem:[#allocation2 + $0xa4] sm:$0x1] %v511_v18  ;;  %v1152_v24 = vld [vmem:[#allocation2 + $0x88] sm:$0xf]  ;;  %v1434_v25 = vshrl.u32 %v1151_v19, 16  ;;  %v1437_v26 = vshll.u32 %v1151_v19, 16  ;;  %v821_v29 = vor.u32 %v819_v62, %v818_v15  ;;  %v1432_v30 = vsel %vm5562_vm9, %v1427_v14, %v1431_v56 }
  0x8d   : > { %v1153_v20 = vld [vmem:[#allocation2 + $0x8c] sm:$0x1]  ;;  %v1023_v11 = vld [vmem:[#allocation2 + $0x98] sm:$0x1]  ;;  %v1443_v31 = vshll.u32 %v1152_v24, 16  ;;  %v1447_v32 = vshrl.u32 %v1152_v24, 16  ;;  %1595 = vrot.lane.b32.xlu1 %v1432_v30, %s5453_s28  ;;  %v1020_v21 = vsel %vm5584_vm11, %v813_v8, %v1019_v22  ;;  %v334_v52 = vmul.f32 %v5784_v4, %v5302_v23 }
  0x8e   : > { %v1453_v33 = vshll.u32 %v1153_v20, 16  ;;  %v1066_v34 = vld [vmem:[#allocation2 + $0x48] sm:$0xf]  ;;  %v1436_v35 = vrot.slane %v1434_v25, 4  ;;  %v1439_v36 = vrot.slane %v1437_v26, 5  ;;  %v814_v57 = vrot.slane %v810_v13, 4 }
  0x8f   : > { %1098 = vst.msk [vmem:[#allocation3 + $0x30] sm:$0xf] %vm411_vm0, %v1066_v34  ;;  %v1067_v37 = vld [vmem:[#allocation2 + $0x4c] sm:$0xf]  ;;  %v1445_v38 = vrot.slane %v1443_v31, 5  ;;  %v1449_v39 = vrot.slane %v1447_v32, 4  ;;  %v335_v61 = vmul.f32 %v5784_v4, %v5303_v51  ;;  %v373_v62 = vadd.f32 %v5804_v27, %v334_v52 }
  0x90   : > { %v1455_v40 = vrot.slane %v1453_v33, 5  ;;  %1021 = vst [vmem:[#allocation2 + $0x90] sm:$0xf] %v1020_v21  ;;  %v823_v41 = vrot.slane %v818_v15, 4  ;;  %1099 = vst.msk [vmem:[#allocation3 + $0x34] sm:$0xf] %vm411_vm0, %v1067_v37  ;;  %v1440_v42 = vor.u32 %v1439_v36, %v1436_v35  ;;  %v822_v28 = vsel %vm5576_vm10, %v814_v57, %v821_v29 }
  0x91   : > { %v404_v43 = vmax.f32 %v372_v49, 0.0  ;;  %v463_v45 = vld [vmem:[#allocation2 + $0xa8] sm:$0x1]  ;;  %v1068_v46 = vld [vmem:[#allocation2 + $0x54] sm:$0xf]  ;;  %v1450_v48 = vor.u32 %v1449_v39, %v1445_v38  ;;  %v825_v56 = vshrl.u32 %v5208_v44, 16  ;;  %v374_v16 = vadd.f32 %v5804_v27, %v335_v61 }
  0x92   : > { %1022 = vst.msk [vmem:[#allocation2 + $0x94] sm:$0xf] %vm411_vm0, %v822_v28  ;;  %v1024_v50 = vsel %vm5507_vm5, %v823_v41, %v1023_v11  ;;  %1100 = vst.msk [vmem:[#allocation3 + $0x38] sm:$0xf] %vm411_vm0, %v1068_v46  ;;  %v1069_v53 = vld [vmem:[#allocation2 + $0x58] sm:$0xf] }
  0x93   : > { %v1441_v54 = vrot.slane %v1440_v42, 4  ;;  %1025 = vst [vmem:[#allocation2 + $0x98] sm:$0x1] %v1024_v50  ;;  %v5209_v55 = vpack.c.bf16 %v404_v43, %v404_v43  ;;  %v828_v58 = vshll.u32 %v5208_v44, 16  ;;  %v513_v59 = vld [vmem:[#allocation2 + $0xb0] sm:$0x1] }
  0x94   : > { %1101 = vst.msk [vmem:[#allocation3 + $0x3c] sm:$0xf] %vm411_vm0, %v1069_v53  ;;  %v1451_v60 = vrot.slane %v1450_v48, 4  ;;  %v464_v0 = vsel %vm5507_vm5, 0, %v463_v45  ;;  %v5893_v1 = vld [vmem:[%s5523_s23 + $0x70] sm:$0xff]   ;;  %v827_v9 = vrot.slane %v825_v56, 7 }
  0x95   : > { %v1446_v3 = vsel %vm5562_vm9, %v1441_v54, %v1445_v38  ;;  %v833_v5 = vshrl.u32 %v5209_v55, 16  ;;  %v836_v6 = vshll.u32 %v5209_v55, 16  ;;  %465 = vst [vmem:[#allocation2 + $0xa8] sm:$0x1] %v464_v0  ;;  %v1070_v7 = vld [vmem:[#allocation2 + $0x60] sm:$0xf]  ;;  %v5306_v24 = vunpack.c.l.bf16 %v5893_v1 }
  0x96   : > { %1597 = vrot.lane.b32.xlu0 %v1446_v3, %s5453_s28  ;;  %v1456_v13 = vsel %vm5562_vm9, %v1451_v60, %v1455_v40  ;;  %v1026_v15 = vld [vmem:[#allocation2 + $0x9c] sm:$0xf]  ;;  %v405_v18 = vmax.f32 %v373_v62, 0.0  ;;  %v514_v14 = vsel %vm5532_vm7, 0, %v513_v59  ;;  %1102 = vst.msk [vmem:[#allocation3 + $0x40] sm:$0xf] %vm411_vm0, %v1070_v7  ;;  %v830_v49 = vor.u32 %v828_v58, %v827_v9 }
  0x97   : > { %v1071_v19 = vld [vmem:[#allocation2 + $0x64] sm:$0xf]  ;;  %1599 = vrot.lane.b32.xlu1 %v1456_v13, %s5453_s28  ;;  %v1154_v22 = vld [vmem:[#allocation2 + $0x90] sm:$0xf]  ;;  %v831_v63 = vrot.slane %v827_v9, 4  ;;  %v835_v23 = vrot.slane %v833_v5, 7  ;;  %v5307_v33 = vunpack.c.h.bf16 %v5893_v1  ;;  %v336_v59 = vmul.f32 %v5784_v4, %v5306_v24 }
  0x98   : > { %515 = vst [vmem:[#allocation2 + $0xb0] sm:$0x1] %v514_v14  ;;  %1103 = vst.msk [vmem:[#allocation3 + $0x44] sm:$0xf] %vm411_vm0, %v1071_v19  ;;  %v1458_v25 = vshrl.u32 %v1154_v22, 16  ;;  %v1461_v26 = vshll.u32 %v1154_v22, 16  ;;  %v5210_v29 = vpack.c.bf16 %v405_v18, %v405_v18  ;;  %v1027_v31 = vsel %vm5584_vm11, %v830_v49, %v1026_v15 }
  0x99   : > { %v1030_v20 = vld [vmem:[#allocation2 + $0xa4] sm:$0x1]  ;;  %v406_v8 = vmax.f32 %v374_v16, 0.0  ;;  %v1155_v11 = vld [vmem:[#allocation2 + $0x94] sm:$0xf]  ;;  %v838_v30 = vor.u32 %v836_v6, %v835_v23  ;;  %v840_v32 = vrot.slane %v835_v23, 4  ;;  %v337_v61 = vmul.f32 %v5784_v4, %v5307_v33 }
  0x9a   : > { %v1072_v34 = vld [vmem:[#allocation2 + $0x6c] sm:$0xf]  ;;  %v1460_v35 = vrot.slane %v1458_v25, 4  ;;  %v1463_v36 = vrot.slane %v1461_v26, 5  ;;  %v1467_v57 = vshll.u32 %v1155_v11, 16  ;;  %v1471_v21 = vshrl.u32 %v1155_v11, 16 }
  0x9b   : > { %v1156_v37 = vld [vmem:[#allocation2 + $0x98] sm:$0x1]  ;;  %1028 = vst [vmem:[#allocation2 + $0x9c] sm:$0xf] %v1027_v31  ;;  %1104 = vst.msk [vmem:[#allocation3 + $0x48] sm:$0xf] %vm411_vm0, %v1072_v34  ;;  %v839_v39 = vsel %vm5576_vm10, %v831_v63, %v838_v30  ;;  %v1031_v40 = vsel %vm5507_vm5, %v840_v32, %v1030_v20  ;;  %v5211_v41 = vpack.c.bf16 %v406_v8, %v406_v8 }
  0x9c   : > { %v1477_v38 = vshll.u32 %v1156_v37, 16  ;;  %v466_v42 = vld [vmem:[#allocation2 + $0xb4] sm:$0x1]  ;;  %v1073_v28 = vld [vmem:[#allocation2 + $0x70] sm:$0xf]  ;;  %v1464_v43 = vor.u32 %v1463_v36, %v1460_v35  ;;  %v1469_v44 = vrot.slane %v1467_v57, 5  ;;  %v375_v18 = vadd.f32 %v5804_v27, %v336_v59 }
  0x9d   : > { %v1473_v45 = vrot.slane %v1471_v21, 4  ;;  %1029 = vst.msk [vmem:[#allocation2 + $0xa0] sm:$0xf] %vm411_vm0, %v839_v39  ;;  %1032 = vst [vmem:[#allocation2 + $0xa4] sm:$0x1] %v1031_v40  ;;  %v842_v46 = vshrl.u32 %v5210_v29, 16  ;;  %v376_v14 = vadd.f32 %v5804_v27, %v337_v61 }
  0x9e   : > { %v516_v48 = vld [vmem:[#allocation2 + $0xbc] sm:$0x1]  ;;  %1105 = vst.msk [vmem:[#allocation3 + $0x4c] sm:$0xf] %vm411_vm0, %v1073_v28  ;;  %v1479_v50 = vrot.slane %v1477_v38, 5  ;;  %v845_v51 = vshll.u32 %v5210_v29, 16 }
  0x9f   : > { %v850_v52 = vshrl.u32 %v5211_v41, 16  ;;  %v853_v53 = vshll.u32 %v5211_v41, 16  ;;  %v1465_v54 = vrot.slane %v1464_v43, 4  ;;  %v1474_v55 = vor.u32 %v1473_v45, %v1469_v44  ;;  %v1033_v58 = vld [vmem:[#allocation2 + $0xa8] sm:$0xf] }
  0xa0   : > { %v844_v56 = vrot.slane %v842_v46, 7  ;;  %v467_v62 = vsel %vm5507_vm5, 0, %v466_v42  ;;  %v517_v0 = vsel %vm5532_vm7, 0, %v516_v48  ;;  %v1074_v1 = vld [vmem:[#allocation2 + $0x78] sm:$0xf]  ;;  %v407_v8 = vmax.f32 %v375_v18, 0.0 }
  0xa1   : > { %v852_v60 = vrot.slane %v850_v52, 7  ;;  %v1470_v3 = vsel %vm5562_vm9, %v1465_v54, %v1469_v44  ;;  %v1475_v9 = vrot.slane %v1474_v55, 4  ;;  %v1037_v7 = vld [vmem:[#allocation2 + $0xb0] sm:$0x1]  ;;  %468 = vst [vmem:[#allocation2 + $0xb4] sm:$0x1] %v467_v62 }
  0xa2   : > { %v847_v5 = vor.u32 %v845_v51, %v844_v56  ;;  %v848_v6 = vrot.slane %v844_v56, 4  ;;  %518 = vst [vmem:[#allocation2 + $0xbc] sm:$0x1] %v517_v0  ;;  %1106 = vst.msk [vmem:[#allocation3 + $0x50] sm:$0xf] %vm411_vm0, %v1074_v1  ;;  %1601 = vrot.lane.b32.xlu0 %v1470_v3, %s5453_s28  ;;  %v408_v29 = vmax.f32 %v376_v14, 0.0  ;;  %v5212_v34 = vpack.c.bf16 %v407_v8, %v407_v8 }
  0xa3   : > { %v1075_v13 = vld [vmem:[#allocation2 + $0x7c] sm:$0xf]  ;;  %v855_v15 = vor.u32 %v853_v53, %v852_v60  ;;  %v857_v16 = vrot.slane %v852_v60, 4  ;;  %v1480_v19 = vsel %vm5562_vm9, %v1475_v9, %v1479_v50  ;;  %v1076_v23 = vld [vmem:[#allocation2 + $0x84] sm:$0xf]  ;;  %v5947_v60 = vpop.permute.xlu0 %1553  ;;  %vm1779_vm13 = vcmask 1046532  }
  0xa4   : > { %v1157_v4 = vld [vmem:[#allocation2 + $0x9c] sm:$0xf]  ;;  %1107 = vst.msk [vmem:[#allocation3 + $0x54] sm:$0xf] %vm411_vm0, %v1075_v13  ;;  %v1034_v63 = vsel %vm5584_vm11, %v847_v5, %v1033_v58  ;;  %v1077_v24 = vld [vmem:[#allocation2 + $0x88] sm:$0xf]  ;;  %1603 = vrot.lane.b32.xlu1 %v1480_v19, %s5453_s28  ;;  %v5213_v35 = vpack.c.bf16 %v408_v29, %v408_v29  ;;  %vm5979_vm14 = vmor %vm1778_vm12, %vm1779_vm13 }
  0xa5   : > { %v1482_v22 = vshrl.u32 %v1157_v4, 16  ;;  %v1485_v49 = vshll.u32 %v1157_v4, 16  ;;  %v1158_v25 = vld [vmem:[#allocation2 + $0xa0] sm:$0xf]  ;;  %v1159_v26 = vld [vmem:[#allocation2 + $0xa4] sm:$0x1]  ;;  %v856_v20 = vsel %vm5576_vm10, %v848_v6, %v855_v15  ;;  %v1038_v27 = vsel %vm5507_vm5, %v857_v16, %v1037_v7 }
  0xa6   : > { %1035 = vst [vmem:[#allocation2 + $0xa8] sm:$0xf] %v1034_v63  ;;  %1108 = vst.msk [vmem:[#allocation3 + $0x58] sm:$0xf] %vm411_vm0, %v1076_v23  ;;  %v1491_v31 = vshll.u32 %v1158_v25, 16  ;;  %v1495_v32 = vshrl.u32 %v1158_v25, 16 }
  0xa7   : > { %1109 = vst.msk [vmem:[#allocation3 + $0x5c] sm:$0xf] %vm411_vm0, %v1077_v24  ;;  %v1484_v11 = vrot.slane %v1482_v22, 4  ;;  %v1487_v30 = vrot.slane %v1485_v49, 5  ;;  %1036 = vst.msk [vmem:[#allocation2 + $0xac] sm:$0xf] %vm411_vm0, %v856_v20  ;;  %v5963_v25 = vpop.permute.xlu0 %1555 }
  0xa8   : > { %1039 = vst [vmem:[#allocation2 + $0xb0] sm:$0x1] %v1038_v27  ;;  %v1501_v33 = vshll.u32 %v1159_v26, 16  ;;  %v1078_v36 = vld [vmem:[#allocation2 + $0x90] sm:$0xf]  ;;  %v1493_v21 = vrot.slane %v1491_v31, 5  ;;  %v5951_v3 = vpop.permute.xlu1 %1557 }
  0xa9   : > { %v1488_v57 = vor.u32 %v1487_v30, %v1484_v11  ;;  %v1497_v37 = vrot.slane %v1495_v32, 4  ;;  %1110 = vst.msk [vmem:[#allocation3 + $0x60] sm:$0xf] %vm411_vm0, %v1078_v36  ;;  %v1079_v38 = vld [vmem:[#allocation2 + $0x94] sm:$0xf]  ;;  %v859_v39 = vshrl.u32 %v5212_v34, 16 }
  0xaa   : > { %v862_v40 = vshll.u32 %v5212_v34, 16  ;;  %v867_v41 = vshrl.u32 %v5213_v35, 16  ;;  %1111 = vst.msk [vmem:[#allocation3 + $0x64] sm:$0xf] %vm411_vm0, %v1079_v38  ;;  %v1503_v43 = vrot.slane %v1501_v33, 5  ;;  %v870_v44 = vshll.u32 %v5213_v35, 16 }
  0xab   : > { %v1489_v42 = vrot.slane %v1488_v57, 4  ;;  %v1498_v28 = vor.u32 %v1497_v37, %v1493_v21  ;;  %v861_v45 = vrot.slane %v859_v39, 7  ;;  %v1040_v52 = vld [vmem:[#allocation2 + $0xb4] sm:$0xf]  ;;  %v1044_v13 = vld [vmem:[#allocation2 + $0xbc] sm:$0x1]  ;;  %v5975_v36 = vpop.permute.xlu0 %1561 }
  0xac   : > { %v869_v46 = vrot.slane %v867_v41, 7  ;;  %v1080_v18 = vld [vmem:[#allocation2 + $0x9c] sm:$0xf]  ;;  %v1081_v22 = vld [vmem:[#allocation2 + $0xa0] sm:$0xf]  ;;  %v5965_v27 = vpop.permute.xlu1 %1559  ;;  %vm1649_vm15 = vcmask 126016  }
  0xad   : > { %v1494_v48 = vsel %vm5562_vm9, %v1489_v42, %v1493_v21  ;;  %v1499_v50 = vrot.slane %v1498_v28, 4  ;;  %v1160_v51 = vld [vmem:[#allocation2 + $0xa8] sm:$0xf]  ;;  %v864_v58 = vor.u32 %v862_v40, %v861_v45  ;;  %v865_v6 = vrot.slane %v861_v45, 4  ;;  %1112 = vst.msk [vmem:[#allocation3 + $0x68] sm:$0xf] %vm411_vm0, %v1080_v18 }
  0xae   : > { %1605 = vrot.lane.b32.xlu0 %v1494_v48, %s5453_s28  ;;  %v1161_v53 = vld [vmem:[#allocation2 + $0xac] sm:$0xf]  ;;  %v1506_v54 = vshrl.u32 %v1160_v51, 16  ;;  %v1509_v55 = vshll.u32 %v1160_v51, 16  ;;  %v872_v59 = vor.u32 %v870_v44, %v869_v46  ;;  %v874_v16 = vrot.slane %v869_v46, 4 }
  0xaf   : > { %v1162_v56 = vld [vmem:[#allocation2 + $0xb0] sm:$0x1]  ;;  %v1504_v61 = vsel %vm5562_vm9, %v1499_v50, %v1503_v43  ;;  %v1515_v62 = vshll.u32 %v1161_v53, 16  ;;  %v1519_v0 = vshrl.u32 %v1161_v53, 16  ;;  %v1041_v7 = vsel %vm5584_vm11, %v864_v58, %v1040_v52  ;;  %1113 = vst.msk [vmem:[#allocation3 + $0x6c] sm:$0xf] %vm411_vm0, %v1081_v22 }
  0xb0   : > { %v1525_v1 = vshll.u32 %v1162_v56, 16  ;;  %1607 = vrot.lane.b32.xlu1 %v1504_v61, %s5453_s28  ;;  %v1508_v9 = vrot.slane %v1506_v54, 4  ;;  %v1511_v5 = vrot.slane %v1509_v55, 5  ;;  %1042 = vst [vmem:[#allocation2 + $0xb4] sm:$0xf] %v1041_v7  ;;  %v873_v19 = vsel %vm5576_vm10, %v865_v6, %v872_v59  ;;  %v1564_v41 = vpop.permute.xlu1 %1563 }
  0xb1   : > { %v1517_v4 = vrot.slane %v1515_v62, 5  ;;  %v1521_v15 = vrot.slane %v1519_v0, 4  ;;  %1043 = vst.msk [vmem:[#allocation2 + $0xb8] sm:$0xf] %vm411_vm0, %v873_v19  ;;  %v1045_v23 = vsel %vm5507_vm5, %v874_v16, %v1044_v13  ;;  %v1082_v26 = vld [vmem:[#allocation2 + $0xa8] sm:$0xf] }
  0xb2   : > { %v1512_v14 = vor.u32 %v1511_v5, %v1508_v9  ;;  %v1527_v63 = vrot.slane %v1525_v1, 5  ;;  %1046 = vst [vmem:[#allocation2 + $0xbc] sm:$0x1] %v1045_v23  ;;  %1114 = vst.msk [vmem:[#allocation3 + $0x70] sm:$0xf] %vm411_vm0, %v1082_v26  ;;  %vm4402_vm2 = vcmask 1043456  }
  0xb3   : > { %v1522_v49 = vor.u32 %v1521_v15, %v1517_v4  ;;  %v1083_v8 = vld [vmem:[#allocation2 + $0xac] sm:$0xf]  ;;  %v1683_v35 = vld [vmem:[#allocation2 + $0x4] sm:$0xf]  ;;  %v1682_v28 = vld [vmem:[#allocation2] sm:$0xe] }
  0xb4   : > { %v1513_v24 = vrot.slane %v1512_v14, 4  ;;  %1115 = vst.msk [vmem:[#allocation3 + $0x74] sm:$0xf] %vm411_vm0, %v1083_v8  ;;  %v1783_v46 = vrot.slane %v1683_v35, 5  ;;  %v1684_v48 = vld [vmem:[#allocation2 + $0x8] sm:$0x1] }
  0xb5   : > { %v1523_v20 = vrot.slane %v1522_v49, 4  ;;  %v1686_v50 = vld [vmem:[#allocation2 + $0x10] sm:$0xf]  ;;  %v5063_v54 = vrot.slane %v1682_v28, 9  ;;  %v1786_v56 = vrot.slane %v1684_v48, 5  ;;  %vm1989_vm3 = vcmask 191616  }
  0xb6   : > { %v1518_v29 = vsel %vm5562_vm9, %v1513_v24, %v1517_v4  ;;  %v1685_v58 = vld [vmem:[#allocation2 + $0xc] sm:$0xe]  ;;  %v1566_v59 = vpop.permute.xlu0 %1565  ;;  %v1785_v0 = vrot.slane %v1783_v46, 4  ;;  %v1790_v1 = vrot.slane %v1686_v50, 5  ;;  %v1687_v5 = vld [vmem:[#allocation2 + $0x14] sm:$0x1] }
  0xb7   : > { %1609 = vrot.lane.b32.xlu0 %v1518_v29, %s5453_s28  ;;  %v1528_v11 = vsel %vm5562_vm9, %v1523_v20, %v1527_v63  ;;  %v1163_v30 = vld [vmem:[#allocation2 + $0xb4] sm:$0xf]  ;;  %v1689_v6 = vld [vmem:[#allocation2 + $0x1c] sm:$0xf]  ;;  %v1784_v13 = vsel %vm5979_vm14, %v5063_v54, %v1783_v46  ;;  %v5064_v4 = vrot.slane %v1685_v58, 9  ;;  %v1793_v14 = vrot.slane %v1687_v5, 5 }
  0xb8   : > { %1611 = vrot.lane.b32.xlu1 %v1528_v11, %s5453_s28  ;;  %v1530_v31 = vshrl.u32 %v1163_v30, 16  ;;  %v1533_v32 = vshll.u32 %v1163_v30, 16  ;;  %v1084_v33 = vld [vmem:[#allocation2 + $0xb4] sm:$0xf]  ;;  %v1164_v34 = vld [vmem:[#allocation2 + $0xb8] sm:$0xf]  ;;  %v1568_v9 = vpop.permute.xlu1 %1567  ;;  %v1787_v16 = vsel %vm5979_vm14, %v1785_v0, %v1786_v56 }
  0xb9   : > { %1116 = vst.msk [vmem:[#allocation3 + $0x78] sm:$0xf] %vm411_vm0, %v1084_v33  ;;  %v1085_v57 = vld [vmem:[#allocation2 + $0xb8] sm:$0xf]  ;;  %v1539_v38 = vshll.u32 %v1164_v34, 16  ;;  %v1543_v39 = vshrl.u32 %v1164_v34, 16  ;;  %v1791_v23 = vsel %vm5979_vm14, %v5064_v4, %v1790_v1 }
  0xba   : > { %v1532_v21 = vrot.slane %v1530_v31, 4  ;;  %v1535_v37 = vrot.slane %v1533_v32, 5  ;;  %v1165_v40 = vld [vmem:[#allocation2 + $0xbc] sm:$0x1]  ;;  %1117 = vst.msk [vmem:[#allocation3 + $0x7c] sm:$0xf] %vm411_vm0, %v1085_v57 }
  0xbb   : > { %v1549_v42 = vshll.u32 %v1165_v40, 16  ;;  %v1541_v44 = vrot.slane %v1539_v38, 5  ;;  %v1545_v45 = vrot.slane %v1543_v39, 4  ;;  %v1688_v15 = vld [vmem:[#allocation2 + $0x18] sm:$0xe]  ;;  %v1792_v18 = vrot.slane %v1790_v1, 4 }
  0xbc   : > { %v1536_v43 = vor.u32 %v1535_v37, %v1532_v21  ;;  %v1797_v19 = vrot.slane %v1689_v6, 5  ;;  %v1690_v22 = vld [vmem:[#allocation2 + $0x20] sm:$0x1]  ;;  %v1692_v49 = vld [vmem:[#allocation2 + $0x28] sm:$0xf]  ;;  %v5065_v24 = vrot.slane %v1688_v15, 9 }
  0xbd   : > { %v1546_v52 = vor.u32 %v1545_v45, %v1541_v44  ;;  %v1551_v53 = vrot.slane %v1549_v42, 5  ;;  %v1691_v20 = vld [vmem:[#allocation2 + $0x24] sm:$0xe]  ;;  %v1794_v8 = vsel %vm5979_vm14, %v1792_v18, %v1793_v14  ;;  %v1800_v11 = vrot.slane %v1690_v22, 5  ;;  %v1695_v31 = vld [vmem:[#allocation2 + $0x34] sm:$0xf] }
  0xbe   : > { %v1537_v51 = vrot.slane %v1536_v43, 4  ;;  %v1570_v63 = vpop.permute.xlu0 %1569  ;;  %v1799_v29 = vrot.slane %v1797_v19, 4  ;;  %v1804_v30 = vrot.slane %v1692_v49, 5  ;;  %1650 = vst.msk [vmem:[#allocation3] sm:$0xf] %vm1649_vm15, %v5947_v60  ;;  %v1811_v32 = vrot.slane %v1695_v31, 5 }
  0xbf   : > { %v1547_v62 = vrot.slane %v1546_v52, 4  ;;  %1652 = vst.msk [vmem:[#allocation3 + $0x8] sm:$0xf] %vm1649_vm15, %v5951_v3  ;;  %1651 = vst.msk [vmem:[#allocation3 + $0x4] sm:$0xf] %vm1649_vm15, %v5963_v25  ;;  %v1798_v3 = vsel %vm5979_vm14, %v5065_v24, %v1797_v19  ;;  %v5066_v25 = vrot.slane %v1691_v20, 9 }
  0xc0   : > { %v1542_v61 = vsel %vm5562_vm9, %v1537_v51, %v1541_v44  ;;  %1653 = vst.msk [vmem:[#allocation3 + $0xc] sm:$0xf] %vm1649_vm15, %v5965_v27  ;;  %1654 = vst.msk [vmem:[#allocation3 + $0x10] sm:$0xf] %vm1649_vm15, %v5975_v36  ;;  %v1693_v60 = vld [vmem:[#allocation2 + $0x2c] sm:$0x1]  ;;  %v1801_v35 = vsel %vm5979_vm14, %v1799_v29, %v1800_v11 }
  0xc1   : > { %1613 = vrot.lane.b32.xlu0 %v1542_v61, %s5453_s28  ;;  %v1552_v7 = vsel %vm5562_vm9, %v1547_v62, %v1551_v53  ;;  %v1572_v26 = vpop.permute.xlu1 %1571  ;;  %1655 = vst.msk [vmem:[#allocation3 + $0x14] sm:$0xf] %vm1649_vm15, %v1564_v41  ;;  %1656 = vst.msk [vmem:[#allocation3 + $0x18] sm:$0xf] %vm1649_vm15, %v1566_v59  ;;  %v1694_v27 = vld [vmem:[#allocation2 + $0x30] sm:$0xe]  ;;  %v1805_v40 = vsel %vm5979_vm14, %v5066_v25, %v1804_v30 }
  0xc2   : > { %1615 = vrot.lane.b32.xlu1 %v1552_v7, %s5453_s28  ;;  %1657 = vst.msk [vmem:[#allocation3 + $0x1c] sm:$0xf] %vm1649_vm15, %v1568_v9  ;;  %1658 = vst.msk [vmem:[#allocation3 + $0x20] sm:$0xf] %vm1649_vm15, %v1570_v63  ;;  %v2215_v33 = vld [vmem:[#allocation2 + $0xc] sm:$0xf] }
  0xc3   : > { %1659 = vst.msk [vmem:[#allocation3 + $0x24] sm:$0xf] %vm1649_vm15, %v1572_v26  ;;  %v1806_v36 = vrot.slane %v1804_v30, 4  ;;  %v1807_v57 = vrot.slane %v1693_v60, 5  ;;  %v1696_v21 = vld [vmem:[#allocation2 + $0x38] sm:$0x1] }
  0xc4   : > { %v5067_v38 = vrot.slane %v1694_v27, 9  ;;  %v2216_v39 = vld [vmem:[#allocation2 + $0x10] sm:$0xf]  ;;  %v2264_v41 = vshrl.u32 %v2215_v33, 16  ;;  %v2267_v42 = vshll.u32 %v2215_v33, 16  ;;  %v1813_v28 = vrot.slane %v1811_v32, 4 }
  0xc5   : > { %1893 = vrot.lane.b32.xlu0 %v1784_v13, %s5454_s8  ;;  %v1814_v43 = vrot.slane %v1696_v21, 5  ;;  %v2218_v44 = vld [vmem:[#allocation2 + $0x18] sm:$0xf]  ;;  %v1808_v45 = vsel %vm5979_vm14, %v1806_v36, %v1807_v57  ;;  %v2273_v46 = vshll.u32 %v2216_v39, 16  ;;  %v2277_v48 = vshrl.u32 %v2216_v39, 16 }
  0xc6   : > { %1895 = vrot.lane.b32.xlu1 %v1787_v16, %s5454_s8  ;;  %v1574_v34 = vpop.permute.xlu0 %1573  ;;  %v1812_v50 = vsel %vm5979_vm14, %v5067_v38, %v1811_v32  ;;  %v2219_v51 = vld [vmem:[#allocation2 + $0x1c] sm:$0xf]  ;;  %v2266_v52 = vrot.slane %v2264_v41, 4  ;;  %v2269_v53 = vrot.slane %v2267_v42, 5  ;;  %v2288_v54 = vshrl.u32 %v2218_v44, 16 }
  0xc7   : > { %1660 = vst.msk [vmem:[#allocation3 + $0x28] sm:$0xf] %vm1649_vm15, %v1574_v34  ;;  %v1576_v37 = vpop.permute.xlu1 %1575  ;;  %v2291_v56 = vshll.u32 %v2218_v44, 16  ;;  %v1815_v58 = vsel %vm5979_vm14, %v1813_v28, %v1814_v43  ;;  %v2275_v59 = vrot.slane %v2273_v46, 5  ;;  %v2279_v61 = vrot.slane %v2277_v48, 4 }
  0xc8   : > { %1661 = vst.msk [vmem:[#allocation3 + $0x2c] sm:$0xf] %vm1649_vm15, %v1576_v37  ;;  %v2297_v62 = vshll.u32 %v2219_v51, 16  ;;  %v2301_v0 = vshrl.u32 %v2219_v51, 16  ;;  %v2217_v1 = vld [vmem:[#allocation2 + $0x14] sm:$0x1]  ;;  %v2270_v5 = vor.u32 %v2269_v53, %v2266_v52 }
  0xc9   : > { %1897 = vrot.lane.b32.xlu0 %v1791_v23, %s5454_s8  ;;  %v2022_v9 = vld [vmem:[#allocation2 + $0xc] sm:$0xf]  ;;  %v2290_v6 = vrot.slane %v2288_v54, 4  ;;  %v2293_v7 = vrot.slane %v2291_v56, 5  ;;  %v2023_v4 = vld [vmem:[#allocation2 + $0x10] sm:$0xf]  ;;  %v2280_v15 = vor.u32 %v2279_v61, %v2275_v59 }
  0xca   : > { %1899 = vrot.lane.b32.xlu1 %v1794_v8, %s5454_s8  ;;  %v2283_v16 = vshll.u32 %v2217_v1, 16  ;;  %v2299_v18 = vrot.slane %v2297_v62, 5  ;;  %v2303_v14 = vrot.slane %v2301_v0, 4  ;;  %v2220_v22 = vld [vmem:[#allocation2 + $0x20] sm:$0x1]  ;;  %v2271_v63 = vrot.slane %v2270_v5, 4 }
  0xcb   : > { %v2024_v49 = vld [vmem:[#allocation2 + $0x18] sm:$0xf]  ;;  %v2294_v23 = vor.u32 %v2293_v7, %v2290_v6  ;;  %v2025_v24 = vld [vmem:[#allocation2 + $0x1c] sm:$0xf]  ;;  %v2281_v26 = vrot.slane %v2280_v15, 4  ;;  %v2307_v29 = vshll.u32 %v2220_v22, 16 }
  0xcc   : > { %v2285_v20 = vrot.slane %v2283_v16, 5  ;;  %v2304_v8 = vor.u32 %v2303_v14, %v2299_v18  ;;  %v2777_v11 = vld [vmem:[#allocation2 + $0x10] sm:$0xf]  ;;  %v2276_v30 = vsel %vm5562_vm9, %v2271_v63, %v2275_v59  ;;  %v2776_v60 = vld [vmem:[#allocation2 + $0xc] sm:$0xe]  ;;  %vm2182_vm4 = vcmask 257216  }
  0xcd   : > { %1901 = vrot.lane.b32.xlu0 %v1798_v3, %s5454_s8  ;;  %v2295_v31 = vrot.slane %v2294_v23, 4  ;;  %v2309_v27 = vrot.slane %v2307_v29, 5  ;;  %v2874_v32 = vrot.slane %v2777_v11, 5  ;;  %v2780_v33 = vld [vmem:[#allocation2 + $0x1c] sm:$0xf]  ;;  %v5079_v36 = vrot.slane %v2776_v60, 9 }
  0xce   : > { %1903 = vrot.lane.b32.xlu1 %v1801_v35, %s5454_s8  ;;  %v2286_v3 = vsel %vm5562_vm9, %v2281_v26, %v2285_v20  ;;  %v2305_v25 = vrot.slane %v2304_v8, 4  ;;  %v2778_v34 = vld [vmem:[#allocation2 + $0x14] sm:$0x1]  ;;  %v2779_v57 = vld [vmem:[#allocation2 + $0x18] sm:$0xe]  ;;  %v2881_v21 = vrot.slane %v2780_v33, 5 }
  0xcf   : > { %v2300_v35 = vsel %vm5562_vm9, %v2295_v31, %v2299_v18  ;;  %v3307_v37 = vld [vmem:[#allocation2 + $0x18] sm:$0xf]  ;;  %v2876_v39 = vrot.slane %v2874_v32, 4  ;;  %v2781_v41 = vld [vmem:[#allocation2 + $0x20] sm:$0x1]  ;;  %v5080_v42 = vrot.slane %v2779_v57, 9  ;;  %v2875_v44 = vsel %vm5979_vm14, %v5079_v36, %v2874_v32 }
  0xd0   : > { %v2310_v38 = vsel %vm5562_vm9, %v2305_v25, %v2309_v27  ;;  %v3308_v28 = vld [vmem:[#allocation2 + $0x1c] sm:$0xf]  ;;  %v3359_v46 = vshll.u32 %v3307_v37, 16  ;;  %v2884_v51 = vrot.slane %v2781_v41, 5  ;;  %v3310_v52 = vld [vmem:[#allocation2 + $0x24] sm:$0xf] }
  0xd1   : > { %1905 = vrot.lane.b32.xlu0 %v1805_v40, %s5454_s8  ;;  %v2877_v40 = vrot.slane %v2778_v34, 5  ;;  %v3365_v54 = vshll.u32 %v3308_v28, 16  ;;  %v3369_v56 = vshrl.u32 %v3308_v28, 16  ;;  %v3311_v59 = vld [vmem:[#allocation2 + $0x28] sm:$0xf]  ;;  %v3380_v0 = vshrl.u32 %v3310_v52, 16 }
  0xd2   : > { %1907 = vrot.lane.b32.xlu1 %v1808_v45, %s5454_s8  ;;  %v1578_v13 = vpop.permute.xlu0 %1577  ;;  %v3356_v45 = vshrl.u32 %v3307_v37, 16  ;;  %v3361_v62 = vrot.slane %v3359_v46, 5  ;;  %v3383_v1 = vshll.u32 %v3310_v52, 16  ;;  %v3309_v15 = vld [vmem:[#allocation2 + $0x20] sm:$0x1]  ;;  %vm2743_vm6 = vcmask 322816  }
  0xd3   : > { %1662 = vst.msk [vmem:[#allocation3 + $0x30] sm:$0xf] %vm1649_vm15, %v1578_v13  ;;  %v1580_v19 = vpop.permute.xlu1 %1579  ;;  %v2878_v53 = vsel %vm5979_vm14, %v2876_v39, %v2877_v40  ;;  %v3367_v6 = vrot.slane %v3365_v54, 5  ;;  %v3371_v7 = vrot.slane %v3369_v56, 4  ;;  %v3389_v13 = vshll.u32 %v3311_v59, 16 }
  0xd4   : > { %1663 = vst.msk [vmem:[#allocation3 + $0x34] sm:$0xf] %vm1649_vm15, %v1580_v19  ;;  %v3358_v61 = vrot.slane %v3356_v45, 4  ;;  %v3114_v16 = vld [vmem:[#allocation2 + $0x18] sm:$0xf]  ;;  %v3382_v14 = vrot.slane %v3380_v0, 4 }
  0xd5   : > { %1909 = vrot.lane.b32.xlu0 %v1812_v50, %s5454_s8  ;;  %v2883_v50 = vrot.slane %v2881_v21, 4  ;;  %v3385_v19 = vrot.slane %v3383_v1, 5  ;;  %v3372_v63 = vor.u32 %v3371_v7, %v3367_v6  ;;  %v3375_v23 = vshll.u32 %v3309_v15, 16  ;;  %v3312_v20 = vld [vmem:[#allocation2 + $0x2c] sm:$0x1] }
  0xd6   : > { %1911 = vrot.lane.b32.xlu1 %v1815_v58, %s5454_s8  ;;  %v2882_v58 = vsel %vm5979_vm14, %v5080_v42, %v2881_v21  ;;  %v3362_v18 = vor.u32 %v3361_v62, %v3358_v61  ;;  %v3116_v8 = vld [vmem:[#allocation2 + $0x24] sm:$0xf]  ;;  %v3399_v25 = vshll.u32 %v3312_v20, 16  ;;  %v3869_v27 = vld [vmem:[#allocation2 + $0x1c] sm:$0xf]  ;;  %vm3080_vm8 = vcmask 388416  }
  0xd7   : > { %v3386_v11 = vor.u32 %v3385_v19, %v3382_v14  ;;  %v3373_v31 = vrot.slane %v3372_v63, 4  ;;  %v3377_v60 = vrot.slane %v3375_v23, 5  ;;  %v3872_v39 = vld [vmem:[#allocation2 + $0x28] sm:$0xf]  ;;  %v3870_v40 = vld [vmem:[#allocation2 + $0x20] sm:$0x1] }
  0xd8   : > { %v3363_v29 = vrot.slane %v3362_v18, 4  ;;  %v3401_v37 = vrot.slane %v3399_v25, 5  ;;  %v3871_v28 = vld [vmem:[#allocation2 + $0x24] sm:$0xe]  ;;  %v2224_v62 = vld [vmem:[#allocation2 + $0x30] sm:$0xf] }
  0xd9   : > { %2086 = vrot.lane.b32.xlu0 %v2022_v9, %s5455_s9  ;;  %v2885_v9 = vsel %vm5979_vm14, %v2883_v50, %v2884_v51  ;;  %v3387_v34 = vrot.slane %v3386_v11, 4  ;;  %v3378_v57 = vsel %vm5562_vm9, %v3373_v31, %v3377_v60  ;;  %v3873_v50 = vld [vmem:[#allocation2 + $0x2c] sm:$0x1]  ;;  %v2222_v51 = vld [vmem:[#allocation2 + $0x28] sm:$0xf]  ;;  %v5096_v52 = vrot.slane %v3871_v28, 9 }
  0xda   : > { %2088 = vrot.lane.b32.xlu1 %v2023_v4, %s5455_s9  ;;  %v3393_v4 = vshrl.u32 %v3311_v59, 16  ;;  %v3368_v33 = vsel %vm5562_vm9, %v3363_v29, %v3367_v6  ;;  %v3976_v59 = vrot.slane %v3873_v50, 5  ;;  %v2321_v61 = vshll.u32 %v2222_v51, 16  ;;  %v2225_v7 = vld [vmem:[#allocation2 + $0x34] sm:$0xf]  ;;  %v5420_v18 = vld [vmem:[%s7225_s3 + $0x18] sm:$0xff]  }
  0xdb   : > { %v2336_v15 = vshrl.u32 %v2224_v62, 16  ;;  %v2345_v63 = vshll.u32 %v2225_v7, 16  ;;  %v2349_v23 = vshrl.u32 %v2225_v7, 16  ;;  %v2026_v20 = vld [vmem:[#allocation2 + $0x24] sm:$0xf]  ;;  %vm3274_vm12 = vcmask 454016  }
  0xdc   : > { %v3395_v26 = vrot.slane %v3393_v4, 4  ;;  %v6105_v19 = vrot.slane %v2321_v61, 5  ;;  %v2027_v31 = vld [vmem:[#allocation2 + $0x28] sm:$0xf]  ;;  %v3313_v61 = vld [vmem:[#allocation2 + $0x30] sm:$0xf] }
  0xdd   : > { %2090 = vrot.lane.b32.xlu0 %v2024_v49, %s5455_s9  ;;  %v3115_v49 = vld [vmem:[#allocation2 + $0x1c] sm:$0xf]  ;;  %v2338_v29 = vrot.slane %v2336_v15, 4  ;;  %v2347_v25 = vrot.slane %v2345_v63, 5  ;;  %v3314_v7 = vld [vmem:[#allocation2 + $0x34] sm:$0xf] }
  0xde   : > { %2092 = vrot.lane.b32.xlu1 %v2025_v24, %s5455_s9  ;;  %v3391_v24 = vrot.slane %v3389_v13, 5  ;;  %v3407_v15 = vshll.u32 %v3313_v61, 16  ;;  %v3417_v63 = vshrl.u32 %v3314_v7, 16  ;;  %vm3835_vm13 = vcmask 519616   ;;  %v1714_v12 = vld [vmem:[#allocation2 + $0x80] sm:$0x1] }
  0xdf   : > { %v2246_v2 = vld [vmem:[#allocation2 + $0x88] sm:$0xf] }
  0xe0   : > { %v1582_v43 = vpop.permute.xlu0 %1581  ;;  %v3392_v41 = vsel %vm5562_vm9, %v3387_v34, %v3391_v24 }
  0xe1   : > { %2647 = vrot.lane.b32.xlu0 %v2276_v30, %s5456_s10  ;;  %1664 = vst.msk [vmem:[#allocation3 + $0x38] sm:$0xf] %vm1649_vm15, %v1582_v43  ;;  %v1584_v48 = vpop.permute.xlu1 %1583  ;;  %v3117_v30 = vld [vmem:[#allocation2 + $0x28] sm:$0xf]  ;;  %v3973_v43 = vrot.slane %v3872_v39, 5 }
  0xe2   : > { %2649 = vrot.lane.b32.xlu1 %v2286_v3, %s5456_s10  ;;  %1665 = vst.msk [vmem:[#allocation3 + $0x3c] sm:$0xf] %vm1649_vm15, %v1584_v48  ;;  %v3396_v3 = vor.u32 %v3395_v26, %v3391_v24  ;;  %v3969_v48 = vrot.slane %v3870_v40, 5  ;;  %v2223_v26 = vld [vmem:[#allocation2 + $0x2c] sm:$0x1] }
  0xe3   : > { %v3974_v6 = vsel %vm5979_vm14, %v5096_v52, %v3973_v43  ;;  %v2786_v52 = vld [vmem:[#allocation2 + $0x34] sm:$0xf] }
  0xe4   : > { %v3397_v21 = vrot.slane %v3396_v3, 4  ;;  %v2331_v3 = vshll.u32 %v2223_v26, 16 }
  0xe5   : > { %2651 = vrot.lane.b32.xlu0 %v2300_v35, %s5456_s10  ;;  %v3868_v35 = vld [vmem:[#allocation2 + $0x18] sm:$0xe] }
  0xe6   : > { %2653 = vrot.lane.b32.xlu1 %v2310_v38, %s5456_s10  ;;  %v3966_v38 = vrot.slane %v3869_v27, 5  ;;  %v5095_v42 = vrot.slane %v3868_v35, 9  ;;  %v3402_v45 = vsel %vm5562_vm9, %v3397_v21, %v3401_v37  ;;  %v2351_v27 = vrot.slane %v2349_v23, 4  ;;  %v2029_v37 = vld [vmem:[#allocation2 + $0x34] sm:$0xf] }
  0xe7   : > { %v1586_v5 = vpop.permute.xlu0 %1585  ;;  %v2333_v39 = vrot.slane %v2331_v3, 5 }
  0xe8   : > { %1666 = vst.msk [vmem:[#allocation3 + $0x40] sm:$0xf] %vm1649_vm15, %v1586_v5  ;;  %v3968_v46 = vrot.slane %v3966_v38, 4  ;;  %v5419_v5 = vld [vmem:[%s7225_s3 + $0x20] ss:$0 sps:$4 sm:$0xff]   ;;  %v2352_v40 = vor.u32 %v2351_v27, %v2347_v25 }
  0xe9   : > { %2984 = vrot.lane.b32.xlu0 %v2875_v44, %s5457_s11  ;;  %v1588_v22 = vpop.permute.xlu1 %1587  ;;  %v2221_v44 = vld [vmem:[#allocation2 + $0x24] sm:$0xf]  ;;  %5400 = vmatprep.subr.msk.bf16.mxu0 %vm4402_vm2, %v5419_v5  ;;  %v4404_v24 = vsel %vm4402_vm2, %v5419_v5, 0  ;;  %v3118_v27 = vld [vmem:[#allocation2 + $0x30] sm:$0xf] }
  0xea   : > { %2986 = vrot.lane.b32.xlu1 %v2878_v53, %s5457_s11  ;;  %1667 = vst.msk [vmem:[#allocation3 + $0x44] sm:$0xf] %vm1649_vm15, %v1588_v22  ;;  %v3967_v53 = vsel %vm5979_vm14, %v5095_v42, %v3966_v38  ;;  %v2312_v54 = vshrl.u32 %v2221_v44, 16  ;;  %v2315_v56 = vshll.u32 %v2221_v44, 16  ;;  %v3970_v1 = vsel %vm5979_vm14, %v3968_v46, %v3969_v48  ;;  %5401 = vmatprep.subr.msk.bf16.mxu1 %vm4402_vm2, %v5419_v5  ;;  %v2783_v42 = vld [vmem:[#allocation2 + $0x28] sm:$0xf] }
  0xeb   : > { %5349 = vmatpush3.bf16.msra.mxu0 %v4404_v24  ;;  %5395 = vmatpush3.bf16.msra.mxu1 %v4404_v24  ;;  %v5423_v44 = vld [vmem:[%s7225_s3] sm:$0xff]   ;;  %v2353_v48 = vrot.slane %v2352_v40, 4  ;;  %vm4353_vm2 = vcmask 588800  }
  0xec   : > { %v2314_v13 = vrot.slane %v2312_v54, 4  ;;  %v2317_v4 = vrot.slane %v2315_v56, 5  ;;  %5350 = vmatprep.subr.bf16.mxu0 %v5420_v18  ;;  %5391 = vmatprep.subr.bf16.mxu1 %v5420_v18  ;;  %v3317_v24 = vld [vmem:[#allocation2 + $0x40] sm:$0xf]  ;;  %v3318_v40 = vld [vmem:[#allocation2 + $0x44] sm:$0x1] }
  0xed   : > { %2988 = vrot.lane.b32.xlu0 %v2882_v58, %s5457_s11  ;;  %v3975_v58 = vrot.slane %v3973_v43, 4  ;;  %v3441_v3 = vshrl.u32 %v3317_v24, 16 }
  0xee   : > { %2990 = vrot.lane.b32.xlu1 %v2885_v9, %s5457_s11  ;;  %v2325_v9 = vshrl.u32 %v2222_v51, 16  ;;  %v2888_v51 = vrot.slane %v2783_v42, 5 }
  0xef   : > { %v3977_v14 = vsel %vm5979_vm14, %v3975_v58, %v3976_v59  ;;  %5351 = vmatpush3.bf16.msra.mxu0 %v5420_v18  ;;  %5396 = vmatpush3.bf16.msra.mxu1 %v5420_v18  ;;  %v2785_v58 = vld [vmem:[#allocation2 + $0x30] sm:$0xe]  ;;  %v2895_v59 = vrot.slane %v2786_v52, 5 }
  0xf0   : > { %v5082_v5 = vrot.slane %v2785_v58, 9 }
  0xf1   : > { %3178 = vrot.lane.b32.xlu0 %v3114_v16, %s5458_s12  ;;  %v1590_v32 = vpop.permute.xlu0 %1589  ;;  %v2339_v16 = vshll.u32 %v2224_v62, 16 }
  0xf2   : > { %3180 = vrot.lane.b32.xlu1 %v3115_v49, %s5458_s12  ;;  %1668 = vst.msk [vmem:[#allocation3 + $0x48] sm:$0xf] %vm1649_vm15, %v1590_v32  ;;  %v2327_v49 = vrot.slane %v2325_v9, 4  ;;  %v2226_v32 = vld [vmem:[#allocation2 + $0x38] sm:$0x1]  ;;  %v2896_v23 = vsel %vm5979_vm14, %v5082_v5, %v2895_v59 }
  0xf3   : > { %v1592_v36 = vpop.permute.xlu1 %1591  ;;  %v2341_v11 = vrot.slane %v2339_v16, 5  ;;  %v2787_v9 = vld [vmem:[#allocation2 + $0x38] sm:$0x1]  ;;  %v2897_v16 = vrot.slane %v2895_v59, 4 }
  0xf4   : > { %1669 = vst.msk [vmem:[#allocation3 + $0x4c] sm:$0xf] %vm1649_vm15, %v1592_v36  ;;  %v2328_v60 = vor.u32 %v2327_v49, %v6105_v19  ;;  %v2898_v18 = vrot.slane %v2787_v9, 5  ;;  %v3413_v49 = vshll.u32 %v3314_v7, 16 }
  0xf5   : > { %3182 = vrot.lane.b32.xlu0 %v3116_v8, %s5458_s12  ;;  %v2318_v8 = vor.u32 %v2317_v4, %v2314_v13  ;;  %v2342_v35 = vor.u32 %v2341_v11, %v2338_v29  ;;  %v3404_v4 = vshrl.u32 %v3313_v61, 16 }
  0xf6   : > { %3184 = vrot.lane.b32.xlu1 %v3117_v30, %s5458_s12  ;;  %v5421_v30 = vld [vmem:[%s7225_s3 + $0x10] sm:$0xff]   ;;  %v2329_v38 = vrot.slane %v2328_v60, 4  ;;  %v2899_v11 = vsel %vm5979_vm14, %v2897_v16, %v2898_v18  ;;  %v3437_v60 = vshll.u32 %v3317_v24, 16  ;;  %v3879_v16 = vld [vmem:[#allocation2 + $0x44] sm:$0x1] }
  0xf7   : > { %v2319_v34 = vrot.slane %v2318_v8, 4  ;;  %5352 = vmatprep.subr.bf16.mxu0 %v5421_v30  ;;  %5392 = vmatprep.subr.bf16.mxu1 %v5421_v30  ;;  %v2343_v43 = vrot.slane %v2342_v35, 4  ;;  %v3406_v26 = vrot.slane %v3404_v4, 4  ;;  %v1698_v18 = vld [vmem:[#allocation2 + $0x40] sm:$0xf]  ;;  %v3990_v24 = vrot.slane %v3879_v16, 5 }
  0xf8   : > { %5353 = vmatpush3.bf16.msra.mxu0 %v5421_v30  ;;  %5397 = vmatpush3.bf16.msra.mxu1 %v5421_v30  ;;  %v2334_v46 = vsel %vm5562_vm9, %v2329_v38, %v2333_v39  ;;  %v3415_v30 = vrot.slane %v3413_v49, 5  ;;  %v3443_v38 = vrot.slane %v3441_v3, 4  ;;  %v2227_v49 = vld [vmem:[#allocation2 + $0x3c] sm:$0xf] }
  0xf9   : > { %3739 = vrot.lane.b32.xlu0 %v3368_v33, %s5459_s13  ;;  %v2028_v33 = vld [vmem:[#allocation2 + $0x30] sm:$0xf]  ;;  %v2324_v28 = vsel %vm5562_vm9, %v2319_v34, %v6105_v19  ;;  %v2348_v54 = vsel %vm5562_vm9, %v2343_v43, %v2347_v25  ;;  %v3316_v19 = vld [vmem:[#allocation2 + $0x3c] sm:$0xf]  ;;  %v3315_v25 = vld [vmem:[#allocation2 + $0x38] sm:$0x1] }
  0xfa   : > { %3741 = vrot.lane.b32.xlu1 %v3378_v57, %s5459_s13  ;;  %v5422_v57 = vld [vmem:[%s7225_s3 + $0x8] sm:$0xff]   ;;  %v3428_v8 = vshrl.u32 %v3316_v19, 16  ;;  %v3431_v29 = vshll.u32 %v3316_v19, 16  ;;  %v3121_v43 = vld [vmem:[#allocation2 + $0x40] sm:$0xf] }
  0xfb   : > { %v1594_v0 = vpop.permute.xlu0 %1593  ;;  %5354 = vmatprep.subr.bf16.mxu0 %v5422_v57  ;;  %5393 = vmatprep.subr.bf16.mxu1 %v5422_v57 }
  0xfc   : > { %1670 = vst.msk [vmem:[#allocation3 + $0x50] sm:$0xf] %vm1649_vm15, %v1594_v0  ;;  %5355 = vmatpush3.bf16.msra.mxu0 %v5422_v57  ;;  %5398 = vmatpush3.bf16.msra.mxu1 %v5422_v57  ;;  %v2890_v0 = vrot.slane %v2888_v51, 4  ;;  %v3433_v34 = vrot.slane %v3431_v29, 5  ;;  %v1699_v29 = vld [vmem:[#allocation2 + $0x44] sm:$0x1] }
  0xfd   : > { %3743 = vrot.lane.b32.xlu0 %v3392_v41, %s5459_s13  ;;  %v2355_v41 = vshll.u32 %v2226_v32, 16  ;;  %5356 = vmatprep.subr.bf16.mxu0 %v5423_v44 }
  0xfe   : > { %3745 = vrot.lane.b32.xlu1 %v3402_v45, %s5459_s13  ;;  %v2782_v45 = vld [vmem:[#allocation2 + $0x24] sm:$0xe]  ;;  %5394 = vmatprep.subr.bf16.mxu1 %v5423_v44 }
  0xff   : > { %v1596_v22 = vpop.permute.xlu1 %1595  ;;  %v2357_v50 = vrot.slane %v2355_v41, 5  ;;  %v5081_v56 = vrot.slane %v2782_v45, 9  ;;  %v3120_v41 = vld [vmem:[#allocation2 + $0x3c] sm:$0xf] }
 0x100   : > { %1671 = vst.msk [vmem:[#allocation3 + $0x54] sm:$0xf] %vm1649_vm15, %v1596_v22  ;;  %5357 = vmatpush3.bf16.msra.mxu0 %v5423_v44  ;;  %5399 = vmatpush3.bf16.msra.mxu1 %v5423_v44 }
 0x101   : > { %4076 = vrot.lane.b32.xlu0 %v3967_v53, %s5460_s16  ;;  %v2784_v53 = vld [vmem:[#allocation2 + $0x2c] sm:$0x1]  ;;  %v2358_v62 = vsel %vm5562_vm9, %v2353_v48, %v2357_v50  ;;  %v2889_v13 = vsel %vm5979_vm14, %v5081_v56, %v2888_v51  ;;  %v3447_v48 = vshll.u32 %v3318_v40, 16  ;;  %v3875_v50 = vld [vmem:[#allocation2 + $0x34] sm:$0xf] }
 0x102   : > { %4078 = vrot.lane.b32.xlu1 %v3970_v1, %s5460_s16  ;;  %v2891_v1 = vrot.slane %v2784_v53, 5  ;;  %v3874_v53 = vld [vmem:[#allocation2 + $0x30] sm:$0xe]  ;;  %v3980_v61 = vrot.slane %v3875_v50, 5 }
 0x103   : > { %v3449_v58 = vrot.slane %v3447_v48, 5  ;;  %v5097_v5 = vrot.slane %v3874_v53, 9  ;;  %v2030_v48 = vld [vmem:[#allocation2 + $0x3c] sm:$0xf] }
 0x104   : > { %v2892_v22 = vsel %vm5979_vm14, %v2890_v0, %v2891_v1  ;;  %v3876_v0 = vld [vmem:[#allocation2 + $0x38] sm:$0x1]  ;;  %v3878_v1 = vld [vmem:[#allocation2 + $0x40] sm:$0xf] }
 0x105   : > { %4080 = vrot.lane.b32.xlu0 %v3974_v6, %s5460_s16  ;;  %v3983_v4 = vrot.slane %v3876_v0, 5  ;;  %v2232_v0 = vld [vmem:[#allocation2 + $0x50] sm:$0x1] }
 0x106   : > { %4082 = vrot.lane.b32.xlu1 %v3977_v14, %s5460_s16  ;;  %v2403_v16 = vshll.u32 %v2232_v0, 16 }
 0x108   : > { %v1598_v36 = vpop.permute.xlu0 %1597 }
 0x109   : > { %2094 = vrot.lane.b32.xlu0 %v2026_v20, %s5455_s9  ;;  %1672 = vst.msk [vmem:[#allocation3 + $0x58] sm:$0xf] %vm1649_vm15, %v1598_v36  ;;  %v1600_v21 = vpop.permute.xlu1 %1599  ;;  %v3409_v20 = vrot.slane %v3407_v15, 5  ;;  %v3119_v36 = vld [vmem:[#allocation2 + $0x34] sm:$0xf]  ;;  %v3987_v15 = vrot.slane %v3878_v1, 5 }
 0x10a   : > { %2096 = vrot.lane.b32.xlu1 %v2027_v31, %s5455_s9  ;;  %1673 = vst.msk [vmem:[#allocation3 + $0x5c] sm:$0xf] %vm1649_vm15, %v1600_v21  ;;  %v3419_v31 = vrot.slane %v3417_v63, 4  ;;  %v3423_v21 = vshll.u32 %v3315_v25, 16  ;;  %v2230_v25 = vld [vmem:[#allocation2 + $0x48] sm:$0xf] }
 0x10b   : > { %v3410_v32 = vor.u32 %v3409_v20, %v3406_v26  ;;  %v1818_v26 = vrot.slane %v1698_v18, 5  ;;  %v2228_v20 = vld [vmem:[#allocation2 + $0x40] sm:$0xf]  ;;  %v2032_v1 = vld [vmem:[#allocation2 + $0x48] sm:$0xf] }
 0x10c   : > { %v3420_v57 = vor.u32 %v3419_v31, %v3415_v30  ;;  %v3425_v45 = vrot.slane %v3423_v21, 5  ;;  %v2363_v31 = vshll.u32 %v2227_v49, 16  ;;  %v2369_v3 = vshll.u32 %v2228_v20, 16 }
 0x10d   : > { %2098 = vrot.lane.b32.xlu0 %v2028_v33, %s5455_s9  ;;  %v3430_v33 = vrot.slane %v3428_v8, 4  ;;  %v3411_v42 = vrot.slane %v3410_v32, 4  ;;  %v1820_v32 = vrot.slane %v1818_v26, 4 }
 0x10e   : > { %2100 = vrot.lane.b32.xlu1 %v2029_v37, %s5455_s9  ;;  %v3439_v37 = vrot.slane %v3437_v60, 5  ;;  %v3421_v44 = vrot.slane %v3420_v57, 4  ;;  %v2231_v57 = vld [vmem:[#allocation2 + $0x4c] sm:$0xf] }
 0x10f   : > { %v3416_v51 = vsel %vm5562_vm9, %v3411_v42, %v3415_v30  ;;  %v2360_v30 = vshrl.u32 %v2227_v49, 16 }
 0x111   : > { %2655 = vrot.lane.b32.xlu0 %v2324_v28, %s5456_s10  ;;  %v3434_v28 = vor.u32 %v3433_v34, %v3430_v33  ;;  %v1821_v33 = vrot.slane %v1699_v29, 5  ;;  %v2373_v34 = vshrl.u32 %v2228_v20, 16  ;;  %v2362_v21 = vrot.slane %v2360_v30, 4 }
 0x112   : > { %2657 = vrot.lane.b32.xlu1 %v2334_v46, %s5456_s10  ;;  %v3444_v46 = vor.u32 %v3443_v38, %v3439_v37  ;;  %v2384_v38 = vshrl.u32 %v2230_v25, 16 }
 0x113   : > { %v3435_v52 = vrot.slane %v3434_v28, 4  ;;  %v1822_v42 = vsel %vm5979_vm14, %v1820_v32, %v1821_v33  ;;  %v2375_v28 = vrot.slane %v2373_v34, 4 }
 0x114   : > { %v1602_v6 = vpop.permute.xlu0 %1601  ;;  %v3445_v56 = vrot.slane %v3444_v46, 4  ;;  %v2229_v46 = vld [vmem:[#allocation2 + $0x44] sm:$0x1] }
 0x115   : > { %2659 = vrot.lane.b32.xlu0 %v2348_v54, %s5456_s10  ;;  %1674 = vst.msk [vmem:[#allocation3 + $0x60] sm:$0xf] %vm1649_vm15, %v1602_v6  ;;  %v3426_v54 = vsel %vm5562_vm9, %v3421_v44, %v3425_v45  ;;  %v3440_v9 = vsel %vm5562_vm9, %v3435_v52, %v3439_v37  ;;  %v3877_v6 = vld [vmem:[#allocation2 + $0x3c] sm:$0xe]  ;;  %v2365_v37 = vrot.slane %v2363_v31, 5  ;;  %v2397_v44 = vshrl.u32 %v2231_v57, 16 }
 0x116   : > { %2661 = vrot.lane.b32.xlu1 %v2358_v62, %s5456_s10  ;;  %v1604_v14 = vpop.permute.xlu1 %1603  ;;  %v3450_v7 = vsel %vm5562_vm9, %v3445_v56, %v3449_v58  ;;  %v5098_v19 = vrot.slane %v3877_v6, 9  ;;  %v2379_v58 = vshll.u32 %v2229_v46, 16 }
 0x117   : > { %1675 = vst.msk [vmem:[#allocation3 + $0x64] sm:$0xf] %vm1649_vm15, %v1604_v14  ;;  %v3981_v14 = vsel %vm5979_vm14, %v5097_v5, %v3980_v61  ;;  %v2366_v50 = vor.u32 %v2365_v37, %v2362_v21  ;;  %v3320_v21 = vld [vmem:[#allocation2 + $0x4c] sm:$0xf] }
 0x119   : > { %2992 = vrot.lane.b32.xlu0 %v2889_v13, %s5457_s11  ;;  %v3982_v13 = vrot.slane %v3980_v61, 4  ;;  %v2399_v61 = vrot.slane %v2397_v44, 4  ;;  %v3461_v44 = vshll.u32 %v3320_v21, 16 }
 0x11a   : > { %2994 = vrot.lane.b32.xlu1 %v2892_v22, %s5457_s11  ;;  %v1697_v22 = vld [vmem:[#allocation2 + $0x3c] sm:$0xe] }
 0x11b   : > { %v3984_v63 = vsel %vm5979_vm14, %v3982_v13, %v3983_v4  ;;  %v5068_v8 = vrot.slane %v1697_v22, 9  ;;  %v2381_v4 = vrot.slane %v2379_v58, 5 }
 0x11d   : > { %2996 = vrot.lane.b32.xlu0 %v2896_v23, %s5457_s11  ;;  %v3989_v23 = vrot.slane %v3987_v15, 4 }
 0x11e   : > { %2998 = vrot.lane.b32.xlu1 %v2899_v11, %s5457_s11  ;;  %v3988_v11 = vsel %vm5979_vm14, %v5098_v19, %v3987_v15 }
 0x120   : > { %v1606_v35 = vpop.permute.xlu0 %1605 }
 0x121   : > { %1676 = vst.msk [vmem:[#allocation3 + $0x68] sm:$0xf] %vm1649_vm15, %v1606_v35  ;;  %3186 = vrot.lane.b32.xlu0 %v3118_v27, %s5458_s12  ;;  %v3991_v27 = vsel %vm5979_vm14, %v3989_v23, %v3990_v24 }
 0x122   : > { %v1608_v39 = vpop.permute.xlu1 %1607  ;;  %3188 = vrot.lane.b32.xlu1 %v3119_v36, %s5458_s12  ;;  %v1819_v36 = vsel %vm5979_vm14, %v5068_v8, %v1818_v26  ;;  %v2405_v26 = vrot.slane %v2403_v16, 5  ;;  %v2792_v8 = vld [vmem:[#allocation2 + $0x4c] sm:$0xf] }
 0x123   : > { %1677 = vst.msk [vmem:[#allocation3 + $0x6c] sm:$0xf] %vm1649_vm15, %v1608_v39  ;;  %v2387_v39 = vshll.u32 %v2230_v25, 16  ;;  %v2909_v25 = vrot.slane %v2792_v8, 5 }
 0x125   : > { %3190 = vrot.lane.b32.xlu0 %v3120_v41, %s5458_s12  ;;  %v2371_v41 = vrot.slane %v2369_v3, 5  ;;  %v2389_v52 = vrot.slane %v2387_v39, 5 }
 0x126   : > { %3192 = vrot.lane.b32.xlu1 %v3121_v43, %s5458_s12  ;;  %v2393_v43 = vshll.u32 %v2231_v57, 16 }
 0x127   : > { %v2376_v56 = vor.u32 %v2375_v28, %v2371_v41  ;;  %v3322_v28 = vld [vmem:[#allocation2 + $0x54] sm:$0xf] }
 0x129   : > { %v1610_v59 = vpop.permute.xlu0 %1609  ;;  %3747 = vrot.lane.b32.xlu0 %v3416_v51, %s5459_s13  ;;  %v2386_v51 = vrot.slane %v2384_v38, 4  ;;  %v2377_v13 = vrot.slane %v2376_v56, 4 }
 0x12a   : > { %1678 = vst.msk [vmem:[#allocation3 + $0x70] sm:$0xf] %vm1649_vm15, %v1610_v59  ;;  %v1612_v62 = vpop.permute.xlu1 %1611  ;;  %3749 = vrot.lane.b32.xlu1 %v3426_v54, %s5459_s13  ;;  %v2031_v54 = vld [vmem:[#allocation2 + $0x40] sm:$0xf]  ;;  %v2395_v59 = vrot.slane %v2393_v43, 5 }
 0x12b   : > { %1679 = vst.msk [vmem:[#allocation3 + $0x74] sm:$0xf] %vm1649_vm15, %v1612_v62  ;;  %v2390_v5 = vor.u32 %v2389_v52, %v2386_v51  ;;  %v2382_v23 = vsel %vm5562_vm9, %v2377_v13, %v2381_v4 }
 0x12c   : > { %v2400_v15 = vor.u32 %v2399_v61, %v2395_v59 }
 0x12d   : > { %3751 = vrot.lane.b32.xlu0 %v3440_v9, %s5459_s13  ;;  %v2367_v9 = vrot.slane %v2366_v50, 4  ;;  %v2391_v22 = vrot.slane %v2390_v5, 4  ;;  %v3323_v50 = vld [vmem:[#allocation2 + $0x58] sm:$0xf]  ;;  %v3122_v5 = vld [vmem:[#allocation2 + $0x48] sm:$0xf] }
 0x12e   : > { %3753 = vrot.lane.b32.xlu1 %v3450_v7, %s5459_s13  ;;  %v2033_v7 = vld [vmem:[#allocation2 + $0x4c] sm:$0xf]  ;;  %v2401_v24 = vrot.slane %v2400_v15, 4  ;;  %v3489_v0 = vshrl.u32 %v3323_v50, 16 }
 0x12f   : > { %v2372_v19 = vsel %vm5562_vm9, %v2367_v9, %v2371_v41  ;;  %v2396_v30 = vsel %vm5562_vm9, %v2391_v22, %v2395_v59  ;;  %v2911_v41 = vrot.slane %v2909_v25, 4  ;;  %v3463_v59 = vrot.slane %v3461_v44, 5  ;;  %v3321_v9 = vld [vmem:[#allocation2 + $0x50] sm:$0x1]  ;;  %v3123_v15 = vld [vmem:[#allocation2 + $0x4c] sm:$0xf] }
 0x130   : > { %v2406_v32 = vsel %vm5562_vm9, %v2401_v24, %v2405_v26 }
 0x131   : > { %4084 = vrot.lane.b32.xlu0 %v3981_v14, %s5460_s16  ;;  %v2789_v14 = vld [vmem:[#allocation2 + $0x40] sm:$0xf] }
 0x132   : > { %4086 = vrot.lane.b32.xlu1 %v3984_v63, %s5460_s16  ;;  %v2788_v63 = vld [vmem:[#allocation2 + $0x3c] sm:$0xe]  ;;  %v2902_v20 = vrot.slane %v2789_v14, 5 }
 0x133   : > { %v1614_v60 = vpop.permute.xlu0 %1613  ;;  %v5083_v31 = vrot.slane %v2788_v63, 9  ;;  %v3124_v63 = vld [vmem:[#allocation2 + $0x54] sm:$0xf] }
 0x134   : > { %1680 = vst.msk [vmem:[#allocation3 + $0x78] sm:$0xf] %vm1649_vm15, %v1614_v60  ;;  %v1616_v35 = vpop.permute.xlu1 %1615  ;;  %v2791_v60 = vld [vmem:[#allocation2 + $0x48] sm:$0xe]  ;;  %v2904_v33 = vrot.slane %v2902_v20, 4 }
 0x135   : > { %4088 = vrot.lane.b32.xlu0 %v3988_v11, %s5460_s16  ;;  %1681 = vst.msk [vmem:[#allocation3 + $0x7c] sm:$0xf] %vm1649_vm15, %v1616_v35  ;;  %v2790_v11 = vld [vmem:[#allocation2 + $0x44] sm:$0x1]  ;;  %v2793_v35 = vld [vmem:[#allocation2 + $0x50] sm:$0x1]  ;;  %v2903_v37 = vsel %vm5979_vm14, %v5083_v31, %v2902_v20 }
 0x136   : > { %4090 = vrot.lane.b32.xlu1 %v3991_v27, %s5460_s16  ;;  %v3319_v27 = vld [vmem:[#allocation2 + $0x48] sm:$0xf]  ;;  %v2905_v34 = vrot.slane %v2790_v11, 5  ;;  %v5084_v57 = vrot.slane %v2791_v60, 9  ;;  %v3125_v20 = vld [vmem:[#allocation2 + $0x58] sm:$0xf] }
 0x137   : > { %v1894_v40 = vpop.permute.xlu0 %1893  ;;  %v3452_v38 = vshrl.u32 %v3319_v27, 16  ;;  %v3455_v39 = vshll.u32 %v3319_v27, 16  ;;  %v3881_v60 = vld [vmem:[#allocation2 + $0x4c] sm:$0xf]  ;;  %vm4172_vm15 = vcmask 585216  }
 0x138   : > { %1990 = vst.msk [vmem:[#allocation3] sm:$0xf] %vm1989_vm3, %v1894_v40  ;;  %v1896_v45 = vpop.permute.xlu1 %1895  ;;  %v2906_v43 = vsel %vm5979_vm14, %v2904_v33, %v2905_v34 }
 0x139   : > { %1913 = vrot.lane.b32.xlu0 %v1819_v36, %s5454_s8  ;;  %1991 = vst.msk [vmem:[#allocation3 + $0x4] sm:$0xf] %vm1989_vm3, %v1896_v45  ;;  %v3465_v45 = vshrl.u32 %v3320_v21, 16  ;;  %v3454_v51 = vrot.slane %v3452_v38, 4  ;;  %v3457_v52 = vrot.slane %v3455_v39, 5 }
 0x13a   : > { %1915 = vrot.lane.b32.xlu1 %v1822_v42, %s5454_s8  ;;  %v2912_v42 = vrot.slane %v2793_v35, 5  ;;  %v3882_v21 = vld [vmem:[#allocation2 + $0x50] sm:$0x1] }
 0x13b   : > { %v1898_v53 = vpop.permute.xlu0 %1897  ;;  %v3467_v61 = vrot.slane %v3465_v45, 4 }
 0x13c   : > { %1992 = vst.msk [vmem:[#allocation3 + $0x8] sm:$0xf] %vm1989_vm3, %v1898_v53  ;;  %v1900_v62 = vpop.permute.xlu1 %1899  ;;  %v3476_v53 = vshrl.u32 %v3322_v28, 16  ;;  %v2913_v58 = vsel %vm5979_vm14, %v2911_v41, %v2912_v42  ;;  %v3883_v41 = vld [vmem:[#allocation2 + $0x54] sm:$0xe] }
 0x13d   : > { %2102 = vrot.lane.b32.xlu0 %v2030_v48, %s5455_s9  ;;  %1993 = vst.msk [vmem:[#allocation3 + $0xc] sm:$0xf] %vm1989_vm3, %v1900_v62  ;;  %v2910_v48 = vsel %vm5979_vm14, %v5084_v57, %v2909_v25  ;;  %v3485_v62 = vshll.u32 %v3323_v50, 16  ;;  %v3468_v16 = vor.u32 %v3467_v61, %v3463_v59  ;;  %v1704_v61 = vld [vmem:[#allocation2 + $0x58] sm:$0xf] }
 0x13e   : > { %2104 = vrot.lane.b32.xlu1 %v2031_v54, %s5455_s9  ;;  %v3479_v54 = vshll.u32 %v3322_v28, 16 }
 0x13f   : > { %v1902_v6 = vpop.permute.xlu0 %1901  ;;  %v3487_v14 = vrot.slane %v3485_v62, 5  ;;  %v3469_v8 = vrot.slane %v3468_v16, 4 }
 0x140   : > { %1994 = vst.msk [vmem:[#allocation3 + $0x10] sm:$0xf] %vm1989_vm3, %v1902_v6  ;;  %v1904_v18 = vpop.permute.xlu1 %1903  ;;  %v3458_v6 = vor.u32 %v3457_v52, %v3454_v51  ;;  %v3481_v13 = vrot.slane %v3479_v54, 5  ;;  %v5100_v51 = vrot.slane %v3883_v41, 9 }
 0x141   : > { %2106 = vrot.lane.b32.xlu0 %v2032_v1, %s5455_s9  ;;  %1995 = vst.msk [vmem:[#allocation3 + $0x14] sm:$0xf] %vm1989_vm3, %v1904_v18  ;;  %v3471_v18 = vshll.u32 %v3321_v9, 16 }
 0x142   : > { %2108 = vrot.lane.b32.xlu1 %v2033_v7, %s5455_s9  ;;  %v3478_v7 = vrot.slane %v3476_v53, 4  ;;  %v1700_v53 = vld [vmem:[#allocation2 + $0x48] sm:$0xe] }
 0x143   : > { %v1906_v49 = vpop.permute.xlu0 %1905  ;;  %v5069_v9 = vrot.slane %v1700_v53, 9  ;;  %v2036_v53 = vld [vmem:[#allocation2 + $0x60] sm:$0xf] }
 0x144   : > { %1996 = vst.msk [vmem:[#allocation3 + $0x18] sm:$0xf] %vm1989_vm3, %v1906_v49  ;;  %v1908_v29 = vpop.permute.xlu1 %1907  ;;  %v3324_v49 = vld [vmem:[#allocation2 + $0x5c] sm:$0x1]  ;;  %v3482_v24 = vor.u32 %v3481_v13, %v3478_v7  ;;  %v1832_v7 = vrot.slane %v1704_v61, 5 }
 0x145   : > { %2663 = vrot.lane.b32.xlu0 %v2372_v19, %s5456_s10  ;;  %1997 = vst.msk [vmem:[#allocation3 + $0x1c] sm:$0xf] %vm1989_vm3, %v1908_v29  ;;  %v3491_v19 = vrot.slane %v3489_v0, 4  ;;  %v3473_v29 = vrot.slane %v3471_v18, 5  ;;  %v1702_v0 = vld [vmem:[#allocation2 + $0x50] sm:$0x1] }
 0x146   : > { %2665 = vrot.lane.b32.xlu1 %v2382_v23, %s5456_s10  ;;  %v3459_v23 = vrot.slane %v3458_v6, 4  ;;  %v3483_v25 = vrot.slane %v3482_v24, 4  ;;  %v2233_v13 = vld [vmem:[#allocation2 + $0x54] sm:$0xf]  ;;  %v1828_v16 = vrot.slane %v1702_v0, 5 }
 0x147   : > { %v1910_v3 = vpop.permute.xlu0 %1909  ;;  %v3492_v11 = vor.u32 %v3491_v19, %v3487_v14  ;;  %v3474_v33 = vsel %vm5562_vm9, %v3469_v8, %v3473_v29  ;;  %v1705_v18 = vld [vmem:[#allocation2 + $0x5c] sm:$0x1]  ;;  %v2236_v8 = vld [vmem:[#allocation2 + $0x60] sm:$0xf] }
 0x148   : > { %1998 = vst.msk [vmem:[#allocation3 + $0x20] sm:$0xf] %vm1989_vm3, %v1910_v3  ;;  %v1912_v36 = vpop.permute.xlu1 %1911  ;;  %v3464_v3 = vsel %vm5562_vm9, %v3459_v23, %v3463_v59  ;;  %v3488_v38 = vsel %vm5562_vm9, %v3483_v25, %v3487_v14  ;;  %v2411_v23 = vshll.u32 %v2233_v13, 16 }
 0x149   : > { %2667 = vrot.lane.b32.xlu0 %v2396_v30, %s5456_s10  ;;  %1999 = vst.msk [vmem:[#allocation3 + $0x24] sm:$0xf] %vm1989_vm3, %v1912_v36  ;;  %v3495_v30 = vshll.u32 %v3324_v49, 16  ;;  %v3493_v34 = vrot.slane %v3492_v11, 4  ;;  %v3994_v36 = vrot.slane %v3881_v60, 5 }
 0x14a   : > { %2669 = vrot.lane.b32.xlu1 %v2406_v32, %s5456_s10  ;;  %v3880_v32 = vld [vmem:[#allocation2 + $0x48] sm:$0xe] }
 0x14b   : > { %v2087_v40 = vpop.permute.xlu0 %2086  ;;  %v3497_v35 = vrot.slane %v3495_v30, 5  ;;  %v5099_v39 = vrot.slane %v3880_v32, 9  ;;  %v3996_v28 = vrot.slane %v3994_v36, 4  ;;  %v2432_v32 = vshrl.u32 %v2236_v8, 16 }
 0x14c   : > { %2183 = vst.msk [vmem:[#allocation3] sm:$0xf] %vm2182_vm4, %v2087_v40  ;;  %v2089_v46 = vpop.permute.xlu1 %2088 }
 0x14d   : > { %3000 = vrot.lane.b32.xlu0 %v2903_v37, %s5457_s11  ;;  %2184 = vst.msk [vmem:[#allocation3 + $0x4] sm:$0xf] %vm2182_vm4, %v2089_v46  ;;  %v3884_v37 = vld [vmem:[#allocation2 + $0x58] sm:$0xf]  ;;  %v3498_v42 = vsel %vm5562_vm9, %v3493_v34, %v3497_v35  ;;  %v3885_v46 = vld [vmem:[#allocation2 + $0x5c] sm:$0x1]  ;;  %v3995_v50 = vsel %vm5979_vm14, %v5099_v39, %v3994_v36 }
 0x14e   : > { %3002 = vrot.lane.b32.xlu1 %v2906_v43, %s5457_s11  ;;  %v3997_v43 = vrot.slane %v3882_v21, 5  ;;  %v4001_v44 = vrot.slane %v3884_v37, 5  ;;  %v2235_v39 = vld [vmem:[#allocation2 + $0x5c] sm:$0x1] }
 0x14f   : > { %v2091_v56 = vpop.permute.xlu0 %2090 }
 0x150   : > { %2185 = vst.msk [vmem:[#allocation3 + $0x8] sm:$0xf] %vm2182_vm4, %v2091_v56  ;;  %v2093_v1 = vpop.permute.xlu1 %2092  ;;  %v3998_v54 = vsel %vm5979_vm14, %v3996_v28, %v3997_v43  ;;  %v4003_v56 = vrot.slane %v4001_v44, 4 }
 0x151   : > { %3004 = vrot.lane.b32.xlu0 %v2910_v48, %s5457_s11  ;;  %2186 = vst.msk [vmem:[#allocation3 + $0xc] sm:$0xf] %vm2182_vm4, %v2093_v1  ;;  %v1701_v48 = vld [vmem:[#allocation2 + $0x4c] sm:$0xf]  ;;  %v4002_v1 = vsel %vm5979_vm14, %v5100_v51, %v4001_v44  ;;  %v2035_v44 = vld [vmem:[#allocation2 + $0x58] sm:$0xf] }
 0x152   : > { %3006 = vrot.lane.b32.xlu1 %v2913_v58, %s5457_s11  ;;  %v4004_v58 = vrot.slane %v3885_v46, 5  ;;  %v1825_v59 = vrot.slane %v1701_v48, 5  ;;  %v2427_v46 = vshll.u32 %v2235_v39, 16 }
 0x153   : > { %v2648_v4 = vpop.permute.xlu0 %2647 }
 0x154   : > { %2744 = vst.msk [vmem:[#allocation3] sm:$0xf] %vm2743_vm6, %v2648_v4  ;;  %v2650_v22 = vpop.permute.xlu1 %2649  ;;  %v4005_v4 = vsel %vm5979_vm14, %v4003_v56, %v4004_v58  ;;  %v1826_v49 = vsel %vm5979_vm14, %v5069_v9, %v1825_v59 }
 0x155   : > { %3194 = vrot.lane.b32.xlu0 %v3122_v5, %s5458_s12  ;;  %2745 = vst.msk [vmem:[#allocation3 + $0x4] sm:$0xf] %vm2743_vm6, %v2650_v22  ;;  %v1703_v5 = vld [vmem:[#allocation2 + $0x54] sm:$0xe]  ;;  %v2234_v22 = vld [vmem:[#allocation2 + $0x58] sm:$0xf] }
 0x156   : > { %3196 = vrot.lane.b32.xlu1 %v3123_v15, %s5458_s12  ;;  %v1827_v15 = vrot.slane %v1825_v59, 4  ;;  %v5070_v19 = vrot.slane %v1703_v5, 9  ;;  %v2417_v11 = vshll.u32 %v2234_v22, 16  ;;  %v2421_v30 = vshrl.u32 %v2234_v22, 16  ;;  %v2037_v59 = vld [vmem:[#allocation2 + $0x64] sm:$0xf] }
 0x157   : > { %v2652_v26 = vpop.permute.xlu0 %2651  ;;  %v2795_v5 = vld [vmem:[#allocation2 + $0x58] sm:$0xf] }
 0x158   : > { %2746 = vst.msk [vmem:[#allocation3 + $0x8] sm:$0xf] %vm2743_vm6, %v2652_v26  ;;  %v2654_v31 = vpop.permute.xlu1 %2653  ;;  %v1834_v26 = vrot.slane %v1832_v7, 4  ;;  %v1829_v29 = vsel %vm5979_vm14, %v1827_v15, %v1828_v16  ;;  %v1833_v60 = vsel %vm5979_vm14, %v5070_v19, %v1832_v7  ;;  %v2419_v36 = vrot.slane %v2417_v11, 5  ;;  %v2796_v19 = vld [vmem:[#allocation2 + $0x5c] sm:$0x1] }
 0x159   : > { %3198 = vrot.lane.b32.xlu0 %v3124_v63, %s5458_s12  ;;  %2747 = vst.msk [vmem:[#allocation3 + $0xc] sm:$0xf] %vm2743_vm6, %v2654_v31  ;;  %v2408_v63 = vshrl.u32 %v2233_v13, 16 }
 0x15a   : > { %3200 = vrot.lane.b32.xlu1 %v3125_v20, %s5458_s12  ;;  %v1835_v20 = vrot.slane %v1705_v18, 5 }
 0x15b   : > { %v2985_v27 = vpop.permute.xlu0 %2984  ;;  %v2410_v25 = vrot.slane %v2408_v63, 4  ;;  %v2798_v63 = vld [vmem:[#allocation2 + $0x64] sm:$0xf] }
 0x15c   : > { %3081 = vst.msk [vmem:[#allocation3] sm:$0xf] %vm3080_vm8, %v2985_v27  ;;  %v2987_v57 = vpop.permute.xlu1 %2986  ;;  %v2413_v27 = vrot.slane %v2411_v23, 5  ;;  %v1836_v35 = vsel %vm5979_vm14, %v1834_v26, %v1835_v20  ;;  %v2797_v26 = vld [vmem:[#allocation2 + $0x60] sm:$0xe] }
 0x15d   : > { %3755 = vrot.lane.b32.xlu0 %v3464_v3, %s5459_s13  ;;  %3082 = vst.msk [vmem:[#allocation3 + $0x4] sm:$0xf] %vm3080_vm8, %v2987_v57  ;;  %v2237_v3 = vld [vmem:[#allocation2 + $0x64] sm:$0xf]  ;;  %v2423_v57 = vrot.slane %v2421_v30, 4  ;;  %v2919_v30 = vrot.slane %v2796_v19, 5 }
 0x15e   : > { %3757 = vrot.lane.b32.xlu1 %v3474_v33, %s5459_s13  ;;  %v2435_v33 = vshll.u32 %v2236_v8, 16  ;;  %v2441_v21 = vshll.u32 %v2237_v3, 16  ;;  %v2445_v37 = vshrl.u32 %v2237_v3, 16  ;;  %v2414_v41 = vor.u32 %v2413_v27, %v2410_v25  ;;  %v3325_v8 = vld [vmem:[#allocation2 + $0x60] sm:$0xf] }
 0x15f   : > { %v2989_v40 = vpop.permute.xlu0 %2988  ;;  %v5086_v27 = vrot.slane %v2797_v26, 9 }
 0x160   : > { %3083 = vst.msk [vmem:[#allocation3 + $0x8] sm:$0xf] %vm3080_vm8, %v2989_v40  ;;  %v2991_v45 = vpop.permute.xlu1 %2990  ;;  %v2034_v40 = vld [vmem:[#allocation2 + $0x54] sm:$0xf]  ;;  %v2437_v28 = vrot.slane %v2435_v33, 5  ;;  %v2443_v48 = vrot.slane %v2441_v21, 5 }
 0x161   : > { %3759 = vrot.lane.b32.xlu0 %v3488_v38, %s5459_s13  ;;  %3084 = vst.msk [vmem:[#allocation3 + $0xc] sm:$0xf] %vm3080_vm8, %v2991_v45  ;;  %v2424_v45 = vor.u32 %v2423_v57, %v2419_v36  ;;  %v3328_v21 = vld [vmem:[#allocation2 + $0x6c] sm:$0xf] }
 0x162   : > { %3761 = vrot.lane.b32.xlu1 %v3498_v42, %s5459_s13  ;;  %v2434_v42 = vrot.slane %v2432_v32, 4  ;;  %v2799_v32 = vld [vmem:[#allocation2 + $0x68] sm:$0x1] }
 0x163   : > { %v3179_v52 = vpop.permute.xlu0 %3178  ;;  %v2425_v61 = vrot.slane %v2424_v45, 4  ;;  %v2926_v39 = vrot.slane %v2799_v32, 5  ;;  %v3524_v45 = vshrl.u32 %v3328_v21, 16  ;;  %v3888_v32 = vld [vmem:[#allocation2 + $0x68] sm:$0x1] }
 0x164   : > { %3275 = vst.msk [vmem:[#allocation3] sm:$0xf] %vm3274_vm12, %v3179_v52  ;;  %v3181_v62 = vpop.permute.xlu1 %3180  ;;  %v2238_v52 = vld [vmem:[#allocation2 + $0x68] sm:$0x1]  ;;  %v2438_v56 = vor.u32 %v2437_v28, %v2434_v42  ;;  %v3329_v28 = vld [vmem:[#allocation2 + $0x70] sm:$0xf] }
 0x165   : > { %4092 = vrot.lane.b32.xlu0 %v3995_v50, %s5460_s16  ;;  %3276 = vst.msk [vmem:[#allocation3 + $0x4] sm:$0xf] %vm3274_vm12, %v3181_v62  ;;  %v2447_v50 = vrot.slane %v2445_v37, 4  ;;  %v2429_v62 = vrot.slane %v2427_v46, 5  ;;  %v3527_v46 = vshll.u32 %v3328_v21, 16 }
 0x166   : > { %4094 = vrot.lane.b32.xlu1 %v3998_v54, %s5460_s16  ;;  %v2415_v54 = vrot.slane %v2414_v41, 4  ;;  %v2439_v7 = vrot.slane %v2438_v56, 4 }
 0x167   : > { %v3183_v6 = vpop.permute.xlu0 %3182  ;;  %v2448_v0 = vor.u32 %v2447_v50, %v2443_v48  ;;  %v2430_v15 = vsel %vm5562_vm9, %v2425_v61, %v2429_v62  ;;  %v3526_v62 = vrot.slane %v3524_v45, 4  ;;  %v1706_v45 = vld [vmem:[#allocation2 + $0x60] sm:$0xe] }
 0x168   : > { %3277 = vst.msk [vmem:[#allocation3 + $0x8] sm:$0xf] %vm3274_vm12, %v3183_v6  ;;  %v3185_v14 = vpop.permute.xlu1 %3184  ;;  %v2420_v6 = vsel %vm5562_vm9, %v2415_v54, %v2419_v36  ;;  %v2444_v23 = vsel %vm5562_vm9, %v2439_v7, %v2443_v48  ;;  %v3537_v54 = vshrl.u32 %v3329_v28, 16 }
 0x169   : > { %4096 = vrot.lane.b32.xlu0 %v4002_v1, %s5460_s16  ;;  %3278 = vst.msk [vmem:[#allocation3 + $0xc] sm:$0xf] %vm3274_vm12, %v3185_v14  ;;  %v2451_v1 = vshll.u32 %v2238_v52, 16  ;;  %v2449_v16 = vrot.slane %v2448_v0, 4  ;;  %v2916_v14 = vrot.slane %v2795_v5, 5  ;;  %v3529_v0 = vrot.slane %v3527_v46, 5 }
 0x16a   : > { %4098 = vrot.lane.b32.xlu1 %v4005_v4, %s5460_s16  ;;  %v2794_v4 = vld [vmem:[#allocation2 + $0x54] sm:$0xe] }
 0x16b   : > { %v3740_v24 = vpop.permute.xlu0 %3739  ;;  %v2453_v18 = vrot.slane %v2451_v1, 5  ;;  %v2918_v11 = vrot.slane %v2916_v14, 4 }
 0x16c   : > { %3836 = vst.msk [vmem:[#allocation3] sm:$0xf] %vm3835_vm13, %v3740_v24  ;;  %v3742_v31 = vpop.permute.xlu1 %3741  ;;  %v5085_v24 = vrot.slane %v2794_v4, 9 }
 0x16d   : > { %1917 = vrot.lane.b32.xlu0 %v1826_v49, %s5454_s8  ;;  %3837 = vst.msk [vmem:[#allocation3 + $0x4] sm:$0xf] %vm3835_vm13, %v3742_v31  ;;  %v2923_v31 = vrot.slane %v2798_v63, 5  ;;  %v2920_v37 = vsel %vm5979_vm14, %v2918_v11, %v2919_v30  ;;  %v3886_v30 = vld [vmem:[#allocation2 + $0x60] sm:$0xe] }
 0x16e   : > { %1919 = vrot.lane.b32.xlu1 %v1829_v29, %s5454_s8  ;;  %v2454_v29 = vsel %vm5562_vm9, %v2449_v16, %v2453_v18  ;;  %v2917_v33 = vsel %vm5979_vm14, %v5085_v24, %v2916_v14  ;;  %v3128_v16 = vld [vmem:[#allocation2 + $0x6c] sm:$0xf]  ;;  %v3530_v14 = vor.u32 %v3529_v0, %v3526_v62 }
 0x16f   : > { %v3744_v34 = vpop.permute.xlu0 %3743  ;;  %v2924_v42 = vsel %vm5979_vm14, %v5086_v27, %v2923_v31  ;;  %v2239_v0 = vld [vmem:[#allocation2 + $0x6c] sm:$0xf] }
 0x170   : > { %3838 = vst.msk [vmem:[#allocation3 + $0x8] sm:$0xf] %vm3835_vm13, %v3744_v34  ;;  %v3746_v38 = vpop.permute.xlu1 %3745  ;;  %v3500_v34 = vshrl.u32 %v3325_v8, 16 }
 0x171   : > { %1921 = vrot.lane.b32.xlu0 %v1833_v60, %s5454_s8  ;;  %3839 = vst.msk [vmem:[#allocation3 + $0xc] sm:$0xf] %vm3835_vm13, %v3746_v38  ;;  %v3326_v60 = vld [vmem:[#allocation2 + $0x64] sm:$0xf]  ;;  %v2925_v38 = vrot.slane %v2923_v31, 4 }
 0x172   : > { %1923 = vrot.lane.b32.xlu1 %v1836_v35, %s5454_s8  ;;  %v3503_v35 = vshll.u32 %v3325_v8, 16  ;;  %v3509_v57 = vshll.u32 %v3326_v60, 16 }
 0x173   : > { %v4077_v43 = vpop.permute.xlu0 %4076 }
 0x174   : > { %4173 = vst.msk [vmem:[#allocation3] sm:$0xf] %vm4172_vm15, %v4077_v43  ;;  %v4079_v51 = vpop.permute.xlu1 %4078  ;;  %v3502_v43 = vrot.slane %v3500_v34, 4  ;;  %v3511_v50 = vrot.slane %v3509_v57, 5  ;;  %v3889_v57 = vld [vmem:[#allocation2 + $0x6c] sm:$0xe] }
 0x175   : > { %2110 = vrot.lane.b32.xlu0 %v2034_v40, %s5455_s9  ;;  %4174 = vst.msk [vmem:[#allocation3 + $0x4] sm:$0xf] %vm4172_vm15, %v4079_v51  ;;  %v3513_v40 = vshrl.u32 %v3326_v60, 16  ;;  %v2927_v51 = vsel %vm5979_vm14, %v2925_v38, %v2926_v39  ;;  %v4011_v38 = vrot.slane %v3888_v32, 5 }
 0x176   : > { %2112 = vrot.lane.b32.xlu1 %v2035_v44, %s5455_s9  ;;  %v3505_v44 = vrot.slane %v3503_v35, 5  ;;  %v5101_v35 = vrot.slane %v3886_v30, 9 }
 0x177   : > { %v4081_v58 = vpop.permute.xlu0 %4080  ;;  %v3515_v52 = vrot.slane %v3513_v40, 4 }
 0x178   : > { %4175 = vst.msk [vmem:[#allocation3 + $0x8] sm:$0xf] %vm4172_vm15, %v4081_v58  ;;  %v4083_v9 = vpop.permute.xlu1 %4082  ;;  %v3327_v58 = vld [vmem:[#allocation2 + $0x68] sm:$0x1]  ;;  %v3506_v61 = vor.u32 %v3505_v44, %v3502_v43  ;;  %v5102_v43 = vrot.slane %v3889_v57, 9 }
 0x179   : > { %2114 = vrot.lane.b32.xlu0 %v2036_v53, %s5455_s9  ;;  %4176 = vst.msk [vmem:[#allocation3 + $0xc] sm:$0xf] %vm4172_vm15, %v4083_v9  ;;  %v3533_v53 = vshll.u32 %v3329_v28, 16  ;;  %v3127_v9 = vld [vmem:[#allocation2 + $0x64] sm:$0xf]  ;;  %v3516_v5 = vor.u32 %v3515_v52, %v3511_v50 }
 0x17a   : > { %2116 = vrot.lane.b32.xlu1 %v2037_v59, %s5455_s9  ;;  %v3126_v59 = vld [vmem:[#allocation2 + $0x60] sm:$0xf]  ;;  %v3507_v18 = vrot.slane %v3506_v61, 4  ;;  %v1710_v52 = vld [vmem:[#allocation2 + $0x70] sm:$0xf] }
 0x17b   : > { %v2095_v13 = vpop.permute.xlu0 %2094  ;;  %v3535_v7 = vrot.slane %v3533_v53, 5  ;;  %v1846_v62 = vrot.slane %v1710_v52, 5  ;;  %v2041_v52 = vld [vmem:[#allocation2 + $0x7c] sm:$0xf] }
 0x17c   : > { %2187 = vst.msk [vmem:[#allocation3 + $0x10] sm:$0xf] %vm2182_vm4, %v2095_v13  ;;  %v2097_v22 = vpop.permute.xlu1 %2096  ;;  %v5424_v49 = vld [vmem:[#allocation3] sm:$0xff]   ;;  %v3539_v13 = vrot.slane %v3537_v54, 4  ;;  %v3512_v8 = vsel %vm5562_vm9, %v3507_v18, %v3511_v50  ;;  %v1708_v54 = vld [vmem:[#allocation2 + $0x68] sm:$0x1] }
 0x17d   : > { %2671 = vrot.lane.b32.xlu0 %v2420_v6, %s5456_s10  ;;  %2188 = vst.msk [vmem:[#allocation3 + $0x14] sm:$0xf] %vm2182_vm4, %v2097_v22  ;;  %5358 = vmatprep.mubr.msk.bf16.mxu0 %vm4353_vm2, %v5424_v49  ;;  %v3519_v6 = vshll.u32 %v3327_v58, 16  ;;  %v3129_v22 = vld [vmem:[#allocation2 + $0x70] sm:$0xf]  ;;  %v3517_v49 = vrot.slane %v3516_v5, 4 }
 0x17e   : > { %2673 = vrot.lane.b32.xlu1 %v2430_v15, %s5456_s10  ;;  %v3330_v15 = vld [vmem:[#allocation2 + $0x74] sm:$0x1]  ;;  %v5071_v58 = vrot.slane %v1706_v45, 9  ;;  %v1842_v5 = vrot.slane %v1708_v54, 5  ;;  %v2459_v18 = vshll.u32 %v2239_v0, 16 }
 0x17f   : > { %v2099_v20 = vpop.permute.xlu0 %2098  ;;  %v3521_v63 = vrot.slane %v3519_v6, 5  ;;  %v3543_v24 = vshll.u32 %v3330_v15, 16  ;;  %v1711_v6 = vld [vmem:[#allocation2 + $0x74] sm:$0x1]  ;;  %v2244_v45 = vld [vmem:[#allocation2 + $0x80] sm:$0x1] }
 0x180   : > { %2189 = vst.msk [vmem:[#allocation3 + $0x18] sm:$0xf] %vm2182_vm4, %v2099_v20  ;;  %v2101_v3 = vpop.permute.xlu1 %2100  ;;  %v5425_v25 = vld [vmem:[#allocation3 + $0x8] sm:$0xff]  }
 0x181   : > { %2675 = vrot.lane.b32.xlu0 %v2444_v23, %s5456_s10  ;;  %2190 = vst.msk [vmem:[#allocation3 + $0x1c] sm:$0xf] %vm2182_vm4, %v2101_v3  ;;  %5359 = vmatmul.mubr.msk.bf16.vlgmr.msra.gmra.mxu0 %vm4353_vm2, %v5425_v25  ;;  %v3540_v23 = vor.u32 %v3539_v13, %v3535_v7  ;;  %v3887_v20 = vld [vmem:[#allocation2 + $0x64] sm:$0xf]  ;;  %v3522_v31 = vsel %vm5562_vm9, %v3517_v49, %v3521_v63  ;;  %v3545_v3 = vrot.slane %v3543_v24, 5 }
 0x182   : > { %2677 = vrot.lane.b32.xlu1 %v2454_v29, %s5456_s10  ;;  %v3531_v29 = vrot.slane %v3530_v14, 4  ;;  %v4008_v25 = vrot.slane %v3887_v20, 5  ;;  %v2242_v49 = vld [vmem:[#allocation2 + $0x78] sm:$0xf] }
 0x183   : > { %v2656_v36 = vpop.permute.xlu0 %2655  ;;  %v3541_v60 = vrot.slane %v3540_v23, 4  ;;  %v2480_v30 = vshrl.u32 %v2242_v49, 16 }
 0x184   : > { %2748 = vst.msk [vmem:[#allocation3 + $0x10] sm:$0xf] %vm2743_vm6, %v2656_v36  ;;  %v2658_v41 = vpop.permute.xlu1 %2657  ;;  %v3536_v34 = vsel %vm5562_vm9, %v3531_v29, %v3535_v7  ;;  %v4009_v28 = vsel %vm5979_vm14, %v5101_v35, %v4008_v25  ;;  %v2241_v35 = vld [vmem:[#allocation2 + $0x74] sm:$0x1] }
 0x185   : > { %3008 = vrot.lane.b32.xlu0 %v2917_v33, %s5457_s11  ;;  %2749 = vst.msk [vmem:[#allocation3 + $0x14] sm:$0xf] %vm2743_vm6, %v2658_v41  ;;  %v3890_v33 = vld [vmem:[#allocation2 + $0x70] sm:$0xf]  ;;  %v3546_v21 = vsel %vm5562_vm9, %v3541_v60, %v3545_v3  ;;  %v3891_v41 = vld [vmem:[#allocation2 + $0x74] sm:$0x1] }
 0x186   : > { %3010 = vrot.lane.b32.xlu1 %v2920_v37, %s5457_s11  ;;  %v4010_v37 = vrot.slane %v4008_v25, 4  ;;  %v4015_v39 = vrot.slane %v3890_v33, 5  ;;  %v4018_v50 = vrot.slane %v3891_v41, 5  ;;  %v2475_v41 = vshll.u32 %v2241_v35, 16 }
 0x187   : > { %v2660_v48 = vpop.permute.xlu0 %2659 }
 0x188   : > { %2750 = vst.msk [vmem:[#allocation3 + $0x18] sm:$0xf] %vm2743_vm6, %v2660_v48  ;;  %v2662_v56 = vpop.permute.xlu1 %2661  ;;  %v4012_v46 = vsel %vm5979_vm14, %v4010_v37, %v4011_v38  ;;  %v4017_v48 = vrot.slane %v4015_v39, 4  ;;  %v2477_v54 = vrot.slane %v2475_v41, 5 }
 0x189   : > { %3012 = vrot.lane.b32.xlu0 %v2924_v42, %s5457_s11  ;;  %2751 = vst.msk [vmem:[#allocation3 + $0x1c] sm:$0xf] %vm2743_vm6, %v2662_v56  ;;  %v1707_v42 = vld [vmem:[#allocation2 + $0x64] sm:$0xf]  ;;  %v4016_v56 = vsel %vm5979_vm14, %v5102_v43, %v4015_v39  ;;  %v2039_v39 = vld [vmem:[#allocation2 + $0x70] sm:$0xf] }
 0x18a   : > { %3014 = vrot.lane.b32.xlu1 %v2927_v51, %s5457_s11  ;;  %v1839_v51 = vrot.slane %v1707_v42, 5 }
 0x18b   : > { %v2993_v1 = vpop.permute.xlu0 %2992 }
 0x18c   : > { %3085 = vst.msk [vmem:[#allocation3 + $0x10] sm:$0xf] %vm3080_vm8, %v2993_v1  ;;  %v2995_v4 = vpop.permute.xlu1 %2994  ;;  %v4019_v1 = vsel %vm5979_vm14, %v4017_v48, %v4018_v50  ;;  %v1840_v15 = vsel %vm5979_vm14, %v5071_v58, %v1839_v51  ;;  %v2499_v58 = vshll.u32 %v2244_v45, 16 }
 0x18d   : > { %3202 = vrot.lane.b32.xlu0 %v3126_v59, %s5458_s12  ;;  %3086 = vst.msk [vmem:[#allocation3 + $0x14] sm:$0xf] %vm3080_vm8, %v2995_v4  ;;  %v1709_v59 = vld [vmem:[#allocation2 + $0x6c] sm:$0xe]  ;;  %v2240_v4 = vld [vmem:[#allocation2 + $0x70] sm:$0xf] }
 0x18e   : > { %3204 = vrot.lane.b32.xlu1 %v3127_v9, %s5458_s12  ;;  %v1841_v9 = vrot.slane %v1839_v51, 4  ;;  %v5072_v13 = vrot.slane %v1709_v59, 9  ;;  %v2465_v23 = vshll.u32 %v2240_v4, 16  ;;  %v2469_v24 = vshrl.u32 %v2240_v4, 16 }
 0x18f   : > { %v2997_v19 = vpop.permute.xlu0 %2996 }
 0x190   : > { %3087 = vst.msk [vmem:[#allocation3 + $0x18] sm:$0xf] %vm3080_vm8, %v2997_v19  ;;  %v2999_v26 = vpop.permute.xlu1 %2998  ;;  %v1848_v19 = vrot.slane %v1846_v62, 4  ;;  %v1843_v63 = vsel %vm5979_vm14, %v1841_v9, %v1842_v5  ;;  %v1847_v20 = vsel %vm5979_vm14, %v5072_v13, %v1846_v62  ;;  %v2467_v25 = vrot.slane %v2465_v23, 5  ;;  %v2801_v62 = vld [vmem:[#allocation2 + $0x70] sm:$0xf] }
 0x191   : > { %3206 = vrot.lane.b32.xlu0 %v3128_v16, %s5458_s12  ;;  %3088 = vst.msk [vmem:[#allocation3 + $0x1c] sm:$0xf] %vm3080_vm8, %v2999_v26  ;;  %v2456_v16 = vshrl.u32 %v2239_v0, 16  ;;  %v2800_v5 = vld [vmem:[#allocation2 + $0x6c] sm:$0xe]  ;;  %v2501_v13 = vrot.slane %v2499_v58, 5 }
 0x192   : > { %3208 = vrot.lane.b32.xlu1 %v3129_v22, %s5458_s12  ;;  %v1849_v22 = vrot.slane %v1711_v6, 5  ;;  %v2930_v4 = vrot.slane %v2801_v62, 5 }
 0x193   : > { %v3187_v11 = vpop.permute.xlu0 %3186  ;;  %v2458_v29 = vrot.slane %v2456_v16, 4  ;;  %v2802_v16 = vld [vmem:[#allocation2 + $0x74] sm:$0x1] }
 0x194   : > { %3279 = vst.msk [vmem:[#allocation3 + $0x10] sm:$0xf] %vm3274_vm12, %v3187_v11  ;;  %v3189_v27 = vpop.permute.xlu1 %3188  ;;  %v2461_v11 = vrot.slane %v2459_v18, 5  ;;  %v1850_v3 = vsel %vm5979_vm14, %v1848_v19, %v1849_v22  ;;  %v2804_v18 = vld [vmem:[#allocation2 + $0x7c] sm:$0xf]  ;;  %v5087_v19 = vrot.slane %v2800_v5, 9 }
 0x195   : > { %3763 = vrot.lane.b32.xlu0 %v3512_v8, %s5459_s13  ;;  %3280 = vst.msk [vmem:[#allocation3 + $0x14] sm:$0xf] %vm3274_vm12, %v3189_v27  ;;  %v2243_v8 = vld [vmem:[#allocation2 + $0x7c] sm:$0xf]  ;;  %v2471_v27 = vrot.slane %v2469_v24, 4  ;;  %v2932_v24 = vrot.slane %v2930_v4, 4 }
 0x196   : > { %3765 = vrot.lane.b32.xlu1 %v3522_v31, %s5459_s13  ;;  %v2483_v31 = vshll.u32 %v2242_v49, 16  ;;  %v2489_v32 = vshll.u32 %v2243_v8, 16  ;;  %v2493_v33 = vshrl.u32 %v2243_v8, 16  ;;  %v2462_v57 = vor.u32 %v2461_v11, %v2458_v29  ;;  %v2803_v22 = vld [vmem:[#allocation2 + $0x78] sm:$0xe] }
 0x197   : > { %v3191_v36 = vpop.permute.xlu0 %3190  ;;  %v3332_v8 = vld [vmem:[#allocation2 + $0x7c] sm:$0xf]  ;;  %v5088_v11 = vrot.slane %v2803_v22, 9 }
 0x198   : > { %3281 = vst.msk [vmem:[#allocation3 + $0x18] sm:$0xf] %vm3274_vm12, %v3191_v36  ;;  %v3193_v40 = vpop.permute.xlu1 %3192  ;;  %v2038_v36 = vld [vmem:[#allocation2 + $0x6c] sm:$0xf]  ;;  %v2485_v37 = vrot.slane %v2483_v31, 5  ;;  %v2491_v42 = vrot.slane %v2489_v32, 5  ;;  %v2931_v31 = vsel %vm5979_vm14, %v5087_v19, %v2930_v4 }
 0x199   : > { %3767 = vrot.lane.b32.xlu0 %v3536_v34, %s5459_s13  ;;  %3282 = vst.msk [vmem:[#allocation3 + $0x1c] sm:$0xf] %vm3274_vm12, %v3193_v40  ;;  %v2472_v40 = vor.u32 %v2471_v27, %v2467_v25  ;;  %v2463_v48 = vrot.slane %v2462_v57, 4  ;;  %v3557_v27 = vshll.u32 %v3332_v8, 16  ;;  %v3334_v32 = vld [vmem:[#allocation2 + $0x84] sm:$0xf] }
 0x19a   : > { %3769 = vrot.lane.b32.xlu1 %v3546_v21, %s5459_s13  ;;  %v2482_v21 = vrot.slane %v2480_v30, 4  ;;  %v2805_v30 = vld [vmem:[#allocation2 + $0x80] sm:$0x1]  ;;  %v3575_v41 = vshll.u32 %v3334_v32, 16 }
 0x19b   : > { %v3748_v44 = vpop.permute.xlu0 %3747  ;;  %v2468_v0 = vsel %vm5562_vm9, %v2463_v48, %v2467_v25  ;;  %v2940_v35 = vrot.slane %v2805_v30, 5  ;;  %v469_v30 = vld [vmem:[#allocation2 + $0xc0] sm:$0x1] }
 0x19c   : > { %3840 = vst.msk [vmem:[#allocation3 + $0x10] sm:$0xf] %vm3835_vm13, %v3748_v44  ;;  %v3750_v53 = vpop.permute.xlu1 %3749  ;;  %v2486_v50 = vor.u32 %v2485_v37, %v2482_v21  ;;  %v3335_v37 = vld [vmem:[#allocation2 + $0x88] sm:$0xf] }
 0x19d   : > { %4100 = vrot.lane.b32.xlu0 %v4009_v28, %s5460_s16  ;;  %3841 = vst.msk [vmem:[#allocation3 + $0x14] sm:$0xf] %vm3835_vm13, %v3750_v53  ;;  %v2495_v28 = vrot.slane %v2493_v33, 4  ;;  %v2473_v53 = vrot.slane %v2472_v40, 4  ;;  %v3572_v40 = vshrl.u32 %v3334_v32, 16  ;;  %v3585_v48 = vshrl.u32 %v3335_v37, 16 }
 0x19e   : > { %4102 = vrot.lane.b32.xlu1 %v4012_v46, %s5460_s16  ;;  %v2040_v46 = vld [vmem:[#allocation2 + $0x78] sm:$0xf] }
 0x19f   : > { %v3752_v61 = vpop.permute.xlu0 %3751  ;;  %v2478_v6 = vsel %vm5562_vm9, %v2473_v53, %v2477_v54  ;;  %v3130_v54 = vld [vmem:[#allocation2 + $0x78] sm:$0xf]  ;;  %v3574_v58 = vrot.slane %v3572_v40, 4 }
 0x1a0   : > { %3842 = vst.msk [vmem:[#allocation3 + $0x18] sm:$0xf] %vm3835_vm13, %v3752_v61  ;;  %v3754_v7 = vpop.permute.xlu1 %3753 }
 0x1a1   : > { %4104 = vrot.lane.b32.xlu0 %v4016_v56, %s5460_s16  ;;  %3843 = vst.msk [vmem:[#allocation3 + $0x1c] sm:$0xf] %vm3835_vm13, %v3754_v7  ;;  %v2496_v56 = vor.u32 %v2495_v28, %v2491_v42  ;;  %v6425_v28 = vrot.slane %v3557_v27, 5 }
 0x1a2   : > { %4106 = vrot.lane.b32.xlu1 %v4019_v1, %s5460_s16  ;;  %v2487_v1 = vrot.slane %v2486_v50, 4  ;;  %v5326_v50 = vld [vmem:[%s5523_s23 + $0x78] sm:$0xff]  }
 0x1a3   : > { %v4085_v14 = vpop.permute.xlu0 %4084  ;;  %v2497_v7 = vrot.slane %v2496_v56, 4  ;;  %v5311_v53 = vunpack.c.h.bf16 %v5326_v50 }
 0x1a4   : > { %4177 = vst.msk [vmem:[#allocation3 + $0x10] sm:$0xf] %vm4172_vm15, %v4085_v14  ;;  %v4087_v26 = vpop.permute.xlu1 %4086  ;;  %v2492_v14 = vsel %vm5562_vm9, %v2487_v1, %v2491_v42 }
 0x1a5   : > { %1925 = vrot.lane.b32.xlu0 %v1840_v15, %s5454_s8  ;;  %4178 = vst.msk [vmem:[#allocation3 + $0x14] sm:$0xf] %vm4172_vm15, %v4087_v26  ;;  %v2502_v23 = vsel %vm5562_vm9, %v2497_v7, %v2501_v13  ;;  %v2933_v26 = vrot.slane %v2802_v16, 5  ;;  %v3336_v7 = vld [vmem:[#allocation2 + $0x8c] sm:$0x1]  ;;  %v3587_v13 = vrot.slane %v3585_v48, 4 }
 0x1a6   : > { %1927 = vrot.lane.b32.xlu1 %v1843_v63, %s5454_s8  ;;  %v3331_v63 = vld [vmem:[#allocation2 + $0x78] sm:$0xf]  ;;  %v5443_v16 = vld [vmem:[%s7224_s2] ss:$0 sm:$0xff] }
 0x1a7   : > { %v4089_v60 = vpop.permute.xlu0 %4088  ;;  %v2934_v33 = vsel %vm5979_vm14, %v2932_v24, %v2933_v26  ;;  %v3591_v26 = vshll.u32 %v3336_v7, 16 }
 0x1a8   : > { %4179 = vst.msk [vmem:[#allocation3 + $0x18] sm:$0xf] %vm4172_vm15, %v4089_v60  ;;  %v4091_v34 = vpop.permute.xlu1 %4090  ;;  %v3548_v60 = vshrl.u32 %v3331_v63, 16 }
 0x1a9   : > { %1929 = vrot.lane.b32.xlu0 %v1847_v20, %s5454_s8  ;;  %4180 = vst.msk [vmem:[#allocation3 + $0x1c] sm:$0xf] %vm4172_vm15, %v4091_v34  ;;  %v2937_v20 = vrot.slane %v2804_v18, 5 }
 0x1aa   : > { %1931 = vrot.lane.b32.xlu1 %v1850_v3, %s5454_s8  ;;  %v3551_v3 = vshll.u32 %v3331_v63, 16 }
 0x1ab   : > { %v1914_v38 = vpop.permute.xlu0 %1913  ;;  %v2939_v34 = vrot.slane %v2937_v20, 4  ;;  %v2938_v21 = vsel %vm5979_vm14, %v5088_v11, %v2937_v20  ;;  %v3893_v11 = vld [vmem:[#allocation2 + $0x7c] sm:$0xf] }
 0x1ac   : > { %2000 = vst.msk [vmem:[#allocation3 + $0x28] sm:$0xf] %vm1989_vm3, %v1914_v38  ;;  %v1916_v43 = vpop.permute.xlu1 %1915  ;;  %v5426_v44 = vld [vmem:[#allocation3 + $0x10] sm:$0xff]   ;;  %v3550_v38 = vrot.slane %v3548_v60, 4 }
 0x1ad   : > { %2118 = vrot.lane.b32.xlu0 %v2038_v36, %s5455_s9  ;;  %2001 = vst.msk [vmem:[#allocation3 + $0x2c] sm:$0xf] %vm1989_vm3, %v1916_v43  ;;  %5362 = vmatprep.mubr.msk.bf16.mxu0 %vm4353_vm2, %v5426_v44  ;;  %v3561_v36 = vshrl.u32 %v3332_v8, 16  ;;  %v2941_v43 = vsel %vm5979_vm14, %v2939_v34, %v2940_v35  ;;  %v3333_v44 = vld [vmem:[#allocation2 + $0x80] sm:$0x1]  ;;  %v3593_v35 = vrot.slane %v3591_v26, 5 }
 0x1ae   : > { %2120 = vrot.lane.b32.xlu1 %v2039_v39, %s5455_s9  ;;  %v3553_v39 = vrot.slane %v3551_v3, 5  ;;  %v3567_v62 = vshll.u32 %v3333_v44, 16  ;;  %v470_v3 = vsel %vm5507_vm5, 0, %v469_v30  ;;  %v2245_v30 = vld [vmem:[#allocation2 + $0x84] sm:$0xf] }
 0x1af   : > { %v2103_v51 = vpop.permute.xlu0 %2102  ;;  %v3563_v45 = vrot.slane %v3561_v36, 4  ;;  %471 = vst [vmem:[#allocation2 + $0xc0] sm:$0x1] %v470_v3  ;;  %v3892_v36 = vld [vmem:[#allocation2 + $0x78] sm:$0xe]  ;;  %v1856_v3 = vrot.slane %v1714_v12, 5 }
 0x1b0   : > { %2191 = vst.msk [vmem:[#allocation3 + $0x20] sm:$0xf] %vm2182_vm4, %v2103_v51  ;;  %v2105_v59 = vpop.permute.xlu1 %2104  ;;  %v5427_v61 = vld [vmem:[#allocation3 + $0x18] sm:$0xff]   ;;  %v3554_v56 = vor.u32 %v3553_v39, %v3550_v38  ;;  %v3569_v24 = vrot.slane %v3567_v62, 5  ;;  %v3894_v39 = vld [vmem:[#allocation2 + $0x80] sm:$0x1] }
 0x1b1   : > { %2122 = vrot.lane.b32.xlu0 %v2040_v46, %s5455_s9  ;;  %2192 = vst.msk [vmem:[#allocation3 + $0x24] sm:$0xf] %vm2182_vm4, %v2105_v59  ;;  %5363 = vmatmul.mubr.msk.bf16.gmra.mxu0 %vm4353_vm2, %v5427_v61  ;;  %v3581_v46 = vshll.u32 %v3335_v37, 16  ;;  %v3577_v59 = vrot.slane %v3575_v41, 5  ;;  %v3564_v5 = vor.u32 %v3563_v45, %v6425_v28  ;;  %v519_v41 = vld [vmem:[#allocation2 + $0xc8] sm:$0x1] }
 0x1b2   : > { %2124 = vrot.lane.b32.xlu1 %v2041_v52, %s5455_s9  ;;  %v5310_v52 = vunpack.c.l.bf16 %v5326_v50  ;;  %v3555_v19 = vrot.slane %v3554_v56, 4  ;;  %v5103_v50 = vrot.slane %v3892_v36, 9 }
 0x1b3   : > { %v2107_v9 = vpop.permute.xlu0 %2106  ;;  %v3578_v22 = vor.u32 %v3577_v59, %v3574_v58  ;;  %v3565_v8 = vrot.slane %v3564_v5, 4  ;;  %v4025_v59 = vrot.slane %v3894_v39, 5  ;;  %v2513_v39 = vshll.u32 %v2246_v2, 16 }
 0x1b4   : > { %2193 = vst.msk [vmem:[#allocation3 + $0x28] sm:$0xf] %vm2182_vm4, %v2107_v9  ;;  %v2109_v15 = vpop.permute.xlu1 %2108  ;;  %v3131_v9 = vld [vmem:[#allocation2 + $0x7c] sm:$0xf]  ;;  %v3560_v27 = vsel %vm5562_vm9, %v3555_v19, %v6425_v28  ;;  %v3896_v28 = vld [vmem:[#allocation2 + $0x88] sm:$0xf] }
 0x1b5   : > { %2679 = vrot.lane.b32.xlu0 %v2468_v0, %s5456_s10  ;;  %2194 = vst.msk [vmem:[#allocation3 + $0x2c] sm:$0xf] %vm2182_vm4, %v2109_v15  ;;  %v5442_v0 = vld [vmem:[%s7223_s1] ss:$0 sm:$0xff]  ;;  %v3579_v32 = vrot.slane %v3578_v22, 4  ;;  %v3570_v37 = vsel %vm5562_vm9, %v3565_v8, %v3569_v24 }
 0x1b6   : > { %2681 = vrot.lane.b32.xlu1 %v2478_v6, %s5456_s10  ;;  %v338_v1 = vmul.f32 %v5442_v0, %v5310_v52  ;;  %v6439_v6 = vrot.slane %v3581_v46, 5  ;;  %v339_v4 = vmul.f32 %v5442_v0, %v5311_v53  ;;  %v520_v46 = vsel %vm5532_vm7, 0, %v519_v41  ;;  %v1047_v5 = vld [vmem:[#allocation2 + $0xc0] sm:$0xf] }
 0x1b7   : > { %v2664_v49 = vpop.permute.xlu0 %2663  ;;  %521 = vst [vmem:[#allocation2 + $0xc8] sm:$0x1] %v520_v46 }
 0x1b8   : > { %2752 = vst.msk [vmem:[#allocation3 + $0x20] sm:$0xf] %vm2743_vm6, %v2664_v49  ;;  %v2666_v29 = vpop.permute.xlu1 %2665  ;;  %v377_v18 = vadd.f32 %v5443_v16, %v338_v1  ;;  %v378_v49 = vadd.f32 %v5443_v16, %v339_v4  ;;  %v3584_v48 = vsel %vm5562_vm9, %v3579_v32, %v6439_v6  ;;  %v3897_v1 = vld [vmem:[#allocation2 + $0x8c] sm:$0x1]  ;;  %v1712_v16 = vld [vmem:[#allocation2 + $0x78] sm:$0xe] }
 0x1b9   : > { %2683 = vrot.lane.b32.xlu0 %v2492_v14, %s5456_s10  ;;  %2753 = vst.msk [vmem:[#allocation3 + $0x24] sm:$0xf] %vm2743_vm6, %v2666_v29  ;;  %v3132_v14 = vld [vmem:[#allocation2 + $0x84] sm:$0xf]  ;;  %v3588_v29 = vor.u32 %v3587_v13, %v6439_v6  ;;  %v4032_v22 = vrot.slane %v3897_v1, 5  ;;  %v5073_v26 = vrot.slane %v1712_v16, 9 }
 0x1ba   : > { %2685 = vrot.lane.b32.xlu1 %v2502_v23, %s5456_s10  ;;  %v3133_v23 = vld [vmem:[#allocation2 + $0x88] sm:$0xf]  ;;  %v409_v20 = vmax.f32 %v377_v18, 0.0  ;;  %v2250_v16 = vld [vmem:[#allocation2 + $0x98] sm:$0x1] }
 0x1bb   : > { %v2668_v25 = vpop.permute.xlu0 %2667  ;;  %v3589_v38 = vrot.slane %v3588_v29, 4 }
 0x1bc   : > { %2754 = vst.msk [vmem:[#allocation3 + $0x28] sm:$0xf] %vm2743_vm6, %v2668_v25  ;;  %v2670_v57 = vpop.permute.xlu1 %2669  ;;  %v5214_v25 = vpack.c.bf16 %v409_v20, %v409_v20  ;;  %v1715_v20 = vld [vmem:[#allocation2 + $0x84] sm:$0xe] }
 0x1bd   : > { %3016 = vrot.lane.b32.xlu0 %v2931_v31, %s5457_s11  ;;  %2755 = vst.msk [vmem:[#allocation3 + $0x2c] sm:$0xf] %vm2743_vm6, %v2670_v57  ;;  %v410_v31 = vmax.f32 %v378_v49, 0.0  ;;  %v4022_v57 = vrot.slane %v3893_v11, 5  ;;  %v3594_v10 = vsel %vm5562_vm9, %v3589_v38, %v3593_v35  ;;  %v1716_v49 = vld [vmem:[#allocation2 + $0x88] sm:$0xf] }
 0x1be   : > { %3018 = vrot.lane.b32.xlu1 %v2934_v33, %s5457_s11  ;;  %v879_v44 = vshll.u32 %v5214_v25, 16  ;;  %v1860_v11 = vrot.slane %v1716_v49, 5  ;;  %v5074_v32 = vrot.slane %v1715_v20, 9  ;;  %v2507_v35 = vshll.u32 %v2245_v30, 16 }
 0x1bf   : > { %v3001_v42 = vpop.permute.xlu0 %3000  ;;  %v5215_v33 = vpack.c.bf16 %v410_v31, %v410_v31  ;;  %v4024_v53 = vrot.slane %v4022_v57, 4  ;;  %v4023_v6 = vsel %vm5979_vm14, %v5103_v50, %v4022_v57 }
 0x1c0   : > { %3089 = vst.msk [vmem:[#allocation3 + $0x20] sm:$0xf] %vm3080_vm8, %v3001_v42  ;;  %v3003_v51 = vpop.permute.xlu1 %3002  ;;  %v1862_v57 = vrot.slane %v1860_v11, 4 }
 0x1c1   : > { %3020 = vrot.lane.b32.xlu0 %v2938_v21, %s5457_s11  ;;  %3090 = vst.msk [vmem:[#allocation3 + $0x24] sm:$0xf] %vm3080_vm8, %v3003_v51  ;;  %v876_v21 = vshrl.u32 %v5214_v25, 16  ;;  %v884_v40 = vshrl.u32 %v5215_v33, 16  ;;  %v887_v45 = vshll.u32 %v5215_v33, 16 }
 0x1c2   : > { %3022 = vrot.lane.b32.xlu1 %v2941_v43, %s5457_s11  ;;  %v1717_v25 = vld [vmem:[#allocation2 + $0x8c] sm:$0x1] }
 0x1c3   : > { %v3005_v61 = vpop.permute.xlu0 %3004  ;;  %v878_v43 = vrot.slane %v876_v21, 7  ;;  %v886_v51 = vrot.slane %v884_v40, 7  ;;  %v1863_v21 = vrot.slane %v1717_v25, 5  ;;  %v2517_v40 = vshrl.u32 %v2246_v2, 16  ;;  %v2810_v25 = vld [vmem:[#allocation2 + $0x94] sm:$0xf] }
 0x1c4   : > { %3091 = vst.msk [vmem:[#allocation3 + $0x28] sm:$0xf] %vm3080_vm8, %v3005_v61  ;;  %v3007_v15 = vpop.permute.xlu1 %3006  ;;  %v4029_v61 = vrot.slane %v3896_v28, 5  ;;  %v2249_v28 = vld [vmem:[#allocation2 + $0x94] sm:$0xf] }
 0x1c5   : > { %3210 = vrot.lane.b32.xlu0 %v3130_v54, %s5458_s12  ;;  %3092 = vst.msk [vmem:[#allocation3 + $0x2c] sm:$0xf] %vm3080_vm8, %v3007_v15  ;;  %v3895_v54 = vld [vmem:[#allocation2 + $0x84] sm:$0xe]  ;;  %v881_v56 = vor.u32 %v879_v44, %v878_v43  ;;  %v882_v58 = vrot.slane %v878_v43, 4  ;;  %v889_v62 = vor.u32 %v887_v45, %v886_v51  ;;  %v891_v18 = vrot.slane %v886_v51, 4 }
 0x1c6   : > { %3212 = vrot.lane.b32.xlu1 %v3131_v9, %s5458_s12  ;;  %v1713_v9 = vld [vmem:[#allocation2 + $0x7c] sm:$0xf]  ;;  %v5104_v7 = vrot.slane %v3895_v54, 9  ;;  %v4031_v19 = vrot.slane %v4029_v61, 4  ;;  %v2509_v44 = vrot.slane %v2507_v35, 5  ;;  %v1864_v50 = vsel %vm5979_vm14, %v1862_v57, %v1863_v21 }
 0x1c7   : > { %v3195_v63 = vpop.permute.xlu0 %3194  ;;  %v1048_v13 = vsel %vm5584_vm11, %v881_v56, %v1047_v5  ;;  %v890_v4 = vsel %vm5576_vm10, %v882_v58, %v889_v62  ;;  %v1853_v17 = vrot.slane %v1713_v9, 5  ;;  %v2515_v51 = vrot.slane %v2513_v39, 5  ;;  %v2043_v9 = vld [vmem:[#allocation2 + $0x88] sm:$0xf]  ;;  %v3337_v57 = vld [vmem:[#allocation2 + $0x90] sm:$0xf] }
 0x1c8   : > { %3283 = vst.msk [vmem:[#allocation3 + $0x20] sm:$0xf] %vm3274_vm12, %v3195_v63  ;;  %v3197_v60 = vpop.permute.xlu1 %3196  ;;  %1049 = vst [vmem:[#allocation2 + $0xc0] sm:$0xf] %v1048_v13  ;;  %v4030_v24 = vsel %vm5979_vm14, %v5104_v7, %v4029_v61  ;;  %v4033_v31 = vsel %vm5979_vm14, %v4031_v19, %v4032_v22  ;;  %v2541_v54 = vshrl.u32 %v2249_v28, 16 }
 0x1c9   : > { %3214 = vrot.lane.b32.xlu0 %v3132_v14, %s5458_s12  ;;  %3284 = vst.msk [vmem:[#allocation3 + $0x24] sm:$0xf] %vm3274_vm12, %v3197_v60  ;;  %v4026_v14 = vsel %vm5979_vm14, %v4024_v53, %v4025_v59  ;;  %v1855_v60 = vrot.slane %v1853_v17, 4  ;;  %v1854_v33 = vsel %vm5979_vm14, %v5073_v26, %v1853_v17  ;;  %v2537_v53 = vshll.u32 %v2249_v28, 16  ;;  %v2042_v59 = vld [vmem:[#allocation2 + $0x84] sm:$0xf] }
 0x1ca   : > { %3216 = vrot.lane.b32.xlu1 %v3133_v23, %s5458_s12  ;;  %1050 = vst.msk [vmem:[#allocation2 + $0xc4] sm:$0xf] %vm411_vm0, %v890_v4  ;;  %v1051_v23 = vld [vmem:[#allocation2 + $0xc8] sm:$0x1]  ;;  %v2543_v13 = vrot.slane %v2541_v54, 4 }
 0x1cb   : > { %v3199_v34 = vpop.permute.xlu0 %3198  ;;  %v1052_v8 = vsel %vm5507_vm5, %v891_v18, %v1051_v23  ;;  %v1857_v38 = vsel %vm5979_vm14, %v1855_v60, %v1856_v3  ;;  %v2539_v7 = vrot.slane %v2537_v53, 5  ;;  %v2044_v18 = vld [vmem:[#allocation2 + $0x90] sm:$0xf]  ;;  %v2045_v17 = vld [vmem:[#allocation2 + $0x94] sm:$0xf]  ;;  %v2547_v23 = vshll.u32 %v2250_v16, 16 }
 0x1cc   : > { %3285 = vst.msk [vmem:[#allocation3 + $0x28] sm:$0xf] %vm3274_vm12, %v3199_v34  ;;  %v3201_v42 = vpop.permute.xlu1 %3200  ;;  %1053 = vst [vmem:[#allocation2 + $0xc8] sm:$0x1] %v1052_v8  ;;  %v2504_v34 = vshrl.u32 %v2245_v30, 16  ;;  %vm4567_vm5 = vcmask 64512  }
 0x1cd   : > { %3771 = vrot.lane.b32.xlu0 %v3560_v27, %s5459_s13  ;;  %3286 = vst.msk [vmem:[#allocation3 + $0x2c] sm:$0xf] %vm3274_vm12, %v3201_v42  ;;  %v1861_v42 = vsel %vm5979_vm14, %v5074_v32, %v1860_v11  ;;  %v2544_v12 = vor.u32 %v2543_v13, %v2539_v7  ;;  %v2807_v26 = vld [vmem:[#allocation2 + $0x88] sm:$0xf]  ;;  %v2806_v11 = vld [vmem:[#allocation2 + $0x84] sm:$0xe] }
 0x1ce   : > { %3773 = vrot.lane.b32.xlu1 %v3570_v37, %s5459_s13  ;;  %v2248_v37 = vld [vmem:[#allocation2 + $0x90] sm:$0xf]  ;;  %v2506_v43 = vrot.slane %v2504_v34, 4  ;;  %v2549_v60 = vrot.slane %v2547_v23, 5  ;;  %v2944_v3 = vrot.slane %v2807_v26, 5 }
 0x1cf   : > { %v3756_v52 = vpop.permute.xlu0 %3755  ;;  %v2528_v45 = vshrl.u32 %v2248_v37, 16  ;;  %v2531_v46 = vshll.u32 %v2248_v37, 16  ;;  %v2808_v32 = vld [vmem:[#allocation2 + $0x8c] sm:$0x1]  ;;  %v2809_v34 = vld [vmem:[#allocation2 + $0x90] sm:$0xe] }
 0x1d0   : > { %3844 = vst.msk [vmem:[#allocation3 + $0x20] sm:$0xf] %vm3835_vm13, %v3756_v52  ;;  %v3758_v0 = vpop.permute.xlu1 %3757  ;;  %v2519_v52 = vrot.slane %v2517_v40, 4  ;;  %v2510_v61 = vor.u32 %v2509_v44, %v2506_v43  ;;  %v2946_v37 = vrot.slane %v2944_v3, 4  ;;  %v2811_v39 = vld [vmem:[#allocation2 + $0x98] sm:$0x1] }
 0x1d1   : > { %3775 = vrot.lane.b32.xlu0 %v3584_v48, %s5459_s13  ;;  %3845 = vst.msk [vmem:[#allocation3 + $0x24] sm:$0xf] %vm3835_vm13, %v3758_v0  ;;  %v2530_v62 = vrot.slane %v2528_v45, 4  ;;  %v2533_v0 = vrot.slane %v2531_v46, 5  ;;  %v3596_v43 = vshrl.u32 %v3337_v57, 16  ;;  %v3599_v44 = vshll.u32 %v3337_v57, 16 }
 0x1d2   : > { %3777 = vrot.lane.b32.xlu1 %v3594_v10, %s5459_s13  ;;  %v2247_v10 = vld [vmem:[#allocation2 + $0x8c] sm:$0x1]  ;;  %v2520_v5 = vor.u32 %v2519_v52, %v2515_v51  ;;  %v3136_v26 = vld [vmem:[#allocation2 + $0x9c] sm:$0xf] }
 0x1d3   : > { %v3760_v15 = vpop.permute.xlu0 %3759  ;;  %v2534_v19 = vor.u32 %v2533_v0, %v2530_v62 }
 0x1d4   : > { %3846 = vst.msk [vmem:[#allocation3 + $0x28] sm:$0xf] %vm3835_vm13, %v3760_v15  ;;  %v3762_v63 = vpop.permute.xlu1 %3761  ;;  %v2521_v49 = vrot.slane %v2520_v5, 4 }
 0x1d5   : > { %4108 = vrot.lane.b32.xlu0 %v4023_v6, %s5460_s16  ;;  %3847 = vst.msk [vmem:[#allocation3 + $0x2c] sm:$0xf] %vm3835_vm13, %v3762_v63  ;;  %v2523_v6 = vshll.u32 %v2247_v10, 16  ;;  %v2535_v8 = vrot.slane %v2534_v19, 4  ;;  %v3598_v10 = vrot.slane %v3596_v43, 4 }
 0x1d6   : > { %4110 = vrot.lane.b32.xlu1 %v4026_v14, %s5460_s16  ;;  %v2511_v14 = vrot.slane %v2510_v61, 4 }
 0x1d7   : > { %v4093_v29 = vpop.permute.xlu0 %4092  ;;  %v2525_v63 = vrot.slane %v2523_v6, 5  ;;  %v2540_v2 = vsel %vm5562_vm9, %v2535_v8, %v2539_v7 }
 0x1d8   : > { %4181 = vst.msk [vmem:[#allocation3 + $0x20] sm:$0xf] %vm4172_vm15, %v4093_v29  ;;  %v4095_v27 = vpop.permute.xlu1 %4094  ;;  %v2516_v20 = vsel %vm5562_vm9, %v2511_v14, %v2515_v51 }
 0x1d9   : > { %4112 = vrot.lane.b32.xlu0 %v4030_v24, %s5460_s16  ;;  %4182 = vst.msk [vmem:[#allocation3 + $0x24] sm:$0xf] %vm4172_vm15, %v4095_v27  ;;  %v2526_v30 = vsel %vm5562_vm9, %v2521_v49, %v2525_v63 }
 0x1da   : > { %4114 = vrot.lane.b32.xlu1 %v4033_v31, %s5460_s16  ;;  %v2545_v31 = vrot.slane %v2544_v12, 4 }
 0x1db   : > { %v4097_v36 = vpop.permute.xlu0 %4096 }
 0x1dc   : > { %4183 = vst.msk [vmem:[#allocation3 + $0x28] sm:$0xf] %vm4172_vm15, %v4097_v36  ;;  %v4099_v41 = vpop.permute.xlu1 %4098  ;;  %v2951_v36 = vrot.slane %v2810_v25, 5  ;;  %v2550_v21 = vsel %vm5562_vm9, %v2545_v31, %v2549_v60 }
 0x1dd   : > { %1933 = vrot.lane.b32.xlu0 %v1854_v33, %s5454_s8  ;;  %4184 = vst.msk [vmem:[#allocation3 + $0x2c] sm:$0xf] %vm4172_vm15, %v4099_v41  ;;  %v5089_v33 = vrot.slane %v2806_v11, 9  ;;  %v5090_v41 = vrot.slane %v2809_v34, 9  ;;  %v3137_v11 = vld [vmem:[#allocation2 + $0xa0] sm:$0xf] }
 0x1de   : > { %1935 = vrot.lane.b32.xlu1 %v1857_v38, %s5454_s8  ;;  %v2947_v38 = vrot.slane %v2808_v32, 5  ;;  %v2953_v46 = vrot.slane %v2951_v36, 4  ;;  %v3898_v34 = vld [vmem:[#allocation2 + $0x90] sm:$0xe] }
 0x1df   : > { %v1918_v48 = vpop.permute.xlu0 %1917  ;;  %v2945_v28 = vsel %vm5979_vm14, %v5089_v33, %v2944_v3 }
 0x1e0   : > { %2002 = vst.msk [vmem:[#allocation3 + $0x30] sm:$0xf] %vm1989_vm3, %v1918_v48  ;;  %v1920_v56 = vpop.permute.xlu1 %1919  ;;  %v5428_v58 = vld [vmem:[#allocation3 + $0x20] sm:$0xff]   ;;  %v2954_v48 = vrot.slane %v2811_v39, 5  ;;  %v2948_v51 = vsel %vm5979_vm14, %v2946_v37, %v2947_v38  ;;  %v3902_v39 = vld [vmem:[#allocation2 + $0xa0] sm:$0xf] }
 0x1e1   : > { %1937 = vrot.lane.b32.xlu0 %v1861_v42, %s5454_s8  ;;  %2003 = vst.msk [vmem:[#allocation3 + $0x34] sm:$0xf] %vm1989_vm3, %v1920_v56  ;;  %5366 = vmatprep.mubr.msk.bf16.mxu0 %vm4353_vm2, %v5428_v58  ;;  %v3338_v42 = vld [vmem:[#allocation2 + $0x94] sm:$0xf]  ;;  %v2952_v56 = vsel %vm5979_vm14, %v5090_v41, %v2951_v36  ;;  %v3341_v58 = vld [vmem:[#allocation2 + $0xa0] sm:$0xf] }
 0x1e2   : > { %1939 = vrot.lane.b32.xlu1 %v1864_v50, %s5454_s8  ;;  %v3340_v50 = vld [vmem:[#allocation2 + $0x9c] sm:$0xf]  ;;  %v3605_v52 = vshll.u32 %v3338_v42, 16  ;;  %v3609_v53 = vshrl.u32 %v3338_v42, 16  ;;  %v3629_v6 = vshll.u32 %v3341_v58, 16  ;;  %v3633_v7 = vshrl.u32 %v3341_v58, 16 }
 0x1e3   : > { %v1922_v1 = vpop.permute.xlu0 %1921  ;;  %v3620_v61 = vshrl.u32 %v3340_v50, 16  ;;  %v3623_v62 = vshll.u32 %v3340_v50, 16  ;;  %v3900_v38 = vld [vmem:[#allocation2 + $0x98] sm:$0x1]  ;;  %v5105_v41 = vrot.slane %v3898_v34, 9 }
 0x1e4   : > { %2004 = vst.msk [vmem:[#allocation3 + $0x38] sm:$0xf] %vm1989_vm3, %v1922_v1  ;;  %v1924_v4 = vpop.permute.xlu1 %1923  ;;  %v5429_v15 = vld [vmem:[#allocation3 + $0x28] sm:$0xff]   ;;  %v2955_v1 = vsel %vm5979_vm14, %v2953_v46, %v2954_v48  ;;  %v3611_v5 = vrot.slane %v3609_v53, 4  ;;  %v3631_v63 = vrot.slane %v3629_v6, 5  ;;  %v3635_v12 = vrot.slane %v3633_v7, 4 }
 0x1e5   : > { %2126 = vrot.lane.b32.xlu0 %v2042_v59, %s5455_s9  ;;  %2005 = vst.msk [vmem:[#allocation3 + $0x3c] sm:$0xf] %vm1989_vm3, %v1924_v4  ;;  %5367 = vmatmul.mubr.msk.bf16.gmra.mxu0 %vm4353_vm2, %v5429_v15  ;;  %v3601_v59 = vrot.slane %v3599_v44, 5  ;;  %v3339_v4 = vld [vmem:[#allocation2 + $0x98] sm:$0x1]  ;;  %v3625_v14 = vrot.slane %v3623_v62, 5 }
 0x1e6   : > { %2128 = vrot.lane.b32.xlu1 %v2043_v9, %s5455_s9  ;;  %v3607_v9 = vrot.slane %v3605_v52, 5  ;;  %v3134_v15 = vld [vmem:[#allocation2 + $0x90] sm:$0xf]  ;;  %v3615_v49 = vshll.u32 %v3339_v4, 16  ;;  %v3636_v60 = vor.u32 %v3635_v12, %v3631_v63  ;;  %v4043_v46 = vrot.slane %v3902_v39, 5 }
 0x1e7   : > { %v2111_v22 = vpop.permute.xlu0 %2110  ;;  %v3602_v16 = vor.u32 %v3601_v59, %v3598_v10  ;;  %v3903_v50 = vld [vmem:[#allocation2 + $0xa4] sm:$0x1]  ;;  %v1722_v62 = vld [vmem:[#allocation2 + $0xa0] sm:$0xf]  ;;  %v1721_v6 = vld [vmem:[#allocation2 + $0x9c] sm:$0xe] }
 0x1e8   : > { %2195 = vst.msk [vmem:[#allocation3 + $0x30] sm:$0xf] %vm2182_vm4, %v2111_v22  ;;  %v2113_v24 = vpop.permute.xlu1 %2112  ;;  %v3135_v22 = vld [vmem:[#allocation2 + $0x94] sm:$0xf]  ;;  %v3617_v31 = vrot.slane %v3615_v49, 5  ;;  %v3637_v36 = vrot.slane %v3636_v60, 4 }
 0x1e9   : > { %2130 = vrot.lane.b32.xlu0 %v2044_v18, %s5455_s9  ;;  %2196 = vst.msk [vmem:[#allocation3 + $0x34] sm:$0xf] %vm2182_vm4, %v2113_v24  ;;  %v3622_v18 = vrot.slane %v3620_v61, 4  ;;  %v3342_v24 = vld [vmem:[#allocation2 + $0xa4] sm:$0x1]  ;;  %v4045_v10 = vrot.slane %v4043_v46, 4 }
 0x1ea   : > { %2132 = vrot.lane.b32.xlu1 %v2045_v17, %s5455_s9  ;;  %v3612_v17 = vor.u32 %v3611_v5, %v3607_v9  ;;  %v3639_v3 = vshll.u32 %v3342_v24, 16  ;;  %v4046_v59 = vrot.slane %v3903_v50, 5  ;;  %v2251_v4 = vld [vmem:[#allocation2 + $0x9c] sm:$0xf]  ;;  %v2255_v60 = vld [vmem:[#allocation2 + $0xac] sm:$0xf] }
 0x1eb   : > { %v2115_v29 = vpop.permute.xlu0 %2114  ;;  %v3626_v8 = vor.u32 %v3625_v14, %v3622_v18  ;;  %v1723_v14 = vld [vmem:[#allocation2 + $0xa4] sm:$0x1]  ;;  %v2555_v12 = vshll.u32 %v2251_v4, 16  ;;  %v2046_v39 = vld [vmem:[#allocation2 + $0x9c] sm:$0xf] }
 0x1ec   : > { %2197 = vst.msk [vmem:[#allocation3 + $0x38] sm:$0xf] %vm2182_vm4, %v2115_v29  ;;  %v2117_v27 = vpop.permute.xlu1 %2116  ;;  %v3641_v57 = vrot.slane %v3639_v3, 5 }
 0x1ed   : > { %2687 = vrot.lane.b32.xlu0 %v2516_v20, %s5456_s10  ;;  %2198 = vst.msk [vmem:[#allocation3 + $0x3c] sm:$0xf] %vm2182_vm4, %v2117_v27  ;;  %v3603_v20 = vrot.slane %v3602_v16, 4  ;;  %v3899_v27 = vld [vmem:[#allocation2 + $0x94] sm:$0xf] }
 0x1ee   : > { %2689 = vrot.lane.b32.xlu1 %v2526_v30, %s5456_s10  ;;  %v3613_v30 = vrot.slane %v3612_v17, 4  ;;  %v3642_v43 = vsel %vm5562_vm9, %v3637_v36, %v3641_v57  ;;  %v2252_v17 = vld [vmem:[#allocation2 + $0xa0] sm:$0xf]  ;;  %v2585_v36 = vshll.u32 %v2255_v60, 16  ;;  %v2589_v57 = vshrl.u32 %v2255_v60, 16 }
 0x1ef   : > { %v2672_v35 = vpop.permute.xlu0 %2671  ;;  %v3608_v32 = vsel %vm5562_vm9, %v3603_v20, %v3607_v9  ;;  %v2254_v20 = vld [vmem:[#allocation2 + $0xa8] sm:$0xf] }
 0x1f0   : > { %2756 = vst.msk [vmem:[#allocation3 + $0x30] sm:$0xf] %vm2743_vm6, %v2672_v35  ;;  %v2674_v40 = vpop.permute.xlu1 %2673  ;;  %v3618_v35 = vsel %vm5562_vm9, %v3613_v30, %v3617_v31 }
 0x1f1   : > { %2691 = vrot.lane.b32.xlu0 %v2540_v2, %s5456_s10  ;;  %2757 = vst.msk [vmem:[#allocation3 + $0x34] sm:$0xf] %vm2743_vm6, %v2674_v40  ;;  %v3627_v2 = vrot.slane %v3626_v8, 4 }
 0x1f2   : > { %2693 = vrot.lane.b32.xlu1 %v2550_v21, %s5456_s10  ;;  %v4036_v21 = vrot.slane %v3899_v27, 5  ;;  %v2576_v27 = vshrl.u32 %v2254_v20, 16 }
 0x1f3   : > { %v2676_v45 = vpop.permute.xlu0 %2675  ;;  %v3632_v40 = vsel %vm5562_vm9, %v3627_v2, %v3631_v63  ;;  %v2552_v63 = vshrl.u32 %v2251_v4, 16 }
 0x1f4   : > { %2758 = vst.msk [vmem:[#allocation3 + $0x38] sm:$0xf] %vm2743_vm6, %v2676_v45  ;;  %v2678_v54 = vpop.permute.xlu1 %2677  ;;  %v4038_v44 = vrot.slane %v4036_v21, 4  ;;  %v4039_v45 = vrot.slane %v3900_v38, 5  ;;  %v4037_v52 = vsel %vm5979_vm14, %v5105_v41, %v4036_v21  ;;  %v2253_v38 = vld [vmem:[#allocation2 + $0xa4] sm:$0x1] }
 0x1f5   : > { %3024 = vrot.lane.b32.xlu0 %v2945_v28, %s5457_s11  ;;  %2759 = vst.msk [vmem:[#allocation3 + $0x3c] sm:$0xf] %vm2743_vm6, %v2678_v54  ;;  %v3901_v28 = vld [vmem:[#allocation2 + $0x9c] sm:$0xe]  ;;  %v2554_v3 = vrot.slane %v2552_v63, 4  ;;  %v2578_v41 = vrot.slane %v2576_v27, 4 }
 0x1f6   : > { %3026 = vrot.lane.b32.xlu1 %v2948_v51, %s5457_s11  ;;  %v1719_v51 = vld [vmem:[#allocation2 + $0x94] sm:$0xf]  ;;  %v5106_v53 = vrot.slane %v3901_v28, 9  ;;  %v4040_v58 = vsel %vm5979_vm14, %v4038_v44, %v4039_v45  ;;  %v2571_v45 = vshll.u32 %v2253_v38, 16  ;;  %v2815_v63 = vld [vmem:[#allocation2 + $0xa8] sm:$0xe] }
 0x1f7   : > { %v3009_v0 = vpop.permute.xlu0 %3008  ;;  %v1867_v61 = vrot.slane %v1719_v51, 5 }
 0x1f8   : > { %3093 = vst.msk [vmem:[#allocation3 + $0x30] sm:$0xf] %vm3080_vm8, %v3009_v0  ;;  %v3011_v13 = vpop.permute.xlu1 %3010  ;;  %v4044_v9 = vsel %vm5979_vm14, %v5106_v53, %v4043_v46  ;;  %v2587_v46 = vrot.slane %v2585_v36, 5  ;;  %v2048_v53 = vld [vmem:[#allocation2 + $0xa8] sm:$0xf] }
 0x1f9   : > { %3028 = vrot.lane.b32.xlu0 %v2952_v56, %s5457_s11  ;;  %3094 = vst.msk [vmem:[#allocation3 + $0x34] sm:$0xf] %vm3080_vm8, %v3011_v13  ;;  %v1718_v56 = vld [vmem:[#allocation2 + $0x90] sm:$0xe]  ;;  %v1874_v13 = vrot.slane %v1722_v62, 5  ;;  %v1869_v16 = vrot.slane %v1867_v61, 4 }
 0x1fa   : > { %3030 = vrot.lane.b32.xlu1 %v2955_v1, %s5457_s11  ;;  %v1720_v1 = vld [vmem:[#allocation2 + $0x98] sm:$0x1]  ;;  %v5075_v5 = vrot.slane %v1718_v56, 9 }
 0x1fb   : > { %v3013_v19 = vpop.permute.xlu0 %3012  ;;  %v1870_v18 = vrot.slane %v1720_v1, 5  ;;  %v1876_v24 = vrot.slane %v1874_v13, 4 }
 0x1fc   : > { %3095 = vst.msk [vmem:[#allocation3 + $0x38] sm:$0xf] %vm3080_vm8, %v3013_v19  ;;  %v3015_v23 = vpop.permute.xlu1 %3014  ;;  %v1868_v49 = vsel %vm5979_vm14, %v5075_v5, %v1867_v61  ;;  %v2573_v61 = vrot.slane %v2571_v45, 5 }
 0x1fd   : > { %3218 = vrot.lane.b32.xlu0 %v3134_v15, %s5458_s12  ;;  %3096 = vst.msk [vmem:[#allocation3 + $0x3c] sm:$0xf] %vm3080_vm8, %v3015_v23  ;;  %v4047_v15 = vsel %vm5979_vm14, %v4045_v10, %v4046_v59  ;;  %v1871_v8 = vsel %vm5979_vm14, %v1869_v16, %v1870_v18  ;;  %v2049_v10 = vld [vmem:[#allocation2 + $0xac] sm:$0xf] }
 0x1fe   : > { %3220 = vrot.lane.b32.xlu1 %v3135_v22, %s5458_s12  ;;  %v5076_v22 = vrot.slane %v1721_v6, 9 }
 0x1ff   : > { %v3203_v29 = vpop.permute.xlu0 %3202 }
 0x200   : > { %3287 = vst.msk [vmem:[#allocation3 + $0x30] sm:$0xf] %vm3274_vm12, %v3203_v29  ;;  %v3205_v25 = vpop.permute.xlu1 %3204  ;;  %v2561_v29 = vshll.u32 %v2252_v17, 16  ;;  %v1875_v31 = vsel %vm5979_vm14, %v5076_v22, %v1874_v13  ;;  %v2812_v13 = vld [vmem:[#allocation2 + $0x9c] sm:$0xe] }
 0x201   : > { %3222 = vrot.lane.b32.xlu0 %v3136_v26, %s5458_s12  ;;  %3288 = vst.msk [vmem:[#allocation3 + $0x34] sm:$0xf] %vm3274_vm12, %v3205_v25  ;;  %v1877_v26 = vrot.slane %v1723_v14, 5  ;;  %v2557_v25 = vrot.slane %v2555_v12, 5  ;;  %v2816_v14 = vld [vmem:[#allocation2 + $0xac] sm:$0xf] }
 0x202   : > { %3224 = vrot.lane.b32.xlu1 %v3137_v11, %s5458_s12  ;;  %v2565_v11 = vshrl.u32 %v2252_v17, 16  ;;  %v2563_v34 = vrot.slane %v2561_v29, 5  ;;  %v2814_v22 = vld [vmem:[#allocation2 + $0xa4] sm:$0x1]  ;;  %v2817_v29 = vld [vmem:[#allocation2 + $0xb0] sm:$0x1] }
 0x203   : > { %v3207_v33 = vpop.permute.xlu0 %3206 }
 0x204   : > { %3289 = vst.msk [vmem:[#allocation3 + $0x38] sm:$0xf] %vm3274_vm12, %v3207_v33  ;;  %v3209_v37 = vpop.permute.xlu1 %3208  ;;  %v1878_v33 = vsel %vm5979_vm14, %v1876_v24, %v1877_v26  ;;  %v3343_v24 = vld [vmem:[#allocation2 + $0xa8] sm:$0xf] }
 0x205   : > { %3779 = vrot.lane.b32.xlu0 %v3608_v32, %s5459_s13  ;;  %3290 = vst.msk [vmem:[#allocation3 + $0x3c] sm:$0xf] %vm3274_vm12, %v3209_v37  ;;  %v2579_v32 = vshll.u32 %v2254_v20, 16 }
 0x206   : > { %3781 = vrot.lane.b32.xlu1 %v3618_v35, %s5459_s13  ;;  %v2567_v35 = vrot.slane %v2565_v11, 4 }
 0x207   : > { %v3764_v42 = vpop.permute.xlu0 %3763 }
 0x208   : > { %3848 = vst.msk [vmem:[#allocation3 + $0x30] sm:$0xf] %vm3835_vm13, %v3764_v42  ;;  %v3766_v48 = vpop.permute.xlu1 %3765  ;;  %v2581_v42 = vrot.slane %v2579_v32, 5  ;;  %v2568_v44 = vor.u32 %v2567_v35, %v2563_v34 }
 0x209   : > { %3783 = vrot.lane.b32.xlu0 %v3632_v40, %s5459_s13  ;;  %3849 = vst.msk [vmem:[#allocation3 + $0x34] sm:$0xf] %vm3835_vm13, %v3766_v48  ;;  %v2558_v40 = vor.u32 %v2557_v25, %v2554_v3  ;;  %v2591_v48 = vrot.slane %v2589_v57, 4  ;;  %v3644_v3 = vshrl.u32 %v3343_v24, 16  ;;  %v3647_v25 = vshll.u32 %v3343_v24, 16 }
 0x20a   : > { %3785 = vrot.lane.b32.xlu1 %v3642_v43, %s5459_s13  ;;  %v2047_v43 = vld [vmem:[#allocation2 + $0xa0] sm:$0xf]  ;;  %v2582_v56 = vor.u32 %v2581_v42, %v2578_v41  ;;  %v2569_v59 = vrot.slane %v2568_v44, 4 }
 0x20b   : > { %v3768_v54 = vpop.permute.xlu0 %3767  ;;  %v2592_v62 = vor.u32 %v2591_v48, %v2587_v46  ;;  %v3646_v38 = vrot.slane %v3644_v3, 4 }
 0x20c   : > { %3850 = vst.msk [vmem:[#allocation3 + $0x38] sm:$0xf] %vm3835_vm13, %v3768_v54  ;;  %v3770_v0 = vpop.permute.xlu1 %3769  ;;  %v2559_v54 = vrot.slane %v2558_v40, 4  ;;  %v2583_v6 = vrot.slane %v2582_v56, 4  ;;  %v2574_v4 = vsel %vm5562_vm9, %v2569_v59, %v2573_v61 }
 0x20d   : > { %4116 = vrot.lane.b32.xlu0 %v4037_v52, %s5460_s16  ;;  %3851 = vst.msk [vmem:[#allocation3 + $0x3c] sm:$0xf] %vm3835_vm13, %v3770_v0  ;;  %v2256_v52 = vld [vmem:[#allocation2 + $0xb0] sm:$0x1] }
 0x20e   : > { %4118 = vrot.lane.b32.xlu1 %v4040_v58, %s5460_s16  ;;  %v2595_v0 = vshll.u32 %v2256_v52, 16  ;;  %v2564_v5 = vsel %vm5562_vm9, %v2559_v54, %v2563_v34  ;;  %v2588_v17 = vsel %vm5562_vm9, %v2583_v6, %v2587_v46 }
 0x20f   : > { %v4101_v7 = vpop.permute.xlu0 %4100 }
 0x210   : > { %4185 = vst.msk [vmem:[#allocation3 + $0x30] sm:$0xf] %vm4172_vm15, %v4101_v7  ;;  %v4103_v19 = vpop.permute.xlu1 %4102  ;;  %v2597_v16 = vrot.slane %v2595_v0, 5 }
 0x211   : > { %4120 = vrot.lane.b32.xlu0 %v4044_v9, %s5460_s16  ;;  %4186 = vst.msk [vmem:[#allocation3 + $0x34] sm:$0xf] %vm4172_vm15, %v4103_v19  ;;  %v2813_v9 = vld [vmem:[#allocation2 + $0xa0] sm:$0xf] }
 0x212   : > { %4122 = vrot.lane.b32.xlu1 %v4047_v15, %s5460_s16  ;;  %v2593_v15 = vrot.slane %v2592_v62, 4  ;;  %v2958_v18 = vrot.slane %v2813_v9, 5  ;;  %v3140_v9 = vld [vmem:[#allocation2 + $0xb4] sm:$0xf] }
 0x213   : > { %v4105_v23 = vpop.permute.xlu0 %4104 }
 0x214   : > { %4187 = vst.msk [vmem:[#allocation3 + $0x38] sm:$0xf] %vm4172_vm15, %v4105_v23  ;;  %v4107_v30 = vpop.permute.xlu1 %4106  ;;  %v2965_v23 = vrot.slane %v2816_v14, 5  ;;  %v2598_v26 = vsel %vm5562_vm9, %v2593_v15, %v2597_v16  ;;  %v2960_v20 = vrot.slane %v2958_v18, 4  ;;  %v3905_v14 = vld [vmem:[#allocation2 + $0xac] sm:$0xf] }
 0x215   : > { %1941 = vrot.lane.b32.xlu0 %v1868_v49, %s5454_s8  ;;  %4188 = vst.msk [vmem:[#allocation3 + $0x3c] sm:$0xf] %vm4172_vm15, %v4107_v30  ;;  %v5091_v49 = vrot.slane %v2812_v13, 9  ;;  %v5092_v30 = vrot.slane %v2815_v63, 9  ;;  %v3141_v13 = vld [vmem:[#allocation2 + $0xb8] sm:$0xf] }
 0x216   : > { %1943 = vrot.lane.b32.xlu1 %v1871_v8, %s5454_s8  ;;  %v2961_v8 = vrot.slane %v2814_v22, 5  ;;  %v2967_v32 = vrot.slane %v2965_v23, 4  ;;  %v3904_v63 = vld [vmem:[#allocation2 + $0xa8] sm:$0xe] }
 0x217   : > { %v1926_v2 = vpop.permute.xlu0 %1925  ;;  %v2959_v60 = vsel %vm5979_vm14, %v5091_v49, %v2958_v18 }
 0x218   : > { %2006 = vst.msk [vmem:[#allocation3 + $0x40] sm:$0xf] %vm1989_vm3, %v1926_v2  ;;  %v1928_v21 = vpop.permute.xlu1 %1927  ;;  %v5430_v37 = vld [vmem:[#allocation3 + $0x30] sm:$0xff]   ;;  %v2968_v2 = vrot.slane %v2817_v29, 5  ;;  %v2962_v34 = vsel %vm5979_vm14, %v2960_v20, %v2961_v8  ;;  %v3906_v20 = vld [vmem:[#allocation2 + $0xb0] sm:$0x1] }
 0x219   : > { %1945 = vrot.lane.b32.xlu0 %v1875_v31, %s5454_s8  ;;  %2007 = vst.msk [vmem:[#allocation3 + $0x44] sm:$0xf] %vm1989_vm3, %v1928_v21  ;;  %5370 = vmatprep.mubr.msk.bf16.mxu0 %vm4353_vm2, %v5430_v37  ;;  %v3344_v31 = vld [vmem:[#allocation2 + $0xac] sm:$0xf]  ;;  %v2966_v21 = vsel %vm5979_vm14, %v5092_v30, %v2965_v23  ;;  %v3347_v37 = vld [vmem:[#allocation2 + $0xb8] sm:$0xf] }
 0x21a   : > { %1947 = vrot.lane.b32.xlu1 %v1878_v33, %s5454_s8  ;;  %v3346_v33 = vld [vmem:[#allocation2 + $0xb4] sm:$0xf]  ;;  %v3653_v35 = vshll.u32 %v3344_v31, 16  ;;  %v3657_v36 = vshrl.u32 %v3344_v31, 16  ;;  %v3677_v45 = vshll.u32 %v3347_v37, 16  ;;  %v3681_v46 = vshrl.u32 %v3347_v37, 16 }
 0x21b   : > { %v1930_v28 = vpop.permute.xlu0 %1929  ;;  %v3668_v40 = vshrl.u32 %v3346_v33, 16  ;;  %v3671_v41 = vshll.u32 %v3346_v33, 16  ;;  %v3908_v29 = vld [vmem:[#allocation2 + $0xb8] sm:$0xf]  ;;  %v5107_v30 = vrot.slane %v3904_v63, 9  ;;  %v4053_v3 = vrot.slane %v3906_v20, 5 }
 0x21c   : > { %2008 = vst.msk [vmem:[#allocation3 + $0x48] sm:$0xf] %vm1989_vm3, %v1930_v28  ;;  %v1932_v50 = vpop.permute.xlu1 %1931  ;;  %v5431_v51 = vld [vmem:[#allocation3 + $0x38] sm:$0xff]   ;;  %v2969_v28 = vsel %vm5979_vm14, %v2967_v32, %v2968_v2  ;;  %v3659_v44 = vrot.slane %v3657_v36, 4  ;;  %v3679_v61 = vrot.slane %v3677_v45, 5  ;;  %v3683_v62 = vrot.slane %v3681_v46, 4 }
 0x21d   : > { %2134 = vrot.lane.b32.xlu0 %v2046_v39, %s5455_s9  ;;  %2009 = vst.msk [vmem:[#allocation3 + $0x4c] sm:$0xf] %vm1989_vm3, %v1932_v50  ;;  %5371 = vmatmul.mubr.msk.bf16.gmra.mxu0 %vm4353_vm2, %v5431_v51  ;;  %v3649_v39 = vrot.slane %v3647_v25, 5  ;;  %v3345_v50 = vld [vmem:[#allocation2 + $0xb0] sm:$0x1]  ;;  %v3673_v54 = vrot.slane %v3671_v41, 5 }
 0x21e   : > { %2136 = vrot.lane.b32.xlu1 %v2047_v43, %s5455_s9  ;;  %v3655_v43 = vrot.slane %v3653_v35, 5  ;;  %v3138_v51 = vld [vmem:[#allocation2 + $0xa8] sm:$0xf]  ;;  %v3663_v59 = vshll.u32 %v3345_v50, 16  ;;  %v3684_v16 = vor.u32 %v3683_v62, %v3679_v61  ;;  %v3907_v25 = vld [vmem:[#allocation2 + $0xb4] sm:$0xe] }
 0x21f   : > { %v2119_v58 = vpop.permute.xlu0 %2118  ;;  %v3650_v52 = vor.u32 %v3649_v39, %v3646_v38  ;;  %v4057_v32 = vrot.slane %v3908_v29, 5  ;;  %v3909_v33 = vld [vmem:[#allocation2 + $0xbc] sm:$0x1]  ;;  %v5108_v36 = vrot.slane %v3907_v25, 9  ;;  %v1724_v38 = vld [vmem:[#allocation2 + $0xa8] sm:$0xe] }
 0x220   : > { %2199 = vst.msk [vmem:[#allocation3 + $0x40] sm:$0xf] %vm2182_vm4, %v2119_v58  ;;  %v2121_v1 = vpop.permute.xlu1 %2120  ;;  %v3139_v58 = vld [vmem:[#allocation2 + $0xac] sm:$0xf]  ;;  %v3665_v15 = vrot.slane %v3663_v59, 5  ;;  %v3685_v24 = vrot.slane %v3684_v16, 4 }
 0x221   : > { %2138 = vrot.lane.b32.xlu0 %v2048_v53, %s5455_s9  ;;  %2200 = vst.msk [vmem:[#allocation3 + $0x44] sm:$0xf] %vm2182_vm4, %v2121_v1  ;;  %v3670_v53 = vrot.slane %v3668_v40, 4  ;;  %v3348_v1 = vld [vmem:[#allocation2 + $0xbc] sm:$0x1]  ;;  %v4059_v40 = vrot.slane %v4057_v32, 4 }
 0x222   : > { %2140 = vrot.lane.b32.xlu1 %v2049_v10, %s5455_s9  ;;  %v3660_v10 = vor.u32 %v3659_v44, %v3655_v43  ;;  %v3687_v18 = vshll.u32 %v3348_v1, 16  ;;  %v4060_v41 = vrot.slane %v3909_v33, 5  ;;  %v1726_v45 = vld [vmem:[#allocation2 + $0xb0] sm:$0x1]  ;;  %v5077_v50 = vrot.slane %v1724_v38, 9 }
 0x223   : > { %v2123_v7 = vpop.permute.xlu0 %2122  ;;  %v3674_v6 = vor.u32 %v3673_v54, %v3670_v53  ;;  %v1729_v62 = vld [vmem:[#allocation2 + $0xbc] sm:$0x1] }
 0x224   : > { %2201 = vst.msk [vmem:[#allocation3 + $0x48] sm:$0xf] %vm2182_vm4, %v2123_v7  ;;  %v2125_v19 = vpop.permute.xlu1 %2124 }
 0x225   : > { %2695 = vrot.lane.b32.xlu0 %v2564_v5, %s5456_s10  ;;  %2202 = vst.msk [vmem:[#allocation3 + $0x4c] sm:$0xf] %vm2182_vm4, %v2125_v19  ;;  %v3651_v5 = vrot.slane %v3650_v52, 4 }
 0x226   : > { %2697 = vrot.lane.b32.xlu1 %v2574_v4, %s5456_s10  ;;  %v3661_v4 = vrot.slane %v3660_v10, 4  ;;  %v4061_v10 = vsel %vm5979_vm14, %v4059_v40, %v4060_v41 }
 0x227   : > { %v2680_v12 = vpop.permute.xlu0 %2679  ;;  %v3656_v22 = vsel %vm5562_vm9, %v3651_v5, %v3655_v43  ;;  %v2258_v5 = vld [vmem:[#allocation2 + $0xb8] sm:$0xf] }
 0x228   : > { %2760 = vst.msk [vmem:[#allocation3 + $0x40] sm:$0xf] %vm2743_vm6, %v2680_v12  ;;  %v2682_v11 = vpop.permute.xlu1 %2681  ;;  %v4050_v12 = vrot.slane %v3905_v14, 5  ;;  %v3666_v23 = vsel %vm5562_vm9, %v3661_v4, %v3665_v15  ;;  %v2260_v14 = vld [vmem:[#allocation2 + $0xc0] sm:$0xf] }
 0x229   : > { %2699 = vrot.lane.b32.xlu0 %v2588_v17, %s5456_s10  ;;  %2761 = vst.msk [vmem:[#allocation3 + $0x44] sm:$0xf] %vm2743_vm6, %v2682_v11  ;;  %v3675_v17 = vrot.slane %v3674_v6, 4  ;;  %v2627_v20 = vshll.u32 %v2260_v14, 16 }
 0x22a   : > { %2701 = vrot.lane.b32.xlu1 %v2598_v26, %s5456_s10  ;;  %v3689_v26 = vrot.slane %v3687_v18, 5  ;;  %v4051_v35 = vsel %vm5979_vm14, %v5107_v30, %v4050_v12  ;;  %v1891_v18 = vrot.slane %v1729_v62, 5  ;;  %v2818_v62 = vld [vmem:[#allocation2 + $0xb4] sm:$0xe] }
 0x22b   : > { %v2684_v27 = vpop.permute.xlu0 %2683  ;;  %v3680_v11 = vsel %vm5562_vm9, %v3675_v17, %v3679_v61  ;;  %v1884_v61 = vrot.slane %v1726_v45, 5  ;;  %v2613_v17 = vshrl.u32 %v2258_v5, 16 }
 0x22c   : > { %2762 = vst.msk [vmem:[#allocation3 + $0x48] sm:$0xf] %vm2743_vm6, %v2684_v27  ;;  %v2686_v57 = vpop.permute.xlu1 %2685  ;;  %v3690_v27 = vsel %vm5562_vm9, %v3685_v24, %v3689_v26  ;;  %v2624_v26 = vshrl.u32 %v2260_v14, 16 }
 0x22d   : > { %3032 = vrot.lane.b32.xlu0 %v2959_v60, %s5457_s11  ;;  %2763 = vst.msk [vmem:[#allocation3 + $0x4c] sm:$0xf] %vm2743_vm6, %v2686_v57  ;;  %v4052_v60 = vrot.slane %v4050_v12, 4  ;;  %v2261_v12 = vld [vmem:[#allocation2 + $0xc4] sm:$0xf]  ;;  %v2615_v30 = vrot.slane %v2613_v17, 4 }
 0x22e   : > { %3034 = vrot.lane.b32.xlu1 %v2962_v34, %s5457_s11  ;;  %v1725_v34 = vld [vmem:[#allocation2 + $0xac] sm:$0xf]  ;;  %v2626_v33 = vrot.slane %v2624_v26, 4  ;;  %v3350_v26 = vld [vmem:[#allocation2 + $0xc4] sm:$0xf] }
 0x22f   : > { %v3017_v42 = vpop.permute.xlu0 %3016  ;;  %v4054_v37 = vsel %vm5979_vm14, %v4052_v60, %v4053_v3  ;;  %v2637_v60 = vshrl.u32 %v2261_v12, 16 }
 0x230   : > { %3097 = vst.msk [vmem:[#allocation3 + $0x40] sm:$0xf] %vm3080_vm8, %v3017_v42  ;;  %v3019_v48 = vpop.permute.xlu1 %3018  ;;  %v1881_v42 = vrot.slane %v1725_v34, 5  ;;  %v2629_v34 = vrot.slane %v2627_v20, 5 }
 0x231   : > { %3036 = vrot.lane.b32.xlu0 %v2966_v21, %s5457_s11  ;;  %3098 = vst.msk [vmem:[#allocation3 + $0x44] sm:$0xf] %vm3080_vm8, %v3019_v48  ;;  %v4058_v48 = vsel %vm5979_vm14, %v5108_v36, %v4057_v32  ;;  %v2050_v32 = vld [vmem:[#allocation2 + $0xb4] sm:$0xf]  ;;  %v2051_v36 = vld [vmem:[#allocation2 + $0xb8] sm:$0xf] }
 0x232   : > { %3038 = vrot.lane.b32.xlu1 %v2969_v28, %s5457_s11  ;;  %v1728_v28 = vld [vmem:[#allocation2 + $0xb8] sm:$0xf]  ;;  %v1883_v59 = vrot.slane %v1881_v42, 4  ;;  %v2630_v45 = vor.u32 %v2629_v34, %v2626_v33  ;;  %v3353_v33 = vld [vmem:[#allocation2 + $0xd0] sm:$0xf] }
 0x233   : > { %v3021_v56 = vpop.permute.xlu0 %3020  ;;  %v1888_v54 = vrot.slane %v1728_v28, 5  ;;  %v2052_v28 = vld [vmem:[#allocation2 + $0xc0] sm:$0xf] }
 0x234   : > { %3099 = vst.msk [vmem:[#allocation3 + $0x48] sm:$0xf] %vm3080_vm8, %v3021_v56  ;;  %v3023_v0 = vpop.permute.xlu1 %3022  ;;  %v2257_v56 = vld [vmem:[#allocation2 + $0xb4] sm:$0xf] }
 0x235   : > { %3226 = vrot.lane.b32.xlu0 %v3138_v51, %s5458_s12  ;;  %3100 = vst.msk [vmem:[#allocation3 + $0x4c] sm:$0xf] %vm3080_vm8, %v3023_v0  ;;  %v1727_v51 = vld [vmem:[#allocation2 + $0xb4] sm:$0xe]  ;;  %v2603_v4 = vshll.u32 %v2257_v56, 16  ;;  %v1890_v16 = vrot.slane %v1888_v54, 4 }
 0x236   : > { %3228 = vrot.lane.b32.xlu1 %v3139_v58, %s5458_s12 }
 0x237   : > { %v3211_v7 = vpop.permute.xlu0 %3210  ;;  %v2605_v24 = vrot.slane %v2603_v4, 5  ;;  %v1892_v29 = vsel %vm5979_vm14, %v1890_v16, %v1891_v18  ;;  %v2820_v4 = vld [vmem:[#allocation2 + $0xbc] sm:$0x1]  ;;  %v5093_v16 = vrot.slane %v2818_v62, 9  ;;  %v2821_v18 = vld [vmem:[#allocation2 + $0xc0] sm:$0xe] }
 0x238   : > { %3291 = vst.msk [vmem:[#allocation3 + $0x40] sm:$0xf] %vm3274_vm12, %v3211_v7  ;;  %v3213_v19 = vpop.permute.xlu1 %3212  ;;  %v1882_v7 = vsel %vm5979_vm14, %v5077_v50, %v1881_v42  ;;  %v2262_v42 = vld [vmem:[#allocation2 + $0xc8] sm:$0x1]  ;;  %v3144_v62 = vld [vmem:[#allocation2 + $0xcc] sm:$0xf] }
 0x239   : > { %3230 = vrot.lane.b32.xlu0 %v3140_v9, %s5458_s12  ;;  %3292 = vst.msk [vmem:[#allocation3 + $0x44] sm:$0xf] %vm3274_vm12, %v3213_v19  ;;  %v5078_v9 = vrot.slane %v1727_v51, 9  ;;  %v1885_v19 = vsel %vm5979_vm14, %v1883_v59, %v1884_v61  ;;  %v2631_v59 = vrot.slane %v2630_v45, 4  ;;  %v3142_v45 = vld [vmem:[#allocation2 + $0xc0] sm:$0xf] }
 0x23a   : > { %3232 = vrot.lane.b32.xlu1 %v3141_v13, %s5458_s12  ;;  %v2600_v13 = vshrl.u32 %v2257_v56, 16 }
 0x23b   : > { %v3215_v49 = vpop.permute.xlu0 %3214  ;;  %v1889_v63 = vsel %vm5979_vm14, %v5078_v9, %v1888_v54  ;;  %v2643_v54 = vshll.u32 %v2262_v42, 16  ;;  %v3729_v42 = vshrl.u32 %v3353_v33, 16 }
 0x23c   : > { %3293 = vst.msk [vmem:[#allocation3 + $0x48] sm:$0xf] %vm3274_vm12, %v3215_v49  ;;  %v3217_v8 = vpop.permute.xlu1 %3216 }
 0x23d   : > { %3787 = vrot.lane.b32.xlu0 %v3656_v22, %s5459_s13  ;;  %3294 = vst.msk [vmem:[#allocation3 + $0x4c] sm:$0xf] %vm3274_vm12, %v3217_v8  ;;  %v2609_v22 = vshll.u32 %v2258_v5, 16  ;;  %v2645_v5 = vrot.slane %v2643_v54, 5 }
 0x23e   : > { %3789 = vrot.lane.b32.xlu1 %v3666_v23, %s5459_s13  ;;  %v2602_v23 = vrot.slane %v2600_v13, 4 }
 0x23f   : > { %v3772_v31 = vpop.permute.xlu0 %3771 }
 0x240   : > { %3852 = vst.msk [vmem:[#allocation3 + $0x40] sm:$0xf] %vm3835_vm13, %v3772_v31  ;;  %v3774_v2 = vpop.permute.xlu1 %3773  ;;  %v2633_v31 = vshll.u32 %v2261_v12, 16  ;;  %v2823_v12 = vld [vmem:[#allocation2 + $0xc8] sm:$0x1] }
 0x241   : > { %3791 = vrot.lane.b32.xlu0 %v3680_v11, %s5459_s13  ;;  %3853 = vst.msk [vmem:[#allocation3 + $0x44] sm:$0xf] %vm3835_vm13, %v3774_v2  ;;  %v6686_v57 = vpop.f32.mrf.mxu0  ;;  %v2611_v11 = vrot.slane %v2609_v22, 5  ;;  %v2606_v2 = vor.u32 %v2605_v24, %v2602_v23  ;;  %v3349_v22 = vld [vmem:[#allocation2 + $0xc0] sm:$0xf]  ;;  %v5094_v24 = vrot.slane %v2821_v18, 9 }
 0x242   : > { %3793 = vrot.lane.b32.xlu1 %v3690_v27, %s5459_s13  ;;  %v5218_v39 = vpack.c.bf16 %v6686_v57, %v6686_v57  ;;  %v2259_v27 = vld [vmem:[#allocation2 + $0xbc] sm:$0x1]  ;;  %v2635_v38 = vrot.slane %v2633_v31, 5  ;;  %v2982_v31 = vrot.slane %v2823_v12, 5 }
 0x243   : > { %v3776_v21 = vpop.permute.xlu0 %3775  ;;  %v6693_v44 = vpop.f32.mrf.mxu0 }
 0x244   : > { %3854 = vst.msk [vmem:[#allocation3 + $0x48] sm:$0xf] %vm3835_vm13, %v3776_v21  ;;  %v3778_v43 = vpop.permute.xlu1 %3777  ;;  %v5216_v46 = vpack.c.bf16 %v6693_v44, %v6693_v44  ;;  %v2616_v21 = vor.u32 %v2615_v30, %v2611_v11 }
 0x245   : > { %4124 = vrot.lane.b32.xlu0 %v4051_v35, %s5460_s16  ;;  %4903 = vst.msk [vmem:[%s6683_s15 + $0x8] sm:$0xf] %vm411_vm0, %v5218_v39  ;;  %v6704_v52 = vpop.f32.mrf.mxu0  ;;  %v2639_v39 = vrot.slane %v2637_v60, 4  ;;  %v3352_v60 = vld [vmem:[#allocation2 + $0xcc] sm:$0xf] }
 0x246   : > { %3855 = vst.msk [vmem:[#allocation3 + $0x4c] sm:$0xf] %vm3835_vm13, %v3778_v43  ;;  %4126 = vrot.lane.b32.xlu1 %v4054_v37, %s5460_s16  ;;  %v5219_v58 = vpack.c.bf16 %v6704_v52, %v6704_v52  ;;  %v2619_v37 = vshll.u32 %v2259_v27, 16  ;;  %v2607_v43 = vrot.slane %v2606_v2, 4  ;;  %v2617_v50 = vrot.slane %v2616_v21, 4 }
 0x247   : > { %v4109_v53 = vpop.permute.xlu0 %4108  ;;  %4901 = vst.msk [vmem:[%s6683_s15] sm:$0xf] %vm411_vm0, %v5216_v46  ;;  %v6713_v1 = vpop.f32.mrf.mxu0  ;;  %v3705_v27 = vshrl.u32 %v3350_v26, 16  ;;  %v3719_v21 = vshll.u32 %v3352_v60, 16 }
 0x248   : > { %4189 = vst.msk [vmem:[#allocation3 + $0x40] sm:$0xf] %vm4172_vm15, %v4109_v53  ;;  %v4111_v0 = vpop.permute.xlu1 %4110  ;;  %v5217_v6 = vpack.c.bf16 %v6713_v1, %v6713_v1  ;;  %v2621_v51 = vrot.slane %v2619_v37, 5  ;;  %v2640_v53 = vor.u32 %v2639_v39, %v2635_v38 }
 0x249   : > { %4128 = vrot.lane.b32.xlu0 %v4058_v48, %s5460_s16  ;;  %4904 = vst.msk [vmem:[%s6683_s15 + $0xc] sm:$0xf] %vm411_vm0, %v5219_v58  ;;  %v2053_v48 = vld [vmem:[#allocation2 + $0xc4] sm:$0xf]  ;;  %v2819_v58 = vld [vmem:[#allocation2 + $0xb8] sm:$0xf] }
 0x24a   : > { %4190 = vst.msk [vmem:[#allocation3 + $0x44] sm:$0xf] %vm4172_vm15, %v4111_v0  ;;  %4130 = vrot.lane.b32.xlu1 %v4061_v10, %s5460_s16  ;;  %v2612_v10 = vsel %vm5562_vm9, %v2607_v43, %v2611_v11  ;;  %v2622_v0 = vsel %vm5562_vm9, %v2617_v50, %v2621_v51  ;;  %v2641_v9 = vrot.slane %v2640_v53, 4  ;;  %v3351_v43 = vld [vmem:[#allocation2 + $0xc8] sm:$0x1]  ;;  %v3721_v50 = vrot.slane %v3719_v21, 5 }
 0x24b   : > { %v4113_v15 = vpop.permute.xlu0 %4112  ;;  %4902 = vst.msk [vmem:[%s6683_s15 + $0x4] sm:$0xf] %vm411_vm0, %v5217_v6  ;;  %v2972_v6 = vrot.slane %v2819_v58, 5  ;;  %v3143_v53 = vld [vmem:[#allocation2 + $0xc4] sm:$0xf] }
 0x24c   : > { %4191 = vst.msk [vmem:[#allocation3 + $0x48] sm:$0xf] %vm4172_vm15, %v4113_v15  ;;  %v4115_v49 = vpop.permute.xlu1 %4114  ;;  %v2636_v15 = vsel %vm5562_vm9, %v2631_v59, %v2635_v38  ;;  %v2646_v17 = vsel %vm5562_vm9, %v2641_v9, %v2645_v5 }
 0x24d   : > { %1949 = vrot.lane.b32.xlu0 %v1882_v7, %s5454_s8  ;;  %4192 = vst.msk [vmem:[#allocation3 + $0x4c] sm:$0xf] %vm4172_vm15, %v4115_v49  ;;  %v2822_v7 = vld [vmem:[#allocation2 + $0xc4] sm:$0xf]  ;;  %v2974_v49 = vrot.slane %v2972_v6, 4  ;;  %v2973_v20 = vsel %vm5979_vm14, %v5093_v16, %v2972_v6 }
 0x24e   : > { %1951 = vrot.lane.b32.xlu1 %v1885_v19, %s5454_s8  ;;  %v2979_v19 = vrot.slane %v2822_v7, 5  ;;  %v3145_v6 = vld [vmem:[#allocation2 + $0xd0] sm:$0xf]  ;;  %v3911_v16 = vld [vmem:[#allocation2 + $0xc4] sm:$0xf] }
 0x24f   : > { %v1934_v8 = vpop.permute.xlu0 %1933 }
 0x250   : > { %2010 = vst.msk [vmem:[#allocation3 + $0x50] sm:$0xf] %vm1989_vm3, %v1934_v8  ;;  %v1936_v3 = vpop.permute.xlu1 %1935  ;;  %v3692_v8 = vshrl.u32 %v3349_v22, 16  ;;  %v2981_v30 = vrot.slane %v2979_v19, 4  ;;  %v2980_v2 = vsel %vm5979_vm14, %v5094_v24, %v2979_v19 }
 0x251   : > { %1953 = vrot.lane.b32.xlu0 %v1889_v63, %s5454_s8  ;;  %v5432_v25 = vld [vmem:[#allocation3 + $0x40] sm:$0xff]   ;;  %2011 = vst.msk [vmem:[#allocation3 + $0x54] sm:$0xf] %vm1989_vm3, %v1936_v3  ;;  %v2975_v63 = vrot.slane %v2820_v4, 5 }
 0x252   : > { %1955 = vrot.lane.b32.xlu1 %v1892_v29, %s5454_s8  ;;  %5374 = vmatprep.mubr.msk.bf16.mxu1 %vm4353_vm2, %v5432_v25  ;;  %v3695_v29 = vshll.u32 %v3349_v22, 16  ;;  %v3701_v25 = vshll.u32 %v3350_v26, 16  ;;  %v3694_v34 = vrot.slane %v3692_v8, 4  ;;  %v2983_v38 = vsel %vm5979_vm14, %v2981_v30, %v2982_v31 }
 0x253   : > { %v1938_v35 = vpop.permute.xlu0 %1937  ;;  %v2976_v3 = vsel %vm5979_vm14, %v2974_v49, %v2975_v63  ;;  %v3910_v49 = vld [vmem:[#allocation2 + $0xc0] sm:$0xe]  ;;  %v4064_v63 = vrot.slane %v3911_v16, 5 }
 0x254   : > { %2012 = vst.msk [vmem:[#allocation3 + $0x58] sm:$0xf] %vm1989_vm3, %v1938_v35  ;;  %v1940_v40 = vpop.permute.xlu1 %1939  ;;  %v5433_v41 = vld [vmem:[#allocation3 + $0x48] sm:$0xff]   ;;  %v3697_v35 = vrot.slane %v3695_v29, 5  ;;  %v3703_v39 = vrot.slane %v3701_v25, 5 }
 0x255   : > { %2142 = vrot.lane.b32.xlu0 %v2050_v32, %s5455_s9  ;;  %2013 = vst.msk [vmem:[#allocation3 + $0x5c] sm:$0xf] %vm1989_vm3, %v1940_v40  ;;  %5375 = vmatmul.mubr.msk.bf16.vlgmr.msra.gmra.mxu1 %vm4353_vm2, %v5433_v41  ;;  %v3707_v40 = vrot.slane %v3705_v27, 4  ;;  %v3725_v41 = vshll.u32 %v3353_v33, 16  ;;  %v3912_v29 = vld [vmem:[#allocation2 + $0xc8] sm:$0x1] }
 0x256   : > { %2144 = vrot.lane.b32.xlu1 %v2051_v36, %s5455_s9  ;;  %v3716_v36 = vshrl.u32 %v3352_v60, 16  ;;  %v5109_v60 = vrot.slane %v3910_v49, 9  ;;  %v4066_v27 = vrot.slane %v4064_v63, 4 }
 0x257   : > { %v2127_v46 = vpop.permute.xlu0 %2126  ;;  %v3708_v54 = vor.u32 %v3707_v40, %v3703_v39  ;;  %v3727_v58 = vrot.slane %v3725_v41, 5 }
 0x258   : > { %2203 = vst.msk [vmem:[#allocation3 + $0x50] sm:$0xf] %vm2182_vm4, %v2127_v46  ;;  %v2129_v56 = vpop.permute.xlu1 %2128  ;;  %v3698_v46 = vor.u32 %v3697_v35, %v3694_v34  ;;  %v4067_v34 = vrot.slane %v3912_v29, 5 }
 0x259   : > { %2146 = vrot.lane.b32.xlu0 %v2052_v28, %s5455_s9  ;;  %2204 = vst.msk [vmem:[#allocation3 + $0x54] sm:$0xf] %vm2182_vm4, %v2129_v56  ;;  %v3711_v56 = vshll.u32 %v3351_v43, 16  ;;  %v3709_v7 = vrot.slane %v3708_v54, 4 }
 0x25a   : > { %2148 = vrot.lane.b32.xlu1 %v2053_v48, %s5455_s9  ;;  %v3718_v48 = vrot.slane %v3716_v36, 4  ;;  %v4068_v41 = vsel %vm5979_vm14, %v4066_v27, %v4067_v34 }
 0x25b   : > { %v2131_v61 = vpop.permute.xlu0 %2130 }
 0x25c   : > { %2205 = vst.msk [vmem:[#allocation3 + $0x58] sm:$0xf] %vm2182_vm4, %v2131_v61  ;;  %v2133_v13 = vpop.permute.xlu1 %2132  ;;  %v3354_v61 = vld [vmem:[#allocation2 + $0xd4] sm:$0x1]  ;;  %v3722_v9 = vor.u32 %v3721_v50, %v3718_v48 }
 0x25d   : > { %2703 = vrot.lane.b32.xlu0 %v2612_v10, %s5456_s10  ;;  %2206 = vst.msk [vmem:[#allocation3 + $0x5c] sm:$0xf] %vm2182_vm4, %v2133_v13  ;;  %v3731_v10 = vrot.slane %v3729_v42, 4  ;;  %v3713_v13 = vrot.slane %v3711_v56, 5 }
 0x25e   : > { %2705 = vrot.lane.b32.xlu1 %v2622_v0, %s5456_s10  ;;  %v3699_v0 = vrot.slane %v3698_v46, 4  ;;  %v3723_v19 = vrot.slane %v3722_v9, 4 }
 0x25f   : > { %v2688_v14 = vpop.permute.xlu0 %2687  ;;  %v3732_v4 = vor.u32 %v3731_v10, %v3727_v58 }
 0x260   : > { %2764 = vst.msk [vmem:[#allocation3 + $0x50] sm:$0xf] %vm2743_vm6, %v2688_v14  ;;  %v2690_v23 = vpop.permute.xlu1 %2689  ;;  %v3704_v14 = vsel %vm5562_vm9, %v3699_v0, %v3703_v39  ;;  %v3728_v31 = vsel %vm5562_vm9, %v3723_v19, %v3727_v58  ;;  %v4065_v39 = vsel %vm5979_vm14, %v5109_v60, %v4064_v63 }
 0x261   : > { %2707 = vrot.lane.b32.xlu0 %v2636_v15, %s5456_s10  ;;  %2765 = vst.msk [vmem:[#allocation3 + $0x54] sm:$0xf] %vm2743_vm6, %v2690_v23  ;;  %v3735_v15 = vshll.u32 %v3354_v61, 16  ;;  %v3714_v23 = vsel %vm5562_vm9, %v3709_v7, %v3713_v13  ;;  %v3733_v24 = vrot.slane %v3732_v4, 4 }
 0x262   : > { %2709 = vrot.lane.b32.xlu1 %v2646_v17, %s5456_s10  ;;  %s7102_s10 = scalar_lea.vmem %s7227_s5, %s5028_s20 }
 0x263   : > { %v2692_v11 = vpop.permute.xlu0 %2691  ;;  %v3737_v26 = vrot.slane %v3735_v15, 5 }
 0x264   : > { %2766 = vst.msk [vmem:[#allocation3 + $0x58] sm:$0xf] %vm2743_vm6, %v2692_v11  ;;  %v2694_v32 = vpop.permute.xlu1 %2693  ;;  %v3914_v11 = vld [vmem:[#allocation2 + $0xd0] sm:$0xf] }
 0x265   : > { %3040 = vrot.lane.b32.xlu0 %v2973_v20, %s5457_s11  ;;  %2767 = vst.msk [vmem:[#allocation3 + $0x5c] sm:$0xf] %vm2743_vm6, %v2694_v32  ;;  %v3913_v32 = vld [vmem:[#allocation2 + $0xcc] sm:$0xe]  ;;  %v3738_v33 = vsel %vm5562_vm9, %v3733_v24, %v3737_v26  ;;  %v4071_v35 = vrot.slane %v3914_v11, 5 }
 0x266   : > { %3042 = vrot.lane.b32.xlu1 %v2976_v3, %s5457_s11  ;;  %v5110_v47 = vrot.slane %v3913_v32, 9 }
 0x267   : > { %v3025_v37 = vpop.permute.xlu0 %3024  ;;  %v4073_v42 = vrot.slane %v4071_v35, 4 }
 0x268   : > { %3101 = vst.msk [vmem:[#allocation3 + $0x50] sm:$0xf] %vm3080_vm8, %v3025_v37  ;;  %v3027_v28 = vpop.permute.xlu1 %3026  ;;  %v3915_v37 = vld [vmem:[#allocation2 + $0xd4] sm:$0x1] }
 0x269   : > { %3044 = vrot.lane.b32.xlu0 %v2980_v2, %s5457_s11  ;;  %3102 = vst.msk [vmem:[#allocation3 + $0x54] sm:$0xf] %vm3080_vm8, %v3027_v28  ;;  %v4074_v28 = vrot.slane %v3915_v37, 5 }
 0x26a   : > { %3046 = vrot.lane.b32.xlu1 %v2983_v38, %s5457_s11 }
 0x26b   : > { %v3029_v51 = vpop.permute.xlu0 %3028  ;;  %v4075_v48 = vsel %vm5979_vm14, %v4073_v42, %v4074_v28 }
 0x26c   : > { %3103 = vst.msk [vmem:[#allocation3 + $0x58] sm:$0xf] %vm3080_vm8, %v3029_v51  ;;  %v3031_v59 = vpop.permute.xlu1 %3030 }
 0x26d   : > { %3234 = vrot.lane.b32.xlu0 %v3142_v45, %s5458_s12  ;;  %3104 = vst.msk [vmem:[#allocation3 + $0x5c] sm:$0xf] %vm3080_vm8, %v3031_v59  ;;  %v4072_v45 = vsel %vm5979_vm14, %v5110_v47, %v4071_v35 }
 0x26e   : > { %3236 = vrot.lane.b32.xlu1 %v3143_v53, %s5458_s12 }
 0x26f   : > { %v3219_v5 = vpop.permute.xlu0 %3218 }
 0x270   : > { %3295 = vst.msk [vmem:[#allocation3 + $0x50] sm:$0xf] %vm3274_vm12, %v3219_v5  ;;  %v3221_v18 = vpop.permute.xlu1 %3220 }
 0x271   : > { %3238 = vrot.lane.b32.xlu0 %v3144_v62, %s5458_s12  ;;  %3296 = vst.msk [vmem:[#allocation3 + $0x54] sm:$0xf] %vm3274_vm12, %v3221_v18  ;;  %v6792_v22 = vpop.f32.mrf.mxu0 }
 0x272   : > { %3240 = vrot.lane.b32.xlu1 %v3145_v6, %s5458_s12  ;;  %v5222_v12 = vpack.c.bf16 %v6792_v22, %v6792_v22 }
 0x273   : > { %v3223_v17 = vpop.permute.xlu0 %3222  ;;  %v6799_v8 = vpop.f32.mrf.mxu0 }
 0x274   : > { %3297 = vst.msk [vmem:[#allocation3 + $0x58] sm:$0xf] %vm3274_vm12, %v3223_v17  ;;  %v3225_v20 = vpop.permute.xlu1 %3224  ;;  %v5220_v30 = vpack.c.bf16 %v6799_v8, %v6799_v8 }
 0x275   : > { %3795 = vrot.lane.b32.xlu0 %v3704_v14, %s5459_s13  ;;  %4907 = vst.msk [vmem:[%s6683_s15 + $0x18] sm:$0xf] %vm411_vm0, %v5222_v12  ;;  %v6810_v3 = vpop.f32.mrf.mxu0 }
 0x276   : > { %3298 = vst.msk [vmem:[#allocation3 + $0x5c] sm:$0xf] %vm3274_vm12, %v3225_v20  ;;  %3797 = vrot.lane.b32.xlu1 %v3714_v23, %s5459_s13  ;;  %v5223_v2 = vpack.c.bf16 %v6810_v3, %v6810_v3 }
 0x277   : > { %v3780_v25 = vpop.permute.xlu0 %3779  ;;  %4905 = vst.msk [vmem:[%s6683_s15 + $0x10] sm:$0xf] %vm411_vm0, %v5220_v30  ;;  %v6819_v21 = vpop.f32.mrf.mxu0 }
 0x278   : > { %3856 = vst.msk [vmem:[#allocation3 + $0x50] sm:$0xf] %vm3835_vm13, %v3780_v25  ;;  %v3782_v36 = vpop.permute.xlu1 %3781  ;;  %v5221_v38 = vpack.c.bf16 %v6819_v21, %v6819_v21 }
 0x279   : > { %3799 = vrot.lane.b32.xlu0 %v3728_v31, %s5459_s13  ;;  %4908 = vst.msk [vmem:[%s6683_s15 + $0x1c] sm:$0xf] %vm411_vm0, %v5223_v2 }
 0x27a   : > { %3857 = vst.msk [vmem:[#allocation3 + $0x54] sm:$0xf] %vm3835_vm13, %v3782_v36  ;;  %3801 = vrot.lane.b32.xlu1 %v3738_v33, %s5459_s13 }
 0x27b   : > { %v3784_v40 = vpop.permute.xlu0 %3783  ;;  %4906 = vst.msk [vmem:[%s6683_s15 + $0x14] sm:$0xf] %vm411_vm0, %v5221_v38 }
 0x27c   : > { %3858 = vst.msk [vmem:[#allocation3 + $0x58] sm:$0xf] %vm3835_vm13, %v3784_v40  ;;  %v3786_v43 = vpop.permute.xlu1 %3785 }
 0x27d   : > { %4132 = vrot.lane.b32.xlu0 %v4065_v39, %s5460_s16  ;;  %3859 = vst.msk [vmem:[#allocation3 + $0x5c] sm:$0xf] %vm3835_vm13, %v3786_v43 }
 0x27e   : > { %4134 = vrot.lane.b32.xlu1 %v4068_v41, %s5460_s16 }
 0x27f   : > { %v4117_v46 = vpop.permute.xlu0 %4116 }
 0x280   : > { %4193 = vst.msk [vmem:[#allocation3 + $0x50] sm:$0xf] %vm4172_vm15, %v4117_v46  ;;  %v4119_v50 = vpop.permute.xlu1 %4118 }
 0x281   : > { %4136 = vrot.lane.b32.xlu0 %v4072_v45, %s5460_s16  ;;  %4194 = vst.msk [vmem:[#allocation3 + $0x54] sm:$0xf] %vm4172_vm15, %v4119_v50 }
 0x282   : > { %4138 = vrot.lane.b32.xlu1 %v4075_v48, %s5460_s16 }
 0x283   : > { %v4121_v51 = vpop.permute.xlu0 %4120 }
 0x284   : > { %4195 = vst.msk [vmem:[#allocation3 + $0x58] sm:$0xf] %vm4172_vm15, %v4121_v51  ;;  %v4123_v53 = vpop.permute.xlu1 %4122 }
 0x285   : > { %4196 = vst.msk [vmem:[#allocation3 + $0x5c] sm:$0xf] %vm4172_vm15, %v4123_v53 }
 0x287   : > { %v1942_v54 = vpop.permute.xlu0 %1941 }
 0x288   : > { %2014 = vst.msk [vmem:[#allocation3 + $0x60] sm:$0xf] %vm1989_vm3, %v1942_v54  ;;  %v1944_v56 = vpop.permute.xlu1 %1943  ;;  %v5434_v58 = vld [vmem:[#allocation3 + $0x50] sm:$0xff]  }
 0x289   : > { %2015 = vst.msk [vmem:[#allocation3 + $0x64] sm:$0xf] %vm1989_vm3, %v1944_v56  ;;  %5378 = vmatprep.mubr.msk.bf16.mxu1 %vm4353_vm2, %v5434_v58 }
 0x28b   : > { %v1946_v55 = vpop.permute.xlu0 %1945 }
 0x28c   : > { %2016 = vst.msk [vmem:[#allocation3 + $0x68] sm:$0xf] %vm1989_vm3, %v1946_v55  ;;  %v1948_v10 = vpop.permute.xlu1 %1947  ;;  %v5435_v59 = vld [vmem:[#allocation3 + $0x58] sm:$0xff]  }
 0x28d   : > { %2017 = vst.msk [vmem:[#allocation3 + $0x6c] sm:$0xf] %vm1989_vm3, %v1948_v10  ;;  %5379 = vmatmul.mubr.msk.bf16.gmra.mxu1 %vm4353_vm2, %v5435_v59 }
 0x28f   : > { %v2135_v61 = vpop.permute.xlu0 %2134 }
 0x290   : > { %2207 = vst.msk [vmem:[#allocation3 + $0x60] sm:$0xf] %vm2182_vm4, %v2135_v61  ;;  %v2137_v62 = vpop.permute.xlu1 %2136 }
 0x291   : > { %2208 = vst.msk [vmem:[#allocation3 + $0x64] sm:$0xf] %vm2182_vm4, %v2137_v62 }
 0x293   : > { %v2139_v0 = vpop.permute.xlu0 %2138 }
 0x294   : > { %2209 = vst.msk [vmem:[#allocation3 + $0x68] sm:$0xf] %vm2182_vm4, %v2139_v0  ;;  %v2141_v9 = vpop.permute.xlu1 %2140 }
 0x295   : > { %2210 = vst.msk [vmem:[#allocation3 + $0x6c] sm:$0xf] %vm2182_vm4, %v2141_v9 }
 0x297   : > { %v2696_v5 = vpop.permute.xlu0 %2695 }
 0x298   : > { %2768 = vst.msk [vmem:[#allocation3 + $0x60] sm:$0xf] %vm2743_vm6, %v2696_v5  ;;  %v2698_v6 = vpop.permute.xlu1 %2697 }
 0x299   : > { %2769 = vst.msk [vmem:[#allocation3 + $0x64] sm:$0xf] %vm2743_vm6, %v2698_v6 }
 0x29b   : > { %v2700_v7 = vpop.permute.xlu0 %2699 }
 0x29c   : > { %2770 = vst.msk [vmem:[#allocation3 + $0x68] sm:$0xf] %vm2743_vm6, %v2700_v7  ;;  %v2702_v13 = vpop.permute.xlu1 %2701 }
 0x29d   : > { %2771 = vst.msk [vmem:[#allocation3 + $0x6c] sm:$0xf] %vm2743_vm6, %v2702_v13 }
 0x29f   : > { %v3033_v4 = vpop.permute.xlu0 %3032 }
 0x2a0   : > { %3105 = vst.msk [vmem:[#allocation3 + $0x60] sm:$0xf] %vm3080_vm8, %v3033_v4  ;;  %v3035_v15 = vpop.permute.xlu1 %3034 }
 0x2a1   : > { %3106 = vst.msk [vmem:[#allocation3 + $0x64] sm:$0xf] %vm3080_vm8, %v3035_v15 }
 0x2a3   : > { %v3037_v16 = vpop.permute.xlu0 %3036 }
 0x2a4   : > { %3107 = vst.msk [vmem:[#allocation3 + $0x68] sm:$0xf] %vm3080_vm8, %v3037_v16  ;;  %v3039_v18 = vpop.permute.xlu1 %3038 }
 0x2a5   : > { %3108 = vst.msk [vmem:[#allocation3 + $0x6c] sm:$0xf] %vm3080_vm8, %v3039_v18  ;;  %v6866_v14 = vpop.f32.mrf.mxu0 }
 0x2a6   : > { %v5226_v17 = vpack.c.bf16 %v6866_v14, %v6866_v14 }
 0x2a7   : > { %v3227_v19 = vpop.permute.xlu0 %3226  ;;  %v6871_v63 = vpop.f32.mrf.mxu0 }
 0x2a8   : > { %3299 = vst.msk [vmem:[#allocation3 + $0x60] sm:$0xf] %vm3274_vm12, %v3227_v19  ;;  %v3229_v49 = vpop.permute.xlu1 %3228  ;;  %v5224_v12 = vpack.c.bf16 %v6871_v63, %v6871_v63 }
 0x2a9   : > { %4911 = vst.msk [vmem:[%s6683_s15 + $0x28] sm:$0xf] %vm411_vm0, %v5226_v17  ;;  %v6878_v23 = vpop.f32.mrf.mxu0 }
 0x2aa   : > { %3300 = vst.msk [vmem:[#allocation3 + $0x64] sm:$0xf] %vm3274_vm12, %v3229_v49  ;;  %v5227_v26 = vpack.c.bf16 %v6878_v23, %v6878_v23 }
 0x2ab   : > { %v3231_v24 = vpop.permute.xlu0 %3230  ;;  %4909 = vst.msk [vmem:[%s6683_s15 + $0x20] sm:$0xf] %vm411_vm0, %v5224_v12  ;;  %v6885_v29 = vpop.f32.mrf.mxu0 }
 0x2ac   : > { %3301 = vst.msk [vmem:[#allocation3 + $0x68] sm:$0xf] %vm3274_vm12, %v3231_v24  ;;  %v3233_v20 = vpop.permute.xlu1 %3232  ;;  %v5225_v11 = vpack.c.bf16 %v6885_v29, %v6885_v29 }
 0x2ad   : > { %4912 = vst.msk [vmem:[%s6683_s15 + $0x2c] sm:$0xf] %vm411_vm0, %v5227_v26 }
 0x2ae   : > { %3302 = vst.msk [vmem:[#allocation3 + $0x6c] sm:$0xf] %vm3274_vm12, %v3233_v20 }
 0x2af   : > { %v3788_v30 = vpop.permute.xlu0 %3787  ;;  %4910 = vst.msk [vmem:[%s6683_s15 + $0x24] sm:$0xf] %vm411_vm0, %v5225_v11 }
 0x2b0   : > { %3860 = vst.msk [vmem:[#allocation3 + $0x60] sm:$0xf] %vm3835_vm13, %v3788_v30  ;;  %v3790_v31 = vpop.permute.xlu1 %3789 }
 0x2b1   : > { %3861 = vst.msk [vmem:[#allocation3 + $0x64] sm:$0xf] %vm3835_vm13, %v3790_v31 }
 0x2b3   : > { %v3792_v60 = vpop.permute.xlu0 %3791 }
 0x2b4   : > { %3862 = vst.msk [vmem:[#allocation3 + $0x68] sm:$0xf] %vm3835_vm13, %v3792_v60  ;;  %v3794_v25 = vpop.permute.xlu1 %3793 }
 0x2b5   : > { %3863 = vst.msk [vmem:[#allocation3 + $0x6c] sm:$0xf] %vm3835_vm13, %v3794_v25 }
 0x2b7   : > { %v4125_v27 = vpop.permute.xlu0 %4124 }
 0x2b8   : > { %4197 = vst.msk [vmem:[#allocation3 + $0x60] sm:$0xf] %vm4172_vm15, %v4125_v27  ;;  %v4127_v32 = vpop.permute.xlu1 %4126 }
 0x2b9   : > { %4198 = vst.msk [vmem:[#allocation3 + $0x64] sm:$0xf] %vm4172_vm15, %v4127_v32 }
 0x2bb   : > { %v4129_v2 = vpop.permute.xlu0 %4128 }
 0x2bc   : > { %4199 = vst.msk [vmem:[#allocation3 + $0x68] sm:$0xf] %vm4172_vm15, %v4129_v2  ;;  %v4131_v33 = vpop.permute.xlu1 %4130 }
 0x2bd   : > { %4200 = vst.msk [vmem:[#allocation3 + $0x6c] sm:$0xf] %vm4172_vm15, %v4131_v33 }
 0x2bf   : > { %v1950_v34 = vpop.permute.xlu0 %1949 }
 0x2c0   : > { %2018 = vst.msk [vmem:[#allocation3 + $0x70] sm:$0xf] %vm1989_vm3, %v1950_v34  ;;  %v1952_v35 = vpop.permute.xlu1 %1951  ;;  %v5436_v36 = vld [vmem:[#allocation3 + $0x60] sm:$0xff]  }
 0x2c1   : > { %2019 = vst.msk [vmem:[#allocation3 + $0x74] sm:$0xf] %vm1989_vm3, %v1952_v35  ;;  %5382 = vmatprep.mubr.msk.bf16.mxu1 %vm4353_vm2, %v5436_v36 }
 0x2c3   : > { %v1954_v37 = vpop.permute.xlu0 %1953 }
 0x2c4   : > { %2020 = vst.msk [vmem:[#allocation3 + $0x78] sm:$0xf] %vm1989_vm3, %v1954_v37  ;;  %v1956_v38 = vpop.permute.xlu1 %1955  ;;  %v5437_v39 = vld [vmem:[#allocation3 + $0x68] sm:$0xff]  }
 0x2c5   : > { %2021 = vst.msk [vmem:[#allocation3 + $0x7c] sm:$0xf] %vm1989_vm3, %v1956_v38  ;;  %5383 = vmatmul.mubr.msk.bf16.gmra.mxu1 %vm4353_vm2, %v5437_v39  ;;  %v4569_v38 = vsel %vm4567_vm5, %v6713_v1, 0.0  ;;  %v4568_v39 = vsel %vm4567_vm5, %v6693_v44, 0.0 }
 0x2c7   : > { %v2143_v47 = vpop.permute.xlu0 %2142 }
 0x2c8   : > { %2211 = vst.msk [vmem:[#allocation3 + $0x70] sm:$0xf] %vm2182_vm4, %v2143_v47  ;;  %v2145_v40 = vpop.permute.xlu1 %2144  ;;  %v4570_v47 = vadd.f32 %v4569_v38, %v4568_v39 }
 0x2c9   : > { %2212 = vst.msk [vmem:[#allocation3 + $0x74] sm:$0xf] %vm2182_vm4, %v2145_v40  ;;  %v4571_v40 = vsel %vm4567_vm5, %v6686_v57, 0.0 }
 0x2cb   : > { %v2147_v41 = vpop.permute.xlu0 %2146 }
 0x2cc   : > { %2213 = vst.msk [vmem:[#allocation3 + $0x78] sm:$0xf] %vm2182_vm4, %v2147_v41  ;;  %v2149_v42 = vpop.permute.xlu1 %2148  ;;  %v4572_v41 = vadd.f32 %v4571_v40, %v4570_v47 }
 0x2cd   : > { %2214 = vst.msk [vmem:[#allocation3 + $0x7c] sm:$0xf] %vm2182_vm4, %v2149_v42  ;;  %v4573_v42 = vsel %vm4567_vm5, %v6704_v52, 0.0 }
 0x2cf   : > { %v2704_v28 = vpop.permute.xlu0 %2703 }
 0x2d0   : > { %2772 = vst.msk [vmem:[#allocation3 + $0x70] sm:$0xf] %vm2743_vm6, %v2704_v28  ;;  %v2706_v43 = vpop.permute.xlu1 %2705  ;;  %v4575_v28 = vsel %vm4567_vm5, %v6799_v8, 0.0 }
 0x2d1   : > { %2773 = vst.msk [vmem:[#allocation3 + $0x74] sm:$0xf] %vm2743_vm6, %v2706_v43  ;;  %v4574_v43 = vadd.f32 %v4573_v42, %v4572_v41 }
 0x2d3   : > { %v2708_v45 = vpop.permute.xlu0 %2707 }
 0x2d4   : > { %2774 = vst.msk [vmem:[#allocation3 + $0x78] sm:$0xf] %vm2743_vm6, %v2708_v45  ;;  %v2710_v46 = vpop.permute.xlu1 %2709  ;;  %v4577_v45 = vsel %vm4567_vm5, %v6819_v21, 0.0 }
 0x2d5   : > { %2775 = vst.msk [vmem:[#allocation3 + $0x7c] sm:$0xf] %vm2743_vm6, %v2710_v46  ;;  %v4576_v46 = vadd.f32 %v4575_v28, %v4574_v43 }
 0x2d7   : > { %v3041_v48 = vpop.permute.xlu0 %3040 }
 0x2d8   : > { %3109 = vst.msk [vmem:[#allocation3 + $0x70] sm:$0xf] %vm3080_vm8, %v3041_v48  ;;  %v3043_v50 = vpop.permute.xlu1 %3042  ;;  %v4578_v48 = vadd.f32 %v4577_v45, %v4576_v46 }
 0x2d9   : > { %3110 = vst.msk [vmem:[#allocation3 + $0x74] sm:$0xf] %vm3080_vm8, %v3043_v50  ;;  %v4579_v50 = vsel %vm4567_vm5, %v6792_v22, 0.0 }
 0x2db   : > { %v3045_v51 = vpop.permute.xlu0 %3044 }
 0x2dc   : > { %3111 = vst.msk [vmem:[#allocation3 + $0x78] sm:$0xf] %vm3080_vm8, %v3045_v51  ;;  %v3047_v53 = vpop.permute.xlu1 %3046  ;;  %v4580_v51 = vadd.f32 %v4579_v50, %v4578_v48 }
 0x2dd   : > { %3112 = vst.msk [vmem:[#allocation3 + $0x7c] sm:$0xf] %vm3080_vm8, %v3047_v53  ;;  %v6920_v54 = vpop.f32.mrf.mxu0  ;;  %v4581_v53 = vsel %vm4567_vm5, %v6810_v3, 0.0 }
 0x2de   : > { %v5230_v58 = vpack.c.bf16 %v6920_v54, %v6920_v54 }
 0x2df   : > { %v3235_v56 = vpop.permute.xlu0 %3234  ;;  %v6925_v10 = vpop.f32.mrf.mxu0 }
 0x2e0   : > { %3303 = vst.msk [vmem:[#allocation3 + $0x70] sm:$0xf] %vm3274_vm12, %v3235_v56  ;;  %v3237_v55 = vpop.permute.xlu1 %3236  ;;  %v5228_v59 = vpack.c.bf16 %v6925_v10, %v6925_v10  ;;  %v4583_v56 = vsel %vm4567_vm5, %v6871_v63, 0.0 }
 0x2e1   : > { %4915 = vst.msk [vmem:[%s6683_s15 + $0x38] sm:$0xf] %vm411_vm0, %v5230_v58  ;;  %v6932_v61 = vpop.f32.mrf.mxu0  ;;  %v4582_v58 = vadd.f32 %v4581_v53, %v4580_v51 }
 0x2e2   : > { %3304 = vst.msk [vmem:[#allocation3 + $0x74] sm:$0xf] %vm3274_vm12, %v3237_v55  ;;  %v5231_v0 = vpack.c.bf16 %v6932_v61, %v6932_v61 }
 0x2e3   : > { %v3239_v62 = vpop.permute.xlu0 %3238  ;;  %4913 = vst.msk [vmem:[%s6683_s15 + $0x30] sm:$0xf] %vm411_vm0, %v5228_v59  ;;  %v6939_v5 = vpop.f32.mrf.mxu0  ;;  %v4585_v59 = vsel %vm4567_vm5, %v6885_v29, 0.0 }
 0x2e4   : > { %3305 = vst.msk [vmem:[#allocation3 + $0x78] sm:$0xf] %vm3274_vm12, %v3239_v62  ;;  %v3241_v9 = vpop.permute.xlu1 %3240  ;;  %v5229_v6 = vpack.c.bf16 %v6939_v5, %v6939_v5 }
 0x2e5   : > { %4916 = vst.msk [vmem:[%s6683_s15 + $0x3c] sm:$0xf] %vm411_vm0, %v5231_v0  ;;  %v4584_v0 = vadd.f32 %v4583_v56, %v4582_v58 }
 0x2e6   : > { %3306 = vst.msk [vmem:[#allocation3 + $0x7c] sm:$0xf] %vm3274_vm12, %v3241_v9 }
 0x2e7   : > { %v3796_v7 = vpop.permute.xlu0 %3795  ;;  %4914 = vst.msk [vmem:[%s6683_s15 + $0x34] sm:$0xf] %vm411_vm0, %v5229_v6 }
 0x2e8   : > { %3864 = vst.msk [vmem:[#allocation3 + $0x70] sm:$0xf] %vm3835_vm13, %v3796_v7  ;;  %v3798_v13 = vpop.permute.xlu1 %3797  ;;  %v4586_v7 = vadd.f32 %v4585_v59, %v4584_v0 }
 0x2e9   : > { %3865 = vst.msk [vmem:[#allocation3 + $0x74] sm:$0xf] %vm3835_vm13, %v3798_v13 }
 0x2eb   : > { %v3800_v4 = vpop.permute.xlu0 %3799 }
 0x2ec   : > { %3866 = vst.msk [vmem:[#allocation3 + $0x78] sm:$0xf] %vm3835_vm13, %v3800_v4  ;;  %v3802_v15 = vpop.permute.xlu1 %3801 }
 0x2ed   : > { %3867 = vst.msk [vmem:[#allocation3 + $0x7c] sm:$0xf] %vm3835_vm13, %v3802_v15 }
 0x2ef   : > { %v4133_v16 = vpop.permute.xlu0 %4132 }
 0x2f0   : > { %4201 = vst.msk [vmem:[#allocation3 + $0x70] sm:$0xf] %vm4172_vm15, %v4133_v16  ;;  %v4135_v18 = vpop.permute.xlu1 %4134  ;;  %v4587_v16 = vsel %vm4567_vm5, %v6866_v14, 0.0 }
 0x2f1   : > { %4202 = vst.msk [vmem:[#allocation3 + $0x74] sm:$0xf] %vm4172_vm15, %v4135_v18 }
 0x2f3   : > { %v4137_v19 = vpop.permute.xlu0 %4136 }
 0x2f4   : > { %4203 = vst.msk [vmem:[#allocation3 + $0x78] sm:$0xf] %vm4172_vm15, %v4137_v19  ;;  %v4139_v17 = vpop.permute.xlu1 %4138  ;;  %v4588_v19 = vadd.f32 %v4587_v16, %v4586_v7 }
 0x2f5   : > { %4204 = vst.msk [vmem:[#allocation3 + $0x7c] sm:$0xf] %vm4172_vm15, %v4139_v17  ;;  %v4589_v17 = vsel %vm4567_vm5, %v6878_v23, 0.0 }
 0x2f8   : > { %v5438_v49 = vld [vmem:[#allocation3 + $0x70] sm:$0xff]  }
 0x2f9   : > { %5386 = vmatprep.mubr.msk.bf16.mxu1 %vm4353_vm2, %v5438_v49  ;;  %v4591_v49 = vsel %vm4567_vm5, %v6925_v10, 0.0 }
 0x2fc   : > { %v5439_v12 = vld [vmem:[#allocation3 + $0x78] sm:$0xff]  }
 0x2fd   : > { %5387 = vmatmul.mubr.msk.bf16.gmra.mxu1 %vm4353_vm2, %v5439_v12  ;;  %v4590_v12 = vadd.f32 %v4589_v17, %v4588_v19 }
 0x315   : > { %v6958_v24 = vpop.f32.mrf.mxu1 }
 0x316   : > { %v5234_v26 = vpack.c.bf16 %v6958_v24, %v6958_v24  ;;  %v4603_v40 = vsel %vm4567_vm5, %v6958_v24, 0.0 }
 0x317   : > { %v6962_v20 = vpop.f32.mrf.mxu1 }
 0x318   : > { %4919 = vst.msk [vmem:[%s6683_s15 + $0x48] sm:$0xf] %vm411_vm0, %v5234_v26  ;;  %v5232_v11 = vpack.c.bf16 %v6962_v20, %v6962_v20  ;;  %v4593_v26 = vsel %vm4567_vm5, %v6939_v5, 0.0 }
 0x319   : > { %v6968_v30 = vpop.f32.mrf.mxu1 }
 0x31a   : > { %4917 = vst.msk [vmem:[%s6683_s15 + $0x40] sm:$0xf] %vm411_vm0, %v5232_v11  ;;  %v5235_v31 = vpack.c.bf16 %v6968_v30, %v6968_v30  ;;  %v4592_v11 = vadd.f32 %v4591_v49, %v4590_v12  ;;  %v4605_v42 = vsel %vm4567_vm5, %v6968_v30, 0.0 }
 0x31b   : > { %v6974_v60 = vpop.f32.mrf.mxu1 }
 0x31c   : > { %4920 = vst.msk [vmem:[%s6683_s15 + $0x4c] sm:$0xf] %vm411_vm0, %v5235_v31  ;;  %v5233_v25 = vpack.c.bf16 %v6974_v60, %v6974_v60  ;;  %v4594_v31 = vadd.f32 %v4593_v26, %v4592_v11  ;;  %v4601_v38 = vsel %vm4567_vm5, %v6974_v60, 0.0 }
 0x31e   : > { %4918 = vst.msk [vmem:[%s6683_s15 + $0x44] sm:$0xf] %vm411_vm0, %v5233_v25  ;;  %v4595_v25 = vsel %vm4567_vm5, %v6920_v54, 0.0 }
 0x34d   : > { %v6982_v27 = vpop.f32.mrf.mxu1 }
 0x34e   : > { %v5238_v32 = vpack.c.bf16 %v6982_v27, %v6982_v27  ;;  %v4611_v50 = vsel %vm4567_vm5, %v6982_v27, 0.0 }
 0x34f   : > { %v6986_v2 = vpop.f32.mrf.mxu1 }
 0x350   : > { %4923 = vst.msk [vmem:[%s6683_s15 + $0x58] sm:$0xf] %vm411_vm0, %v5238_v32  ;;  %v5236_v33 = vpack.c.bf16 %v6986_v2, %v6986_v2  ;;  %v4596_v32 = vadd.f32 %v4595_v25, %v4594_v31  ;;  %v4607_v28 = vsel %vm4567_vm5, %v6986_v2, 0.0 }
 0x351   : > { %v6992_v34 = vpop.f32.mrf.mxu1 }
 0x352   : > { %4921 = vst.msk [vmem:[%s6683_s15 + $0x50] sm:$0xf] %vm411_vm0, %v5236_v33  ;;  %v5239_v35 = vpack.c.bf16 %v6992_v34, %v6992_v34  ;;  %v4597_v33 = vsel %vm4567_vm5, %v6932_v61, 0.0  ;;  %v4613_v53 = vsel %vm4567_vm5, %v6992_v34, 0.0 }
 0x353   : > { %v6998_v36 = vpop.f32.mrf.mxu1 }
 0x354   : > { %4924 = vst.msk [vmem:[%s6683_s15 + $0x5c] sm:$0xf] %vm411_vm0, %v5239_v35  ;;  %v5237_v37 = vpack.c.bf16 %v6998_v36, %v6998_v36  ;;  %v4599_v35 = vsel %vm4567_vm5, %v6962_v20, 0.0  ;;  %v4609_v45 = vsel %vm4567_vm5, %v6998_v36, 0.0 }
 0x356   : > { %4922 = vst.msk [vmem:[%s6683_s15 + $0x54] sm:$0xf] %vm411_vm0, %v5237_v37  ;;  %v4598_v37 = vadd.f32 %v4597_v33, %v4596_v32 }
 0x358   : > { %v4600_v39 = vadd.f32 %v4599_v35, %v4598_v37 }
 0x35a   : > { %v4602_v47 = vadd.f32 %v4601_v38, %v4600_v39 }
 0x35c   : > { %v4604_v41 = vadd.f32 %v4603_v40, %v4602_v47 }
 0x35e   : > { %v4606_v43 = vadd.f32 %v4605_v42, %v4604_v41 }
 0x360   : > { %v4608_v46 = vadd.f32 %v4607_v28, %v4606_v43 }
 0x362   : > { %v4610_v48 = vadd.f32 %v4609_v45, %v4608_v46 }
 0x364   : > { %v4612_v51 = vadd.f32 %v4611_v50, %v4610_v48 }
 0x366   : > { %v4614_v58 = vadd.f32 %v4613_v53, %v4612_v51 }
 0x385   : > { %v7024_v55 = vpop.f32.mrf.mxu1 }
 0x386   : > { %v5242_v62 = vpack.c.bf16 %v7024_v55, %v7024_v55 }
 0x387   : > { %v7030_v9 = vpop.f32.mrf.mxu1 }
 0x388   : > { %4927 = vst.msk [vmem:[%s6683_s15 + $0x68] sm:$0xf] %vm411_vm0, %v5242_v62  ;;  %v5240_v6 = vpack.c.bf16 %v7030_v9, %v7030_v9  ;;  %v4615_v56 = vsel %vm4567_vm5, %v7030_v9, 0.0 }
 0x389   : > { %v7036_v13 = vpop.f32.mrf.mxu1  ;;  %v4616_v62 = vadd.f32 %v4615_v56, %v4614_v58 }
 0x38a   : > { %4925 = vst.msk [vmem:[%s6683_s15 + $0x60] sm:$0xf] %vm411_vm0, %v5240_v6  ;;  %v5243_v4 = vpack.c.bf16 %v7036_v13, %v7036_v13  ;;  %v4619_v6 = vsel %vm4567_vm5, %v7024_v55, 0.0  ;;  %v4621_v19 = vsel %vm4567_vm5, %v7036_v13, 0.0 }
 0x38b   : > { %v7042_v15 = vpop.f32.mrf.mxu1 }
 0x38c   : > { %4928 = vst.msk [vmem:[%s6683_s15 + $0x6c] sm:$0xf] %vm411_vm0, %v5243_v4  ;;  %v5241_v18 = vpack.c.bf16 %v7042_v15, %v7042_v15  ;;  %v4617_v59 = vsel %vm4567_vm5, %v7042_v15, 0.0 }
 0x38d   : > { %v4618_v0 = vadd.f32 %v4617_v59, %v4616_v62 }
 0x38e   : > { %4926 = vst.msk [vmem:[%s6683_s15 + $0x64] sm:$0xf] %vm411_vm0, %v5241_v18 }
 0x38f   : > { %v4620_v7 = vadd.f32 %v4619_v6, %v4618_v0 }
 0x391   : > { %v4622_v12 = vadd.f32 %v4621_v19, %v4620_v7 }
 0x3bd   : > { %v5388_v4 = vpop.f32.mrf.mxu1 }
 0x3be   : > { %v5246_v16 = vpack.c.bf16 %v5388_v4, %v5388_v4  ;;  %v4627_v37 = vsel %vm4567_vm5, %v5388_v4, 0.0 }
 0x3bf   : > { %v4552_v18 = vpop.f32.mrf.mxu1 }
 0x3c0   : > { %4931 = vst.msk [vmem:[%s6683_s15 + $0x78] sm:$0xf] %vm411_vm0, %v5246_v16  ;;  %v4623_v17 = vsel %vm4567_vm5, %v4552_v18, 0.0  ;;  %v5244_v49 = vpack.c.bf16 %v4552_v18, %v4552_v18 }
 0x3c1   : > { %v5389_v26 = vpop.f32.mrf.mxu1  ;;  %v4624_v31 = vadd.f32 %v4623_v17, %v4622_v12 }
 0x3c2   : > { %4929 = vst.msk [vmem:[%s6683_s15 + $0x70] sm:$0xf] %vm411_vm0, %v5244_v49  ;;  %v5247_v11 = vpack.c.bf16 %v5389_v26, %v5389_v26  ;;  %v4629_v39 = vsel %vm4567_vm5, %v5389_v26, 0.0 }
 0x3c3   : > { %v4555_v25 = vpop.f32.mrf.mxu1 }
 0x3c4   : > { %4932 = vst.msk [vmem:[%s6683_s15 + $0x7c] sm:$0xf] %vm411_vm0, %v5247_v11  ;;  %v4625_v32 = vsel %vm4567_vm5, %v4555_v25, 0.0  ;;  %v5245_v33 = vpack.c.bf16 %v4555_v25, %v4555_v25 }
 0x3c5   : > { %v4626_v35 = vadd.f32 %v4625_v32, %v4624_v31 }
 0x3c6   : > { %4930 = vst.msk [vmem:[%s6683_s15 + $0x74] sm:$0xf] %vm411_vm0, %v5245_v33 }
 0x3c7   : > { %v4628_v38 = vadd.f32 %v4627_v37, %v4626_v35 }
 0x3c9   : > { %v4630_v47 = vadd.f32 %v4629_v39, %v4628_v38 }
 0x3cb   : > { %v4631_v40 = vrot.slane %v4630_v47, 4 }
 0x3cd   : > { %v4632_v41 = vadd.f32 %v4631_v40, %v4630_v47 }
 0x3cf   : > { %v4633_v42 = vrot.slane %v4632_v41, 2 }
 0x3d1   : > { %v4634_v28 = vadd.f32 %v4633_v42, %v4632_v41 }
 0x3d3   : > { %v4635_v43 = vrot.slane %v4634_v28, 1 }
 0x3d5   : > { %v4636_v45 = vadd.f32 %v4635_v43, %v4634_v28 }
 0x3d7   : > { %v7104_v46 = vmul.f32 0.00390625, %v4636_v45 }
 0x3d9   : > { %4771 = vst.msk [vmem:[%s7102_s10] sm:$0x1] %vm414_vm1, %v7104_v46  ;;  %v7110_v48 = vsub.f32 %v4552_v18, %v7104_v46  ;;  %v7113_v50 = vsub.f32 %v4555_v25, %v7104_v46  ;;  %v7116_v51 = vsub.f32 %v5388_v4, %v7104_v46  ;;  %v7119_v53 = vsub.f32 %v5389_v26, %v7104_v46 }
 0x3da   : > { %v4638_v56 = vsub.f32 %v6693_v44, %v7104_v46  ;;  %v4639_v58 = vsub.f32 %v6713_v1, %v7104_v46  ;;  %v4640_v59 = vsub.f32 %v6686_v57, %v7104_v46  ;;  %v4641_v62 = vsub.f32 %v6704_v52, %v7104_v46 }
 0x3db   : > { %v4642_v7 = vsub.f32 %v6799_v8, %v7104_v46  ;;  %v4643_v16 = vsub.f32 %v6819_v21, %v7104_v46  ;;  %v4644_v57 = vsub.f32 %v6792_v22, %v7104_v46  ;;  %v4645_v8 = vsub.f32 %v6810_v3, %v7104_v46 }
 0x3dc   : > { %v4670_v0 = vmul.f32 %v4638_v56, %v4638_v56  ;;  %v4671_v6 = vmul.f32 %v4639_v58, %v4639_v58  ;;  %v4672_v4 = vmul.f32 %v4640_v59, %v4640_v59  ;;  %v4673_v18 = vmul.f32 %v4641_v62, %v4641_v62 }
 0x3dd   : > { %v4674_v17 = vmul.f32 %v4642_v7, %v4642_v7  ;;  %v4675_v12 = vmul.f32 %v4643_v16, %v4643_v16  ;;  %v4646_v11 = vsub.f32 %v6871_v63, %v7104_v46  ;;  %v4676_v31 = vmul.f32 %v4644_v57, %v4644_v57 }
 0x3de   : > { %v4702_v44 = vsel %vm4567_vm5, %v4670_v0, 0.0  ;;  %v4703_v1 = vsel %vm4567_vm5, %v4671_v6, 0.0  ;;  %v4705_v52 = vsel %vm4567_vm5, %v4672_v4, 0.0  ;;  %v4707_v26 = vsel %vm4567_vm5, %v4673_v18, 0.0 }
 0x3df   : > { %v4704_v19 = vadd.f32 %v4703_v1, %v4702_v44  ;;  %v4709_v25 = vsel %vm4567_vm5, %v4674_v17, 0.0  ;;  %v4647_v22 = vsub.f32 %v6885_v29, %v7104_v46  ;;  %v4677_v33 = vmul.f32 %v4645_v8, %v4645_v8 }
 0x3e0   : > { %v4711_v35 = vsel %vm4567_vm5, %v4675_v12, 0.0  ;;  %v4648_v3 = vsub.f32 %v6866_v14, %v7104_v46  ;;  %v4678_v38 = vmul.f32 %v4646_v11, %v4646_v11  ;;  %v4713_v39 = vsel %vm4567_vm5, %v4676_v31, 0.0 }
 0x3e1   : > { %v4706_v49 = vadd.f32 %v4705_v52, %v4704_v19  ;;  %v4649_v63 = vsub.f32 %v6878_v23, %v7104_v46  ;;  %v4679_v40 = vmul.f32 %v4647_v22, %v4647_v22  ;;  %v4715_v41 = vsel %vm4567_vm5, %v4677_v33, 0.0 }
 0x3e2   : > { %v4650_v29 = vsub.f32 %v6925_v10, %v7104_v46  ;;  %v4680_v28 = vmul.f32 %v4648_v3, %v4648_v3  ;;  %v4717_v43 = vsel %vm4567_vm5, %v4678_v38, 0.0  ;;  %v4651_v14 = vsub.f32 %v6939_v5, %v7104_v46 }
 0x3e3   : > { %v4708_v21 = vadd.f32 %v4707_v26, %v4706_v49  ;;  %v4681_v56 = vmul.f32 %v4649_v63, %v4649_v63  ;;  %v4719_v58 = vsel %vm4567_vm5, %v4679_v40, 0.0  ;;  %v4652_v23 = vsub.f32 %v6920_v54, %v7104_v46 }
 0x3e4   : > { %v4682_v62 = vmul.f32 %v4650_v29, %v4650_v29  ;;  %v4721_v0 = vsel %vm4567_vm5, %v4680_v28, 0.0  ;;  %v4653_v10 = vsub.f32 %v6932_v61, %v7104_v46  ;;  %v4683_v7 = vmul.f32 %v4651_v14, %v4651_v14 }
 0x3e5   : > { %v4710_v32 = vadd.f32 %v4709_v25, %v4708_v21  ;;  %v4723_v4 = vsel %vm4567_vm5, %v4681_v56, 0.0  ;;  %v4654_v5 = vsub.f32 %v6962_v20, %v7104_v46  ;;  %v4684_v18 = vmul.f32 %v4652_v23, %v4652_v23 }
 0x3e6   : > { %v4725_v44 = vsel %vm4567_vm5, %v4682_v62, 0.0  ;;  %v4655_v54 = vsub.f32 %v6974_v60, %v7104_v46  ;;  %v4685_v19 = vmul.f32 %v4653_v10, %v4653_v10  ;;  %v4727_v57 = vsel %vm4567_vm5, %v4683_v7, 0.0 }
 0x3e7   : > { %v4712_v37 = vadd.f32 %v4711_v35, %v4710_v32  ;;  %v4656_v61 = vsub.f32 %v6958_v24, %v7104_v46  ;;  %v4686_v52 = vmul.f32 %v4654_v5, %v4654_v5  ;;  %v4729_v49 = vsel %vm4567_vm5, %v4684_v18, 0.0 }
 0x3e8   : > { %v4657_v20 = vsub.f32 %v6968_v30, %v7104_v46  ;;  %v4687_v12 = vmul.f32 %v4655_v54, %v4655_v54  ;;  %v4731_v26 = vsel %vm4567_vm5, %v4685_v19, 0.0  ;;  %v4658_v60 = vsub.f32 %v6986_v2, %v7104_v46 }
 0x3e9   : > { %v4714_v47 = vadd.f32 %v4713_v39, %v4712_v37  ;;  %v4688_v11 = vmul.f32 %v4656_v61, %v4656_v61  ;;  %v4733_v31 = vsel %vm4567_vm5, %v4686_v52, 0.0  ;;  %v4659_v24 = vsub.f32 %v6998_v36, %v7104_v46 }
 0x3ea   : > { %v4689_v32 = vmul.f32 %v4657_v20, %v4657_v20  ;;  %v4735_v22 = vsel %vm4567_vm5, %v4687_v12, 0.0  ;;  %v4660_v30 = vsub.f32 %v6982_v27, %v7104_v46  ;;  %v4690_v35 = vmul.f32 %v4658_v60, %v4658_v60 }
 0x3eb   : > { %v4716_v42 = vadd.f32 %v4715_v41, %v4714_v47  ;;  %v4737_v37 = vsel %vm4567_vm5, %v4688_v11, 0.0  ;;  %v4661_v2 = vsub.f32 %v6992_v34, %v7104_v46  ;;  %v4691_v38 = vmul.f32 %v4659_v24, %v4659_v24 }
 0x3ec   : > { %v4739_v39 = vsel %vm4567_vm5, %v4689_v32, 0.0  ;;  %v4662_v36 = vsub.f32 %v7030_v9, %v7104_v46  ;;  %v4692_v63 = vmul.f32 %v4660_v30, %v4660_v30  ;;  %v4741_v40 = vsel %vm4567_vm5, %v4690_v35, 0.0 }
 0x3ed   : > { %v4718_v45 = vadd.f32 %v4717_v43, %v4716_v42  ;;  %v4663_v27 = vsub.f32 %v7042_v15, %v7104_v46  ;;  %v4693_v42 = vmul.f32 %v4661_v2, %v4661_v2  ;;  %v4743_v29 = vsel %vm4567_vm5, %v4691_v38, 0.0 }
 0x3ee   : > { %v4664_v34 = vsub.f32 %v7024_v55, %v7104_v46  ;;  %v4694_v43 = vmul.f32 %v4662_v36, %v4662_v36  ;;  %v4665_v9 = vsub.f32 %v7036_v13, %v7104_v46  ;;  %v4698_v55 = vmul.f32 %v7110_v48, %v7110_v48 }
 0x3ef   : > { %v4720_v59 = vadd.f32 %v4719_v58, %v4718_v45  ;;  %v4745_v45 = vsel %vm4567_vm5, %v4692_v63, 0.0  ;;  %v4695_v56 = vmul.f32 %v4663_v27, %v4663_v27  ;;  %v4747_v58 = vsel %vm4567_vm5, %v4693_v42, 0.0 }
 0x3f0   : > { %v4696_v23 = vmul.f32 %v4664_v34, %v4664_v34  ;;  %v4749_v15 = vsel %vm4567_vm5, %v4694_v43, 0.0  ;;  %v4699_v13 = vmul.f32 %v7113_v50, %v7113_v50  ;;  %v4700_v5 = vmul.f32 %v7116_v51, %v7116_v51 }
 0x3f1   : > { %v4722_v6 = vadd.f32 %v4721_v0, %v4720_v59  ;;  %v4697_v0 = vmul.f32 %v4665_v9, %v4665_v9  ;;  %v4757_v18 = vsel %vm4567_vm5, %v4698_v55, 0.0 }
 0x3f2   : > { %v4753_v7 = vsel %vm4567_vm5, %v4696_v23, 0.0  ;;  %v4759_v48 = vsel %vm4567_vm5, %v4699_v13, 0.0  ;;  %v4761_v19 = vsel %vm4567_vm5, %v4700_v5, 0.0 }
 0x3f3   : > { %v4724_v16 = vadd.f32 %v4723_v4, %v4722_v6  ;;  %v4751_v6 = vsel %vm4567_vm5, %v4695_v56, 0.0  ;;  %v4755_v46 = vsel %vm4567_vm5, %v4697_v0, 0.0 }
 0x3f5   : > { %v4726_v1 = vadd.f32 %v4725_v44, %v4724_v16 }
 0x3f7   : > { %v4728_v17 = vadd.f32 %v4727_v57, %v4726_v1  ;;  %v4701_v1 = vmul.f32 %v7119_v53, %v7119_v53 }
 0x3f9   : > { %v4730_v8 = vadd.f32 %v4729_v49, %v4728_v17  ;;  %v4763_v50 = vsel %vm4567_vm5, %v4701_v1, 0.0 }
 0x3fb   : > { %v4732_v21 = vadd.f32 %v4731_v26, %v4730_v8 }
 0x3fd   : > { %v4734_v25 = vadd.f32 %v4733_v31, %v4732_v21 }
 0x3ff   : > { %v4736_v33 = vadd.f32 %v4735_v22, %v4734_v25 }
 0x401   : > { %v4738_v3 = vadd.f32 %v4737_v37, %v4736_v33 }
 0x403   : > { %v4740_v47 = vadd.f32 %v4739_v39, %v4738_v3 }
 0x405   : > { %v4742_v41 = vadd.f32 %v4741_v40, %v4740_v47 }
 0x407   : > { %v4744_v28 = vadd.f32 %v4743_v29, %v4742_v41 }
 0x409   : > { %v4746_v14 = vadd.f32 %v4745_v45, %v4744_v28 }
 0x40b   : > { %v4748_v59 = vadd.f32 %v4747_v58, %v4746_v14 }
 0x40d   : > { %v4750_v62 = vadd.f32 %v4749_v15, %v4748_v59 }
 0x40f   : > { %v4752_v10 = vadd.f32 %v4751_v6, %v4750_v62 }
 0x411   : > { %v4754_v4 = vadd.f32 %v4753_v7, %v4752_v10 }
 0x413   : > { %v4756_v16 = vadd.f32 %v4755_v46, %v4754_v4 }
 0x415   : > { %v4758_v44 = vadd.f32 %v4757_v18, %v4756_v16 }
 0x417   : > { %v4760_v54 = vadd.f32 %v4759_v48, %v4758_v44 }
 0x419   : > { %v4762_v57 = vadd.f32 %v4761_v19, %v4760_v54 }
 0x41b   : > { %v4764_v17 = vadd.f32 %v4763_v50, %v4762_v57 }
 0x41d   : > { %v4765_v61 = vrot.slane %v4764_v17, 4 }
 0x41f   : > { %v4766_v52 = vadd.f32 %v4765_v61, %v4764_v17 }
 0x421   : > { %v4767_v49 = vrot.slane %v4766_v52, 2 }
 0x423   : > { %v4768_v51 = vadd.f32 %v4767_v49, %v4766_v52 }
 0x425   : > { %v4769_v8 = vrot.slane %v4768_v51, 1 }
 0x427   : > { %v4770_v20 = vadd.f32 %v4769_v8, %v4768_v51 }
 0x429   : > { %4772 = vst.msk [vmem:[%s7102_s10 + $0x1] sm:$0x1] %vm414_vm1, %v4770_v20 }
 0x42a PF: > { %s16_s18 = sadd.s32 1, %s5450_s18  }
 0x42b   : > { %p13_p4 = scmp.ge.s32.totalorder %s16_s18, 4  }
 0x42d   :  { %15 = sbr.rel (!%p13_p4) target bundleno = 1 (0x1), region = 81 }

</bundles_post_ra>
